<compile_context>
chip_gen: v6e
topology: v6e:2x2x1
jax: 0.10.0
libtpu: 0.0.40
codegen_flags: <defaults>
</compile_context>

<pallas_src>
import functools

import numpy as np
import jax
import jax.numpy as jnp
from jax import lax
from jax.experimental import pallas as pl
from jax.experimental.pallas import tpu as pltpu


# ----------------------------------------------------------------------------
# PSP pooling matrices (exact equivalent of AdaptiveAvgPool2d for divisible sizes)
# ----------------------------------------------------------------------------
def build_full_psp_matrix(spatial: int, sizes=(1, 2, 4, 16)) -> np.ndarray:
    """Full (M, N) pooling matrix in true PSP concat order (reference path)."""
    rows = []
    for s in sizes:
        assert spatial % s == 0, "pool size must divide spatial extent"
        k = spatial // s
        for i in range(s):
            for j in range(s):
                m = np.zeros((spatial, spatial), dtype=np.float32)
                m[i * k:(i + 1) * k, j * k:(j + 1) * k] = 1.0 / float(k * k)
                rows.append(m.reshape(-1))
    return np.stack(rows, axis=0)  # (M, spatial*spatial)


def build_psp_small_and_bias(spatial: int, sizes=(1, 2, 4, 16)):
    """Small pooling matrix (identity stage removed), zero-padded so the total
    pooled-token count (pad_small + N) is a multiple of 128, plus the score
    bias masking the padded columns."""
    N = spatial * spatial
    assert spatial in sizes, "identity exploit requires one stage == spatial"
    small_rows = []
    for s in sizes:
        if s == spatial:
            continue  # identity stage handled in-kernel via concat of raw tokens
        assert spatial % s == 0, "pool size must divide spatial extent"
        k = spatial // s
        for i in range(s):
            for j in range(s):
                m = np.zeros((spatial, spatial), dtype=np.float32)
                m[i * k:(i + 1) * k, j * k:(j + 1) * k] = 1.0 / float(k * k)
                small_rows.append(m.reshape(-1))
    m_small = len(small_rows)                       # 21 for sizes (1,2,4)
    m_pad_total = int(np.ceil((m_small + N) / 128.0)) * 128   # 384
    pad_small = m_pad_total - N                     # 128
    assert pad_small >= m_small and pad_small % 8 == 0 and N % 8 == 0

    P_small = np.zeros((pad_small, N), dtype=np.float32)
    P_small[:m_small] = np.stack(small_rows, axis=0)

    bias = np.zeros((1, m_pad_total), dtype=np.float32)
    bias[0, m_small:pad_small] = -1e30              # kill padded pooled tokens
    return P_small, bias, m_pad_total


# ----------------------------------------------------------------------------
# Fused attention kernel (Bt batch elements per grid step)
# ----------------------------------------------------------------------------
def _attention_kernel(x_ref, wqkv_ref, pool_ref, bias_ref, wproj_ref, bproj_ref,
                      o_ref, acc_ref, *, num_heads, in_dim, scale):
    # x_ref:     (Bt, N, C)
    # wqkv_ref:  (C, 3*in_dim)        (torch Linear weight, transposed; no bias)
    # pool_ref:  (pad_small, N)       small PSP pooling matrix (zero-padded rows)
    # bias_ref:  (1, m_pad)           0 on valid pooled columns, -1e30 on padding
    # wproj_ref: (in_dim, in_dim)     (torch Linear weight, transposed)
    # bproj_ref: (1, in_dim)
    # o_ref:     (Bt, N, in_dim)
    # acc_ref:   (Bt*N, in_dim) f32 VMEM scratch (pre-projection attention out)
    bt, n, c = x_ref.shape
    dh = in_dim // num_heads
    cd = wqkv_ref.dtype        # MXU input dtype (f32, or bf16 on v6e/v7x)

    # One big QKV projection over the whole batch block.
    x_flat = x_ref[...].reshape(bt * n, c)
    qkv = jnp.dot(x_flat, wqkv_ref[...],
                  preferred_element_type=jnp.float32)      # (Bt*N, 3*in_dim) f32

    P = pool_ref[...]                                      # (pad_small, N)
    bias = bias_ref[...]                                   # (1, m_pad) f32

    for b in range(bt):                                    # static unroll, Bt small
        qkv_b = qkv[b * n:(b + 1) * n]                     # (N, 3*in_dim)
        kv_all = qkv_b[:, in_dim:]                         # (N, 2*in_dim) = K | V

        # PSP pooling, hoisted out of the head loop; identity block is a concat.
        pooled = jnp.dot(P, kv_all.astype(cd),
                         preferred_element_type=jnp.float32)   # (pad_small, 2*in_dim)
        kv_p = jnp.concatenate([pooled, kv_all], axis=0)       # (m_pad, 2*in_dim)

        for h in range(num_heads):                         # static unroll
            q = qkv_b[:, h * dh:(h + 1) * dh] * scale      # scale folded into q
            k_ph = kv_p[:, h * dh:(h + 1) * dh]                        # (m_pad, dh)
            v_ph = kv_p[:, in_dim + h * dh: in_dim + (h + 1) * dh]     # (m_pad, dh)

            # q @ k_p^T without materializing a transposed copy.
            s = lax.dot_general(q.astype(cd), k_ph.astype(cd),
                                dimension_numbers=(((1,), (1,)), ((), ())),
                                preferred_element_type=jnp.float32)    # (N, m_pad)
            s = s + bias                                   # mask padded columns
            m = jnp.max(s, axis=-1, keepdims=True)
            e = jnp.exp(s - m)                             # unnormalized probs (f32)
            l = jnp.sum(e, axis=-1, keepdims=True)         # (N, 1)

            pv = jnp.dot(e.astype(cd), v_ph.astype(cd),
                         preferred_element_type=jnp.float32)           # (N, dh)
            # Deferred normalization: normalize the (N, dh) output, not (N, m_pad).
            acc_ref[b * n:(b + 1) * n, h * dh:(h + 1) * dh] = (
                pv * pl.reciprocal(l, approx=True))

    # Output projection over the whole batch block at once.
    proj = jnp.dot(acc_ref[...].astype(cd), wproj_ref[...],
                   preferred_element_type=jnp.float32) + bproj_ref[...]
    o_ref[...] = proj.reshape(bt, n, in_dim).astype(o_ref.dtype)


def _pick_batch_block(B: int, max_block: int = 8) -> int:
    """Largest divisor of B that is <= max_block while keeping >= 2 grid steps
    (so v7x's two TensorCores both get work). Falls back to 1."""
    best = 1
    for bt in range(1, min(B, max_block) + 1):
        if B % bt == 0 and (B // bt) >= 2:
            best = bt
    return best


def attention_forward(x, wqkv_t, pool_small, score_bias, wproj_t, bproj, *,
                      num_heads, in_dim, scale, batch_block=None,
                      compute_dtype=jnp.float32):
    B, N, C = x.shape
    pad_small, n2 = pool_small.shape
    assert n2 == N
    m_pad = score_bias.shape[1]
    assert m_pad == pad_small + N

    if batch_block is None:
        batch_block = _pick_batch_block(B)
    assert B % batch_block == 0
    grid = (B // batch_block,)

    kernel = functools.partial(_attention_kernel, num_heads=num_heads,
                               in_dim=in_dim, scale=scale)
    return pl.pallas_call(
        kernel,
        out_shape=jax.ShapeDtypeStruct((B, N, in_dim), x.dtype),
        grid_spec=pltpu.PrefetchScalarGridSpec(
            num_scalar_prefetch=0,
            grid=grid,
            in_specs=[
                pl.BlockSpec((batch_block, N, C), lambda g: (g, 0, 0)),
                pl.BlockSpec((C, 3 * in_dim), lambda g: (0, 0)),
                pl.BlockSpec((pad_small, N), lambda g: (0, 0)),
                pl.BlockSpec((1, m_pad), lambda g: (0, 0)),
                pl.BlockSpec((in_dim, in_dim), lambda g: (0, 0)),
                pl.BlockSpec((1, in_dim), lambda g: (0, 0)),
            ],
            out_specs=pl.BlockSpec((batch_block, N, in_dim),
                                   lambda g: (g, 0, 0)),
            scratch_shapes=[pltpu.VMEM((batch_block * N, in_dim), jnp.float32)],
        ),
        compiler_params=pltpu.CompilerParams(
            dimension_semantics=("parallel",)),
    )(x.astype(compute_dtype),
      wqkv_t.astype(compute_dtype),
      pool_small.astype(compute_dtype),
      score_bias.astype(jnp.float32),
      wproj_t.astype(compute_dtype),
      bproj.astype(jnp.float32))


# ----------------------------------------------------------------------------
# Pure-JAX reference (for correctness check) — true PSP order, full P matrix
# ----------------------------------------------------------------------------
def reference_forward(x, wqkv_t, pool_mat, wproj_t, bproj, *,
                      num_heads, in_dim, scale):
    B, N, C = x.shape
    Dh = in_dim // num_heads
    qkv = (x @ wqkv_t).reshape(B, N, 3, num_heads, Dh).transpose(2, 0, 3, 1, 4)
    q, k, v = qkv[0], qkv[1], qkv[2]                          # (B, H, N, Dh)
    k_p = jnp.einsum('mn,bhnd->bhmd', pool_mat, k)
    v_p = jnp.einsum('mn,bhnd->bhmd', pool_mat, v)
    s = jnp.einsum('bhnd,bhmd->bhnm', q, k_p) * scale
    attn = jax.nn.softmax(s, axis=-1)
    out = jnp.einsum('bhnm,bhmd->bhnd', attn, v_p)
    out = out.transpose(0, 2, 1, 3).reshape(B, N, in_dim)
    return out @ wproj_t + bproj


if __name__ == "__main__":
    # Module config: Attention(dim=32, num_heads=1, in_dim=32), PSP sizes (1,2,4,16).
    # N must be a perfect square whose sqrt is divisible by the largest PSP size,
    # so spatial = 16 -> N = 256. B=4 exercises batch blocking (Bt=2, 2 grid steps).
    B = 4
    spatial = 16
    N = spatial * spatial          # 256 tokens
    dim = 32                       # C
    in_dim = 32
    num_heads = 1
    sizes = (1, 2, 4, 16)
    scale = float((dim // num_heads) ** (-0.5))   # qk_scale default

    key = jax.random.PRNGKey(0)
    kx, kw1, kw2, kb2 = jax.random.split(key, 4)

    x = jax.random.normal(kx, (B, N, dim), dtype=jnp.float32)
    # torch Linear(dim, 3*in_dim, bias=False) weight is (3*in_dim, dim);
    # we keep the transposed version (dim, 3*in_dim).
    wqkv_t = jax.random.normal(kw1, (dim, 3 * in_dim), dtype=jnp.float32) * 0.05
    # torch Linear(in_dim, in_dim) with bias
    wproj_t = jax.random.normal(kw2, (in_dim, in_dim), dtype=jnp.float32) * 0.05
    bproj = jax.random.normal(kb2, (1, in_dim), dtype=jnp.float32) * 0.01

    pool_small_np, score_bias_np, m_pad = build_psp_small_and_bias(spatial, sizes)
    pool_small = jnp.asarray(pool_small_np)       # (128, 256)
    score_bias = jnp.asarray(score_bias_np)       # (1, 384)

    # Default f32 compute path; on v6e/v7x pass compute_dtype=jnp.bfloat16 for
    # the fast MXU path (f32 accumulation, f32 softmax math kept).
    out = attention_forward(x, wqkv_t, pool_small, score_bias, wproj_t, bproj,
                            num_heads=num_heads, in_dim=in_dim, scale=scale)
    out = jax.block_until_ready(out)

    pool_full = jnp.asarray(build_full_psp_matrix(spatial, sizes))  # (277, 256)
    ref = reference_forward(x, wqkv_t, pool_full, wproj_t, bproj,
                            num_heads=num_heads, in_dim=in_dim, scale=scale)
    np.testing.assert_allclose(np.asarray(out), np.asarray(ref),
                               rtol=1e-2, atol=2e-3)

    # attn_drop / proj_drop have p=0.0 -> identity (eval semantics).
    print("KERNEL_OK")
</pallas_src>

<mosaic_0001>
module attributes {stable_mosaic.version = 11 : i64} {
  func.func @_attention_kernel(%arg0: i32, %arg1: memref<2x256x32xf32, #tpu.memory_space<vmem>>, %arg2: memref<32x96xf32, #tpu.memory_space<vmem>>, %arg3: memref<128x256xf32, #tpu.memory_space<vmem>>, %arg4: memref<1x384xf32, #tpu.memory_space<vmem>>, %arg5: memref<32x32xf32, #tpu.memory_space<vmem>>, %arg6: memref<1x32xf32, #tpu.memory_space<vmem>>, %arg7: memref<2x256x32xf32, #tpu.memory_space<vmem>>, %arg8: memref<512x32xf32, #tpu.memory_space<vmem>>) attributes {dimension_semantics = [#tpu.dimension_semantics<parallel>], iteration_bounds = array<i64: 2>, scalar_prefetch = 0 : i64, scratch_operands = 1 : i64, tpu.core_type = #tpu.core_type<tc>, window_params = [{transform_indices = @transform_0, window_bounds = array<i64: 2, 256, 32>}, {pipeline_mode = #tpu.pipeline_mode<synchronous>, transform_indices = @transform_1, window_bounds = array<i64: 32, 96>}, {pipeline_mode = #tpu.pipeline_mode<synchronous>, transform_indices = @transform_2, window_bounds = array<i64: 128, 256>}, {pipeline_mode = #tpu.pipeline_mode<synchronous>, transform_indices = @transform_3, window_bounds = array<i64: 1, 384>}, {pipeline_mode = #tpu.pipeline_mode<synchronous>, transform_indices = @transform_4, window_bounds = array<i64: 32, 32>}, {pipeline_mode = #tpu.pipeline_mode<synchronous>, transform_indices = @transform_5, window_bounds = array<i64: 1, 32>}, {transform_indices = @transform_6, window_bounds = array<i64: 2, 256, 32>}]} {
    %c0 = arith.constant 0 : index
    %c0_0 = arith.constant 0 : index
    %c0_1 = arith.constant 0 : index
    %0 = vector.load %arg1[%c0, %c0_0, %c0_1] : memref<2x256x32xf32, #tpu.memory_space<vmem>>, vector<2x256x32xf32>
    %1 = vector.shape_cast %0 : vector<2x256x32xf32> to vector<512x32xf32>
    %c0_2 = arith.constant 0 : index
    %c0_3 = arith.constant 0 : index
    %2 = vector.load %arg2[%c0_2, %c0_3] : memref<32x96xf32, #tpu.memory_space<vmem>>, vector<32x96xf32>
    %cst = arith.constant dense<0.000000e+00> : vector<512x96xf32>
    %3 = tpu.matmul %1, %2, %cst {dimension_numbers = #tpu.dot_dimension_numbers<[1], [0], [0], [1], [0, 0, 1, 1], [], []>} : vector<512x32xf32>, vector<32x96xf32>, vector<512x96xf32> -> vector<512x96xf32>
    %c0_4 = arith.constant 0 : index
    %c0_5 = arith.constant 0 : index
    %4 = vector.load %arg3[%c0_4, %c0_5] : memref<128x256xf32, #tpu.memory_space<vmem>>, vector<128x256xf32>
    %c0_6 = arith.constant 0 : index
    %c0_7 = arith.constant 0 : index
    %5 = vector.load %arg4[%c0_6, %c0_7] : memref<1x384xf32, #tpu.memory_space<vmem>>, vector<1x384xf32>
    %6 = vector.extract_strided_slice %3 {offsets = [0, 0], sizes = [256, 96], strides = [1, 1]} : vector<512x96xf32> to vector<256x96xf32>
    %7 = vector.extract_strided_slice %6 {offsets = [0, 32], sizes = [256, 64], strides = [1, 1]} : vector<256x96xf32> to vector<256x64xf32>
    %cst_8 = arith.constant dense<0.000000e+00> : vector<128x64xf32>
    %8 = tpu.matmul %4, %7, %cst_8 {dimension_numbers = #tpu.dot_dimension_numbers<[1], [0], [0], [1], [0, 0, 1, 1], [], []>} : vector<128x256xf32>, vector<256x64xf32>, vector<128x64xf32> -> vector<128x64xf32>
    %9 = tpu.concatenate %8, %7 in 0 : vector<128x64xf32>, vector<256x64xf32> -> vector<384x64xf32>
    %10 = vector.extract_strided_slice %6 {offsets = [0, 0], sizes = [256, 32], strides = [1, 1]} : vector<256x96xf32> to vector<256x32xf32>
    %cst_9 = arith.constant 0.176776692 : f32
    %11 = vector.broadcast %cst_9 : f32 to vector<256x32xf32>
    %12 = arith.mulf %10, %11 : vector<256x32xf32>
    %13 = vector.extract_strided_slice %9 {offsets = [0, 0], sizes = [384, 32], strides = [1, 1]} : vector<384x64xf32> to vector<384x32xf32>
    %14 = vector.extract_strided_slice %9 {offsets = [0, 32], sizes = [384, 32], strides = [1, 1]} : vector<384x64xf32> to vector<384x32xf32>
    %cst_10 = arith.constant dense<0.000000e+00> : vector<256x384xf32>
    %15 = tpu.matmul %12, %13, %cst_10 {dimension_numbers = #tpu.dot_dimension_numbers<[1], [1], [0], [0], [0, 0, 1, 0], [], []>} : vector<256x32xf32>, vector<384x32xf32>, vector<256x384xf32> -> vector<256x384xf32>
    %16 = vector.broadcast %5 : vector<1x384xf32> to vector<256x384xf32>
    %17 = arith.addf %15, %16 : vector<256x384xf32>
    %cst_11 = arith.constant dense<0xFF800000> : vector<256xf32>
    %18 = vector.multi_reduction <maximumf>, %17, %cst_11 [1] : vector<256x384xf32> to vector<256xf32>
    %19 = vector.shape_cast %18 : vector<256xf32> to vector<256x1xf32>
    %20 = vector.broadcast %19 : vector<256x1xf32> to vector<256x384xf32>
    %21 = arith.subf %17, %20 : vector<256x384xf32>
    %22 = math.exp %21 : vector<256x384xf32>
    %cst_12 = arith.constant dense<0.000000e+00> : vector<256xf32>
    %23 = vector.multi_reduction <add>, %22, %cst_12 [1] : vector<256x384xf32> to vector<256xf32>
    %24 = vector.shape_cast %23 : vector<256xf32> to vector<256x1xf32>
    %cst_13 = arith.constant dense<0.000000e+00> : vector<256x32xf32>
    %25 = tpu.matmul %22, %14, %cst_13 {dimension_numbers = #tpu.dot_dimension_numbers<[1], [0], [0], [1], [0, 0, 1, 1], [], []>} : vector<256x384xf32>, vector<384x32xf32>, vector<256x32xf32> -> vector<256x32xf32>
    %26 = tpu.reciprocal %24 {approx = true} : vector<256x1xf32> -> vector<256x1xf32>
    %27 = vector.broadcast %26 : vector<256x1xf32> to vector<256x32xf32>
    %28 = arith.mulf %25, %27 : vector<256x32xf32>
    %c0_14 = arith.constant 0 : index
    %c0_15 = arith.constant 0 : index
    %29 = vector.load %arg8[%c0_14, %c0_15] : memref<512x32xf32, #tpu.memory_space<vmem>>, vector<256x32xf32>
    tpu.vector_store %arg8[%c0_14, %c0_15], %28 {strides = array<i32>} : memref<512x32xf32, #tpu.memory_space<vmem>>, vector<256x32xf32>,
    %30 = vector.extract_strided_slice %3 {offsets = [256, 0], sizes = [256, 96], strides = [1, 1]} : vector<512x96xf32> to vector<256x96xf32>
    %31 = vector.extract_strided_slice %30 {offsets = [0, 32], sizes = [256, 64], strides = [1, 1]} : vector<256x96xf32> to vector<256x64xf32>
    %cst_16 = arith.constant dense<0.000000e+00> : vector<128x64xf32>
    %32 = tpu.matmul %4, %31, %cst_16 {dimension_numbers = #tpu.dot_dimension_numbers<[1], [0], [0], [1], [0, 0, 1, 1], [], []>} : vector<128x256xf32>, vector<256x64xf32>, vector<128x64xf32> -> vector<128x64xf32>
    %33 = tpu.concatenate %32, %31 in 0 : vector<128x64xf32>, vector<256x64xf32> -> vector<384x64xf32>
    %34 = vector.extract_strided_slice %30 {offsets = [0, 0], sizes = [256, 32], strides = [1, 1]} : vector<256x96xf32> to vector<256x32xf32>
    %cst_17 = arith.constant 0.176776692 : f32
    %35 = vector.broadcast %cst_17 : f32 to vector<256x32xf32>
    %36 = arith.mulf %34, %35 : vector<256x32xf32>
    %37 = vector.extract_strided_slice %33 {offsets = [0, 0], sizes = [384, 32], strides = [1, 1]} : vector<384x64xf32> to vector<384x32xf32>
    %38 = vector.extract_strided_slice %33 {offsets = [0, 32], sizes = [384, 32], strides = [1, 1]} : vector<384x64xf32> to vector<384x32xf32>
    %cst_18 = arith.constant dense<0.000000e+00> : vector<256x384xf32>
    %39 = tpu.matmul %36, %37, %cst_18 {dimension_numbers = #tpu.dot_dimension_numbers<[1], [1], [0], [0], [0, 0, 1, 0], [], []>} : vector<256x32xf32>, vector<384x32xf32>, vector<256x384xf32> -> vector<256x384xf32>
    %40 = vector.broadcast %5 : vector<1x384xf32> to vector<256x384xf32>
    %41 = arith.addf %39, %40 : vector<256x384xf32>
    %cst_19 = arith.constant dense<0xFF800000> : vector<256xf32>
    %42 = vector.multi_reduction <maximumf>, %41, %cst_19 [1] : vector<256x384xf32> to vector<256xf32>
    %43 = vector.shape_cast %42 : vector<256xf32> to vector<256x1xf32>
    %44 = vector.broadcast %43 : vector<256x1xf32> to vector<256x384xf32>
    %45 = arith.subf %41, %44 : vector<256x384xf32>
    %46 = math.exp %45 : vector<256x384xf32>
    %cst_20 = arith.constant dense<0.000000e+00> : vector<256xf32>
    %47 = vector.multi_reduction <add>, %46, %cst_20 [1] : vector<256x384xf32> to vector<256xf32>
    %48 = vector.shape_cast %47 : vector<256xf32> to vector<256x1xf32>
    %cst_21 = arith.constant dense<0.000000e+00> : vector<256x32xf32>
    %49 = tpu.matmul %46, %38, %cst_21 {dimension_numbers = #tpu.dot_dimension_numbers<[1], [0], [0], [1], [0, 0, 1, 1], [], []>} : vector<256x384xf32>, vector<384x32xf32>, vector<256x32xf32> -> vector<256x32xf32>
    %50 = tpu.reciprocal %48 {approx = true} : vector<256x1xf32> -> vector<256x1xf32>
    %51 = vector.broadcast %50 : vector<256x1xf32> to vector<256x32xf32>
    %52 = arith.mulf %49, %51 : vector<256x32xf32>
    %c256 = arith.constant 256 : index
    %c0_22 = arith.constant 0 : index
    %53 = vector.load %arg8[%c256, %c0_22] : memref<512x32xf32, #tpu.memory_space<vmem>>, vector<256x32xf32>
    tpu.vector_store %arg8[%c256, %c0_22], %52 {strides = array<i32>} : memref<512x32xf32, #tpu.memory_space<vmem>>, vector<256x32xf32>,
    %c0_23 = arith.constant 0 : index
    %c0_24 = arith.constant 0 : index
    %54 = vector.load %arg8[%c0_23, %c0_24] : memref<512x32xf32, #tpu.memory_space<vmem>>, vector<512x32xf32>
    %c0_25 = arith.constant 0 : index
    %c0_26 = arith.constant 0 : index
    %55 = vector.load %arg5[%c0_25, %c0_26] : memref<32x32xf32, #tpu.memory_space<vmem>>, vector<32x32xf32>
    %cst_27 = arith.constant dense<0.000000e+00> : vector<512x32xf32>
    %56 = tpu.matmul %54, %55, %cst_27 {dimension_numbers = #tpu.dot_dimension_numbers<[1], [0], [0], [1], [0, 0, 1, 1], [], []>} : vector<512x32xf32>, vector<32x32xf32>, vector<512x32xf32> -> vector<512x32xf32>
    %c0_28 = arith.constant 0 : index
    %c0_29 = arith.constant 0 : index
    %57 = vector.load %arg6[%c0_28, %c0_29] : memref<1x32xf32, #tpu.memory_space<vmem>>, vector<1x32xf32>
    %58 = vector.broadcast %57 : vector<1x32xf32> to vector<512x32xf32>
    %59 = arith.addf %56, %58 : vector<512x32xf32>
    %60 = vector.shape_cast %59 : vector<512x32xf32> to vector<2x256x32xf32>
    %c0_30 = arith.constant 0 : index
    %c0_31 = arith.constant 0 : index
    %c0_32 = arith.constant 0 : index
    %61 = vector.load %arg7[%c0_30, %c0_31, %c0_32] : memref<2x256x32xf32, #tpu.memory_space<vmem>>, vector<2x256x32xf32>
    tpu.vector_store %arg7[%c0_30, %c0_31, %c0_32], %60 {strides = array<i32>} : memref<2x256x32xf32, #tpu.memory_space<vmem>>, vector<2x256x32xf32>,
    return
  }
  func.func @transform_0(%arg0: i32) -> (i32, i32, i32) {
    %c0_i32 = arith.constant 0 : i32
    %c0_i32_0 = arith.constant 0 : i32
    %c0_i32_1 = arith.constant 0 : i32
    return %arg0, %c0_i32, %c0_i32_0 : i32, i32, i32
  }
  func.func @transform_1(%arg0: i32) -> (i32, i32) {
    %c0_i32 = arith.constant 0 : i32
    %c0_i32_0 = arith.constant 0 : i32
    %c0_i32_1 = arith.constant 0 : i32
    return %c0_i32, %c0_i32_0 : i32, i32
  }
  func.func @transform_2(%arg0: i32) -> (i32, i32) {
    %c0_i32 = arith.constant 0 : i32
    %c0_i32_0 = arith.constant 0 : i32
    %c0_i32_1 = arith.constant 0 : i32
    return %c0_i32, %c0_i32_0 : i32, i32
  }
  func.func @transform_3(%arg0: i32) -> (i32, i32) {
    %c0_i32 = arith.constant 0 : i32
    %c0_i32_0 = arith.constant 0 : i32
    %c0_i32_1 = arith.constant 0 : i32
    return %c0_i32, %c0_i32_0 : i32, i32
  }
  func.func @transform_4(%arg0: i32) -> (i32, i32) {
    %c0_i32 = arith.constant 0 : i32
    %c0_i32_0 = arith.constant 0 : i32
    %c0_i32_1 = arith.constant 0 : i32
    return %c0_i32, %c0_i32_0 : i32, i32
  }
  func.func @transform_5(%arg0: i32) -> (i32, i32) {
    %c0_i32 = arith.constant 0 : i32
    %c0_i32_0 = arith.constant 0 : i32
    %c0_i32_1 = arith.constant 0 : i32
    return %c0_i32, %c0_i32_0 : i32, i32
  }
  func.func @transform_6(%arg0: i32) -> (i32, i32, i32) {
    %c0_i32 = arith.constant 0 : i32
    %c0_i32_0 = arith.constant 0 : i32
    %c0_i32_1 = arith.constant 0 : i32
    return %arg0, %c0_i32, %c0_i32_0 : i32, i32, i32
  }
}

</mosaic_0001>

<bundles_post_ra>
// kernel: tpu_custom_call.1
= control target key start
LH: loop header
LB: loop body
LE: loop exit
PB: predicated region body
PF: predicated region fallthrough
CT: control target
= control target key end

     0   :  { %s8370_s21 = smov 0   ;;  %s12816_s0 = inlined_call_operand.vmem [shape: f32[4,256,32], index: 0, kind: input, shape index: {}]   ;;  %s12817_s1 = inlined_call_operand.vmem [shape: f32[32,96], index: 1, kind: input, shape index: {}]   ;;  %s12818_s2 = inlined_call_operand.vmem [shape: f32[128,256], index: 2, kind: input, shape index: {}]   ;;  %s12819_s3 = inlined_call_operand.vmem [shape: f32[1,384], index: 3, kind: input, shape index: {}]   ;;  %s12820_s4 = inlined_call_operand.vmem [shape: f32[32,32], index: 4, kind: input, shape index: {}]   ;;  %s12821_s5 = inlined_call_operand.vmem [shape: f32[1,32], index: 5, kind: input, shape index: {}]   ;;  %s12822_s6 = inlined_call_operand.vmem [shape: f32[4,256,32], index: 6, kind: output, shape index: {}]  }
   0x1 LB: > { %s6187_s22 = sadd.s32 4294967295, %s8331_s21   ;;  %p6191_p0 = scmp.ge.s32.totalorder %s8331_s21, 1  ;;  %s8331_s21 = sphi %s8370_s21, %s16_s21  }
   0x2   : > { %p214_p1 = scmp.lt.s32.totalorder %s8331_s21, 3 }
   0x4   : > { %p215_p2 = pnand %p6191_p0, %p214_p1 }
   0x6   : > { %218 = sbr.rel (%p215_p2) target bundleno = 2587 (0xa1b), region = 44 }
   0xb   : > { %v327_v0 = vld [vmem:[%s12817_s1 + $0x18] sm:$0xff]  ;;  %v326_v1 = vld [vmem:[%s12817_s1 + $0x10] sm:$0xff]  ;;  %s6192_s27 = sshll.u32 %s6187_s22, 1  ;;  %v325_v2 = vld [vmem:[%s12817_s1 + $0x8] sm:$0xff]  ;;  %vm328_vm0 = vcmask 261120   ;;  %s8333_s12 = smov 96  }
   0xc   : > { %7235 = vmatprep.subr.mxu0 %v327_v0  ;;  %p247_p3 = scmp.lt.s32.totalorder %s6192_s27, 3  ;;  %7763 = vmatprep.subr.mxu1 %v327_v0  ;;  %v324_v3 = vld [vmem:[%s12817_s1] sm:$0xff] }
   0xd   : > { %7236 = vmatpush3.msra.mxu0 %v327_v0  ;;  %7767 = vmatpush3.msra.mxu1 %v327_v0 }
   0xe   : > { %7237 = vmatprep.subr.mxu0 %v326_v1  ;;  %s14022_s27 = smov (!%p247_p3, %s6192_s27), 3  ;;  %7764 = vmatprep.subr.mxu1 %v326_v1 }
   0xf   : > { %7238 = vmatpush3.msra.mxu0 %v326_v1  ;;  %7768 = vmatpush3.msra.mxu1 %v326_v1  ;;  %s6553_s8 = sshll.u32 %s14022_s27, 8 }
  0x10   : > { %7239 = vmatprep.subr.mxu0 %v325_v2  ;;  %7765 = vmatprep.subr.mxu1 %v325_v2  ;;  %s8398_s11 = scalar_lea.vmem %s12816_s0, %s6553_s8  ;;  %s12615_s14 = scalar_lea.vmem %s12822_s6, %s6553_s8 }
  0x11   : > { %7240 = vmatpush3.msra.mxu0 %v325_v2  ;;  %7769 = vmatpush3.msra.mxu1 %v325_v2  ;;  %v260_v4 = vld [vmem:[%s8398_s11] sm:$0xff]  ;;  %v261_v5 = vld [vmem:[%s8398_s11 + $0x8] sm:$0xff]  ;;  %v262_v6 = vld [vmem:[%s8398_s11 + $0x10] sm:$0xff] }
  0x12   : > { %7241 = vmatprep.subr.mxu0 %v324_v3  ;;  %7766 = vmatprep.subr.mxu1 %v324_v3  ;;  %v263_v7 = vld [vmem:[%s8398_s11 + $0x18] sm:$0xff]  ;;  %v264_v8 = vld [vmem:[%s8398_s11 + $0x20] sm:$0xff]  ;;  %v265_v9 = vld [vmem:[%s8398_s11 + $0x28] sm:$0xff] }
  0x13   : > { %7242 = vmatpush3.msra.mxu0 %v324_v3  ;;  %7243 = vmatprep.mubr.msk.f32.mxu0 %vm328_vm0, %v260_v4  ;;  %v266_v10 = vld [vmem:[%s8398_s11 + $0x30] sm:$0xff]  ;;  %v292_v11 = vld [vmem:[%s8398_s11 + $0x100] sm:$0xff]  ;;  %v267_v12 = vld [vmem:[%s8398_s11 + $0x38] sm:$0xff] }
  0x14   : > { %7244 = vmatmul.mubr.msk.f32.vlgmr.msra.gmra.mxu0 %vm328_vm0, %v261_v5  ;;  %7770 = vmatpush3.msra.mxu1 %v324_v3  ;;  %v293_v13 = vld [vmem:[%s8398_s11 + $0x108] sm:$0xff]  ;;  %v294_v14 = vld [vmem:[%s8398_s11 + $0x110] sm:$0xff]  ;;  %v268_v15 = vld [vmem:[%s8398_s11 + $0x40] sm:$0xff] }
  0x15   : > { %7246 = vmatprep.mubr.msk.f32.mxu0 %vm328_vm0, %v262_v6  ;;  %7291 = vmatprep.mubr.msk.f32.mxu1 %vm328_vm0, %v292_v11  ;;  %v295_v16 = vld [vmem:[%s8398_s11 + $0x118] sm:$0xff]  ;;  %v296_v17 = vld [vmem:[%s8398_s11 + $0x120] sm:$0xff]  ;;  %v269_v18 = vld [vmem:[%s8398_s11 + $0x48] sm:$0xff] }
  0x16   : > { %7292 = vmatmul.mubr.msk.f32.vlgmr.msra.gmra.mxu1 %vm328_vm0, %v293_v13  ;;  %v270_v19 = vld [vmem:[%s8398_s11 + $0x50] sm:$0xff]  ;;  %v297_v20 = vld [vmem:[%s8398_s11 + $0x128] sm:$0xff]  ;;  %v271_v22 = vld [vmem:[%s8398_s11 + $0x58] sm:$0xff] }
  0x17   : > { %7294 = vmatprep.mubr.msk.f32.mxu1 %vm328_vm0, %v294_v14  ;;  %v298_v21 = vld [vmem:[%s8398_s11 + $0x130] sm:$0xff]  ;;  %v272_v23 = vld [vmem:[%s8398_s11 + $0x60] sm:$0xff]  ;;  %v299_v24 = vld [vmem:[%s8398_s11 + $0x138] sm:$0xff] }
  0x18   : > { %7247 = vmatmul.mubr.msk.f32.gmra.mxu0 %vm328_vm0, %v263_v7  ;;  %v300_v25 = vld [vmem:[%s8398_s11 + $0x140] sm:$0xff]  ;;  %v273_v26 = vld [vmem:[%s8398_s11 + $0x68] sm:$0xff]  ;;  %v274_v27 = vld [vmem:[%s8398_s11 + $0x70] sm:$0xff] }
  0x19   : > { %7249 = vmatprep.mubr.msk.f32.mxu0 %vm328_vm0, %v264_v8  ;;  %v301_v28 = vld [vmem:[%s8398_s11 + $0x148] sm:$0xff]  ;;  %v302_v29 = vld [vmem:[%s8398_s11 + $0x150] sm:$0xff]  ;;  %v275_v30 = vld [vmem:[%s8398_s11 + $0x78] sm:$0xff] }
  0x1a   : > { %7295 = vmatmul.mubr.msk.f32.gmra.mxu1 %vm328_vm0, %v295_v16  ;;  %v276_v31 = vld [vmem:[%s8398_s11 + $0x80] sm:$0xff]  ;;  %v303_v32 = vld [vmem:[%s8398_s11 + $0x158] sm:$0xff]  ;;  %v277_v34 = vld [vmem:[%s8398_s11 + $0x88] sm:$0xff] }
  0x1b   : > { %7297 = vmatprep.mubr.msk.f32.mxu1 %vm328_vm0, %v296_v17  ;;  %v304_v33 = vld [vmem:[%s8398_s11 + $0x160] sm:$0xff]  ;;  %v278_v35 = vld [vmem:[%s8398_s11 + $0x90] sm:$0xff]  ;;  %v305_v36 = vld [vmem:[%s8398_s11 + $0x168] sm:$0xff] }
  0x1c   : > { %7250 = vmatmul.mubr.msk.f32.gmra.mxu0 %vm328_vm0, %v265_v9  ;;  %v306_v37 = vld [vmem:[%s8398_s11 + $0x170] sm:$0xff]  ;;  %v279_v38 = vld [vmem:[%s8398_s11 + $0x98] sm:$0xff]  ;;  %v280_v39 = vld [vmem:[%s8398_s11 + $0xa0] sm:$0xff] }
  0x1d   : > { %7252 = vmatprep.mubr.msk.f32.mxu0 %vm328_vm0, %v266_v10  ;;  %v307_v40 = vld [vmem:[%s8398_s11 + $0x178] sm:$0xff]  ;;  %v308_v41 = vld [vmem:[%s8398_s11 + $0x180] sm:$0xff]  ;;  %v281_v42 = vld [vmem:[%s8398_s11 + $0xa8] sm:$0xff] }
  0x1e   : > { %7298 = vmatmul.mubr.msk.f32.gmra.mxu1 %vm328_vm0, %v297_v20  ;;  %v282_v43 = vld [vmem:[%s8398_s11 + $0xb0] sm:$0xff]  ;;  %v309_v44 = vld [vmem:[%s8398_s11 + $0x188] sm:$0xff]  ;;  %v283_v46 = vld [vmem:[%s8398_s11 + $0xb8] sm:$0xff] }
  0x1f   : > { %7300 = vmatprep.mubr.msk.f32.mxu1 %vm328_vm0, %v298_v21  ;;  %v310_v45 = vld [vmem:[%s8398_s11 + $0x190] sm:$0xff]  ;;  %v284_v47 = vld [vmem:[%s8398_s11 + $0xc0] sm:$0xff]  ;;  %v311_v48 = vld [vmem:[%s8398_s11 + $0x198] sm:$0xff] }
  0x20   : > { %7253 = vmatmul.mubr.msk.f32.gmra.mxu0 %vm328_vm0, %v267_v12  ;;  %v312_v49 = vld [vmem:[%s8398_s11 + $0x1a0] sm:$0xff]  ;;  %v285_v50 = vld [vmem:[%s8398_s11 + $0xc8] sm:$0xff]  ;;  %v286_v51 = vld [vmem:[%s8398_s11 + $0xd0] sm:$0xff] }
  0x21   : > { %7255 = vmatprep.mubr.msk.f32.mxu0 %vm328_vm0, %v268_v15  ;;  %v313_v52 = vld [vmem:[%s8398_s11 + $0x1a8] sm:$0xff]  ;;  %v314_v53 = vld [vmem:[%s8398_s11 + $0x1b0] sm:$0xff]  ;;  %v287_v54 = vld [vmem:[%s8398_s11 + $0xd8] sm:$0xff] }
  0x22   : > { %7301 = vmatmul.mubr.msk.f32.gmra.mxu1 %vm328_vm0, %v299_v24  ;;  %v288_v55 = vld [vmem:[%s8398_s11 + $0xe0] sm:$0xff]  ;;  %v315_v56 = vld [vmem:[%s8398_s11 + $0x1b8] sm:$0xff]  ;;  %v289_v58 = vld [vmem:[%s8398_s11 + $0xe8] sm:$0xff] }
  0x23   : > { %7303 = vmatprep.mubr.msk.f32.mxu1 %vm328_vm0, %v300_v25  ;;  %v316_v57 = vld [vmem:[%s8398_s11 + $0x1c0] sm:$0xff]  ;;  %v290_v59 = vld [vmem:[%s8398_s11 + $0xf0] sm:$0xff]  ;;  %v317_v60 = vld [vmem:[%s8398_s11 + $0x1c8] sm:$0xff] }
  0x24   : > { %7256 = vmatmul.mubr.msk.f32.gmra.mxu0 %vm328_vm0, %v269_v18  ;;  %v318_v61 = vld [vmem:[%s8398_s11 + $0x1d0] sm:$0xff]  ;;  %v291_v62 = vld [vmem:[%s8398_s11 + $0xf8] sm:$0xff]  ;;  %v320_v0 = vld [vmem:[%s8398_s11 + $0x1e0] sm:$0xff] }
  0x25   : > { %7258 = vmatprep.mubr.msk.f32.mxu0 %vm328_vm0, %v270_v19  ;;  %v319_v63 = vld [vmem:[%s8398_s11 + $0x1d8] sm:$0xff]  ;;  %v321_v1 = vld [vmem:[%s8398_s11 + $0x1e8] sm:$0xff]  ;;  %v322_v2 = vld [vmem:[%s8398_s11 + $0x1f0] sm:$0xff] }
  0x26   : > { %7304 = vmatmul.mubr.msk.f32.gmra.mxu1 %vm328_vm0, %v301_v28  ;;  %v323_v3 = vld [vmem:[%s8398_s11 + $0x1f8] sm:$0xff] }
  0x27   : > { %7306 = vmatprep.mubr.msk.f32.mxu1 %vm328_vm0, %v302_v29 }
  0x28   : > { %7259 = vmatmul.mubr.msk.f32.gmra.mxu0 %vm328_vm0, %v271_v22 }
  0x29   : > { %7261 = vmatprep.mubr.msk.f32.mxu0 %vm328_vm0, %v272_v23 }
  0x2a   : > { %7307 = vmatmul.mubr.msk.f32.gmra.mxu1 %vm328_vm0, %v303_v32 }
  0x2b   : > { %7309 = vmatprep.mubr.msk.f32.mxu1 %vm328_vm0, %v304_v33 }
  0x2c   : > { %7262 = vmatmul.mubr.msk.f32.gmra.mxu0 %vm328_vm0, %v273_v26 }
  0x2d   : > { %7264 = vmatprep.mubr.msk.f32.mxu0 %vm328_vm0, %v274_v27 }
  0x2e   : > { %7310 = vmatmul.mubr.msk.f32.gmra.mxu1 %vm328_vm0, %v305_v36 }
  0x2f   : > { %7312 = vmatprep.mubr.msk.f32.mxu1 %vm328_vm0, %v306_v37 }
  0x30   : > { %7265 = vmatmul.mubr.msk.f32.gmra.mxu0 %vm328_vm0, %v275_v30 }
  0x31   : > { %7267 = vmatprep.mubr.msk.f32.mxu0 %vm328_vm0, %v276_v31 }
  0x32   : > { %7313 = vmatmul.mubr.msk.f32.gmra.mxu1 %vm328_vm0, %v307_v40 }
  0x33   : > { %7315 = vmatprep.mubr.msk.f32.mxu1 %vm328_vm0, %v308_v41 }
  0x34   : > { %7268 = vmatmul.mubr.msk.f32.gmra.mxu0 %vm328_vm0, %v277_v34 }
  0x35   : > { %7270 = vmatprep.mubr.msk.f32.mxu0 %vm328_vm0, %v278_v35 }
  0x36   : > { %7316 = vmatmul.mubr.msk.f32.gmra.mxu1 %vm328_vm0, %v309_v44 }
  0x37   : > { %7318 = vmatprep.mubr.msk.f32.mxu1 %vm328_vm0, %v310_v45 }
  0x38   : > { %7271 = vmatmul.mubr.msk.f32.gmra.mxu0 %vm328_vm0, %v279_v38 }
  0x39   : > { %7273 = vmatprep.mubr.msk.f32.mxu0 %vm328_vm0, %v280_v39 }
  0x3a   : > { %7319 = vmatmul.mubr.msk.f32.gmra.mxu1 %vm328_vm0, %v311_v48 }
  0x3b   : > { %7321 = vmatprep.mubr.msk.f32.mxu1 %vm328_vm0, %v312_v49 }
  0x3c   : > { %7274 = vmatmul.mubr.msk.f32.gmra.mxu0 %vm328_vm0, %v281_v42 }
  0x3d   : > { %7276 = vmatprep.mubr.msk.f32.mxu0 %vm328_vm0, %v282_v43 }
  0x3e   : > { %7322 = vmatmul.mubr.msk.f32.gmra.mxu1 %vm328_vm0, %v313_v52 }
  0x3f   : > { %7324 = vmatprep.mubr.msk.f32.mxu1 %vm328_vm0, %v314_v53 }
  0x40   : > { %7277 = vmatmul.mubr.msk.f32.gmra.mxu0 %vm328_vm0, %v283_v46 }
  0x41   : > { %7279 = vmatprep.mubr.msk.f32.mxu0 %vm328_vm0, %v284_v47 }
  0x42   : > { %7325 = vmatmul.mubr.msk.f32.gmra.mxu1 %vm328_vm0, %v315_v56 }
  0x43   : > { %7327 = vmatprep.mubr.msk.f32.mxu1 %vm328_vm0, %v316_v57 }
  0x44   : > { %7280 = vmatmul.mubr.msk.f32.gmra.mxu0 %vm328_vm0, %v285_v50 }
  0x45   : > { %7282 = vmatprep.mubr.msk.f32.mxu0 %vm328_vm0, %v286_v51 }
  0x46   : > { %7328 = vmatmul.mubr.msk.f32.gmra.mxu1 %vm328_vm0, %v317_v60 }
  0x47   : > { %7330 = vmatprep.mubr.msk.f32.mxu1 %vm328_vm0, %v318_v61 }
  0x48   : > { %7283 = vmatmul.mubr.msk.f32.gmra.mxu0 %vm328_vm0, %v287_v54 }
  0x49   : > { %7285 = vmatprep.mubr.msk.f32.mxu0 %vm328_vm0, %v288_v55 }
  0x4a   : > { %7331 = vmatmul.mubr.msk.f32.gmra.mxu1 %vm328_vm0, %v319_v63 }
  0x4b   : > { %7333 = vmatprep.mubr.msk.f32.mxu1 %vm328_vm0, %v320_v0  ;;  %v907_v0 = vld [vmem:[%s12818_s2 + $0x8] sm:$0xff] }
  0x4c   : > { %7286 = vmatmul.mubr.msk.f32.gmra.mxu0 %vm328_vm0, %v289_v58 }
  0x4d   : > { %7288 = vmatprep.mubr.msk.f32.mxu0 %vm328_vm0, %v290_v59 }
  0x4e   : > { %7334 = vmatmul.mubr.msk.f32.gmra.mxu1 %vm328_vm0, %v321_v1 }
  0x4f   : > { %7336 = vmatprep.mubr.msk.f32.mxu1 %vm328_vm0, %v322_v2 }
  0x50   : > { %7289 = vmatmul.mubr.msk.f32.gmra.mxu0 %vm328_vm0, %v291_v62 }
  0x52   : > { %7337 = vmatmul.mubr.msk.f32.gmra.mxu1 %vm328_vm0, %v323_v3 }
  0x53   : > { %1131 = vmatprep.mubr.f32.mxu1 %v907_v0 }
  0xd4   : > { %v8528_v4 = vpop.f32.mrf.mxu0 }
  0xd6   : > { %v8530_v5 = vpop.f32.mrf.mxu0  ;;  %v8545_v11 = vpop.f32.mrf.mxu1 }
  0xd7   : > { %v8533_v6 = vmul.f32 0.17677669, %v8530_v5  ;;  %13203 = vst [vmem:[#allocation3_spill] sm:$0xff] %v8545_v11 }
  0xd8   : > { %v8535_v7 = vpop.f32.mrf.mxu0  ;;  %v8549_v13 = vpop.f32.mrf.mxu1 }
  0xd9   : > { %7371 = vmatprep.mubr.msk.f32.mxu0 %vm328_vm0, %v8533_v6  ;;  %13204 = vst [vmem:[#allocation4_spill] sm:$0xff] %v8549_v13 }
  0xda   : > { %v8539_v8 = vpop.f32.mrf.mxu0  ;;  %v8553_v15 = vpop.f32.mrf.mxu1 }
  0xdb   : > { %13205 = vst [vmem:[#allocation5_spill] sm:$0xff] %v8553_v15 }
  0xdc   : > { %v8541_v9 = vpop.f32.mrf.mxu0  ;;  %v8557_v17 = vpop.f32.mrf.mxu1 }
  0xdd   : > { %13206 = vst [vmem:[#allocation6_spill] sm:$0xff] %v8557_v17  ;;  %v906_v17 = vld [vmem:[%s12818_s2] sm:$0xff] }
  0xde   : > { %v8543_v10 = vpop.f32.mrf.mxu0  ;;  %v8563_v19 = vpop.f32.mrf.mxu1 }
  0xdf   : > { %13207 = vst [vmem:[#allocation7_spill] sm:$0xff] %v8563_v19 }
  0xe0   : > { %v8547_v12 = vpop.f32.mrf.mxu0  ;;  %v8567_v21 = vpop.f32.mrf.mxu1 }
  0xe1   : > { %13208 = vst [vmem:[#allocation8_spill] sm:$0xff] %v8567_v21 }
  0xe2   : > { %v8551_v14 = vpop.f32.mrf.mxu0  ;;  %v8573_v23 = vpop.f32.mrf.mxu1 }
  0xe3   : > { %13209 = vst [vmem:[#allocation9_spill] sm:$0xff] %v8573_v23 }
  0xe4   : > { %v8555_v16 = vpop.f32.mrf.mxu0  ;;  %v8577_v25 = vpop.f32.mrf.mxu1 }
  0xe5   : > { %989 = vrot.lane.b32.xlu1 %v8555_v16, %s8333_s12  ;;  %13210 = vst [vmem:[#allocation10_spill] sm:$0xff] %v8577_v25 }
  0xe6   : > { %v8561_v18 = vpop.f32.mrf.mxu0  ;;  %v8583_v27 = vpop.f32.mrf.mxu1 }
  0xe7   : > { %13211 = vst [vmem:[#allocation11_spill] sm:$0xff] %v8583_v27 }
  0xe8   : > { %v8565_v20 = vpop.f32.mrf.mxu0  ;;  %v8587_v29 = vpop.f32.mrf.mxu1 }
  0xe9   : > { %987 = vrot.lane.b32.xlu1 %v8561_v18, %s8333_s12  ;;  %13212 = vst [vmem:[#allocation12_spill] sm:$0xff] %v8587_v29 }
  0xea   : > { %v8571_v22 = vpop.f32.mrf.mxu0  ;;  %v8595_v31 = vpop.f32.mrf.mxu1 }
  0xeb   : > { %13213 = vst [vmem:[#allocation13_spill] sm:$0xff] %v8595_v31 }
  0xec   : > { %v8575_v24 = vpop.f32.mrf.mxu0  ;;  %v8599_v33 = vpop.f32.mrf.mxu1 }
  0xed   : > { %993 = vrot.lane.b32.xlu1 %v8565_v20, %s8333_s12  ;;  %13214 = vst [vmem:[#allocation14_spill] sm:$0xff] %v8599_v33 }
  0xee   : > { %v8581_v26 = vpop.f32.mrf.mxu0  ;;  %v8605_v35 = vpop.f32.mrf.mxu1 }
  0xef   : > { %13215 = vst [vmem:[#allocation15_spill] sm:$0xff] %v8605_v35 }
  0xf0   : > { %v8585_v28 = vpop.f32.mrf.mxu0  ;;  %v8613_v38 = vpop.f32.mrf.mxu1 }
  0xf1   : > { %991 = vrot.lane.b32.xlu1 %v8571_v22, %s8333_s12  ;;  %1001 = vrot.lane.b32.xlu0 %v8585_v28, %s8333_s12  ;;  %13216 = vst [vmem:[#allocation16_spill] sm:$0xff] %v8613_v38 }
  0xf2   : > { %v8593_v30 = vpop.f32.mrf.mxu0  ;;  %v8621_v41 = vpop.f32.mrf.mxu1 }
  0xf3   : > { %13217 = vst [vmem:[#allocation17_spill] sm:$0xff] %v8621_v41 }
  0xf4   : > { %v8597_v32 = vpop.f32.mrf.mxu0  ;;  %v8627_v44 = vpop.f32.mrf.mxu1 }
  0xf5   : > { %997 = vrot.lane.b32.xlu1 %v8575_v24, %s8333_s12  ;;  %13218 = vst [vmem:[#allocation18_spill] sm:$0xff] %v8627_v44 }
  0xf6   : > { %v8603_v34 = vpop.f32.mrf.mxu0  ;;  %v8635_v47 = vpop.f32.mrf.mxu1 }
  0xf7   : > { %13219 = vst [vmem:[#allocation19_spill] sm:$0xff] %v8635_v47 }
  0xf8   : > { %v8607_v36 = vpop.f32.mrf.mxu0  ;;  %v8643_v50 = vpop.f32.mrf.mxu1 }
  0xf9   : > { %995 = vrot.lane.b32.xlu1 %v8581_v26, %s8333_s12  ;;  %13220 = vst [vmem:[#allocation20_spill] sm:$0xff] %v8643_v50 }
  0xfa   : > { %v8611_v37 = vpop.f32.mrf.mxu0  ;;  %v8651_v53 = vpop.f32.mrf.mxu1 }
  0xfb   : > { %13221 = vst [vmem:[#allocation21_spill] sm:$0xff] %v8651_v53 }
  0xfc   : > { %v8615_v39 = vpop.f32.mrf.mxu0  ;;  %v8659_v56 = vpop.f32.mrf.mxu1 }
  0xfd   : > { %999 = vrot.lane.b32.xlu1 %v8593_v30, %s8333_s12  ;;  %13222 = vst [vmem:[#allocation22_spill] sm:$0xff] %v8659_v56 }
  0xfe   : > { %v8619_v40 = vpop.f32.mrf.mxu0  ;;  %v8665_v57 = vpop.f32.mrf.mxu1 }
  0xff   : > { %13223 = vst [vmem:[#allocation23_spill] sm:$0xff] %v8665_v57 }
 0x100   : > { %v8623_v42 = vpop.f32.mrf.mxu0  ;;  %v8671_v58 = vpop.f32.mrf.mxu1 }
 0x101   : > { %13224 = vst [vmem:[#allocation24_spill] sm:$0xff] %v8671_v58 }
 0x102   : > { %v8625_v43 = vpop.f32.mrf.mxu0  ;;  %v8677_v59 = vpop.f32.mrf.mxu1 }
 0x103   : > { %13225 = vst [vmem:[#allocation25_spill] sm:$0xff] %v8677_v59 }
 0x104   : > { %v8629_v45 = vpop.f32.mrf.mxu0  ;;  %v8683_v60 = vpop.f32.mrf.mxu1 }
 0x105   : > { %1021 = vrot.lane.b32.xlu0 %v8629_v45, %s8333_s12  ;;  %13226 = vst [vmem:[#allocation26_spill] sm:$0xff] %v8683_v60 }
 0x106   : > { %v8633_v46 = vpop.f32.mrf.mxu0  ;;  %v8689_v61 = vpop.f32.mrf.mxu1 }
 0x107   : > { %13227 = vst [vmem:[#allocation27_spill] sm:$0xff] %v8689_v61 }
 0x108   : > { %v8637_v48 = vpop.f32.mrf.mxu0  ;;  %v8695_v62 = vpop.f32.mrf.mxu1 }
 0x109   : > { %1019 = vrot.lane.b32.xlu0 %v8633_v46, %s8333_s12  ;;  %13228 = vst [vmem:[#allocation28_spill] sm:$0xff] %v8695_v62 }
 0x10a   : > { %v8641_v49 = vpop.f32.mrf.mxu0  ;;  %v8701_v63 = vpop.f32.mrf.mxu1 }
 0x10b   : > { %13229 = vst [vmem:[#allocation29_spill] sm:$0xff] %v8701_v63 }
 0x10c   : > { %v8645_v51 = vpop.f32.mrf.mxu0  ;;  %v8710_v1 = vpop.f32.mrf.mxu1 }
 0x10d   : > { %1025 = vrot.lane.b32.xlu0 %v8637_v48, %s8333_s12  ;;  %13230 = vst [vmem:[#allocation30_spill] sm:$0xff] %v8710_v1 }
 0x10e   : > { %v8649_v52 = vpop.f32.mrf.mxu0  ;;  %v8716_v2 = vpop.f32.mrf.mxu1 }
 0x10f   : > { %13231 = vst [vmem:[#allocation31_spill] sm:$0xff] %v8716_v2 }
 0x110   : > { %v8653_v54 = vpop.f32.mrf.mxu0  ;;  %v8722_v3 = vpop.f32.mrf.mxu1 }
 0x111   : > { %1023 = vrot.lane.b32.xlu0 %v8641_v49, %s8333_s12  ;;  %13232 = vst [vmem:[#allocation32_spill] sm:$0xff] %v8722_v3 }
 0x112   : > { %v8657_v55 = vpop.f32.mrf.mxu0 }
 0x113   : > { %1031 = vrot.lane.b32.xlu1 %v8657_v55, %s8333_s12 }
 0x115   : > { %1029 = vrot.lane.b32.xlu0 %v8645_v51, %s8333_s12 }
 0x117   : > { %985 = vrot.lane.b32.xlu1 %v8547_v12, %s8333_s12 }
 0x119   : > { %1027 = vrot.lane.b32.xlu0 %v8649_v52, %s8333_s12 }
 0x11b   : > { %983 = vrot.lane.b32.xlu1 %v8551_v14, %s8333_s12 }
 0x11d   : > { %1033 = vrot.lane.b32.xlu0 %v8653_v54, %s8333_s12 }
 0x11f   : > { %981 = vrot.lane.b32.xlu1 %v8541_v9, %s8333_s12 }
 0x121   : > { %1017 = vrot.lane.b32.xlu0 %v8623_v42, %s8333_s12 }
 0x123   : > { %979 = vrot.lane.b32.xlu1 %v8543_v10, %s8333_s12 }
 0x125   : > { %1015 = vrot.lane.b32.xlu0 %v8625_v43, %s8333_s12 }
 0x127   : > { %977 = vrot.lane.b32.xlu1 %v8535_v7, %s8333_s12 }
 0x129   : > { %1013 = vrot.lane.b32.xlu0 %v8615_v39, %s8333_s12 }
 0x12b   : > { %975 = vrot.lane.b32.xlu1 %v8539_v8, %s8333_s12 }
 0x12d   : > { %1011 = vrot.lane.b32.xlu0 %v8619_v40, %s8333_s12 }
 0x12f   : > { %973 = vrot.lane.b32.xlu1 %v8528_v4, %s8333_s12 }
 0x131   : > { %1009 = vrot.lane.b32.xlu0 %v8607_v36, %s8333_s12 }
 0x133   : > { %971 = vrot.lane.b32.xlu1 %v8530_v5, %s8333_s12  ;;  %v8728_v5 = vpop.f32.mrf.mxu1 }
 0x134   : > { %13233 = vst [vmem:[#allocation33_spill] sm:$0xff] %v8728_v5 }
 0x135   : > { %1007 = vrot.lane.b32.xlu0 %v8611_v37, %s8333_s12 }
 0x137   : > { %3246 = vrot.lane.b32.xlu1 %v8621_v41, %s8333_s12 }
 0x139   : > { %1005 = vrot.lane.b32.xlu0 %v8597_v32, %s8333_s12 }
 0x13b   : > { %3244 = vrot.lane.b32.xlu1 %v8627_v44, %s8333_s12 }
 0x13d   : > { %1003 = vrot.lane.b32.xlu0 %v8603_v34, %s8333_s12 }
 0x13f   : > { %3242 = vrot.lane.b32.xlu1 %v8605_v35, %s8333_s12 }
 0x141   : > { %3278 = vrot.lane.b32.xlu0 %v8728_v5, %s8333_s12 }
 0x143   : > { %3240 = vrot.lane.b32.xlu1 %v8613_v38, %s8333_s12 }
 0x145   : > { %3274 = vrot.lane.b32.xlu0 %v8716_v2, %s8333_s12  ;;  %v8776_v2 = vpop.f32.mrf.mxu1 }
 0x146   : > { %13236 = vst [vmem:[#allocation36_spill] sm:$0xff] %v8776_v2 }
 0x147   : > { %3238 = vrot.lane.b32.xlu1 %v8595_v31, %s8333_s12 }
 0x149   : > { %3272 = vrot.lane.b32.xlu0 %v8722_v3, %s8333_s12 }
 0x14b   : > { %3236 = vrot.lane.b32.xlu1 %v8599_v33, %s8333_s12 }
 0x14d   : > { %3270 = vrot.lane.b32.xlu0 %v8701_v63, %s8333_s12 }
 0x14f   : > { %3234 = vrot.lane.b32.xlu1 %v8583_v27, %s8333_s12 }
 0x151   : > { %3268 = vrot.lane.b32.xlu0 %v8710_v1, %s8333_s12 }
 0x153   : > { %3232 = vrot.lane.b32.xlu1 %v8587_v29, %s8333_s12 }
 0x155   : > { %3266 = vrot.lane.b32.xlu0 %v8689_v61, %s8333_s12 }
 0x157   : > { %3230 = vrot.lane.b32.xlu1 %v8573_v23, %s8333_s12  ;;  %v8760_v0 = vpop.permute.xlu1 %989 }
 0x158   : > { %13234 = vst [vmem:[#allocation34_spill] sm:$0xff] %v8760_v0 }
 0x159   : > { %3264 = vrot.lane.b32.xlu0 %v8695_v62, %s8333_s12 }
 0x15b   : > { %3228 = vrot.lane.b32.xlu1 %v8577_v25, %s8333_s12  ;;  %v8768_v5 = vpop.permute.xlu1 %987 }
 0x15c   : > { %13235 = vst [vmem:[#allocation35_spill] sm:$0xff] %v8768_v5 }
 0x15d   : > { %3262 = vrot.lane.b32.xlu0 %v8677_v59, %s8333_s12 }
 0x15f   : > { %3226 = vrot.lane.b32.xlu1 %v8563_v19, %s8333_s12  ;;  %v8778_v3 = vpop.permute.xlu1 %993 }
 0x160   : > { %13237 = vst [vmem:[#allocation37_spill] sm:$0xff] %v8778_v3 }
 0x161   : > { %3260 = vrot.lane.b32.xlu0 %v8683_v60, %s8333_s12 }
 0x163   : > { %3224 = vrot.lane.b32.xlu1 %v8567_v21, %s8333_s12  ;;  %v8786_v63 = vpop.permute.xlu1 %991  ;;  %v8788_v1 = vpop.permute.xlu0 %1001 }
 0x164   : > { %13238 = vst [vmem:[#allocation38_spill] sm:$0xff] %v8786_v63  ;;  %13239 = vst [vmem:[#allocation39_spill] sm:$0xff] %v8788_v1 }
 0x165   : > { %3258 = vrot.lane.b32.xlu0 %v8665_v57, %s8333_s12 }
 0x167   : > { %3222 = vrot.lane.b32.xlu1 %v8553_v15, %s8333_s12  ;;  %v8790_v61 = vpop.permute.xlu1 %997 }
 0x168   : > { %13240 = vst [vmem:[#allocation40_spill] sm:$0xff] %v8790_v61 }
 0x169   : > { %3256 = vrot.lane.b32.xlu0 %v8671_v58, %s8333_s12 }
 0x16b   : > { %3276 = vrot.lane.b32.xlu1 %v8776_v2, %s8333_s12  ;;  %v8794_v59 = vpop.permute.xlu1 %995 }
 0x16c   : > { %13241 = vst [vmem:[#allocation41_spill] sm:$0xff] %v8794_v59 }
 0x16d   : > { %3254 = vrot.lane.b32.xlu0 %v8651_v53, %s8333_s12 }
 0x16f   : > { %v8800_v58 = vpop.permute.xlu1 %999 }
 0x170   : > { %13242 = vst [vmem:[#allocation42_spill] sm:$0xff] %v8800_v58 }
 0x177   : > { %v8792_v62 = vpop.permute.xlu0 %1021 }
 0x17b   : > { %v8796_v60 = vpop.permute.xlu0 %1019 }
 0x17f   : > { %v8798_v57 = vpop.permute.xlu0 %1025 }
 0x183   : > { %v8802_v2 = vpop.permute.xlu0 %1023 }
 0x185   : > { %v8804_v41 = vpop.permute.xlu1 %1031 }
 0x187   : > { %v8806_v53 = vpop.permute.xlu0 %1029 }
 0x189   : > { %v8808_v44 = vpop.permute.xlu1 %985 }
 0x18a   : > { %13243 = vst [vmem:[#allocation43_spill] sm:$0xff] %v8808_v44 }
 0x18b   : > { %v8810_v35 = vpop.permute.xlu0 %1027 }
 0x18d   : > { %v8812_v38 = vpop.permute.xlu1 %983 }
 0x18e   : > { %13244 = vst [vmem:[#allocation44_spill] sm:$0xff] %v8812_v38 }
 0x18f   : > { %v8814_v31 = vpop.permute.xlu0 %1033 }
 0x190   : > { %6623 = vmatprep.subr.mxu1 %v8814_v31  ;;  %7339 = vmatprep.subr.msk.mxu0 %vm328_vm0, %v8814_v31 }
 0x191   : > { %6624 = vmatpush3.msra.mxu1 %v8788_v1  ;;  %7340 = vmatpush3.xpose.msk.msra.mxu0 %vm328_vm0, %v8814_v31  ;;  %v8825_v33 = vpop.permute.xlu1 %981 }
 0x192   : > { %6625 = vmatprep.subr.mxu1 %v8804_v41  ;;  %7341 = vmatprep.subr.msk.mxu0 %vm328_vm0, %v8804_v41  ;;  %13245 = vst [vmem:[#allocation45_spill] sm:$0xff] %v8825_v33 }
 0x193   : > { %v8827_v27 = vpop.permute.xlu0 %1017  ;;  %6626 = vmatpush3.msra.mxu1 %v8800_v58 }
 0x194   : > { %6627 = vmatprep.subr.mxu1 %v8806_v53 }
 0x195   : > { %6628 = vmatpush3.msra.mxu1 %v8790_v61  ;;  %7342 = vmatpush3.xpose.msk.msra.mxu0 %vm328_vm0, %v8804_v41  ;;  %v8841_v23 = vpop.permute.xlu1 %979 }
 0x196   : > { %6629 = vmatprep.subr.mxu1 %v8810_v35  ;;  %7343 = vmatprep.subr.msk.mxu0 %vm328_vm0, %v8806_v53  ;;  %13246 = vst [vmem:[#allocation46_spill] sm:$0xff] %v8841_v23 }
 0x197   : > { %v8837_v29 = vpop.permute.xlu0 %1015  ;;  %6630 = vmatpush3.msra.mxu1 %v8794_v59 }
 0x198   : > { %6631 = vmatprep.subr.mxu1 %v8798_v57 }
 0x199   : > { %6632 = vmatpush3.msra.mxu1 %v8778_v3  ;;  %7344 = vmatpush3.xpose.msk.msra.mxu0 %vm328_vm0, %v8806_v53  ;;  %v8857_v19 = vpop.permute.xlu1 %977 }
 0x19a   : > { %6633 = vmatprep.subr.mxu1 %v8802_v2  ;;  %7345 = vmatprep.subr.msk.mxu0 %vm328_vm0, %v8810_v35  ;;  %13247 = vst [vmem:[#allocation47_spill] sm:$0xff] %v8857_v19 }
 0x19b   : > { %v1014_v25 = vpop.permute.xlu0 %1013  ;;  %6634 = vmatpush3.msra.mxu1 %v8786_v63 }
 0x19c   : > { %6635 = vmatprep.subr.mxu1 %v8792_v62 }
 0x19d   : > { %6636 = vmatpush3.msra.mxu1 %v8760_v0  ;;  %7346 = vmatpush3.xpose.msk.msra.mxu0 %vm328_vm0, %v8810_v35  ;;  %v8870_v13 = vpop.permute.xlu1 %975 }
 0x19e   : > { %6637 = vmatprep.subr.mxu1 %v8796_v60  ;;  %7347 = vmatprep.subr.msk.mxu0 %vm328_vm0, %v8798_v57  ;;  %13248 = vst [vmem:[#allocation48_spill] sm:$0xff] %v8870_v13 }
 0x19f   : > { %v1012_v21 = vpop.permute.xlu0 %1011  ;;  %6638 = vmatpush3.msra.mxu1 %v8768_v5 }
 0x1a0   : > { %6639 = vmatprep.subr.mxu1 %v8827_v27 }
 0x1a1   : > { %6640 = vmatpush3.msra.mxu1 %v8808_v44  ;;  %7348 = vmatpush3.xpose.msk.msra.mxu0 %vm328_vm0, %v8798_v57  ;;  %v8887_v50 = vpop.permute.xlu1 %973 }
 0x1a2   : > { %6641 = vmatprep.subr.mxu1 %v8837_v29  ;;  %7349 = vmatprep.subr.msk.mxu0 %vm328_vm0, %v8802_v2  ;;  %13249 = vst [vmem:[#allocation49_spill] sm:$0xff] %v8887_v50 }
 0x1a3   : > { %v8867_v15 = vpop.permute.xlu0 %1009  ;;  %6642 = vmatpush3.msra.mxu1 %v8812_v38 }
 0x1a4   : > { %6643 = vmatprep.subr.mxu1 %v1014_v25 }
 0x1a5   : > { %6644 = vmatpush3.msra.mxu1 %v8825_v33  ;;  %7350 = vmatpush3.xpose.msk.msra.mxu0 %vm328_vm0, %v8802_v2 }
 0x1a6   : > { %6645 = vmatprep.subr.mxu1 %v1012_v21  ;;  %7351 = vmatprep.subr.msk.mxu0 %vm328_vm0, %v8792_v62 }
 0x1a7   : > { %v8877_v11 = vpop.permute.xlu0 %1007  ;;  %6646 = vmatpush3.msra.mxu1 %v8841_v23 }
 0x1a8   : > { %6647 = vmatprep.subr.mxu1 %v8867_v15 }
 0x1a9   : > { %6648 = vmatpush3.msra.mxu1 %v8857_v19  ;;  %7352 = vmatpush3.xpose.msk.msra.mxu0 %vm328_vm0, %v8792_v62 }
 0x1aa   : > { %6649 = vmatprep.subr.mxu1 %v8877_v11  ;;  %7353 = vmatprep.subr.msk.mxu0 %vm328_vm0, %v8796_v60 }
 0x1ab   : > { %v1006_v47 = vpop.permute.xlu0 %1005  ;;  %6650 = vmatpush3.msra.mxu1 %v8870_v13  ;;  %v8902_v13 = vpop.permute.xlu1 %971 }
 0x1ac   : > { %2560 = vrot.lane.b32.xlu1 %v1006_v47, %s8333_s12  ;;  %6651 = vmatprep.subr.mxu1 %v1006_v47  ;;  %13250 = vst [vmem:[#allocation50_spill] sm:$0xff] %v8902_v13 }
 0x1ad   : > { %6652 = vmatpush3.msra.mxu1 %v8887_v50  ;;  %7354 = vmatpush3.xpose.msk.msra.mxu0 %vm328_vm0, %v8796_v60  ;;  %v909_v50 = vld [vmem:[%s12818_s2 + $0x18] sm:$0xff] }
 0x1ae   : > { %7355 = vmatprep.subr.msk.mxu0 %vm328_vm0, %v8827_v27 }
 0x1af   : > { %v1004_v56 = vpop.permute.xlu0 %1003 }
 0x1b0   : > { %2558 = vrot.lane.b32.xlu0 %v1004_v56, %s8333_s12  ;;  %2564 = vrot.lane.b32.xlu1 %v8867_v15, %s8333_s12 }
 0x1b1   : > { %6653 = vmatprep.subr.mxu1 %v1004_v56  ;;  %7356 = vmatpush3.xpose.msk.msra.mxu0 %vm328_vm0, %v8827_v27 }
 0x1b2   : > { %6654 = vmatpush3.msra.mxu1 %v8902_v13  ;;  %7357 = vmatprep.subr.msk.mxu0 %vm328_vm0, %v8837_v29  ;;  %v908_v13 = vld [vmem:[%s12818_s2 + $0x10] sm:$0xff] }
 0x1b3   : > { %1132 = vmatmul.mubr.f32.vlgmr.msra.gmra.mxu1 %v906_v17  ;;  %6703 = vmatprep.subr.msk.mxu1 %vm328_vm0, %v8788_v1  ;;  %v911_v17 = vld [vmem:[%s12818_s2 + $0x28] sm:$0xff]  ;;  %v910_v1 = vld [vmem:[%s12818_s2 + $0x20] sm:$0xff] }
 0x1b4   : > { %2562 = vrot.lane.b32.xlu0 %v8877_v11, %s8333_s12  ;;  %2568 = vrot.lane.b32.xlu1 %v1014_v25, %s8333_s12 }
 0x1b5   : > { %1136 = vmatprep.mubr.f32.mxu1 %v909_v50  ;;  %7358 = vmatpush3.xpose.msk.msra.mxu0 %vm328_vm0, %v8837_v29  ;;  %v913_v50 = vld [vmem:[%s12818_s2 + $0x38] sm:$0xff] }
 0x1b6   : > { %7359 = vmatprep.subr.msk.mxu0 %vm328_vm0, %v1014_v25 }
 0x1b7   : > { %1137 = vmatmul.mubr.f32.gmra.mxu1 %v908_v13  ;;  %v912_v13 = vld [vmem:[%s12818_s2 + $0x30] sm:$0xff] }
 0x1b8   : > { %2566 = vrot.lane.b32.xlu0 %v1012_v21, %s8333_s12  ;;  %2572 = vrot.lane.b32.xlu1 %v8827_v27, %s8333_s12  ;;  %v914_v27 = vld [vmem:[%s12818_s2 + $0x40] sm:$0xff] }
 0x1b9   : > { %1141 = vmatprep.mubr.f32.mxu1 %v911_v17  ;;  %7360 = vmatpush3.xpose.msk.msra.mxu0 %vm328_vm0, %v1014_v25  ;;  %v915_v25 = vld [vmem:[%s12818_s2 + $0x48] sm:$0xff]  ;;  %v928_v17 = vld [vmem:[%s12818_s2 + $0xb0] sm:$0xff] }
 0x1ba   : > { %7361 = vmatprep.subr.msk.mxu0 %vm328_vm0, %v1012_v21 }
 0x1bb   : > { %1142 = vmatmul.mubr.f32.gmra.mxu1 %v910_v1  ;;  %v926_v1 = vld [vmem:[%s12818_s2 + $0xa0] sm:$0xff] }
 0x1bc   : > { %2570 = vrot.lane.b32.xlu0 %v8837_v29, %s8333_s12  ;;  %2576 = vrot.lane.b32.xlu1 %v8792_v62, %s8333_s12  ;;  %v916_v29 = vld [vmem:[%s12818_s2 + $0x50] sm:$0xff]  ;;  %v9031_v62 = vmul.f32 0.17677669, %v8541_v9  ;;  %v929_v9 = vld [vmem:[%s12818_s2 + $0xb8] sm:$0xff] }
 0x1bd   : > { %1146 = vmatprep.mubr.f32.mxu1 %v913_v50  ;;  %7362 = vmatpush3.xpose.msk.msra.mxu0 %vm328_vm0, %v1012_v21  ;;  %v917_v21 = vld [vmem:[%s12818_s2 + $0x58] sm:$0xff]  ;;  %v9063_v50 = vmul.f32 0.17677669, %v8555_v16 }
 0x1be   : > { %7363 = vmatprep.subr.msk.mxu0 %vm328_vm0, %v8867_v15  ;;  %v933_v16 = vld [vmem:[%s12818_s2 + $0xd8] sm:$0xff] }
 0x1bf   : > { %1147 = vmatmul.mubr.f32.gmra.mxu1 %v912_v13  ;;  %v930_v13 = vld [vmem:[%s12818_s2 + $0xc0] sm:$0xff] }
 0x1c0   : > { %2574 = vrot.lane.b32.xlu0 %v8796_v60, %s8333_s12  ;;  %2580 = vrot.lane.b32.xlu1 %v8798_v57, %s8333_s12  ;;  %v8994_v57 = vmul.f32 0.17677669, %v8528_v4  ;;  %v9000_v60 = vmul.f32 0.17677669, %v8539_v8  ;;  %v925_v4 = vld [vmem:[%s12818_s2 + $0x98] sm:$0xff] }
 0x1c1   : > { %1151 = vmatprep.mubr.f32.mxu1 %v915_v25  ;;  %7364 = vmatpush3.xpose.msk.msra.mxu0 %vm328_vm0, %v8867_v15  ;;  %v919_v15 = vld [vmem:[%s12818_s2 + $0x68] sm:$0xff]  ;;  %v9015_v8 = vmul.f32 0.17677669, %v8535_v7  ;;  %v9079_v25 = vmul.f32 0.17677669, %v8565_v20 }
 0x1c2   : > { %7365 = vmatprep.subr.msk.mxu0 %vm328_vm0, %v8877_v11  ;;  %v927_v7 = vld [vmem:[%s12818_s2 + $0xa8] sm:$0xff] }
 0x1c3   : > { %1152 = vmatmul.mubr.f32.gmra.mxu1 %v914_v27  ;;  %v932_v27 = vld [vmem:[%s12818_s2 + $0xd0] sm:$0xff]  ;;  %v935_v20 = vld [vmem:[%s12818_s2 + $0xe8] sm:$0xff] }
 0x1c4   : > { %2578 = vrot.lane.b32.xlu0 %v8802_v2, %s8333_s12  ;;  %2584 = vrot.lane.b32.xlu1 %v8806_v53, %s8333_s12  ;;  %v918_v53 = vld [vmem:[%s12818_s2 + $0x60] sm:$0xff]  ;;  %v9047_v2 = vmul.f32 0.17677669, %v8547_v12  ;;  %v931_v12 = vld [vmem:[%s12818_s2 + $0xc8] sm:$0xff] }
 0x1c5   : > { %1156 = vmatprep.mubr.f32.mxu1 %v917_v21  ;;  %7366 = vmatpush3.xpose.msk.msra.mxu0 %vm328_vm0, %v8877_v11  ;;  %v921_v11 = vld [vmem:[%s12818_s2 + $0x78] sm:$0xff]  ;;  %v9095_v21 = vmul.f32 0.17677669, %v8575_v24 }
 0x1c6   : > { %7367 = vmatprep.subr.msk.mxu0 %vm328_vm0, %v1006_v47  ;;  %v937_v24 = vld [vmem:[%s12818_s2 + $0xf8] sm:$0xff] }
 0x1c7   : > { %1157 = vmatmul.mubr.f32.gmra.mxu1 %v916_v29  ;;  %13252 = vst [vmem:[#allocation52_spill] sm:$0xff] %v9095_v21  ;;  %v934_v29 = vld [vmem:[%s12818_s2 + $0xe0] sm:$0xff] }
 0x1c8   : > { %2582 = vrot.lane.b32.xlu0 %v8810_v35, %s8333_s12  ;;  %1161 = vmatprep.mubr.f32.mxu1 %v919_v15  ;;  %v920_v35 = vld [vmem:[%s12818_s2 + $0x70] sm:$0xff]  ;;  %v9111_v15 = vmul.f32 0.17677669, %v8585_v28  ;;  %v9127_v28 = vmul.f32 0.17677669, %v8611_v37 }
 0x1c9   : > { %7368 = vmatpush3.xpose.msk.msra.mxu0 %vm328_vm0, %v1006_v47  ;;  %v923_v47 = vld [vmem:[%s12818_s2 + $0x88] sm:$0xff]  ;;  %v9149_v37 = vmul.f32 0.17677669, %v8625_v43  ;;  %v9169_v43 = vmul.f32 0.17677669, %v8641_v49 }
 0x1ca   : > { %7369 = vmatprep.subr.msk.mxu0 %vm328_vm0, %v1004_v56  ;;  %13254 = vst [vmem:[#allocation54_spill] sm:$0xff] %v9111_v15  ;;  %13257 = vst [vmem:[#allocation57_spill] sm:$0xff] %v9127_v28  ;;  %v9189_v49 = vmul.f32 0.17677669, %v8657_v55 }
 0x1cb   : > { %1162 = vmatmul.mubr.f32.gmra.mxu1 %v918_v53  ;;  %v936_v53 = vld [vmem:[%s12818_s2 + $0xf0] sm:$0xff]  ;;  %13261 = vst [vmem:[#allocation61_spill] sm:$0xff] %v9149_v37  ;;  %13265 = vst [vmem:[#allocation65_spill] sm:$0xff] %v9169_v43 }
 0x1cc   : > { %2588 = vrot.lane.b32.xlu0 %v8814_v31, %s8333_s12  ;;  %1166 = vmatprep.mubr.f32.mxu1 %v921_v11  ;;  %v922_v31 = vld [vmem:[%s12818_s2 + $0x80] sm:$0xff]  ;;  %v9124_v11 = vmul.f32 0.17677669, %v8597_v32  ;;  %v9146_v32 = vmul.f32 0.17677669, %v8615_v39  ;;  %13269 = vst [vmem:[#allocation69_spill] sm:$0xff] %v9189_v49 }
 0x1cd   : > { %7370 = vmatpush3.xpose.msk.msra.mxu0 %vm328_vm0, %v1004_v56  ;;  %v9018_v56 = vmul.f32 0.17677669, %v8543_v10  ;;  %v9034_v10 = vmul.f32 0.17677669, %v8551_v14  ;;  %v9050_v14 = vmul.f32 0.17677669, %v8561_v18 }
 0x1ce   : > { %v9066_v18 = vmul.f32 0.17677669, %v8571_v22  ;;  %v9082_v22 = vmul.f32 0.17677669, %v8581_v26  ;;  %v9098_v26 = vmul.f32 0.17677669, %v8593_v30 }
 0x1cf   : > { %1167 = vmatmul.mubr.f32.gmra.mxu1 %v920_v35  ;;  %v9114_v30 = vmul.f32 0.17677669, %v8603_v34  ;;  %13256 = vst [vmem:[#allocation56_spill] sm:$0xff] %v9124_v11  ;;  %v9136_v34 = vmul.f32 0.17677669, %v8607_v36  ;;  %13260 = vst [vmem:[#allocation60_spill] sm:$0xff] %v9146_v32 }
 0x1d0   : > { %7372 = vmatmul.mubr.msk.f32.vlgmr.msra.gmra.mxu0 %vm328_vm0, %v8994_v57  ;;  %2586 = vrot.lane.b32.xlu0 %v8804_v41, %s8333_s12  ;;  %v924_v41 = vld [vmem:[%s12818_s2 + $0x90] sm:$0xff]  ;;  %13251 = vst [vmem:[#allocation51_spill] sm:$0xff] %v9082_v22  ;;  %13253 = vst [vmem:[#allocation53_spill] sm:$0xff] %v9098_v26  ;;  %v9139_v35 = vmul.f32 0.17677669, %v8619_v40 }
 0x1d1   : > { %1171 = vmatprep.mubr.f32.mxu1 %v923_v47  ;;  %7374 = vmatprep.mubr.msk.f32.mxu0 %vm328_vm0, %v9000_v60  ;;  %13255 = vst [vmem:[#allocation55_spill] sm:$0xff] %v9114_v30  ;;  %13258 = vst [vmem:[#allocation58_spill] sm:$0xff] %v9136_v34  ;;  %v9156_v36 = vmul.f32 0.17677669, %v8623_v42  ;;  %v9159_v40 = vmul.f32 0.17677669, %v8633_v46 }
 0x1d2   : > { %13259 = vst [vmem:[#allocation59_spill] sm:$0xff] %v9139_v35  ;;  %v9166_v39 = vmul.f32 0.17677669, %v8629_v45  ;;  %v9176_v42 = vmul.f32 0.17677669, %v8637_v48 }
 0x1d3   : > { %1172 = vmatmul.mubr.f32.gmra.mxu1 %v922_v31  ;;  %13262 = vst [vmem:[#allocation62_spill] sm:$0xff] %v9156_v36  ;;  %13263 = vst [vmem:[#allocation63_spill] sm:$0xff] %v9159_v40  ;;  %v9179_v46 = vmul.f32 0.17677669, %v8649_v52  ;;  %v9186_v45 = vmul.f32 0.17677669, %v8645_v51 }
 0x1d4   : > { %7375 = vmatmul.mubr.msk.f32.gmra.mxu0 %vm328_vm0, %v9015_v8  ;;  %1176 = vmatprep.mubr.f32.mxu1 %v925_v4  ;;  %13264 = vst [vmem:[#allocation64_spill] sm:$0xff] %v9166_v39  ;;  %13266 = vst [vmem:[#allocation66_spill] sm:$0xff] %v9176_v42  ;;  %v9196_v48 = vmul.f32 0.17677669, %v8653_v54  ;;  %v9210_v4 = vpop.permute.xlu0 %3278 }
 0x1d5   : > { %7377 = vmatprep.mubr.msk.f32.mxu0 %vm328_vm0, %v9018_v56  ;;  %13267 = vst [vmem:[#allocation67_spill] sm:$0xff] %v9179_v46  ;;  %13268 = vst [vmem:[#allocation68_spill] sm:$0xff] %v9186_v45 }
 0x1d6   : > { %13270 = vst [vmem:[#allocation70_spill] sm:$0xff] %v9196_v48  ;;  %13271 = vst [vmem:[#allocation71_spill] sm:$0xff] %v9210_v4 }
 0x1d7   : > { %1177 = vmatmul.mubr.f32.gmra.mxu1 %v924_v41 }
 0x1d8   : > { %7378 = vmatmul.mubr.msk.f32.gmra.mxu0 %vm328_vm0, %v9031_v62  ;;  %1181 = vmatprep.mubr.f32.mxu1 %v927_v7  ;;  %v9214_v7 = vpop.permute.xlu1 %3246 }
 0x1d9   : > { %7380 = vmatprep.mubr.msk.f32.mxu0 %vm328_vm0, %v9034_v10  ;;  %13272 = vst [vmem:[#allocation72_spill] sm:$0xff] %v9214_v7 }
 0x1db   : > { %1182 = vmatmul.mubr.f32.gmra.mxu1 %v926_v1 }
 0x1dc   : > { %7381 = vmatmul.mubr.msk.f32.gmra.mxu0 %vm328_vm0, %v9047_v2  ;;  %1186 = vmatprep.mubr.f32.mxu1 %v929_v9  ;;  %v9220_v9 = vpop.permute.xlu0 %3274 }
 0x1dd   : > { %7383 = vmatprep.mubr.msk.f32.mxu0 %vm328_vm0, %v9050_v14  ;;  %13273 = vst [vmem:[#allocation73_spill] sm:$0xff] %v9220_v9 }
 0x1df   : > { %1187 = vmatmul.mubr.f32.gmra.mxu1 %v928_v17 }
 0x1e0   : > { %7384 = vmatmul.mubr.msk.f32.gmra.mxu0 %vm328_vm0, %v9063_v50  ;;  %1191 = vmatprep.mubr.f32.mxu1 %v931_v12  ;;  %v9224_v12 = vpop.permute.xlu1 %3244 }
 0x1e1   : > { %7386 = vmatprep.mubr.msk.f32.mxu0 %vm328_vm0, %v9066_v18  ;;  %13274 = vst [vmem:[#allocation74_spill] sm:$0xff] %v9224_v12 }
 0x1e3   : > { %1192 = vmatmul.mubr.f32.gmra.mxu1 %v930_v13 }
 0x1e4   : > { %7387 = vmatmul.mubr.msk.f32.gmra.mxu0 %vm328_vm0, %v9079_v25  ;;  %1196 = vmatprep.mubr.f32.mxu1 %v933_v16 }
 0x1e5   : > { %7389 = vmatprep.mubr.msk.f32.mxu0 %vm328_vm0, %v9082_v22 }
 0x1e7   : > { %1197 = vmatmul.mubr.f32.gmra.mxu1 %v932_v27  ;;  %v9230_v27 = vpop.permute.xlu0 %3272 }
 0x1e8   : > { %7390 = vmatmul.mubr.msk.f32.gmra.mxu0 %vm328_vm0, %v9095_v21  ;;  %1201 = vmatprep.mubr.f32.mxu1 %v935_v20  ;;  %13275 = vst [vmem:[#allocation75_spill] sm:$0xff] %v9230_v27 }
 0x1e9   : > { %7392 = vmatprep.mubr.msk.f32.mxu0 %vm328_vm0, %v9098_v26 }
 0x1eb   : > { %1202 = vmatmul.mubr.f32.gmra.mxu1 %v934_v29  ;;  %v9234_v29 = vpop.permute.xlu1 %3242  ;;  %v9240_v7 = vpop.permute.xlu0 %3270 }
 0x1ec   : > { %7393 = vmatmul.mubr.msk.f32.gmra.mxu0 %vm328_vm0, %v9111_v15  ;;  %1206 = vmatprep.mubr.f32.mxu1 %v937_v24  ;;  %13276 = vst [vmem:[#allocation76_spill] sm:$0xff] %v9234_v29  ;;  %13277 = vst [vmem:[#allocation77_spill] sm:$0xff] %v9240_v7 }
 0x1ed   : > { %7395 = vmatprep.mubr.msk.f32.mxu0 %vm328_vm0, %v9114_v30 }
 0x1ef   : > { %1207 = vmatmul.mubr.f32.gmra.mxu1 %v936_v53 }
 0x1f0   : > { %6735 = vmatprep.mubr.msk.f32.mxu1 %vm328_vm0, %v8533_v6  ;;  %7396 = vmatmul.mubr.msk.f32.gmra.mxu0 %vm328_vm0, %v9124_v11 }
 0x1f1   : > { %7398 = vmatprep.mubr.msk.f32.mxu0 %vm328_vm0, %v9127_v28 }
 0x1f4   : > { %7399 = vmatmul.mubr.msk.f32.gmra.mxu0 %vm328_vm0, %v9136_v34 }
 0x1f5   : > { %7401 = vmatprep.mubr.msk.f32.mxu0 %vm328_vm0, %v9139_v35 }
 0x1f8   : > { %7402 = vmatmul.mubr.msk.f32.gmra.mxu0 %vm328_vm0, %v9146_v32 }
 0x1f9   : > { %7404 = vmatprep.mubr.msk.f32.mxu0 %vm328_vm0, %v9149_v37 }
 0x1fc   : > { %7405 = vmatmul.mubr.msk.f32.gmra.mxu0 %vm328_vm0, %v9156_v36 }
 0x1fd   : > { %7407 = vmatprep.mubr.msk.f32.mxu0 %vm328_vm0, %v9159_v40 }
 0x200   : > { %7408 = vmatmul.mubr.msk.f32.gmra.mxu0 %vm328_vm0, %v9166_v39 }
 0x201   : > { %7410 = vmatprep.mubr.msk.f32.mxu0 %vm328_vm0, %v9169_v43 }
 0x204   : > { %7411 = vmatmul.mubr.msk.f32.gmra.mxu0 %vm328_vm0, %v9176_v42 }
 0x205   : > { %7413 = vmatprep.mubr.msk.f32.mxu0 %vm328_vm0, %v9179_v46 }
 0x208   : > { %7414 = vmatmul.mubr.msk.f32.gmra.mxu0 %vm328_vm0, %v9186_v45  ;;  %v9248_v45 = vpop.permute.xlu0 %3268 }
 0x209   : > { %7416 = vmatprep.mubr.msk.f32.mxu0 %vm328_vm0, %v9189_v49  ;;  %13279 = vst [vmem:[#allocation79_spill] sm:$0xff] %v9248_v45 }
 0x20c   : > { %7417 = vmatmul.mubr.msk.f32.gmra.mxu0 %vm328_vm0, %v9196_v48  ;;  %v9244_v48 = vpop.permute.xlu1 %3240  ;;  %v9252_v43 = vpop.permute.xlu0 %3266 }
 0x20d   : > { %13278 = vst [vmem:[#allocation78_spill] sm:$0xff] %v9244_v48  ;;  %13281 = vst [vmem:[#allocation81_spill] sm:$0xff] %v9252_v43 }
 0x210   : > { %v9250_v46 = vpop.permute.xlu1 %3238  ;;  %v9256_v37 = vpop.permute.xlu0 %3264 }
 0x211   : > { %13280 = vst [vmem:[#allocation80_spill] sm:$0xff] %v9250_v46  ;;  %13283 = vst [vmem:[#allocation83_spill] sm:$0xff] %v9256_v37 }
 0x214   : > { %v9254_v40 = vpop.permute.xlu1 %3236  ;;  %v9260_v45 = vpop.permute.xlu0 %3262 }
 0x215   : > { %13282 = vst [vmem:[#allocation82_spill] sm:$0xff] %v9254_v40  ;;  %13285 = vst [vmem:[#allocation85_spill] sm:$0xff] %v9260_v45 }
 0x218   : > { %v9258_v32 = vpop.permute.xlu1 %3234  ;;  %v9264_v43 = vpop.permute.xlu0 %3260 }
 0x219   : > { %13284 = vst [vmem:[#allocation84_spill] sm:$0xff] %v9258_v32  ;;  %13287 = vst [vmem:[#allocation87_spill] sm:$0xff] %v9264_v43 }
 0x21c   : > { %v9262_v46 = vpop.permute.xlu1 %3232  ;;  %v9268_v37 = vpop.permute.xlu0 %3258 }
 0x21d   : > { %13286 = vst [vmem:[#allocation86_spill] sm:$0xff] %v9262_v46 }
 0x220   : > { %v9266_v40 = vpop.permute.xlu1 %3230  ;;  %v9280_v43 = vpop.permute.xlu0 %3256 }
 0x221   : > { %13288 = vst [vmem:[#allocation88_spill] sm:$0xff] %v9266_v40 }
 0x224   : > { %v9272_v32 = vpop.permute.xlu1 %3228 }
 0x273   : > { %v9200_v52 = vpop.f32.mrf.mxu1 }
 0x275   : > { %v9202_v47 = vpop.f32.mrf.mxu1 }
 0x277   : > { %v9204_v51 = vpop.f32.mrf.mxu1 }
 0x279   : > { %v9206_v55 = vpop.f32.mrf.mxu1 }
 0x27b   : > { %v9208_v31 = vpop.f32.mrf.mxu1 }
 0x27d   : > { %v9212_v41 = vpop.f32.mrf.mxu1 }
 0x27f   : > { %v9216_v54 = vpop.f32.mrf.mxu1 }
 0x281   : > { %v9218_v1 = vpop.f32.mrf.mxu1 }
 0x283   : > { %v9222_v17 = vpop.f32.mrf.mxu1 }
 0x285   : > { %v9226_v13 = vpop.f32.mrf.mxu1 }
 0x287   : > { %v9228_v16 = vpop.f32.mrf.mxu1 }
 0x289   : > { %v9232_v20 = vpop.f32.mrf.mxu1 }
 0x28b   : > { %v9236_v24 = vpop.f32.mrf.mxu1 }
 0x28d   : > { %v9238_v53 = vpop.f32.mrf.mxu1 }
 0x28f   : > { %v9242_v9 = vpop.f32.mrf.mxu1 }
 0x291   : > { %v9246_v12 = vpop.f32.mrf.mxu1 }
 0x293   : > { %v6679_v49 = vpop.f32.mrf.mxu1 }
 0x295   : > { %v6680_v27 = vpop.f32.mrf.mxu1 }
 0x297   : > { %v6682_v42 = vpop.f32.mrf.mxu1 }
 0x299   : > { %v6683_v29 = vpop.f32.mrf.mxu1 }
 0x29b   : > { %v6685_v39 = vpop.f32.mrf.mxu1 }
 0x29d   : > { %v6686_v7 = vpop.f32.mrf.mxu1 }
 0x29f   : > { %v6688_v36 = vpop.f32.mrf.mxu1 }
 0x2a1   : > { %v6689_v48 = vpop.f32.mrf.mxu1 }
 0x2a3   : > { %v6691_v35 = vpop.f32.mrf.mxu1 }
 0x2a5   : > { %v6692_v34 = vpop.f32.mrf.mxu1 }
 0x2a7   : > { %v6694_v28 = vpop.f32.mrf.mxu1 }
 0x2a9   : > { %v6695_v11 = vpop.f32.mrf.mxu1 }
 0x2ab   : > { %v6697_v30 = vpop.f32.mrf.mxu1 }
 0x2ad   : > { %v6698_v15 = vpop.f32.mrf.mxu1 }
 0x2ae   : > { %v9278_v45 = vadd.f32 %v6698_v15, %v6697_v30  ;;  %v9294_v15 = vpop.permute.xlu0 %3254  ;;  %v9296_v30 = vadd.f32 %v6692_v34, %v6691_v35  ;;  %v9314_v35 = vadd.f32 %v6686_v7, %v6685_v39  ;;  %v9330_v39 = vadd.f32 %v6680_v27, %v6679_v49 }
 0x2af   : > { %v6700_v26 = vpop.f32.mrf.mxu1  ;;  %13290 = vst [vmem:[#allocation90_spill] sm:$0xff] %v9294_v15  ;;  %v9350_v27 = vadd.f32 %v9238_v53, %v9236_v24  ;;  %v9368_v53 = vadd.f32 %v9226_v13, %v9222_v17  ;;  %v9384_v17 = vadd.f32 %v9212_v41, %v9208_v31  ;;  %v9400_v41 = vadd.f32 %v9202_v47, %v9200_v52  ;;  %v13319_v52 = vld [vmem:[#allocation65_spill] sm:$0xff]  ;;  %v13320_v47 = vld [vmem:[#allocation66_spill] sm:$0xff] }
 0x2b0   : > { %13289 = vst [vmem:[#allocation89_spill] sm:$0xff] %v9278_v45  ;;  %13291 = vst [vmem:[#allocation91_spill] sm:$0xff] %v9296_v30 }
 0x2b1   : > { %v6701_v21 = vpop.f32.mrf.mxu1  ;;  %13293 = vst [vmem:[#allocation93_spill] sm:$0xff] %v9314_v35  ;;  %13294 = vst [vmem:[#allocation94_spill] sm:$0xff] %v9330_v39 }
 0x2b2   : > { %v9270_v22 = vadd.f32 %v6701_v21, %v6700_v26  ;;  %v9286_v21 = vpop.permute.xlu1 %3226  ;;  %v9288_v26 = vadd.f32 %v6695_v11, %v6694_v28  ;;  %v9304_v11 = vadd.f32 %v6689_v48, %v6688_v36  ;;  %v9306_v28 = vpop.permute.xlu0 %2558  ;;  %v9322_v48 = vadd.f32 %v6683_v29, %v6682_v42  ;;  %13295 = vst [vmem:[#allocation95_spill] sm:$0xff] %v9350_v27 }
 0x2b3   : > { %v9342_v29 = vadd.f32 %v9246_v12, %v9242_v9  ;;  %v9360_v9 = vadd.f32 %v9232_v20, %v9228_v16  ;;  %13297 = vst [vmem:[#allocation97_spill] sm:$0xff] %v9368_v53  ;;  %v9376_v20 = vadd.f32 %v9218_v1, %v9216_v54  ;;  %13300 = vst [vmem:[#allocation99_spill] sm:$0xff] %v9384_v17 }
 0x2b4   : > { %6704 = vmatpush3.xpose.msk.msra.mxu1 %vm328_vm0, %v9270_v22  ;;  %v9392_v1 = vadd.f32 %v9206_v55, %v9204_v51  ;;  %13304 = vst [vmem:[#allocation101_spill] sm:$0xff] %v9400_v41 }
 0x2b5   : > { %6705 = vmatprep.subr.msk.mxu1 %vm328_vm0, %v8800_v58  ;;  %13296 = vst [vmem:[#allocation96_spill] sm:$0xff] %v9360_v9  ;;  %13298 = vst [vmem:[#allocation98_spill] sm:$0xff] %v9376_v20 }
 0x2b6   : > { %v9298_v58 = vpop.permute.xlu1 %3224  ;;  %v9320_v36 = vpop.permute.xlu0 %2562  ;;  %13302 = vst [vmem:[#allocation100_spill] sm:$0xff] %v9392_v1 }
 0x2b8   : > { %6706 = vmatpush3.xpose.msk.msra.mxu1 %vm328_vm0, %v9278_v45 }
 0x2b9   : > { %6707 = vmatprep.subr.msk.mxu1 %vm328_vm0, %v8790_v61 }
 0x2ba   : > { %v9312_v34 = vpop.permute.xlu1 %3222  ;;  %v9332_v7 = vpop.permute.xlu0 %2566 }
 0x2bb   : > { %13292 = vst [vmem:[#allocation92_spill] sm:$0xff] %v9312_v34 }
 0x2bc   : > { %6708 = vmatpush3.xpose.msk.msra.mxu1 %vm328_vm0, %v9288_v26 }
 0x2bd   : > { %6709 = vmatprep.subr.msk.mxu1 %vm328_vm0, %v8794_v59 }
 0x2be   : > { %v9324_v59 = vpop.permute.xlu1 %3276  ;;  %v2571_v49 = vpop.permute.xlu0 %2570 }
 0x2c0   : > { %6710 = vmatpush3.xpose.msk.msra.mxu1 %vm328_vm0, %v9296_v30 }
 0x2c1   : > { %6711 = vmatprep.subr.msk.mxu1 %vm328_vm0, %v8778_v3 }
 0x2c2   : > { %v9338_v42 = vpop.permute.xlu1 %2560  ;;  %v2575_v12 = vpop.permute.xlu0 %2574 }
 0x2c4   : > { %6712 = vmatpush3.xpose.msk.msra.mxu1 %vm328_vm0, %v9304_v11 }
 0x2c5   : > { %6713 = vmatprep.subr.msk.mxu1 %vm328_vm0, %v8786_v63  ;;  %v13301_v63 = vld [vmem:[#allocation49_spill] sm:$0xff] }
 0x2c6   : > { %v2579_v16 = vpop.permute.xlu0 %2578 }
 0x2c8   : > { %6714 = vmatpush3.xpose.msk.msra.mxu1 %vm328_vm0, %v9314_v35 }
 0x2c9   : > { %6715 = vmatprep.subr.msk.mxu1 %vm328_vm0, %v8760_v0 }
 0x2ca   : > { %v2583_v13 = vpop.permute.xlu0 %2582 }
 0x2cc   : > { %6716 = vmatpush3.xpose.msk.msra.mxu1 %vm328_vm0, %v9322_v48 }
 0x2cd   : > { %6717 = vmatprep.subr.msk.mxu1 %vm328_vm0, %v8768_v5  ;;  %v9352_v5 = vpop.permute.xlu1 %2564 }
 0x2ce   : > { %v2589_v31 = vpop.permute.xlu0 %2588 }
 0x2d0   : > { %6718 = vmatpush3.xpose.msk.msra.mxu1 %vm328_vm0, %v9330_v39 }
 0x2d1   : > { %6719 = vmatprep.subr.msk.mxu1 %vm328_vm0, %v8808_v44  ;;  %v2569_v24 = vpop.permute.xlu1 %2568 }
 0x2d2   : > { %v2587_v51 = vpop.permute.xlu0 %2586 }
 0x2d4   : > { %6720 = vmatpush3.xpose.msk.msra.mxu1 %vm328_vm0, %v9342_v29 }
 0x2d5   : > { %6721 = vmatprep.subr.msk.mxu1 %vm328_vm0, %v8812_v38  ;;  %v2573_v38 = vpop.permute.xlu1 %2572 }
 0x2d8   : > { %6722 = vmatpush3.xpose.msk.msra.mxu1 %vm328_vm0, %v9350_v27 }
 0x2d9   : > { %6723 = vmatprep.subr.msk.mxu1 %vm328_vm0, %v8825_v33  ;;  %v2577_v54 = vpop.permute.xlu1 %2576 }
 0x2dc   : > { %6724 = vmatpush3.xpose.msk.msra.mxu1 %vm328_vm0, %v9360_v9 }
 0x2dd   : > { %6725 = vmatprep.subr.msk.mxu1 %vm328_vm0, %v8841_v23  ;;  %v13299_v23 = vld [vmem:[#allocation48_spill] sm:$0xff] }
 0x2e0   : > { %6726 = vmatpush3.xpose.msk.msra.mxu1 %vm328_vm0, %v9368_v53 }
 0x2e1   : > { %6727 = vmatprep.subr.msk.mxu1 %vm328_vm0, %v8857_v19 }
 0x2e4   : > { %6728 = vmatpush3.xpose.msk.msra.mxu1 %vm328_vm0, %v9376_v20 }
 0x2e5   : > { %6729 = vmatprep.subr.msk.mxu1 %vm328_vm0, %v13299_v23  ;;  %v13303_v23 = vld [vmem:[#allocation50_spill] sm:$0xff] }
 0x2e8   : > { %6730 = vmatpush3.xpose.msk.msra.mxu1 %vm328_vm0, %v9384_v17  ;;  %v2581_v17 = vpop.permute.xlu1 %2580 }
 0x2e9   : > { %6731 = vmatprep.subr.msk.mxu1 %vm328_vm0, %v13301_v63 }
 0x2ec   : > { %6732 = vmatpush3.xpose.msk.msra.mxu1 %vm328_vm0, %v9392_v1  ;;  %v2585_v55 = vpop.permute.xlu1 %2584 }
 0x2ed   : > { %6733 = vmatprep.subr.msk.mxu1 %vm328_vm0, %v13303_v23 }
 0x2f0   : > { %6734 = vmatpush3.xpose.msk.msra.mxu1 %vm328_vm0, %v9400_v41 }
 0x2f1   : > { %7419 = vmatprep.subr.mxu1 %v2589_v31 }
 0x2f3   : > { %6736 = vmatmul.mubr.msk.f32.vlgmr.msra.gmra.mxu1 %vm328_vm0, %v8533_v6  ;;  %v13305_v6 = vld [vmem:[#allocation51_spill] sm:$0xff] }
 0x2f4   : > { %6737 = vmatprep.mubr.msk.f32.mxu1 %vm328_vm0, %v8994_v57  ;;  %7420 = vmatpush3.msra.mxu1 %v2589_v31 }
 0x2f5   : > { %7421 = vmatprep.subr.mxu1 %v2587_v51 }
 0x2f6   : > { %7422 = vmatpush3.msra.mxu1 %v2587_v51 }
 0x2f7   : > { %6738 = vmatmul.mubr.msk.f32.gmra.mxu1 %vm328_vm0, %v8994_v57  ;;  %7423 = vmatprep.subr.mxu1 %v2585_v55  ;;  %v13308_v57 = vld [vmem:[#allocation54_spill] sm:$0xff] }
 0x2f8   : > { %6739 = vmatprep.mubr.msk.f32.mxu1 %vm328_vm0, %v9000_v60  ;;  %7424 = vmatpush3.msra.mxu1 %v2585_v55 }
 0x2f9   : > { %7425 = vmatprep.subr.mxu1 %v2583_v13 }
 0x2fa   : > { %7426 = vmatpush3.msra.mxu1 %v2583_v13  ;;  %v7373_v13 = vpop.f32.mrf.mxu0 }
 0x2fb   : > { %6740 = vmatmul.mubr.msk.f32.gmra.mxu1 %vm328_vm0, %v9000_v60  ;;  %7427 = vmatprep.subr.mxu1 %v2581_v17  ;;  %v13309_v60 = vld [vmem:[#allocation55_spill] sm:$0xff] }
 0x2fc   : > { %6741 = vmatprep.mubr.msk.f32.mxu1 %vm328_vm0, %v9015_v8  ;;  %7428 = vmatpush3.msra.mxu1 %v2581_v17  ;;  %v938_v17 = vld [vmem:[%s12819_s3] sm:$0x7] }
 0x2fd   : > { %7429 = vmatprep.subr.mxu1 %v2579_v16 }
 0x2fe   : > { %7430 = vmatpush3.msra.mxu1 %v2579_v16 }
 0x2ff   : > { %6742 = vmatmul.mubr.msk.f32.gmra.mxu1 %vm328_vm0, %v9015_v8  ;;  %7431 = vmatprep.subr.mxu1 %v2577_v54  ;;  %v13310_v8 = vld [vmem:[#allocation56_spill] sm:$0xff] }
 0x300   : > { %6743 = vmatprep.mubr.msk.f32.mxu1 %vm328_vm0, %v9018_v56  ;;  %7432 = vmatpush3.msra.mxu1 %v2577_v54 }
 0x301   : > { %7433 = vmatprep.subr.mxu1 %v2575_v12 }
 0x302   : > { %7434 = vmatpush3.msra.mxu1 %v2575_v12 }
 0x303   : > { %6744 = vmatmul.mubr.msk.f32.gmra.mxu1 %vm328_vm0, %v9018_v56  ;;  %7435 = vmatprep.subr.mxu1 %v2573_v38  ;;  %v13311_v56 = vld [vmem:[#allocation57_spill] sm:$0xff] }
 0x304   : > { %6745 = vmatprep.mubr.msk.f32.mxu1 %vm328_vm0, %v9031_v62  ;;  %7436 = vmatpush3.msra.mxu1 %v2573_v38  ;;  %v13306_v38 = vld [vmem:[#allocation52_spill] sm:$0xff] }
 0x305   : > { %7437 = vmatprep.subr.mxu1 %v2571_v49 }
 0x306   : > { %7438 = vmatpush3.msra.mxu1 %v2571_v49  ;;  %v1245_v49 = vlaneseq }
 0x307   : > { %6746 = vmatmul.mubr.msk.f32.gmra.mxu1 %vm328_vm0, %v9031_v62  ;;  %7439 = vmatprep.subr.mxu1 %v2569_v24  ;;  %v13312_v62 = vld [vmem:[#allocation58_spill] sm:$0xff] }
 0x308   : > { %6747 = vmatprep.mubr.msk.f32.mxu1 %vm328_vm0, %v9034_v10  ;;  %7440 = vmatpush3.msra.mxu1 %v2569_v24  ;;  %v1246_v12 = vshrl.u32 %v1245_v49, 7 }
 0x309   : > { %7441 = vmatprep.subr.mxu1 %v9332_v7 }
 0x30a   : > { %7442 = vmatpush3.msra.mxu1 %v9332_v7  ;;  %v13323_v7 = vld [vmem:[#allocation69_spill] sm:$0xff]  ;;  %v1247_v24 = vsub.s32 0, %v1246_v12  ;;  %v1251_v16 = vsub.s32 1, %v1246_v12  ;;  %v1255_v54 = vsub.s32 2, %v1246_v12 }
 0x30b   : > { %6748 = vmatmul.mubr.msk.f32.gmra.mxu1 %vm328_vm0, %v9034_v10  ;;  %7443 = vmatprep.subr.mxu1 %v9352_v5  ;;  %v13313_v10 = vld [vmem:[#allocation59_spill] sm:$0xff] }
 0x30c   : > { %6749 = vmatprep.mubr.msk.f32.mxu1 %vm328_vm0, %v9047_v2  ;;  %7444 = vmatpush3.msra.mxu1 %v9352_v5  ;;  %v13307_v5 = vld [vmem:[#allocation53_spill] sm:$0xff]  ;;  %v9544_v31 = vrot.slane %v938_v17, %v1247_v24  ;;  %v9546_v51 = vrot.slane %v938_v17, %v1251_v16 }
 0x30d   : > { %7445 = vmatprep.subr.mxu1 %v9320_v36 }
 0x30e   : > { %7446 = vmatpush3.msra.mxu1 %v9320_v36  ;;  %v13322_v36 = vld [vmem:[#allocation68_spill] sm:$0xff]  ;;  %13325 = vst [vmem:[#allocation51_spill] sm:$0xff] %v9544_v31  ;;  %13326 = vst [vmem:[#allocation52_spill] sm:$0xff] %v9546_v51 }
 0x30f   : > { %6750 = vmatmul.mubr.msk.f32.gmra.mxu1 %vm328_vm0, %v9047_v2  ;;  %7447 = vmatprep.subr.mxu1 %v9338_v42  ;;  %v13314_v2 = vld [vmem:[#allocation60_spill] sm:$0xff] }
 0x310   : > { %6751 = vmatprep.mubr.msk.f32.mxu1 %vm328_vm0, %v9050_v14  ;;  %7448 = vmatpush3.msra.mxu1 %v9338_v42  ;;  %v13324_v42 = vld [vmem:[#allocation70_spill] sm:$0xff] }
 0x311   : > { %7449 = vmatprep.subr.mxu1 %v9306_v28 }
 0x312   : > { %7450 = vmatpush3.msra.mxu1 %v9306_v28  ;;  %v13321_v28 = vld [vmem:[#allocation67_spill] sm:$0xff] }
 0x313   : > { %6752 = vmatmul.mubr.msk.f32.gmra.mxu1 %vm328_vm0, %v9050_v14  ;;  %6895 = vmatprep.subr.mxu1 %v9210_v4  ;;  %v13315_v14 = vld [vmem:[#allocation61_spill] sm:$0xff] }
 0x314   : > { %6753 = vmatprep.mubr.msk.f32.mxu1 %vm328_vm0, %v9063_v50 }
 0x317   : > { %6754 = vmatmul.mubr.msk.f32.gmra.mxu1 %vm328_vm0, %v9063_v50  ;;  %v13316_v50 = vld [vmem:[#allocation62_spill] sm:$0xff] }
 0x318   : > { %6755 = vmatprep.mubr.msk.f32.mxu1 %vm328_vm0, %v9066_v18 }
 0x31b   : > { %6756 = vmatmul.mubr.msk.f32.gmra.mxu1 %vm328_vm0, %v9066_v18  ;;  %v13317_v18 = vld [vmem:[#allocation63_spill] sm:$0xff] }
 0x31c   : > { %6757 = vmatprep.mubr.msk.f32.mxu1 %vm328_vm0, %v9079_v25 }
 0x31f   : > { %6758 = vmatmul.mubr.msk.f32.gmra.mxu1 %vm328_vm0, %v9079_v25  ;;  %v13318_v25 = vld [vmem:[#allocation64_spill] sm:$0xff] }
 0x320   : > { %6759 = vmatprep.mubr.msk.f32.mxu1 %vm328_vm0, %v13305_v6 }
 0x323   : > { %6760 = vmatmul.mubr.msk.f32.gmra.mxu1 %vm328_vm0, %v13305_v6  ;;  %v1791_v6 = vpop.f32.mrf.mxu0 }
 0x324   : > { %6761 = vmatprep.mubr.msk.f32.mxu1 %vm328_vm0, %v13306_v38 }
 0x327   : > { %6762 = vmatmul.mubr.msk.f32.gmra.mxu1 %vm328_vm0, %v13306_v38 }
 0x328   : > { %6763 = vmatprep.mubr.msk.f32.mxu1 %vm328_vm0, %v13307_v5 }
 0x32b   : > { %6764 = vmatmul.mubr.msk.f32.gmra.mxu1 %vm328_vm0, %v13307_v5  ;;  %v9548_v5 = vrot.slane %v938_v17, %v1255_v54 }
 0x32c   : > { %6765 = vmatprep.mubr.msk.f32.mxu1 %vm328_vm0, %v13308_v57 }
 0x32d   : > { %13327 = vst [vmem:[#allocation53_spill] sm:$0xff] %v9548_v5 }
 0x32f   : > { %6766 = vmatmul.mubr.msk.f32.gmra.mxu1 %vm328_vm0, %v13308_v57 }
 0x330   : > { %6767 = vmatprep.mubr.msk.f32.mxu1 %vm328_vm0, %v13309_v60 }
 0x333   : > { %6768 = vmatmul.mubr.msk.f32.gmra.mxu1 %vm328_vm0, %v13309_v60 }
 0x334   : > { %6769 = vmatprep.mubr.msk.f32.mxu1 %vm328_vm0, %v13310_v8 }
 0x337   : > { %6770 = vmatmul.mubr.msk.f32.gmra.mxu1 %vm328_vm0, %v13310_v8 }
 0x338   : > { %6771 = vmatprep.mubr.msk.f32.mxu1 %vm328_vm0, %v13311_v56 }
 0x33b   : > { %6772 = vmatmul.mubr.msk.f32.gmra.mxu1 %vm328_vm0, %v13311_v56  ;;  %v9557_v56 = vadd.f32 %v1791_v6, %v9548_v5 }
 0x33c   : > { %6773 = vmatprep.mubr.msk.f32.mxu1 %vm328_vm0, %v13312_v62 }
 0x33f   : > { %6774 = vmatmul.mubr.msk.f32.gmra.mxu1 %vm328_vm0, %v13312_v62 }
 0x340   : > { %6775 = vmatprep.mubr.msk.f32.mxu1 %vm328_vm0, %v13313_v10 }
 0x343   : > { %6776 = vmatmul.mubr.msk.f32.gmra.mxu1 %vm328_vm0, %v13313_v10  ;;  %v7376_v10 = vpop.f32.mrf.mxu0 }
 0x344   : > { %6777 = vmatprep.mubr.msk.f32.mxu1 %vm328_vm0, %v13314_v2 }
 0x347   : > { %6778 = vmatmul.mubr.msk.f32.gmra.mxu1 %vm328_vm0, %v13314_v2 }
 0x348   : > { %6779 = vmatprep.mubr.msk.f32.mxu1 %vm328_vm0, %v13315_v14 }
 0x34b   : > { %6780 = vmatmul.mubr.msk.f32.gmra.mxu1 %vm328_vm0, %v13315_v14 }
 0x34c   : > { %6781 = vmatprep.mubr.msk.f32.mxu1 %vm328_vm0, %v13316_v50 }
 0x34f   : > { %6782 = vmatmul.mubr.msk.f32.gmra.mxu1 %vm328_vm0, %v13316_v50 }
 0x350   : > { %6783 = vmatprep.mubr.msk.f32.mxu1 %vm328_vm0, %v13317_v18 }
 0x353   : > { %6784 = vmatmul.mubr.msk.f32.gmra.mxu1 %vm328_vm0, %v13317_v18 }
 0x354   : > { %6785 = vmatprep.mubr.msk.f32.mxu1 %vm328_vm0, %v13318_v25 }
 0x357   : > { %6786 = vmatmul.mubr.msk.f32.gmra.mxu1 %vm328_vm0, %v13318_v25 }
 0x358   : > { %6787 = vmatprep.mubr.msk.f32.mxu1 %vm328_vm0, %v13319_v52 }
 0x35b   : > { %6788 = vmatmul.mubr.msk.f32.gmra.mxu1 %vm328_vm0, %v13319_v52  ;;  %v9569_v52 = vadd.f32 %v7373_v13, %v9548_v5 }
 0x35c   : > { %6789 = vmatprep.mubr.msk.f32.mxu1 %vm328_vm0, %v13320_v47 }
 0x35f   : > { %6790 = vmatmul.mubr.msk.f32.gmra.mxu1 %vm328_vm0, %v13320_v47 }
 0x360   : > { %6791 = vmatprep.mubr.msk.f32.mxu1 %vm328_vm0, %v13321_v28 }
 0x363   : > { %6792 = vmatmul.mubr.msk.f32.gmra.mxu1 %vm328_vm0, %v13321_v28  ;;  %v1801_v28 = vpop.f32.mrf.mxu0 }
 0x364   : > { %6793 = vmatprep.mubr.msk.f32.mxu1 %vm328_vm0, %v13322_v36  ;;  %v9581_v24 = vadd.f32 %v1801_v28, %v9548_v5 }
 0x365   : > { %v7379_v17 = vpop.f32.mrf.mxu0 }
 0x367   : > { %6794 = vmatmul.mubr.msk.f32.gmra.mxu1 %vm328_vm0, %v13322_v36 }
 0x368   : > { %6795 = vmatprep.mubr.msk.f32.mxu1 %vm328_vm0, %v13323_v7 }
 0x36b   : > { %6796 = vmatmul.mubr.msk.f32.gmra.mxu1 %vm328_vm0, %v13323_v7 }
 0x36c   : > { %6797 = vmatprep.mubr.msk.f32.mxu1 %vm328_vm0, %v13324_v42 }
 0x36f   : > { %6798 = vmatmul.mubr.msk.f32.gmra.mxu1 %vm328_vm0, %v13324_v42 }
 0x3b3   : > { %v1534_v55 = vpop.f32.mrf.mxu1 }
 0x3b4   : > { %v9551_v57 = vadd.f32 %v1534_v55, %v9544_v31 }
 0x3b5   : > { %v1536_v38 = vpop.f32.mrf.mxu1 }
 0x3b6   : > { %v9554_v60 = vadd.f32 %v1536_v38, %v9546_v51 }
 0x3b7   : > { %v1540_v8 = vpop.f32.mrf.mxu1 }
 0x3b8   : > { %v1950_v62 = vmax.f32 %v9551_v57, %v9554_v60  ;;  %v9562_v14 = vadd.f32 %v1540_v8, %v9544_v31  ;;  %v9593_v8 = vadd.f32 %v7376_v10, %v9548_v5 }
 0x3b9   : > { %v1542_v2 = vpop.f32.mrf.mxu1 }
 0x3ba   : > { %13328 = vst [vmem:[#allocation54_spill] sm:$0xff] %v9562_v14  ;;  %v9565_v50 = vadd.f32 %v1542_v2, %v9546_v51  ;;  %v1951_v18 = vmax.f32 %v1950_v62, %v9557_v56  ;;  %v1811_v2 = vpop.f32.mrf.mxu0 }
 0x3bb   : > { %v1546_v25 = vpop.f32.mrf.mxu1 }
 0x3bc   : > { %13329 = vst [vmem:[#allocation55_spill] sm:$0xff] %v9565_v50  ;;  %1952 = vmax.xlane.f32.xlu1 %v1951_v18  ;;  %v1954_v47 = vmax.f32 %v9562_v14, %v9565_v50  ;;  %v9574_v7 = vadd.f32 %v1546_v25, %v9544_v31 }
 0x3bd   : > { %v1548_v36 = vpop.f32.mrf.mxu1 }
 0x3be   : > { %13330 = vst [vmem:[#allocation56_spill] sm:$0xff] %v9574_v7  ;;  %v9577_v42 = vadd.f32 %v1548_v36, %v9546_v51  ;;  %v1955_v49 = vmax.f32 %v1954_v47, %v9569_v52 }
 0x3bf   : > { %v1552_v12 = vpop.f32.mrf.mxu1 }
 0x3c0   : > { %13331 = vst [vmem:[#allocation57_spill] sm:$0xff] %v9577_v42  ;;  %1956 = vmax.xlane.f32.xlu0 %v1955_v49  ;;  %v1958_v16 = vmax.f32 %v9574_v7, %v9577_v42  ;;  %v9586_v54 = vadd.f32 %v1552_v12, %v9544_v31  ;;  %v9605_v49 = vadd.f32 %v1811_v2, %v9548_v5  ;;  %v7382_v12 = vpop.f32.mrf.mxu0 }
 0x3c1   : > { %v1554_v13 = vpop.f32.mrf.mxu1 }
 0x3c2   : > { %13332 = vst [vmem:[#allocation58_spill] sm:$0xff] %v9586_v54  ;;  %v9589_v55 = vadd.f32 %v1554_v13, %v9546_v51  ;;  %v1959_v6 = vmax.f32 %v1958_v16, %v9581_v24 }
 0x3c3   : > { %v1558_v38 = vpop.f32.mrf.mxu1 }
 0x3c4   : > { %13333 = vst [vmem:[#allocation59_spill] sm:$0xff] %v9589_v55  ;;  %1960 = vmax.xlane.f32.xlu1 %v1959_v6  ;;  %v1962_v62 = vmax.f32 %v9586_v54, %v9589_v55  ;;  %v9598_v25 = vadd.f32 %v1558_v38, %v9544_v31 }
 0x3c5   : > { %v1560_v18 = vpop.f32.mrf.mxu1 }
 0x3c6   : > { %13334 = vst [vmem:[#allocation60_spill] sm:$0xff] %v9598_v25  ;;  %v9601_v47 = vadd.f32 %v1560_v18, %v9546_v51  ;;  %v1963_v28 = vmax.f32 %v1962_v62, %v9593_v8  ;;  %v9617_v62 = vadd.f32 %v7379_v17, %v9548_v5 }
 0x3c7   : > { %v1564_v36 = vpop.f32.mrf.mxu1 }
 0x3c8   : > { %13335 = vst [vmem:[#allocation61_spill] sm:$0xff] %v9601_v47  ;;  %1964 = vmax.xlane.f32.xlu0 %v1963_v28  ;;  %v1966_v10 = vmax.f32 %v9598_v25, %v9601_v47  ;;  %v9610_v13 = vadd.f32 %v1564_v36, %v9544_v31  ;;  %v1821_v28 = vpop.f32.mrf.mxu0 }
 0x3c9   : > { %v1566_v16 = vpop.f32.mrf.mxu1 }
 0x3ca   : > { %13336 = vst [vmem:[#allocation62_spill] sm:$0xff] %v9610_v13  ;;  %v9613_v6 = vadd.f32 %v1566_v16, %v9546_v51  ;;  %v1967_v38 = vmax.f32 %v1966_v10, %v9605_v49  ;;  %v9629_v10 = vadd.f32 %v1821_v28, %v9548_v5 }
 0x3cb   : > { %v1570_v18 = vpop.f32.mrf.mxu1 }
 0x3cc   : > { %13337 = vst [vmem:[#allocation63_spill] sm:$0xff] %v9613_v6  ;;  %1968 = vmax.xlane.f32.xlu1 %v1967_v38  ;;  %v1970_v2 = vmax.f32 %v9610_v13, %v9613_v6  ;;  %v9622_v47 = vadd.f32 %v1570_v18, %v9544_v31  ;;  %v7385_v38 = vpop.f32.mrf.mxu0 }
 0x3cd   : > { %v1572_v25 = vpop.f32.mrf.mxu1 }
 0x3ce   : > { %13338 = vst [vmem:[#allocation64_spill] sm:$0xff] %v9622_v47  ;;  %v9625_v36 = vadd.f32 %v1572_v25, %v9546_v51  ;;  %v1971_v16 = vmax.f32 %v1970_v2, %v9617_v62  ;;  %v9641_v2 = vadd.f32 %v7382_v12, %v9548_v5 }
 0x3cf   : > { %v1576_v54 = vpop.f32.mrf.mxu1 }
 0x3d0   : > { %13339 = vst [vmem:[#allocation65_spill] sm:$0xff] %v9625_v36  ;;  %1972 = vmax.xlane.f32.xlu0 %v1971_v16  ;;  %v1974_v17 = vmax.f32 %v9622_v47, %v9625_v36  ;;  %v9634_v6 = vadd.f32 %v1576_v54, %v9544_v31  ;;  %v1831_v16 = vpop.f32.mrf.mxu0 }
 0x3d1   : > { %v1578_v13 = vpop.f32.mrf.mxu1 }
 0x3d2   : > { %13340 = vst [vmem:[#allocation66_spill] sm:$0xff] %v9634_v6  ;;  %v9637_v18 = vadd.f32 %v1578_v13, %v9546_v51  ;;  %v1975_v25 = vmax.f32 %v1974_v17, %v9629_v10  ;;  %v9653_v17 = vadd.f32 %v1831_v16, %v9548_v5 }
 0x3d3   : > { %v1582_v55 = vpop.f32.mrf.mxu1 }
 0x3d4   : > { %13341 = vst [vmem:[#allocation67_spill] sm:$0xff] %v9637_v18  ;;  %1976 = vmax.xlane.f32.xlu1 %v1975_v25  ;;  %v1978_v28 = vmax.f32 %v9634_v6, %v9637_v18  ;;  %v9646_v36 = vadd.f32 %v1582_v55, %v9544_v31  ;;  %v7388_v25 = vpop.f32.mrf.mxu0 }
 0x3d5   : > { %v1584_v47 = vpop.f32.mrf.mxu1 }
 0x3d6   : > { %13342 = vst [vmem:[#allocation68_spill] sm:$0xff] %v9646_v36  ;;  %v9649_v54 = vadd.f32 %v1584_v47, %v9546_v51  ;;  %v1979_v13 = vmax.f32 %v1978_v28, %v9641_v2  ;;  %v9665_v28 = vadd.f32 %v7385_v38, %v9548_v5 }
 0x3d7   : > { %v1588_v7 = vpop.f32.mrf.mxu1 }
 0x3d8   : > { %13343 = vst [vmem:[#allocation69_spill] sm:$0xff] %v9649_v54  ;;  %1980 = vmax.xlane.f32.xlu0 %v1979_v13  ;;  %v1982_v12 = vmax.f32 %v9646_v36, %v9649_v54  ;;  %v9658_v18 = vadd.f32 %v1588_v7, %v9544_v31  ;;  %v1841_v13 = vpop.f32.mrf.mxu0 }
 0x3d9   : > { %v1590_v6 = vpop.f32.mrf.mxu1 }
 0x3da   : > { %13344 = vst [vmem:[#allocation70_spill] sm:$0xff] %v9658_v18  ;;  %v9661_v55 = vadd.f32 %v1590_v6, %v9546_v51  ;;  %v1983_v47 = vmax.f32 %v1982_v12, %v9653_v17  ;;  %v9677_v12 = vadd.f32 %v1841_v13, %v9548_v5 }
 0x3db   : > { %v1594_v42 = vpop.f32.mrf.mxu1 }
 0x3dc   : > { %13345 = vst [vmem:[#allocation102_spill] sm:$0xff] %v9661_v55  ;;  %1984 = vmax.xlane.f32.xlu1 %v1983_v47  ;;  %v1986_v16 = vmax.f32 %v9658_v18, %v9661_v55  ;;  %v9670_v54 = vadd.f32 %v1594_v42, %v9544_v31  ;;  %v7391_v47 = vpop.f32.mrf.mxu0 }
 0x3dd   : > { %v1596_v36 = vpop.f32.mrf.mxu1 }
 0x3de   : > { %13346 = vst [vmem:[#allocation103_spill] sm:$0xff] %v9670_v54  ;;  %v9673_v7 = vadd.f32 %v1596_v36, %v9546_v51  ;;  %v1987_v6 = vmax.f32 %v1986_v16, %v9665_v28  ;;  %v9689_v16 = vadd.f32 %v7388_v25, %v9548_v5 }
 0x3df   : > { %v1600_v14 = vpop.f32.mrf.mxu1 }
 0x3e0   : > { %13347 = vst [vmem:[#allocation104_spill] sm:$0xff] %v9673_v7  ;;  %1988 = vmax.xlane.f32.xlu0 %v1987_v6  ;;  %v1990_v38 = vmax.f32 %v9670_v54, %v9673_v7  ;;  %v9682_v55 = vadd.f32 %v1600_v14, %v9544_v31  ;;  %v1851_v6 = vpop.f32.mrf.mxu0 }
 0x3e1   : > { %v1602_v18 = vpop.f32.mrf.mxu1 }
 0x3e2   : > { %13348 = vst [vmem:[#allocation105_spill] sm:$0xff] %v9682_v55  ;;  %v9685_v42 = vadd.f32 %v1602_v18, %v9546_v51  ;;  %v1991_v36 = vmax.f32 %v1990_v38, %v9677_v12  ;;  %v9701_v38 = vadd.f32 %v1851_v6, %v9548_v5 }
 0x3e3   : > { %v1606_v50 = vpop.f32.mrf.mxu1 }
 0x3e4   : > { %13349 = vst [vmem:[#allocation106_spill] sm:$0xff] %v9685_v42  ;;  %1992 = vmax.xlane.f32.xlu1 %v1991_v36  ;;  %v1994_v13 = vmax.f32 %v9682_v55, %v9685_v42  ;;  %v9694_v7 = vadd.f32 %v1606_v50, %v9544_v31  ;;  %v7394_v36 = vpop.f32.mrf.mxu0 }
 0x3e5   : > { %v1608_v54 = vpop.f32.mrf.mxu1 }
 0x3e6   : > { %13350 = vst [vmem:[#allocation107_spill] sm:$0xff] %v9694_v7  ;;  %v9697_v14 = vadd.f32 %v1608_v54, %v9546_v51  ;;  %v1995_v18 = vmax.f32 %v1994_v13, %v9689_v16  ;;  %v9713_v13 = vadd.f32 %v7391_v47, %v9548_v5 }
 0x3e7   : > { %v1612_v23 = vpop.f32.mrf.mxu1 }
 0x3e8   : > { %13351 = vst [vmem:[#allocation108_spill] sm:$0xff] %v9697_v14  ;;  %1996 = vmax.xlane.f32.xlu0 %v1995_v18  ;;  %v1998_v25 = vmax.f32 %v9694_v7, %v9697_v14  ;;  %v9706_v42 = vadd.f32 %v1612_v23, %v9544_v31  ;;  %13354 = vst [vmem:[#allocation111_spill] sm:$0xff] %v9713_v13  ;;  %v1861_v18 = vpop.f32.mrf.mxu0 }
 0x3e9   : > { %v1614_v55 = vpop.f32.mrf.mxu1 }
 0x3ea   : > { %13352 = vst [vmem:[#allocation109_spill] sm:$0xff] %v9706_v42  ;;  %v9709_v50 = vadd.f32 %v1614_v55, %v9546_v51  ;;  %v1999_v54 = vmax.f32 %v1998_v25, %v9701_v38  ;;  %v9725_v25 = vadd.f32 %v1861_v18, %v9548_v5 }
 0x3eb   : > { %v1618_v41 = vpop.f32.mrf.mxu1 }
 0x3ec   : > { %13353 = vst [vmem:[#allocation110_spill] sm:$0xff] %v9709_v50  ;;  %2000 = vmax.xlane.f32.xlu1 %v1999_v54  ;;  %v2002_v6 = vmax.f32 %v9706_v42, %v9709_v50  ;;  %v9718_v14 = vadd.f32 %v1618_v41, %v9544_v31  ;;  %13357 = vst [vmem:[#allocation114_spill] sm:$0xff] %v9725_v25  ;;  %v7397_v54 = vpop.f32.mrf.mxu0 }
 0x3ed   : > { %v1620_v7 = vpop.f32.mrf.mxu1 }
 0x3ee   : > { %13355 = vst [vmem:[#allocation112_spill] sm:$0xff] %v9718_v14  ;;  %v9721_v23 = vadd.f32 %v1620_v7, %v9546_v51  ;;  %v2003_v55 = vmax.f32 %v2002_v6, %v9713_v13  ;;  %v9737_v6 = vadd.f32 %v7394_v36, %v9548_v5 }
 0x3ef   : > { %v1624_v4 = vpop.f32.mrf.mxu1 }
 0x3f0   : > { %13356 = vst [vmem:[#allocation113_spill] sm:$0xff] %v9721_v23  ;;  %2004 = vmax.xlane.f32.xlu0 %v2003_v55  ;;  %v2006_v47 = vmax.f32 %v9718_v14, %v9721_v23  ;;  %v9730_v50 = vadd.f32 %v1624_v4, %v9544_v31  ;;  %13360 = vst [vmem:[#allocation117_spill] sm:$0xff] %v9737_v6  ;;  %v1871_v55 = vpop.f32.mrf.mxu0 }
 0x3f1   : > { %v1626_v42 = vpop.f32.mrf.mxu1 }
 0x3f2   : > { %13358 = vst [vmem:[#allocation115_spill] sm:$0xff] %v9730_v50  ;;  %v9733_v41 = vadd.f32 %v1626_v42, %v9546_v51  ;;  %v2007_v7 = vmax.f32 %v2006_v47, %v9725_v25  ;;  %v9749_v47 = vadd.f32 %v1871_v55, %v9548_v5 }
 0x3f3   : > { %v1630_v53 = vpop.f32.mrf.mxu1 }
 0x3f4   : > { %13359 = vst [vmem:[#allocation116_spill] sm:$0xff] %v9733_v41  ;;  %2008 = vmax.xlane.f32.xlu1 %v2007_v7  ;;  %v2010_v18 = vmax.f32 %v9730_v50, %v9733_v41  ;;  %v9742_v23 = vadd.f32 %v1630_v53, %v9544_v31  ;;  %13363 = vst [vmem:[#allocation120_spill] sm:$0xff] %v9749_v47  ;;  %v7400_v7 = vpop.f32.mrf.mxu0 }
 0x3f5   : > { %v1632_v14 = vpop.f32.mrf.mxu1 }
 0x3f6   : > { %13361 = vst [vmem:[#allocation118_spill] sm:$0xff] %v9742_v23  ;;  %v9745_v4 = vadd.f32 %v1632_v14, %v9546_v51  ;;  %v2011_v42 = vmax.f32 %v2010_v18, %v9737_v6  ;;  %v9761_v18 = vadd.f32 %v7397_v54, %v9548_v5 }
 0x3f7   : > { %v1636_v27 = vpop.f32.mrf.mxu1 }
 0x3f8   : > { %13362 = vst [vmem:[#allocation119_spill] sm:$0xff] %v9745_v4  ;;  %2012 = vmax.xlane.f32.xlu0 %v2011_v42  ;;  %v2014_v36 = vmax.f32 %v9742_v23, %v9745_v4  ;;  %v9754_v41 = vadd.f32 %v1636_v27, %v9544_v31  ;;  %13366 = vst [vmem:[#allocation123_spill] sm:$0xff] %v9761_v18  ;;  %v1881_v42 = vpop.f32.mrf.mxu0 }
 0x3f9   : > { %v1638_v50 = vpop.f32.mrf.mxu1 }
 0x3fa   : > { %13364 = vst [vmem:[#allocation121_spill] sm:$0xff] %v9754_v41  ;;  %v9757_v53 = vadd.f32 %v1638_v50, %v9546_v51  ;;  %v2015_v14 = vmax.f32 %v2014_v36, %v9749_v47  ;;  %v9773_v36 = vadd.f32 %v1881_v42, %v9548_v5 }
 0x3fb   : > { %v1642_v39 = vpop.f32.mrf.mxu1 }
 0x3fc   : > { %13365 = vst [vmem:[#allocation122_spill] sm:$0xff] %v9757_v53  ;;  %2016 = vmax.xlane.f32.xlu1 %v2015_v14  ;;  %v2018_v55 = vmax.f32 %v9754_v41, %v9757_v53  ;;  %v9766_v4 = vadd.f32 %v1642_v39, %v9544_v31  ;;  %13369 = vst [vmem:[#allocation126_spill] sm:$0xff] %v9773_v36  ;;  %v7403_v14 = vpop.f32.mrf.mxu0 }
 0x3fd   : > { %v1644_v23 = vpop.f32.mrf.mxu1 }
 0x3fe   : > { %13367 = vst [vmem:[#allocation124_spill] sm:$0xff] %v9766_v4  ;;  %v9769_v27 = vadd.f32 %v1644_v23, %v9546_v51  ;;  %v2019_v50 = vmax.f32 %v2018_v55, %v9761_v18  ;;  %v9785_v55 = vadd.f32 %v7400_v7, %v9548_v5 }
 0x3ff   : > { %v1648_v35 = vpop.f32.mrf.mxu1 }
 0x400   : > { %13368 = vst [vmem:[#allocation125_spill] sm:$0xff] %v9769_v27  ;;  %2020 = vmax.xlane.f32.xlu1 %v2019_v50  ;;  %v2022_v54 = vmax.f32 %v9766_v4, %v9769_v27  ;;  %v9778_v53 = vadd.f32 %v1648_v35, %v9544_v31  ;;  %13372 = vst [vmem:[#allocation129_spill] sm:$0xff] %v9785_v55  ;;  %v1891_v50 = vpop.f32.mrf.mxu0 }
 0x401   : > { %v1650_v41 = vpop.f32.mrf.mxu1 }
 0x402   : > { %13370 = vst [vmem:[#allocation127_spill] sm:$0xff] %v9778_v53  ;;  %v9781_v39 = vadd.f32 %v1650_v41, %v9546_v51  ;;  %v2023_v23 = vmax.f32 %v2022_v54, %v9773_v36  ;;  %v9797_v54 = vadd.f32 %v1891_v50, %v9548_v5 }
 0x403   : > { %v1654_v30 = vpop.f32.mrf.mxu1 }
 0x404   : > { %13371 = vst [vmem:[#allocation128_spill] sm:$0xff] %v9781_v39  ;;  %2024 = vmax.xlane.f32.xlu1 %v2023_v23  ;;  %v2026_v42 = vmax.f32 %v9778_v53, %v9781_v39  ;;  %v9790_v27 = vadd.f32 %v1654_v30, %v9544_v31  ;;  %13375 = vst [vmem:[#allocation132_spill] sm:$0xff] %v9797_v54  ;;  %v7406_v23 = vpop.f32.mrf.mxu0 }
 0x405   : > { %v1656_v4 = vpop.f32.mrf.mxu1  ;;  %v9857_v9 = vadd.f32 %v7406_v23, %v9548_v5 }
 0x406   : > { %13373 = vst [vmem:[#allocation130_spill] sm:$0xff] %v9790_v27  ;;  %v9793_v35 = vadd.f32 %v1656_v4, %v9546_v51  ;;  %v2027_v41 = vmax.f32 %v2026_v42, %v9785_v55  ;;  %v9809_v42 = vadd.f32 %v7403_v14, %v9548_v5 }
 0x407   : > { %v1660_v45 = vpop.f32.mrf.mxu1  ;;  %13389 = vst [vmem:[#allocation144_spill] sm:$0xff] %v9857_v9 }
 0x408   : > { %13374 = vst [vmem:[#allocation131_spill] sm:$0xff] %v9793_v35  ;;  %v2030_v7 = vmax.f32 %v9790_v27, %v9793_v35  ;;  %2028 = vmax.xlane.f32.xlu1 %v2027_v41  ;;  %v9802_v39 = vadd.f32 %v1660_v45, %v9544_v31  ;;  %13378 = vst [vmem:[#allocation135_spill] sm:$0xff] %v9809_v42  ;;  %v1901_v27 = vpop.f32.mrf.mxu0 }
 0x409   : > { %v1662_v53 = vpop.f32.mrf.mxu1 }
 0x40a   : > { %13376 = vst [vmem:[#allocation133_spill] sm:$0xff] %v9802_v39  ;;  %v9805_v30 = vadd.f32 %v1662_v53, %v9546_v51  ;;  %v2031_v4 = vmax.f32 %v2030_v7, %v9797_v54  ;;  %v9821_v7 = vadd.f32 %v1901_v27, %v9548_v5 }
 0x40b   : > { %v1666_v63 = vpop.f32.mrf.mxu1 }
 0x40c   : > { %13377 = vst [vmem:[#allocation134_spill] sm:$0xff] %v9805_v30  ;;  %v2034_v50 = vmax.f32 %v9802_v39, %v9805_v30  ;;  %2032 = vmax.xlane.f32.xlu1 %v2031_v4  ;;  %v9814_v35 = vadd.f32 %v1666_v63, %v9544_v31  ;;  %13381 = vst [vmem:[#allocation138_spill] sm:$0xff] %v9821_v7 }
 0x40d   : > { %v1668_v41 = vpop.f32.mrf.mxu1 }
 0x40e   : > { %13379 = vst [vmem:[#allocation136_spill] sm:$0xff] %v9814_v35  ;;  %v9817_v45 = vadd.f32 %v1668_v41, %v9546_v51  ;;  %v2035_v53 = vmax.f32 %v2034_v50, %v9809_v42  ;;  %v13382_v50 = vld [vmem:[#allocation6_spill] sm:$0xff]  ;;  %v7409_v42 = vpop.f32.mrf.mxu0 }
 0x40f   : > { %v1672_v19 = vpop.f32.mrf.mxu1 }
 0x410   : > { %13380 = vst [vmem:[#allocation137_spill] sm:$0xff] %v9817_v45  ;;  %2036 = vmax.xlane.f32.xlu1 %v2035_v53  ;;  %v2038_v14 = vmax.f32 %v9814_v35, %v9817_v45  ;;  %v1911_v55 = vpop.f32.mrf.mxu0  ;;  %v13383_v35 = vld [vmem:[#allocation22_spill] sm:$0xff]  ;;  %v9844_v1 = vadd.f32 %v1672_v19, %v9544_v31 }
 0x411   : > { %v1674_v39 = vpop.f32.mrf.mxu1  ;;  %v9874_v23 = vadd.f32 %v1911_v55, %v9548_v5 }
 0x412   : > { %v2039_v4 = vmax.f32 %v2038_v14, %v9821_v7  ;;  %v7412_v45 = vpop.f32.mrf.mxu0  ;;  %13385 = vst [vmem:[#allocation140_spill] sm:$0xff] %v9844_v1 }
 0x413   : > { %v1678_v30 = vpop.f32.mrf.mxu1 }
 0x414   : > { %2040 = vmax.xlane.f32.xlu0 %v2039_v4  ;;  %v1921_v7 = vpop.f32.mrf.mxu0 }
 0x415   : > { %v1680_v63 = vpop.f32.mrf.mxu1 }
 0x416   : > { %v9836_v36 = vpop.f32.mrf.mxu0  ;;  %v9851_v20 = vadd.f32 %v1680_v63, %v9546_v51 }
 0x417   : > { %v1684_v33 = vpop.f32.mrf.mxu1 }
 0x418   : > { %v9838_v18 = vpop.f32.mrf.mxu0  ;;  %13387 = vst [vmem:[#allocation142_spill] sm:$0xff] %v9851_v20 }
 0x419   : > { %v1686_v44 = vpop.f32.mrf.mxu1 }
 0x41b   : > { %v1690_v41 = vpop.f32.mrf.mxu1 }
 0x41d   : > { %v1692_v54 = vpop.f32.mrf.mxu1 }
 0x41e   : > { %v9888_v55 = vadd.f32 %v1692_v54, %v9546_v51 }
 0x41f   : > { %v1696_v0 = vpop.f32.mrf.mxu1 }
 0x420   : > { %13394 = vst [vmem:[#allocation149_spill] sm:$0xff] %v9888_v55 }
 0x421   : > { %3220 = vrot.lane.b32.xlu1 %v13382_v50, %s8333_s12  ;;  %v1698_v27 = vpop.f32.mrf.mxu1  ;;  %v9841_v50 = vadd.f32 %v1674_v39, %v9546_v51  ;;  %v9860_v39 = vadd.f32 %v1678_v30, %v9544_v31 }
 0x422   : > { %v9905_v54 = vadd.f32 %v1698_v27, %v9546_v51 }
 0x423   : > { %v9828_v53 = vpop.f32.mrf.mxu1  ;;  %13384 = vst [vmem:[#allocation139_spill] sm:$0xff] %v9841_v50  ;;  %v2042_v6 = vmax.f32 %v9844_v1, %v9841_v50  ;;  %13390 = vst [vmem:[#allocation145_spill] sm:$0xff] %v9860_v39  ;;  %v9868_v1 = vadd.f32 %v1686_v44, %v9546_v51 }
 0x424   : > { %13396 = vst [vmem:[#allocation151_spill] sm:$0xff] %v9905_v54 }
 0x425   : > { %v1704_v14 = vpop.f32.mrf.mxu1  ;;  %13392 = vst [vmem:[#allocation147_spill] sm:$0xff] %v9868_v1  ;;  %v2043_v63 = vmax.f32 %v2042_v6, %v9857_v9  ;;  %v9893_v9 = vadd.f32 %v7409_v42, %v9548_v5 }
 0x427   : > { %v9832_v4 = vpop.f32.mrf.mxu1 }
 0x429   : > { %v9834_v3 = vpop.f32.mrf.mxu1 }
 0x42a   : > { %3252 = vrot.lane.b32.xlu0 %v13383_v35, %s8333_s12  ;;  %v9846_v35 = vpop.f32.mrf.mxu0 }
 0x42b   : > { %v1714_v61 = vpop.f32.mrf.mxu1  ;;  %13386 = vst [vmem:[#allocation141_spill] sm:$0xff] %v9846_v35  ;;  %v2046_v35 = vmax.f32 %v9860_v39, %v9851_v20 }
 0x42c   : > { %v9863_v19 = vadd.f32 %v1714_v61, %v9544_v31  ;;  %v1941_v13 = vpop.f32.mrf.mxu0  ;;  %v9880_v61 = vadd.f32 %v1684_v33, %v9544_v31 }
 0x42d   : > { %v1716_v47 = vpop.f32.mrf.mxu1  ;;  %v9877_v30 = vadd.f32 %v1941_v13, %v9548_v5  ;;  %v2047_v13 = vmax.f32 %v2046_v35, %v9874_v23 }
 0x42e   : > { %v9854_v25 = vadd.f32 %v1716_v47, %v9546_v51  ;;  %13391 = vst [vmem:[#allocation146_spill] sm:$0xff] %v9863_v19  ;;  %13393 = vst [vmem:[#allocation148_spill] sm:$0xff] %v9880_v61 }
 0x430   : > { %13388 = vst [vmem:[#allocation143_spill] sm:$0xff] %v9854_v25  ;;  %v2070_v47 = vmax.f32 %v9863_v19, %v9854_v25  ;;  %v2050_v19 = vmax.f32 %v9880_v61, %v9868_v1 }
 0x432   : > { %v2071_v25 = vmax.f32 %v2070_v47, %v9877_v30  ;;  %v2051_v42 = vmax.f32 %v2050_v19, %v9893_v9  ;;  %v9925_v47 = vadd.f32 %v7412_v45, %v9548_v5 }
 0x445   : > { %2044 = vmax.xlane.f32.xlu1 %v2043_v63  ;;  %v1953_v50 = vpop.xlane.xlu1 %1952 }
 0x446   : > { %v2078_v39 = vsub.f32 %v9551_v57, %v1953_v50  ;;  %v2079_v44 = vsub.f32 %v9554_v60, %v1953_v50  ;;  %v2080_v6 = vsub.f32 %v9557_v56, %v1953_v50  ;;  %v9896_v57 = vadd.f32 %v1690_v41, %v9544_v31 }
 0x447   : > { %v9909_v50 = vadd.f32 %v1921_v7, %v9548_v5 }
 0x448   : > { %v2174_v33 = vmul.f32 1.442695, %v2078_v39  ;;  %v2176_v20 = vmul.f32 1.442695, %v2079_v44  ;;  %v2178_v63 = vmul.f32 1.442695, %v2080_v6  ;;  %v2054_v35 = vmax.f32 %v9896_v57, %v9888_v55 }
 0x449   : > { %13395 = vst [vmem:[#allocation150_spill] sm:$0xff] %v9896_v57  ;;  %v9898_v60 = vpop.xlane.xlu0 %1956  ;;  %2048 = vmax.xlane.f32.xlu1 %v2047_v13  ;;  %2072 = vmax.xlane.f32.xlu0 %v2071_v25  ;;  %v9912_v25 = vadd.f32 %v1696_v0, %v9544_v31  ;;  %v9929_v0 = vadd.f32 %v9828_v53, %v9544_v31 }
 0x44a   : > { %7781 = vpow2.f32 %v2174_v33  ;;  %v2083_v56 = vsub.f32 %v9569_v52, %v9898_v60  ;;  %v2055_v19 = vmax.f32 %v2054_v35, %v9909_v50  ;;  %v9939_v6 = vadd.f32 %v9834_v3, %v9546_v51 }
 0x44b   : > { %7783 = vpow2.f32 %v2176_v20  ;;  %13397 = vst [vmem:[#allocation152_spill] sm:$0xff] %v9912_v25  ;;  %v2058_v27 = vmax.f32 %v9912_v25, %v9905_v54  ;;  %v9921_v20 = vadd.f32 %v1704_v14, %v9546_v51  ;;  %13399 = vst [vmem:[#allocation154_spill] sm:$0xff] %v9929_v0  ;;  %v9944_v53 = vadd.f32 %v9838_v18, %v9548_v5  ;;  %v13423_v54 = vld [vmem:[#allocation85_spill] sm:$0xff] }
 0x44c   : > { %7785 = vpow2.f32 %v2178_v63  ;;  %v2184_v41 = vmul.f32 1.442695, %v2083_v56  ;;  %13400 = vst [vmem:[#allocation155_spill] sm:$0xff] %v9939_v6  ;;  %v9948_v33 = vadd.f32 %v9832_v4, %v9544_v31  ;;  %v9961_v4 = vadd.f32 %v9836_v36, %v9548_v5 }
 0x44d   : > { %2052 = vmax.xlane.f32.xlu1 %v2051_v42  ;;  %v9914_v39 = vpop.xlane.xlu1 %1960  ;;  %13398 = vst [vmem:[#allocation153_spill] sm:$0xff] %v9921_v20  ;;  %v2062_v14 = vmax.f32 %v9929_v0, %v9921_v20  ;;  %v2059_v45 = vmax.f32 %v2058_v27, %v9925_v47  ;;  %v13419_v20 = vld [vmem:[#allocation81_spill] sm:$0xff] }
 0x44e   : > { %v2086_v52 = vsub.f32 %v9581_v24, %v9914_v39  ;;  %7787 = vpow2.f32 %v2184_v41  ;;  %13401 = vst [vmem:[#allocation156_spill] sm:$0xff] %v9948_v33  ;;  %v2066_v56 = vmax.f32 %v9948_v33, %v9939_v6  ;;  %v13418_v6 = vld [vmem:[#allocation82_spill] sm:$0xff] }
 0x44f   : > { %v2063_v35 = vmax.f32 %v2062_v14, %v9944_v53 }
 0x450   : > { %v2190_v7 = vmul.f32 1.442695, %v2086_v52 }
 0x451   : > { %v9931_v44 = vpop.xlane.xlu0 %1964  ;;  %2056 = vmax.xlane.f32.xlu1 %v2055_v19  ;;  %v2067_v19 = vmax.f32 %v2066_v56, %v9961_v4 }
 0x452   : > { %v2089_v24 = vsub.f32 %v9593_v8, %v9931_v44  ;;  %7789 = vpow2.f32 %v2190_v7 }
 0x454   : > { %v2196_v13 = vmul.f32 1.442695, %v2089_v24 }
 0x455   : > { %2060 = vmax.xlane.f32.xlu1 %v2059_v45  ;;  %v9950_v8 = vpop.xlane.xlu1 %1968 }
 0x456   : > { %v2092_v63 = vsub.f32 %v9605_v49, %v9950_v8  ;;  %7791 = vpow2.f32 %v2196_v13  ;;  %v13404_v13 = vld [vmem:[#allocation72_spill] sm:$0xff] }
 0x457   : > { %v9954_v3 = vpop.eup %7781 }
 0x458   : > { %v7784_v42 = vpop.eup %7783  ;;  %v2202_v18 = vmul.f32 1.442695, %v2092_v63 }
 0x459   : > { %v7786_v41 = vpop.eup %7785  ;;  %2702 = vmatprep.mubr.f32.mxu0 %v7784_v42  ;;  %v9963_v52 = vpop.xlane.xlu0 %1972  ;;  %2064 = vmax.xlane.f32.xlu1 %v2063_v35  ;;  %v2366_v49 = vadd.f32 %v7784_v42, %v9954_v3  ;;  %v13407_v35 = vld [vmem:[#allocation74_spill] sm:$0xff] }
 0x45a   : > { %7451 = vmatprep.mubr.f32.mxu1 %v7786_v41  ;;  %v2095_v27 = vsub.f32 %v9617_v62, %v9963_v52  ;;  %7793 = vpow2.f32 %v2202_v18  ;;  %v13405_v62 = vld [vmem:[#allocation19_spill] sm:$0xff]  ;;  %v13408_v18 = vld [vmem:[#allocation73_spill] sm:$0xff] }
 0x45b   : > { %v9969_v7 = vadd.f32 %v7786_v41, %v2366_v49  ;;  %v9971_v14 = vpop.eup %7787  ;;  %v13409_v41 = vld [vmem:[#allocation76_spill] sm:$0xff] }
 0x45c   : > { %v2208_v24 = vmul.f32 1.442695, %v2095_v27  ;;  %13403 = vst [vmem:[#allocation158_spill] sm:$0xff] %v9971_v14  ;;  %7452 = vmatmul.mubr.f32.vlgmr.msra.gmra.mxu1 %v9971_v14  ;;  %v13410_v49 = vld [vmem:[#allocation20_spill] sm:$0xff]  ;;  %v13413_v14 = vld [vmem:[#allocation78_spill] sm:$0xff] }
 0x45d   : > { %13402 = vst [vmem:[#allocation157_spill] sm:$0xff] %v9969_v7  ;;  %2068 = vmax.xlane.f32.xlu1 %v2067_v19  ;;  %v9973_v36 = vpop.xlane.xlu1 %1976  ;;  %6896 = vmatpush3.msra.mxu1 %v13404_v13  ;;  %v13411_v19 = vld [vmem:[#allocation75_spill] sm:$0xff]  ;;  %v13414_v7 = vld [vmem:[#allocation77_spill] sm:$0xff] }
 0x45e   : > { %v2098_v45 = vsub.f32 %v9629_v10, %v9973_v36  ;;  %7795 = vpow2.f32 %v2208_v24  ;;  %6897 = vmatprep.subr.mxu1 %v9324_v59  ;;  %v13005_v24 = vmov 0.0  }
 0x45f   : > { %3250 = vrot.lane.b32.xlu0 %v13405_v62, %s8333_s12  ;;  %v9982_v56 = vpop.eup %7789  ;;  %6898 = vmatpush3.msra.mxu1 %v13407_v35  ;;  %v13438_v62 = vld [vmem:[#allocation100_spill] sm:$0xff] }
 0x460   : > { %v2214_v63 = vmul.f32 1.442695, %v2098_v45  ;;  %13406 = vst [vmem:[#allocation72_spill] sm:$0xff] %v9982_v56  ;;  %6899 = vmatprep.subr.mxu1 %v13408_v18  ;;  %7454 = vmatprep.mubr.f32.mxu1 %v9982_v56 }
 0x461   : > { %v9985_v42 = vpop.xlane.xlu0 %1980  ;;  %6900 = vmatpush3.msra.mxu1 %v13409_v41  ;;  %2638 = vmatprep.subr.mxu0 %v13005_v24  ;;  %v13416_v24 = vld [vmem:[#allocation79_spill] sm:$0xff] }
 0x462   : > { %v2101_v10 = vsub.f32 %v9641_v2, %v9985_v42  ;;  %7797 = vpow2.f32 %v2214_v63  ;;  %6901 = vmatprep.subr.mxu1 %v13411_v19  ;;  %v13415_v63 = vld [vmem:[#allocation80_spill] sm:$0xff] }
 0x463   : > { %3248 = vrot.lane.b32.xlu0 %v13410_v49, %s8333_s12  ;;  %v9996_v45 = vpop.eup %7791  ;;  %6902 = vmatpush3.msra.mxu1 %v13413_v14 }
 0x464   : > { %v2220_v27 = vmul.f32 1.442695, %v2101_v10  ;;  %13412 = vst [vmem:[#allocation74_spill] sm:$0xff] %v9996_v45  ;;  %6903 = vmatprep.subr.mxu1 %v13414_v7  ;;  %7455 = vmatmul.mubr.f32.gmra.mxu1 %v9996_v45  ;;  %v13420_v45 = vld [vmem:[#allocation84_spill] sm:$0xff] }
 0x465   : > { %v9999_v56 = vpop.xlane.xlu1 %1984  ;;  %6904 = vmatpush3.msra.mxu1 %v13415_v63 }
 0x466   : > { %v2104_v2 = vsub.f32 %v9653_v17, %v9999_v56  ;;  %7799 = vpow2.f32 %v2220_v27  ;;  %6905 = vmatprep.subr.mxu1 %v13416_v24  ;;  %v13421_v27 = vld [vmem:[#allocation83_spill] sm:$0xff] }
 0x467   : > { %2524 = vrot.lane.b32.xlu0 %v9270_v22, %s8333_s12  ;;  %v10009_v33 = vpop.eup %7793  ;;  %6906 = vmatpush3.msra.mxu1 %v13418_v6 }
 0x468   : > { %v2226_v10 = vmul.f32 1.442695, %v2104_v2  ;;  %13417 = vst [vmem:[#allocation73_spill] sm:$0xff] %v10009_v33  ;;  %6907 = vmatprep.subr.mxu1 %v13419_v20  ;;  %7457 = vmatprep.mubr.f32.mxu1 %v10009_v33 }
 0x469   : > { %v10012_v0 = vpop.xlane.xlu0 %1988  ;;  %6908 = vmatpush3.msra.mxu1 %v13420_v45 }
 0x46a   : > { %v2107_v17 = vsub.f32 %v9665_v28, %v10012_v0  ;;  %7801 = vpow2.f32 %v2226_v10  ;;  %6909 = vmatprep.subr.mxu1 %v13421_v27 }
 0x46b   : > { %2520 = vrot.lane.b32.xlu0 %v9288_v26, %s8333_s12  ;;  %v10022_v2 = vpop.eup %7795  ;;  %6910 = vmatpush3.msra.mxu1 %v9262_v46  ;;  %v13424_v26 = vld [vmem:[#allocation3_spill] sm:$0xff] }
 0x46c   : > { %v2232_v22 = vmul.f32 1.442695, %v2107_v17  ;;  %13422 = vst [vmem:[#allocation75_spill] sm:$0xff] %v10022_v2  ;;  %6911 = vmatprep.subr.mxu1 %v13423_v54  ;;  %7458 = vmatmul.mubr.f32.gmra.mxu1 %v10022_v2  ;;  %v13425_v17 = vld [vmem:[#allocation87_spill] sm:$0xff] }
 0x46d   : > { %v10025_v25 = vpop.xlane.xlu1 %1992  ;;  %6912 = vmatpush3.msra.mxu1 %v9266_v40 }
 0x46e   : > { %v2110_v28 = vsub.f32 %v9677_v12, %v10025_v25  ;;  %3218 = vrot.lane.b32.xlu1 %v13424_v26, %s8333_s12  ;;  %7803 = vpow2.f32 %v2232_v22  ;;  %6913 = vmatprep.subr.mxu1 %v13425_v17 }
 0x46f   : > { %2516 = vrot.lane.b32.xlu0 %v9304_v11, %s8333_s12  ;;  %v10037_v33 = vpop.eup %7797  ;;  %6914 = vmatpush3.msra.mxu1 %v9272_v32 }
 0x470   : > { %v2238_v10 = vmul.f32 1.442695, %v2110_v28  ;;  %13426 = vst [vmem:[#allocation78_spill] sm:$0xff] %v10037_v33  ;;  %6915 = vmatprep.subr.mxu1 %v9268_v37  ;;  %7460 = vmatprep.mubr.f32.mxu1 %v10037_v33  ;;  %v13429_v33 = vld [vmem:[#allocation111_spill] sm:$0xff] }
 0x471   : > { %v10040_v2 = vpop.xlane.xlu0 %1996  ;;  %6916 = vmatpush3.msra.mxu1 %v9286_v21 }
 0x472   : > { %v2113_v12 = vsub.f32 %v9689_v16, %v10040_v2  ;;  %7805 = vpow2.f32 %v2238_v10  ;;  %6917 = vmatprep.subr.mxu1 %v9280_v43 }
 0x473   : > { %2512 = vrot.lane.b32.xlu0 %v9322_v48, %s8333_s12  ;;  %v10050_v11 = vpop.eup %7799  ;;  %6918 = vmatpush3.msra.mxu1 %v9298_v58 }
 0x474   : > { %v2244_v22 = vmul.f32 1.442695, %v2113_v12  ;;  %13427 = vst [vmem:[#allocation77_spill] sm:$0xff] %v10050_v11  ;;  %6919 = vmatprep.subr.mxu1 %v9294_v15  ;;  %7461 = vmatmul.mubr.f32.gmra.mxu1 %v10050_v11 }
 0x475   : > { %v10053_v28 = vpop.xlane.xlu1 %2000  ;;  %6920 = vmatpush3.msra.mxu1 %v9312_v34 }
 0x476   : > { %v2116_v16 = vsub.f32 %v9701_v38, %v10053_v28  ;;  %7807 = vpow2.f32 %v2244_v22  ;;  %v13430_v38 = vld [vmem:[#allocation96_spill] sm:$0xff] }
 0x477   : > { %2508 = vrot.lane.b32.xlu0 %v9342_v29, %s8333_s12  ;;  %v10062_v48 = vpop.eup %7801  ;;  %v13433_v29 = vld [vmem:[#allocation114_spill] sm:$0xff] }
 0x478   : > { %v2250_v10 = vmul.f32 1.442695, %v2116_v16  ;;  %13428 = vst [vmem:[#allocation80_spill] sm:$0xff] %v10062_v48  ;;  %7463 = vmatprep.mubr.f32.mxu1 %v10062_v48  ;;  %v13434_v48 = vld [vmem:[#allocation98_spill] sm:$0xff] }
 0x479   : > { %v10064_v12 = vpop.xlane.xlu0 %2004 }
 0x47a   : > { %v2119_v57 = vsub.f32 %v13429_v33, %v10064_v12  ;;  %7809 = vpow2.f32 %v2250_v10  ;;  %v1720_v10 = vpop.f32.mrf.mxu1 }
 0x47b   : > { %2504 = vrot.lane.b32.xlu0 %v13430_v38, %s8333_s12  ;;  %v10071_v55 = vpop.eup %7803  ;;  %v13437_v38 = vld [vmem:[#allocation117_spill] sm:$0xff] }
 0x47c   : > { %v2256_v11 = vmul.f32 1.442695, %v2119_v57  ;;  %13431 = vst [vmem:[#allocation79_spill] sm:$0xff] %v10071_v55  ;;  %7464 = vmatmul.mubr.f32.gmra.mxu1 %v10071_v55 }
 0x47d   : > { %v10073_v22 = vpop.xlane.xlu1 %2008 }
 0x47e   : > { %13432 = vst [vmem:[#allocation82_spill] sm:$0xff] %v10073_v22  ;;  %v2122_v16 = vsub.f32 %v13433_v29, %v10073_v22  ;;  %7811 = vpow2.f32 %v2256_v11  ;;  %v13441_v22 = vld [vmem:[#allocation39_spill] sm:$0xff] }
 0x47f   : > { %2500 = vrot.lane.b32.xlu0 %v13434_v48, %s8333_s12  ;;  %v10080_v33 = vpop.eup %7805  ;;  %v1722_v48 = vpop.f32.mrf.mxu1 }
 0x480   : > { %v2262_v61 = vmul.f32 1.442695, %v2122_v16  ;;  %13435 = vst [vmem:[#allocation81_spill] sm:$0xff] %v10080_v33  ;;  %7466 = vmatprep.mubr.f32.mxu1 %v10080_v33  ;;  %v13440_v16 = vld [vmem:[#allocation120_spill] sm:$0xff] }
 0x481   : > { %v10082_v57 = vpop.xlane.xlu0 %2012 }
 0x482   : > { %13436 = vst [vmem:[#allocation83_spill] sm:$0xff] %v10082_v57  ;;  %v2125_v1 = vsub.f32 %v13437_v38, %v10082_v57  ;;  %7813 = vpow2.f32 %v2262_v61  ;;  %v13444_v38 = vld [vmem:[#allocation123_spill] sm:$0xff]  ;;  %v10109_v57 = vadd.f32 %v1720_v10, %v9544_v31  ;;  %v13449_v10 = vld [vmem:[#allocation141_spill] sm:$0xff] }
 0x483   : > { %2496 = vrot.lane.b32.xlu0 %v13438_v62, %s8333_s12  ;;  %v10089_v11 = vpop.eup %7807 }
 0x484   : > { %v2268_v55 = vmul.f32 1.442695, %v2125_v1  ;;  %13439 = vst [vmem:[#allocation85_spill] sm:$0xff] %v10089_v11  ;;  %7467 = vmatmul.mubr.f32.gmra.mxu1 %v10089_v11  ;;  %v10101_v1 = vadd.f32 %v1722_v48, %v9546_v51  ;;  %13445 = vst [vmem:[#allocation111_spill] sm:$0xff] %v10109_v57  ;;  %v10124_v51 = vadd.f32 %v13449_v10, %v9548_v5  ;;  %v13456_v5 = vld [vmem:[#allocation132_spill] sm:$0xff] }
 0x485   : > { %v10091_v29 = vpop.xlane.xlu1 %2016 }
 0x486   : > { %v2128_v49 = vsub.f32 %v13440_v16, %v10091_v29  ;;  %7815 = vpow2.f32 %v2268_v55  ;;  %13443 = vst [vmem:[#allocation87_spill] sm:$0xff] %v10101_v1  ;;  %v2074_v48 = vmax.f32 %v10109_v57, %v10101_v1  ;;  %v13457_v1 = vld [vmem:[#allocation43_spill] sm:$0xff] }
 0x487   : > { %2556 = vrot.lane.b32.xlu0 %v13441_v22, %s8333_s12  ;;  %v10098_v61 = vpop.eup %7809 }
 0x488   : > { %v2274_v33 = vmul.f32 1.442695, %v2128_v49  ;;  %13442 = vst [vmem:[#allocation3_spill] sm:$0xff] %v10098_v61  ;;  %7469 = vmatprep.mubr.f32.mxu1 %v10098_v61  ;;  %v13446_v49 = vld [vmem:[#allocation40_spill] sm:$0xff]  ;;  %v13448_v61 = vld [vmem:[#allocation126_spill] sm:$0xff]  ;;  %v2075_v57 = vmax.f32 %v2074_v48, %v10124_v51 }
 0x489   : > { %v10103_v62 = vpop.xlane.xlu1 %2020 }
 0x48a   : > { %v2131_v11 = vsub.f32 %v13444_v38, %v10103_v62  ;;  %7817 = vpow2.f32 %v2274_v33 }
 0x48b   : > { %2552 = vrot.lane.b32.xlu0 %v13446_v49, %s8333_s12  ;;  %v10113_v22 = vpop.eup %7811 }
 0x48c   : > { %v2280_v55 = vmul.f32 1.442695, %v2131_v11  ;;  %13447 = vst [vmem:[#allocation96_spill] sm:$0xff] %v10113_v22  ;;  %7470 = vmatmul.mubr.f32.gmra.mxu1 %v10113_v22  ;;  %v13450_v11 = vld [vmem:[#allocation37_spill] sm:$0xff] }
 0x48d   : > { %v10117_v16 = vpop.xlane.xlu1 %2024  ;;  %v13452_v22 = vld [vmem:[#allocation129_spill] sm:$0xff] }
 0x48e   : > { %v2134_v38 = vsub.f32 %v13448_v61, %v10117_v16  ;;  %7819 = vpow2.f32 %v2280_v55  ;;  %v13453_v55 = vld [vmem:[#allocation34_spill] sm:$0xff] }
 0x48f   : > { %2548 = vrot.lane.b32.xlu0 %v13450_v11, %s8333_s12  ;;  %v10128_v49 = vpop.eup %7813 }
 0x490   : > { %v2286_v33 = vmul.f32 1.442695, %v2134_v38  ;;  %13451 = vst [vmem:[#allocation114_spill] sm:$0xff] %v10128_v49  ;;  %7472 = vmatprep.mubr.f32.mxu1 %v10128_v49 }
 0x491   : > { %v10130_v31 = vpop.xlane.xlu1 %2028 }
 0x492   : > { %v2137_v61 = vsub.f32 %v13452_v22, %v10130_v31  ;;  %2076 = vmax.xlane.f32.xlu1 %v2075_v57  ;;  %7821 = vpow2.f32 %v2286_v33  ;;  %v13459_v33 = vld [vmem:[#allocation135_spill] sm:$0xff] }
 0x493   : > { %2544 = vrot.lane.b32.xlu0 %v13453_v55, %s8333_s12  ;;  %v10138_v38 = vpop.eup %7815 }
 0x494   : > { %v2292_v10 = vmul.f32 1.442695, %v2137_v61  ;;  %13454 = vst [vmem:[#allocation98_spill] sm:$0xff] %v10138_v38  ;;  %7473 = vmatmul.mubr.f32.gmra.mxu1 %v10138_v38  ;;  %v13460_v38 = vld [vmem:[#allocation45_spill] sm:$0xff] }
 0x495   : > { %v10140_v11 = vpop.xlane.xlu1 %2032 }
 0x496   : > { %13455 = vst [vmem:[#allocation117_spill] sm:$0xff] %v10140_v11  ;;  %v2140_v48 = vsub.f32 %v13456_v5, %v10140_v11  ;;  %7823 = vpow2.f32 %v2292_v10 }
 0x497   : > { %2540 = vrot.lane.b32.xlu0 %v13457_v1, %s8333_s12  ;;  %v10147_v57 = vpop.eup %7817  ;;  %v13462_v1 = vld [vmem:[#allocation138_spill] sm:$0xff] }
 0x498   : > { %v2298_v49 = vmul.f32 1.442695, %v2140_v48  ;;  %13458 = vst [vmem:[#allocation100_spill] sm:$0xff] %v10147_v57  ;;  %7475 = vmatprep.mubr.f32.mxu1 %v10147_v57  ;;  %v13463_v57 = vld [vmem:[#allocation47_spill] sm:$0xff] }
 0x499   : > { %v10149_v22 = vpop.xlane.xlu1 %2036 }
 0x49a   : > { %v2143_v61 = vsub.f32 %v13459_v33, %v10149_v22  ;;  %7825 = vpow2.f32 %v2298_v49 }
 0x49b   : > { %2536 = vrot.lane.b32.xlu0 %v13460_v38, %s8333_s12  ;;  %v10156_v5 = vpop.eup %7819  ;;  %v13467_v38 = vld [vmem:[#allocation4_spill] sm:$0xff] }
 0x49c   : > { %v2304_v55 = vmul.f32 1.442695, %v2143_v61  ;;  %13461 = vst [vmem:[#allocation120_spill] sm:$0xff] %v10156_v5  ;;  %7476 = vmatmul.mubr.f32.gmra.mxu1 %v10156_v5  ;;  %v13476_v5 = vld [vmem:[#allocation94_spill] sm:$0xff] }
 0x49d   : > { %v10158_v10 = vpop.xlane.xlu0 %2040  ;;  %v10169_v61 = vpop.permute.xlu1 %3220 }
 0x49e   : > { %v2146_v48 = vsub.f32 %v13462_v1, %v10158_v10  ;;  %7827 = vpow2.f32 %v2304_v55  ;;  %13466 = vst [vmem:[#allocation40_spill] sm:$0xff] %v10169_v61  ;;  %v13468_v55 = vld [vmem:[#allocation49_spill] sm:$0xff] }
 0x49f   : > { %2532 = vrot.lane.b32.xlu0 %v13463_v57, %s8333_s12  ;;  %v10165_v33 = vpop.eup %7821  ;;  %v13470_v1 = vld [vmem:[#allocation89_spill] sm:$0xff] }
 0x4a0   : > { %v2310_v11 = vmul.f32 1.442695, %v2146_v48  ;;  %13464 = vst [vmem:[#allocation39_spill] sm:$0xff] %v10165_v33  ;;  %7478 = vmatprep.mubr.f32.mxu1 %v10165_v33  ;;  %v13485_v33 = vld [vmem:[#allocation38_spill] sm:$0xff] }
 0x4a1   : > { %v10167_v49 = vpop.permute.xlu0 %3252 }
 0x4a2   : > { %13465 = vst [vmem:[#allocation123_spill] sm:$0xff] %v10167_v49  ;;  %6921 = vmatprep.subr.mxu1 %v10167_v49  ;;  %7829 = vpow2.f32 %v2310_v11  ;;  %v13472_v11 = vld [vmem:[#allocation91_spill] sm:$0xff] }
 0x4a3   : > { %6922 = vmatpush3.msra.mxu1 %v10169_v61  ;;  %3216 = vrot.lane.b32.xlu1 %v13467_v38, %s8333_s12  ;;  %v10178_v57 = vpop.eup %7823 }
 0x4a4   : > { %2528 = vrot.lane.b32.xlu0 %v13468_v55, %s8333_s12  ;;  %13469 = vst [vmem:[#allocation126_spill] sm:$0xff] %v10178_v57  ;;  %7479 = vmatmul.mubr.f32.gmra.mxu1 %v10178_v57  ;;  %v13474_v57 = vld [vmem:[#allocation93_spill] sm:$0xff] }
 0x4a7   : > { %2522 = vrot.lane.b32.xlu1 %v13470_v1, %s8333_s12  ;;  %v10185_v48 = vpop.eup %7825 }
 0x4a8   : > { %4781 = vrot.lane.b32.xlu0 %v13409_v41, %s8333_s12  ;;  %13471 = vst [vmem:[#allocation141_spill] sm:$0xff] %v10185_v48  ;;  %7481 = vmatprep.mubr.f32.mxu1 %v10185_v48  ;;  %v13484_v48 = vld [vmem:[#allocation144_spill] sm:$0xff]  ;;  %v13492_v41 = vld [vmem:[#allocation46_spill] sm:$0xff] }
 0x4ab   : > { %2518 = vrot.lane.b32.xlu1 %v13472_v11, %s8333_s12  ;;  %v10192_v55 = vpop.eup %7827  ;;  %v13477_v11 = vld [vmem:[#allocation95_spill] sm:$0xff] }
 0x4ac   : > { %4773 = vrot.lane.b32.xlu0 %v13420_v45, %s8333_s12  ;;  %13473 = vst [vmem:[#allocation37_spill] sm:$0xff] %v10192_v55  ;;  %7482 = vmatmul.mubr.f32.gmra.mxu1 %v10192_v55  ;;  %v13479_v55 = vld [vmem:[#allocation99_spill] sm:$0xff]  ;;  %v13489_v45 = vld [vmem:[#allocation44_spill] sm:$0xff] }
 0x4af   : > { %2514 = vrot.lane.b32.xlu1 %v13474_v57, %s8333_s12  ;;  %v10199_v1 = vpop.eup %7829  ;;  %v13478_v57 = vld [vmem:[#allocation97_spill] sm:$0xff] }
 0x4b0   : > { %4771 = vrot.lane.b32.xlu0 %v9262_v46, %s8333_s12  ;;  %13475 = vst [vmem:[#allocation129_spill] sm:$0xff] %v10199_v1  ;;  %7484 = vmatprep.mubr.f32.mxu1 %v10199_v1  ;;  %v13481_v1 = vld [vmem:[#allocation101_spill] sm:$0xff] }
 0x4b3   : > { %2510 = vrot.lane.b32.xlu1 %v13476_v5, %s8333_s12  ;;  %v13480_v5 = vld [vmem:[#allocation71_spill] sm:$0xff] }
 0x4b4   : > { %4769 = vrot.lane.b32.xlu0 %v9266_v40, %s8333_s12  ;;  %v13486_v40 = vld [vmem:[#allocation35_spill] sm:$0xff] }
 0x4b7   : > { %2506 = vrot.lane.b32.xlu1 %v13477_v11, %s8333_s12  ;;  %v13482_v11 = vld [vmem:[#allocation42_spill] sm:$0xff] }
 0x4b8   : > { %4761 = vrot.lane.b32.xlu0 %v9312_v34, %s8333_s12 }
 0x4bb   : > { %2502 = vrot.lane.b32.xlu1 %v13478_v57, %s8333_s12  ;;  %v13483_v57 = vld [vmem:[#allocation41_spill] sm:$0xff] }
 0x4bc   : > { %4759 = vrot.lane.b32.xlu0 %v10169_v61, %s8333_s12 }
 0x4bf   : > { %2498 = vrot.lane.b32.xlu1 %v13479_v55, %s8333_s12 }
 0x4c0   : > { %4817 = vrot.lane.b32.xlu0 %v13480_v5, %s8333_s12 }
 0x4c3   : > { %2494 = vrot.lane.b32.xlu1 %v13481_v1, %s8333_s12 }
 0x4c4   : > { %4813 = vrot.lane.b32.xlu0 %v13408_v18, %s8333_s12 }
 0x4c7   : > { %2554 = vrot.lane.b32.xlu1 %v13482_v11, %s8333_s12 }
 0x4c8   : > { %4811 = vrot.lane.b32.xlu0 %v13411_v19, %s8333_s12 }
 0x4cb   : > { %2550 = vrot.lane.b32.xlu1 %v13483_v57, %s8333_s12 }
 0x4cc   : > { %4807 = vrot.lane.b32.xlu0 %v13416_v24, %s8333_s12 }
 0x4ce   : > { %v10230_v55 = vpop.xlane.xlu1 %2044 }
 0x4cf   : > { %v2149_v1 = vsub.f32 %v13484_v48, %v10230_v55  ;;  %2546 = vrot.lane.b32.xlu1 %v13485_v33, %s8333_s12 }
 0x4d0   : > { %4805 = vrot.lane.b32.xlu0 %v13419_v20, %s8333_s12 }
 0x4d1   : > { %v2316_v11 = vmul.f32 1.442695, %v2149_v1 }
 0x4d2   : > { %v10238_v61 = vpop.xlane.xlu1 %2048  ;;  %v10240_v34 = vpop.xlane.xlu0 %2072 }
 0x4d3   : > { %v2152_v57 = vsub.f32 %v9874_v23, %v10238_v61  ;;  %2542 = vrot.lane.b32.xlu1 %v13486_v40, %s8333_s12  ;;  %7831 = vpow2.f32 %v2316_v11 }
 0x4d4   : > { %4803 = vrot.lane.b32.xlu0 %v13421_v27, %s8333_s12 }
 0x4d5   : > { %v2322_v48 = vmul.f32 1.442695, %v2152_v57 }
 0x4d6   : > { %v10248_v33 = vpop.xlane.xlu1 %2052  ;;  %v10250_v46 = vpop.permute.xlu0 %3250 }
 0x4d7   : > { %13487 = vst [vmem:[#allocation34_spill] sm:$0xff] %v10248_v33  ;;  %13488 = vst [vmem:[#allocation132_spill] sm:$0xff] %v10250_v46  ;;  %v2155_v1 = vsub.f32 %v9893_v9, %v10248_v33  ;;  %6923 = vmatprep.subr.mxu1 %v10250_v46  ;;  %2538 = vrot.lane.b32.xlu1 %v13489_v45, %s8333_s12  ;;  %7833 = vpow2.f32 %v2322_v48 }
 0x4d8   : > { %4799 = vrot.lane.b32.xlu0 %v13425_v17, %s8333_s12 }
 0x4d9   : > { %v2328_v11 = vmul.f32 1.442695, %v2155_v1  ;;  %v13494_v1 = vld [vmem:[#allocation48_spill] sm:$0xff] }
 0x4da   : > { %v10259_v40 = vpop.xlane.xlu1 %2056  ;;  %v10261_v23 = vpop.permute.xlu0 %3248 }
 0x4db   : > { %13490 = vst [vmem:[#allocation43_spill] sm:$0xff] %v10259_v40  ;;  %13491 = vst [vmem:[#allocation135_spill] sm:$0xff] %v10261_v23  ;;  %v2158_v57 = vsub.f32 %v9909_v50, %v10259_v40  ;;  %2534 = vrot.lane.b32.xlu1 %v13492_v41, %s8333_s12  ;;  %7835 = vpow2.f32 %v2328_v11  ;;  %v13495_v41 = vmov 0.0  }
 0x4dc   : > { %4797 = vrot.lane.b32.xlu0 %v9268_v37, %s8333_s12 }
 0x4dd   : > { %v2334_v9 = vmul.f32 1.442695, %v2158_v57 }
 0x4de   : > { %v10269_v45 = vpop.xlane.xlu1 %2060  ;;  %v2525_v33 = vpop.permute.xlu0 %2524 }
 0x4df   : > { %13493 = vst [vmem:[#allocation45_spill] sm:$0xff] %v10269_v45  ;;  %v2161_v48 = vsub.f32 %v9925_v47, %v10269_v45  ;;  %2639 = vmatpush1.msra.mxu0 %v2525_v33  ;;  %2530 = vrot.lane.b32.xlu1 %v13494_v1, %s8333_s12  ;;  %7837 = vpow2.f32 %v2334_v9  ;;  %v13497_v33 = vld [vmem:[#allocation50_spill] sm:$0xff] }
 0x4e0   : > { %4795 = vrot.lane.b32.xlu0 %v9280_v43, %s8333_s12  ;;  %2640 = vmatprep.subr.mxu0 %v13495_v41  ;;  %v10278_v40 = vpop.eup %7831 }
 0x4e1   : > { %v2340_v50 = vmul.f32 1.442695, %v2161_v48  ;;  %13496 = vst [vmem:[#allocation138_spill] sm:$0xff] %v10278_v40  ;;  %7485 = vmatmul.mubr.f32.gmra.mxu1 %v10278_v40  ;;  %v2170_v48 = vsub.f32 %v9877_v30, %v10240_v34 }
 0x4e2   : > { %v10280_v57 = vpop.xlane.xlu1 %2064 }
 0x4e3   : > { %v2164_v47 = vsub.f32 %v9944_v53, %v10280_v57  ;;  %2526 = vrot.lane.b32.xlu1 %v13497_v33, %s8333_s12  ;;  %7839 = vpow2.f32 %v2340_v50  ;;  %v2358_v33 = vmul.f32 1.442695, %v2170_v48 }
 0x4e4   : > { %v10287_v1 = vpop.eup %7833 }
 0x4e5   : > { %v2346_v11 = vmul.f32 1.442695, %v2164_v47  ;;  %13498 = vst [vmem:[#allocation47_spill] sm:$0xff] %v10287_v1  ;;  %7487 = vmatprep.mubr.f32.mxu1 %v10287_v1 }
 0x4e6   : > { %v10291_v45 = vpop.xlane.xlu1 %2068 }
 0x4e7   : > { %v2167_v9 = vsub.f32 %v9961_v4, %v10291_v45  ;;  %4785 = vrot.lane.b32.xlu1 %v13404_v13, %s8333_s12  ;;  %7841 = vpow2.f32 %v2346_v11 }
 0x4e8   : > { %v10301_v47 = vpop.eup %7835 }
 0x4e9   : > { %v2352_v53 = vmul.f32 1.442695, %v2167_v9  ;;  %13499 = vst [vmem:[#allocation4_spill] sm:$0xff] %v10301_v47  ;;  %7488 = vmatmul.mubr.f32.gmra.mxu1 %v10301_v47 }
 0x4ea   : > { %v10298_v50 = vpop.permute.xlu1 %3218 }
 0x4eb   : > { %6924 = vmatpush3.msra.mxu1 %v10298_v50  ;;  %4783 = vrot.lane.b32.xlu1 %v13407_v35, %s8333_s12  ;;  %7843 = vpow2.f32 %v2352_v53  ;;  %v2521_v53 = vpop.permute.xlu0 %2520 }
 0x4ec   : > { %6925 = vmatprep.subr.mxu1 %v10261_v23  ;;  %7845 = vpow2.f32 %v2358_v33  ;;  %v10307_v30 = vpop.eup %7837 }
 0x4ed   : > { %13500 = vst [vmem:[#allocation49_spill] sm:$0xff] %v10307_v30  ;;  %7490 = vmatprep.mubr.f32.mxu1 %v10307_v30 }
 0x4ef   : > { %4779 = vrot.lane.b32.xlu1 %v13413_v14, %s8333_s12  ;;  %v2517_v33 = vpop.permute.xlu0 %2516 }
 0x4f0   : > { %v10312_v4 = vpop.eup %7839 }
 0x4f1   : > { %13501 = vst [vmem:[#allocation89_spill] sm:$0xff] %v10312_v4  ;;  %7491 = vmatmul.mubr.f32.gmra.mxu1 %v10312_v4 }
 0x4f3   : > { %4777 = vrot.lane.b32.xlu1 %v13415_v63, %s8333_s12  ;;  %v2513_v4 = vpop.permute.xlu0 %2512 }
 0x4f4   : > { %v10317_v11 = vpop.eup %7841 }
 0x4f5   : > { %13502 = vst [vmem:[#allocation91_spill] sm:$0xff] %v10317_v11  ;;  %7493 = vmatprep.mubr.f32.mxu1 %v10317_v11 }
 0x4f7   : > { %4775 = vrot.lane.b32.xlu1 %v13418_v6, %s8333_s12 }
 0x4f8   : > { %v10322_v48 = vpop.eup %7843 }
 0x4f9   : > { %13503 = vst [vmem:[#allocation93_spill] sm:$0xff] %v10322_v48  ;;  %v10324_v9 = vpop.eup %7845  ;;  %7494 = vmatmul.mubr.f32.gmra.mxu1 %v10322_v48  ;;  %v2509_v48 = vpop.permute.xlu0 %2508 }
 0x4fa   : > { %13504 = vst [vmem:[#allocation94_spill] sm:$0xff] %v10324_v9  ;;  %7496 = vmatprep.mubr.f32.mxu1 %v10324_v9 }
 0x4fb   : > { %4767 = vrot.lane.b32.xlu1 %v9272_v32, %s8333_s12 }
 0x4fd   : > { %v2505_v30 = vpop.permute.xlu0 %2504 }
 0x4ff   : > { %4765 = vrot.lane.b32.xlu1 %v9286_v21, %s8333_s12 }
 0x503   : > { %4763 = vrot.lane.b32.xlu1 %v9298_v58, %s8333_s12 }
 0x507   : > { %4757 = vrot.lane.b32.xlu1 %v10298_v50, %s8333_s12 }
 0x51b   : > { %v10336_v47 = vpop.xlane.xlu1 %2076 }
 0x51c   : > { %v2173_v40 = vsub.f32 %v10124_v51, %v10336_v47 }
 0x51e   : > { %v2364_v9 = vmul.f32 1.442695, %v2173_v40  ;;  %v2501_v40 = vpop.permute.xlu0 %2500 }
 0x51f   : > { %v10340_v11 = vpop.permute.xlu1 %3216 }
 0x520   : > { %13505 = vst [vmem:[#allocation95_spill] sm:$0xff] %v10340_v11  ;;  %4755 = vrot.lane.b32.xlu1 %v10340_v11, %s8333_s12  ;;  %6926 = vmatpush3.msra.mxu1 %v10340_v11  ;;  %7847 = vpow2.f32 %v2364_v9 }
 0x521   : > { %7499 = vmatprep.subr.msk.mxu1 %vm328_vm0, %v13480_v5 }
 0x523   : > { %v2523_v1 = vpop.permute.xlu1 %2522 }
 0x524   : > { %4815 = vrot.lane.b32.xlu1 %v9324_v59, %s8333_s12  ;;  %2641 = vmatpush1.msra.mxu0 %v2523_v1  ;;  %v2497_v1 = vpop.permute.xlu0 %2496 }
 0x525   : > { %2642 = vmatprep.subr.mxu0 %v13495_v41 }
 0x526   : > { %2643 = vmatpush1.msra.mxu0 %v2521_v53 }
 0x527   : > { %v2519_v51 = vpop.permute.xlu1 %2518  ;;  %2644 = vmatprep.subr.mxu0 %v13495_v41 }
 0x528   : > { %4809 = vrot.lane.b32.xlu1 %v13414_v7, %s8333_s12  ;;  %2645 = vmatpush1.msra.mxu0 %v2519_v51 }
 0x529   : > { %2646 = vmatprep.subr.mxu0 %v13495_v41 }
 0x52a   : > { %2647 = vmatpush1.msra.mxu0 %v2517_v33  ;;  %v8293_v33 = vld [vmem:[%s12818_s2 + $0x8] sm:$0xff] }
 0x52b   : > { %v2515_v9 = vpop.permute.xlu1 %2514  ;;  %2648 = vmatprep.subr.mxu0 %v13495_v41 }
 0x52c   : > { %4801 = vrot.lane.b32.xlu1 %v13423_v54, %s8333_s12  ;;  %2649 = vmatpush1.msra.mxu0 %v2515_v9  ;;  %v8294_v9 = vld [vmem:[%s12818_s2] sm:$0xff] }
 0x52d   : > { %2650 = vmatprep.subr.mxu0 %v13495_v41  ;;  %v10358_v53 = vpop.eup %7847 }
 0x52e   : > { %2651 = vmatpush1.msra.mxu0 %v2513_v4  ;;  %13506 = vst [vmem:[#allocation97_spill] sm:$0xff] %v10358_v53  ;;  %7497 = vmatmul.mubr.f32.gmra.mxu1 %v10358_v53  ;;  %v2557_v4 = vpop.permute.xlu0 %2556 }
 0x52f   : > { %v2511_v11 = vpop.permute.xlu1 %2510  ;;  %2652 = vmatprep.subr.mxu0 %v13495_v41  ;;  %3376 = vmatprep.mubr.f32.mxu1 %v8293_v33  ;;  %v8296_v33 = vld [vmem:[%s12818_s2 + $0x10] sm:$0xff] }
 0x530   : > { %2653 = vmatpush1.msra.mxu0 %v2511_v11  ;;  %v8295_v11 = vld [vmem:[%s12818_s2 + $0x18] sm:$0xff] }
 0x531   : > { %2654 = vmatprep.subr.mxu0 %v13495_v41 }
 0x532   : > { %2655 = vmatpush1.msra.mxu0 %v2509_v48  ;;  %3377 = vmatmul.mubr.f32.vlgmr.msra.gmra.mxu1 %v8294_v9  ;;  %v8298_v9 = vld [vmem:[%s12818_s2 + $0x20] sm:$0xff] }
 0x533   : > { %v2507_v51 = vpop.permute.xlu1 %2506  ;;  %2656 = vmatprep.subr.mxu0 %v13495_v41  ;;  %7500 = vmatpush3.xpose.msk.msra.mxu1 %vm328_vm0, %v13480_v5  ;;  %v2553_v5 = vpop.permute.xlu0 %2552 }
 0x534   : > { %2657 = vmatpush1.msra.mxu0 %v2507_v51  ;;  %7501 = vmatprep.subr.msk.mxu1 %vm328_vm0, %v9324_v59 }
 0x535   : > { %2658 = vmatprep.subr.mxu0 %v13495_v41  ;;  %3381 = vmatprep.mubr.f32.mxu1 %v8295_v11 }
 0x536   : > { %2659 = vmatpush1.msra.mxu0 %v2505_v30  ;;  %3382 = vmatmul.mubr.f32.gmra.mxu1 %v8296_v33  ;;  %v8297_v30 = vld [vmem:[%s12818_s2 + $0x28] sm:$0xff]  ;;  %v8302_v33 = vld [vmem:[%s12818_s2 + $0x40] sm:$0xff] }
 0x537   : > { %v2503_v48 = vpop.permute.xlu1 %2502  ;;  %2660 = vmatprep.subr.mxu0 %v13495_v41  ;;  %7502 = vmatpush3.xpose.msk.msra.mxu1 %vm328_vm0, %v9324_v59  ;;  %v8299_v59 = vld [vmem:[%s12818_s2 + $0x38] sm:$0xff]  ;;  %v2549_v11 = vpop.permute.xlu0 %2548 }
 0x538   : > { %2661 = vmatpush1.msra.mxu0 %v2503_v48  ;;  %7503 = vmatprep.subr.msk.mxu1 %vm328_vm0, %v13408_v18  ;;  %v8300_v48 = vld [vmem:[%s12818_s2 + $0x30] sm:$0xff] }
 0x539   : > { %2662 = vmatprep.subr.mxu0 %v13495_v41  ;;  %3386 = vmatprep.mubr.f32.mxu1 %v8297_v30 }
 0x53a   : > { %2663 = vmatpush1.msra.mxu0 %v2501_v40  ;;  %3387 = vmatmul.mubr.f32.gmra.mxu1 %v8298_v9 }
 0x53b   : > { %v2499_v51 = vpop.permute.xlu1 %2498  ;;  %2664 = vmatprep.subr.mxu0 %v13495_v41  ;;  %7504 = vmatpush3.xpose.msk.msra.mxu1 %vm328_vm0, %v13408_v18  ;;  %v8301_v18 = vld [vmem:[%s12818_s2 + $0x48] sm:$0xff] }
 0x53c   : > { %2665 = vmatpush1.msra.mxu0 %v2499_v51  ;;  %7505 = vmatprep.subr.msk.mxu1 %vm328_vm0, %v13411_v19  ;;  %v8304_v51 = vld [vmem:[%s12818_s2 + $0x50] sm:$0xff] }
 0x53d   : > { %2666 = vmatprep.subr.mxu0 %v13495_v41  ;;  %3391 = vmatprep.mubr.f32.mxu1 %v8299_v59  ;;  %v8306_v59 = vld [vmem:[%s12818_s2 + $0x60] sm:$0xff] }
 0x53e   : > { %2667 = vmatpush1.msra.mxu0 %v2497_v1  ;;  %3392 = vmatmul.mubr.f32.gmra.mxu1 %v8300_v48 }
 0x53f   : > { %v2495_v40 = vpop.permute.xlu1 %2494  ;;  %2668 = vmatprep.subr.mxu0 %v13495_v41  ;;  %7506 = vmatpush3.xpose.msk.msra.mxu1 %vm328_vm0, %v13411_v19  ;;  %v2545_v19 = vpop.permute.xlu0 %2544 }
 0x540   : > { %2669 = vmatpush1.msra.mxu0 %v2495_v40  ;;  %7507 = vmatprep.subr.msk.mxu1 %vm328_vm0, %v13414_v7 }
 0x541   : > { %2670 = vmatprep.subr.mxu0 %v13495_v41  ;;  %3396 = vmatprep.mubr.f32.mxu1 %v8301_v18  ;;  %v13508_v18 = vld [vmem:[#allocation54_spill] sm:$0xff] }
 0x542   : > { %2671 = vmatpush2.msra.mxu0 %v2557_v4  ;;  %3397 = vmatmul.mubr.f32.gmra.mxu1 %v8302_v33  ;;  %v8303_v4 = vld [vmem:[%s12818_s2 + $0x58] sm:$0xff]  ;;  %v13509_v33 = vld [vmem:[#allocation57_spill] sm:$0xff] }
 0x543   : > { %v2555_v1 = vpop.permute.xlu1 %2554  ;;  %2672 = vmatprep.subr.mxu0 %v13495_v41  ;;  %7508 = vmatpush3.xpose.msk.msra.mxu1 %vm328_vm0, %v13414_v7  ;;  %v8305_v7 = vld [vmem:[%s12818_s2 + $0x68] sm:$0xff]  ;;  %v2541_v9 = vpop.permute.xlu0 %2540 }
 0x544   : > { %2673 = vmatpush2.msra.mxu0 %v2555_v1  ;;  %7509 = vmatprep.subr.msk.mxu1 %vm328_vm0, %v13416_v24  ;;  %v2081_v1 = vsub.f32 %v13508_v18, %v9898_v60  ;;  %v13512_v18 = vld [vmem:[#allocation58_spill] sm:$0xff] }
 0x545   : > { %2674 = vmatprep.subr.mxu0 %v13495_v41  ;;  %3401 = vmatprep.mubr.f32.mxu1 %v8303_v4  ;;  %v2085_v4 = vsub.f32 %v13509_v33, %v9914_v39 }
 0x546   : > { %2675 = vmatpush2.msra.mxu0 %v2553_v5  ;;  %3402 = vmatmul.mubr.f32.gmra.mxu1 %v8304_v51 }
 0x547   : > { %v2551_v30 = vpop.permute.xlu1 %2550  ;;  %2676 = vmatprep.subr.mxu0 %v13495_v41  ;;  %7510 = vmatpush3.xpose.msk.msra.mxu1 %vm328_vm0, %v13416_v24  ;;  %v13507_v24 = vld [vmem:[#allocation55_spill] sm:$0xff] }
 0x548   : > { %2677 = vmatpush2.msra.mxu0 %v2551_v30  ;;  %7511 = vmatprep.subr.msk.mxu1 %vm328_vm0, %v13419_v20  ;;  %v2082_v40 = vsub.f32 %v13507_v24, %v9898_v60  ;;  %v8309_v60 = vld [vmem:[%s12818_s2 + $0x88] sm:$0xff]  ;;  %v2188_v24 = vmul.f32 1.442695, %v2085_v4  ;;  %v13513_v4 = vld [vmem:[#allocation61_spill] sm:$0xff] }
 0x549   : > { %2678 = vmatprep.subr.mxu0 %v13495_v41  ;;  %3406 = vmatprep.mubr.f32.mxu1 %v8305_v7  ;;  %v2180_v7 = vmul.f32 1.442695, %v2081_v1  ;;  %v2087_v1 = vsub.f32 %v13512_v18, %v9931_v44  ;;  %v13517_v18 = vld [vmem:[#allocation65_spill] sm:$0xff] }
 0x54a   : > { %2679 = vmatpush2.msra.mxu0 %v2549_v11  ;;  %3407 = vmatmul.mubr.f32.gmra.mxu1 %v8306_v59  ;;  %v8307_v11 = vld [vmem:[%s12818_s2 + $0x78] sm:$0xff]  ;;  %v2182_v30 = vmul.f32 1.442695, %v2082_v40  ;;  %v13511_v40 = vld [vmem:[#allocation59_spill] sm:$0xff] }
 0x54b   : > { %v2547_v5 = vpop.permute.xlu1 %2546  ;;  %2680 = vmatprep.subr.mxu0 %v13495_v41  ;;  %7512 = vmatpush3.xpose.msk.msra.mxu1 %vm328_vm0, %v13419_v20  ;;  %v8308_v20 = vld [vmem:[%s12818_s2 + $0x70] sm:$0xff] }
 0x54c   : > { %2681 = vmatpush2.msra.mxu0 %v2547_v5  ;;  %7513 = vmatprep.subr.msk.mxu1 %vm328_vm0, %v13421_v27  ;;  %v13510_v5 = vld [vmem:[#allocation56_spill] sm:$0xff]  ;;  %7849 = vpow2.f32 %v2182_v30  ;;  %v2091_v30 = vsub.f32 %v13513_v4, %v9950_v8 }
 0x54d   : > { %2682 = vmatprep.subr.mxu0 %v13495_v41  ;;  %3411 = vmatprep.mubr.f32.mxu1 %v8307_v11  ;;  %v2084_v59 = vsub.f32 %v13510_v5, %v9914_v39  ;;  %v2088_v11 = vsub.f32 %v13511_v40, %v9931_v44  ;;  %v8311_v39 = vld [vmem:[%s12818_s2 + $0x98] sm:$0xff]  ;;  %7851 = vpow2.f32 %v2180_v7  ;;  %v8313_v44 = vld [vmem:[%s12818_s2 + $0xa8] sm:$0xff] }
 0x54e   : > { %2683 = vmatpush2.msra.mxu0 %v2545_v19  ;;  %3412 = vmatmul.mubr.f32.gmra.mxu1 %v8308_v20  ;;  %v2537_v19 = vpop.permute.xlu0 %2536  ;;  %v8312_v20 = vld [vmem:[%s12818_s2 + $0x90] sm:$0xff]  ;;  %7853 = vpow2.f32 %v2188_v24  ;;  %v2200_v5 = vmul.f32 1.442695, %v2091_v30 }
 0x54f   : > { %v2543_v48 = vpop.permute.xlu1 %2542  ;;  %2684 = vmatprep.subr.mxu0 %v13495_v41  ;;  %7514 = vmatpush3.xpose.msk.msra.mxu1 %vm328_vm0, %v13421_v27  ;;  %v8310_v27 = vld [vmem:[%s12818_s2 + $0x80] sm:$0xff]  ;;  %v2194_v33 = vmul.f32 1.442695, %v2088_v11 }
 0x550   : > { %2685 = vmatpush2.msra.mxu0 %v2543_v48  ;;  %7515 = vmatprep.subr.msk.mxu1 %vm328_vm0, %v13423_v54  ;;  %v2186_v48 = vmul.f32 1.442695, %v2084_v59  ;;  %v13515_v59 = vld [vmem:[#allocation63_spill] sm:$0xff] }
 0x551   : > { %2686 = vmatprep.subr.mxu0 %v13495_v41  ;;  %3416 = vmatprep.mubr.f32.mxu1 %v8309_v60  ;;  %v2192_v60 = vmul.f32 1.442695, %v2087_v1  ;;  %v2097_v1 = vsub.f32 %v13517_v18, %v9973_v36  ;;  %v13529_v18 = vld [vmem:[#allocation102_spill] sm:$0xff] }
 0x552   : > { %2687 = vmatpush2.msra.mxu0 %v2541_v9  ;;  %3417 = vmatmul.mubr.f32.gmra.mxu1 %v8310_v27  ;;  %7855 = vpow2.f32 %v2186_v48  ;;  %v2094_v27 = vsub.f32 %v13515_v59, %v9963_v52 }
 0x553   : > { %v2539_v51 = vpop.permute.xlu1 %2538  ;;  %2688 = vmatprep.subr.mxu0 %v13495_v41  ;;  %7516 = vmatpush3.xpose.msk.msra.mxu1 %vm328_vm0, %v13423_v54  ;;  %v2533_v54 = vpop.permute.xlu0 %2532  ;;  %7857 = vpow2.f32 %v2194_v33  ;;  %v2212_v30 = vmul.f32 1.442695, %v2097_v1  ;;  %v2106_v1 = vsub.f32 %v13529_v18, %v10012_v0 }
 0x554   : > { %2689 = vmatpush2.msra.mxu0 %v2539_v51  ;;  %7517 = vmatprep.subr.msk.mxu1 %vm328_vm0, %v13425_v17  ;;  %v13514_v51 = vld [vmem:[#allocation60_spill] sm:$0xff]  ;;  %7859 = vpow2.f32 %v2192_v60  ;;  %v2206_v48 = vmul.f32 1.442695, %v2094_v27  ;;  %v13525_v27 = vld [vmem:[#allocation69_spill] sm:$0xff] }
 0x555   : > { %2690 = vmatprep.subr.mxu0 %v13495_v41  ;;  %3421 = vmatprep.mubr.f32.mxu1 %v8311_v39  ;;  %v2090_v7 = vsub.f32 %v13514_v51, %v9950_v8  ;;  %v8315_v8 = vld [vmem:[%s12818_s2 + $0xb8] sm:$0xff]  ;;  %7861 = vpow2.f32 %v2200_v5 }
 0x556   : > { %2691 = vmatpush2.msra.mxu0 %v2537_v19  ;;  %3422 = vmatmul.mubr.f32.gmra.mxu1 %v8312_v20  ;;  %v13516_v39 = vld [vmem:[#allocation62_spill] sm:$0xff] }
 0x557   : > { %v2535_v9 = vpop.permute.xlu1 %2534  ;;  %2692 = vmatprep.subr.mxu0 %v13495_v41  ;;  %7518 = vmatpush3.xpose.msk.msra.mxu1 %vm328_vm0, %v13425_v17  ;;  %v8314_v17 = vld [vmem:[%s12818_s2 + $0xa0] sm:$0xff]  ;;  %v2529_v24 = vpop.permute.xlu0 %2528  ;;  %v2198_v11 = vmul.f32 1.442695, %v2090_v7  ;;  %v13523_v51 = vld [vmem:[#allocation66_spill] sm:$0xff] }
 0x558   : > { %2693 = vmatpush2.msra.mxu0 %v2535_v9  ;;  %7519 = vmatprep.subr.msk.mxu1 %vm328_vm0, %v9268_v37  ;;  %v2093_v9 = vsub.f32 %v13516_v39, %v9963_v52  ;;  %v2099_v7 = vsub.f32 %v13523_v51, %v9985_v42  ;;  %v13535_v51 = vld [vmem:[#allocation6_spill] sm:$0xff] }
 0x559   : > { %2694 = vmatprep.subr.mxu0 %v13495_v41  ;;  %3426 = vmatprep.mubr.f32.mxu1 %v8313_v44  ;;  %v10529_v52 = vpop.eup %7849  ;;  %7863 = vpow2.f32 %v2198_v11  ;;  %v13521_v44 = vld [vmem:[#allocation67_spill] sm:$0xff]  ;;  %v13527_v11 = vld [vmem:[#allocation68_spill] sm:$0xff] }
 0x55a   : > { %2695 = vmatpush2.msra.mxu0 %v2533_v54  ;;  %3427 = vmatmul.mubr.f32.gmra.mxu1 %v8314_v17  ;;  %13518 = vst [vmem:[#allocation99_spill] sm:$0xff] %v10529_v52  ;;  %v8317_v54 = vld [vmem:[%s12818_s2 + $0xc8] sm:$0xff]  ;;  %v2204_v20 = vmul.f32 1.442695, %v2093_v9  ;;  %v10542_v4 = vpop.eup %7851  ;;  %7865 = vpow2.f32 %v2206_v48  ;;  %v8320_v17 = vld [vmem:[%s12818_s2 + $0xd0] sm:$0xff]  ;;  %v2102_v39 = vsub.f32 %v13527_v11, %v9999_v56  ;;  %v8322_v9 = vld [vmem:[%s12818_s2 + $0xe0] sm:$0xff] }
 0x55b   : > { %v2531_v19 = vpop.permute.xlu1 %2530  ;;  %2696 = vmatprep.subr.mxu0 %v13495_v41  ;;  %7520 = vmatpush3.xpose.msk.msra.mxu1 %vm328_vm0, %v9268_v37  ;;  %v8316_v37 = vld [vmem:[%s12818_s2 + $0xb0] sm:$0xff]  ;;  %13520 = vst [vmem:[#allocation71_spill] sm:$0xff] %v10542_v4 }
 0x55c   : > { %2697 = vmatpush2.msra.mxu0 %v2531_v19  ;;  %7521 = vmatprep.subr.msk.mxu1 %vm328_vm0, %v9280_v43  ;;  %v2100_v19 = vsub.f32 %v13521_v44, %v9985_v42  ;;  %7867 = vpow2.f32 %v2204_v20  ;;  %v10597_v20 = vmul.f32 0.17677669, %v13467_v38 }
 0x55d   : > { %2698 = vmatprep.subr.mxu0 %v13495_v41  ;;  %3431 = vmatprep.mubr.f32.mxu1 %v8315_v8  ;;  %7869 = vpow2.f32 %v2212_v30  ;;  %v8321_v8 = vld [vmem:[%s12818_s2 + $0xe8] sm:$0xff]  ;;  %v8324_v30 = vld [vmem:[%s12818_s2 + $0xf0] sm:$0xff] }
 0x55e   : > { %2699 = vmatpush2.msra.mxu0 %v2529_v24  ;;  %3432 = vmatmul.mubr.f32.gmra.mxu1 %v8316_v37  ;;  %v2218_v59 = vmul.f32 1.442695, %v2100_v19  ;;  %v2103_v24 = vsub.f32 %v13525_v27, %v9999_v56  ;;  %v2230_v19 = vmul.f32 1.442695, %v2106_v1  ;;  %v13542_v1 = vld [vmem:[#allocation105_spill] sm:$0xff] }
 0x55f   : > { %v2527_v40 = vpop.permute.xlu1 %2526  ;;  %2700 = vmatprep.subr.mxu0 %v13495_v41  ;;  %7522 = vmatpush3.xpose.msk.msra.mxu1 %vm328_vm0, %v9280_v43  ;;  %v13519_v43 = vld [vmem:[#allocation64_spill] sm:$0xff] }
 0x560   : > { %2701 = vmatpush2.msra.mxu0 %v2527_v40  ;;  %7523 = vmatprep.subr.msk.mxu1 %vm328_vm0, %v9294_v15  ;;  %v2096_v33 = vsub.f32 %v13519_v43, %v9973_v36  ;;  %v8319_v36 = vld [vmem:[%s12818_s2 + $0xd8] sm:$0xff]  ;;  %v2216_v40 = vmul.f32 1.442695, %v2099_v7  ;;  %v2224_v48 = vmul.f32 1.442695, %v2103_v24 }
 0x561   : > { %2703 = vmatmul.mubr.f32.vlgmr.msra.gmra.mxu0 %v9954_v3  ;;  %3436 = vmatprep.mubr.f32.mxu1 %v8317_v54  ;;  %v8318_v3 = vld [vmem:[%s12818_s2 + $0xc0] sm:$0xff]  ;;  %v8323_v54 = vld [vmem:[%s12818_s2 + $0xf8] sm:$0xff]  ;;  %v2222_v43 = vmul.f32 1.442695, %v2102_v39  ;;  %v10621_v7 = vmul.f32 0.17677669, %v13535_v51 }
 0x562   : > { %6975 = vmatprep.subr.msk.mxu0 %vm328_vm0, %v13404_v13  ;;  %2707 = vmatprep.mubr.f32.mxu0 %v10529_v52  ;;  %v10551_v13 = vpop.eup %7853  ;;  %v2210_v60 = vmul.f32 1.442695, %v2096_v33  ;;  %v13531_v33 = vld [vmem:[#allocation70_spill] sm:$0xff]  ;;  %v13540_v39 = vld [vmem:[#allocation5_spill] sm:$0xff] }
 0x563   : > { %3437 = vmatmul.mubr.f32.gmra.mxu1 %v8318_v3  ;;  %13522 = vst [vmem:[#allocation101_spill] sm:$0xff] %v10551_v13  ;;  %v10562_v5 = vpop.eup %7855  ;;  %v2105_v3 = vsub.f32 %v13531_v33, %v10012_v0  ;;  %v10616_v0 = vmul.f32 0.17677669, %v13424_v26 }
 0x564   : > { %7524 = vmatpush3.xpose.msk.msra.mxu1 %vm328_vm0, %v9294_v15  ;;  %3441 = vmatprep.mubr.f32.mxu1 %v8319_v36  ;;  %13524 = vst [vmem:[#allocation42_spill] sm:$0xff] %v10562_v5  ;;  %v10571_v42 = vpop.eup %7857  ;;  %7871 = vpow2.f32 %v2210_v60  ;;  %v13533_v36 = vld [vmem:[#allocation104_spill] sm:$0xff] }
 0x565   : > { %7525 = vmatprep.subr.msk.mxu1 %vm328_vm0, %v10167_v49  ;;  %2708 = vmatmul.mubr.f32.gmra.mxu0 %v10542_v4  ;;  %13526 = vst [vmem:[#allocation41_spill] sm:$0xff] %v10571_v42  ;;  %v10582_v37 = vpop.eup %7859  ;;  %7873 = vpow2.f32 %v2218_v59  ;;  %v2109_v38 = vsub.f32 %v13533_v36, %v10025_v25  ;;  %v13536_v59 = vld [vmem:[#allocation103_spill] sm:$0xff]  ;;  %v13588_v4 = vld [vmem:[#allocation128_spill] sm:$0xff] }
 0x566   : > { %2712 = vmatprep.mubr.f32.mxu0 %v10551_v13  ;;  %13528 = vst [vmem:[#allocation144_spill] sm:$0xff] %v10582_v37  ;;  %v10591_v56 = vpop.eup %7861  ;;  %7875 = vpow2.f32 %v2216_v40  ;;  %v2108_v27 = vsub.f32 %v13536_v59, %v10025_v25  ;;  %v13541_v25 = vld [vmem:[#allocation8_spill] sm:$0xff]  ;;  %v13546_v36 = vld [vmem:[#allocation7_spill] sm:$0xff]  ;;  %v13646_v13 = vld [vmem:[#allocation149_spill] sm:$0xff] }
 0x567   : > { %3442 = vmatmul.mubr.f32.gmra.mxu1 %v8320_v17  ;;  %13530 = vst [vmem:[#allocation38_spill] sm:$0xff] %v10591_v56  ;;  %v10605_v44 = vpop.eup %7863  ;;  %7877 = vpow2.f32 %v2224_v48  ;;  %v2228_v17 = vmul.f32 1.442695, %v2105_v3  ;;  %v2236_v26 = vmul.f32 1.442695, %v2109_v38  ;;  %v13544_v3 = vld [vmem:[#allocation108_spill] sm:$0xff] }
 0x568   : > { %7526 = vmatpush3.xpose.msk.msra.mxu1 %vm328_vm0, %v10167_v49  ;;  %3446 = vmatprep.mubr.f32.mxu1 %v8321_v8  ;;  %13532 = vst [vmem:[#allocation35_spill] sm:$0xff] %v10605_v44  ;;  %v10613_v60 = vpop.eup %7865  ;;  %7879 = vpow2.f32 %v2222_v43  ;;  %v13538_v8 = vld [vmem:[#allocation106_spill] sm:$0xff]  ;;  %v10641_v48 = vmul.f32 0.17677669, %v13541_v25  ;;  %v2234_v18 = vmul.f32 1.442695, %v2108_v27 }
 0x569   : > { %7527 = vmatprep.subr.msk.mxu1 %vm328_vm0, %v10250_v46  ;;  %2713 = vmatmul.mubr.f32.gmra.mxu0 %v10562_v5  ;;  %13534 = vst [vmem:[#allocation44_spill] sm:$0xff] %v10613_v60  ;;  %v10628_v24 = vpop.eup %7867  ;;  %7881 = vpow2.f32 %v2230_v19  ;;  %v2112_v40 = vsub.f32 %v13538_v8, %v10040_v2  ;;  %v10657_v38 = vmul.f32 0.17677669, %v13546_v36  ;;  %v13548_v59 = vld [vmem:[#allocation107_spill] sm:$0xff] }
 0x56a   : > { %2717 = vmatprep.mubr.f32.mxu0 %v10571_v42  ;;  %13537 = vst [vmem:[#allocation46_spill] sm:$0xff] %v10628_v24  ;;  %v10634_v11 = vpop.eup %7869  ;;  %7883 = vpow2.f32 %v2228_v17  ;;  %v2114_v27 = vsub.f32 %v13548_v59, %v10053_v28  ;;  %v13556_v59 = vld [vmem:[#allocation82_spill] sm:$0xff]  ;;  %v13638_v5 = vld [vmem:[#allocation147_spill] sm:$0xff] }
 0x56b   : > { %3447 = vmatmul.mubr.f32.gmra.mxu1 %v8322_v9  ;;  %13539 = vst [vmem:[#allocation48_spill] sm:$0xff] %v10634_v11  ;;  %v10637_v9 = vmul.f32 0.17677669, %v13540_v39  ;;  %7885 = vpow2.f32 %v2236_v26  ;;  %v2242_v33 = vmul.f32 1.442695, %v2112_v40  ;;  %v13550_v40 = vld [vmem:[#allocation110_spill] sm:$0xff] }
 0x56c   : > { %7528 = vmatpush3.xpose.msk.msra.mxu1 %vm328_vm0, %v10250_v46  ;;  %3451 = vmatprep.mubr.f32.mxu1 %v8323_v54  ;;  %v2111_v54 = vsub.f32 %v13542_v1, %v10040_v2  ;;  %v13547_v2 = vld [vmem:[#allocation10_spill] sm:$0xff]  ;;  %7887 = vpow2.f32 %v2234_v18  ;;  %v2118_v39 = vsub.f32 %v13550_v40, %v10064_v12  ;;  %v13552_v18 = vld [vmem:[#allocation9_spill] sm:$0xff] }
 0x56d   : > { %7529 = vmatprep.subr.msk.mxu1 %vm328_vm0, %v10261_v23  ;;  %2718 = vmatmul.mubr.f32.gmra.mxu0 %v10582_v37  ;;  %v10661_v51 = vmul.f32 0.17677669, %v13547_v2  ;;  %7889 = vpow2.f32 %v2242_v33  ;;  %v10677_v1 = vmul.f32 0.17677669, %v13552_v18  ;;  %v2246_v33 = vmul.f32 1.442695, %v2114_v27 }
 0x56e   : > { %2722 = vmatprep.mubr.f32.mxu0 %v10591_v56  ;;  %v2240_v17 = vmul.f32 1.442695, %v2111_v54  ;;  %v2254_v2 = vmul.f32 1.442695, %v2118_v39  ;;  %v13557_v40 = vld [vmem:[#allocation113_spill] sm:$0xff]  ;;  %v13561_v39 = vld [vmem:[#allocation112_spill] sm:$0xff] }
 0x56f   : > { %3452 = vmatmul.mubr.f32.gmra.mxu1 %v8324_v30  ;;  %v2115_v30 = vsub.f32 %v13544_v3, %v10053_v28  ;;  %v13553_v28 = vld [vmem:[#allocation12_spill] sm:$0xff]  ;;  %v13554_v3 = vld [vmem:[#allocation109_spill] sm:$0xff]  ;;  %v2121_v18 = vsub.f32 %v13557_v40, %v13556_v59  ;;  %v2120_v40 = vsub.f32 %v13561_v39, %v13556_v59  ;;  %v13576_v42 = vld [vmem:[#allocation122_spill] sm:$0xff] }
 0x570   : > { %7530 = vmatpush3.xpose.msk.msra.mxu1 %vm328_vm0, %v10261_v23  ;;  %7531 = vmatprep.mubr.msk.f32.mxu1 %vm328_vm0, %v10597_v20  ;;  %v10681_v54 = vmul.f32 0.17677669, %v13553_v28  ;;  %7891 = vpow2.f32 %v2240_v17  ;;  %v13559_v17 = vld [vmem:[#allocation11_spill] sm:$0xff]  ;;  %v13567_v59 = vld [vmem:[#allocation16_spill] sm:$0xff] }
 0x571   : > { %2723 = vmatmul.mubr.f32.gmra.mxu0 %v10605_v44  ;;  %4867 = vmatprep.subr.mxu1 %v13495_v41  ;;  %v10648_v43 = vpop.eup %7871  ;;  %v2248_v8 = vmul.f32 1.442695, %v2115_v30  ;;  %v2117_v30 = vsub.f32 %v13554_v3, %v10064_v12  ;;  %v10697_v27 = vmul.f32 0.17677669, %v13559_v17  ;;  %v13560_v12 = vld [vmem:[#allocation14_spill] sm:$0xff] }
 0x572   : > { %2727 = vmatprep.mubr.f32.mxu0 %v10613_v60  ;;  %13543 = vst [vmem:[#allocation50_spill] sm:$0xff] %v10648_v43  ;;  %v10654_v19 = vpop.eup %7873  ;;  %v10701_v3 = vmul.f32 0.17677669, %v13560_v12  ;;  %v2260_v17 = vmul.f32 1.442695, %v2121_v18  ;;  %v13568_v18 = vld [vmem:[#allocation115_spill] sm:$0xff] }
 0x573   : > { %7532 = vmatmul.mubr.msk.f32.vlgmr.msra.gmra.mxu1 %vm328_vm0, %v10616_v0  ;;  %13545 = vst [vmem:[#allocation55_spill] sm:$0xff] %v10654_v19  ;;  %v10668_v26 = vpop.eup %7875  ;;  %7893 = vpow2.f32 %v2248_v8  ;;  %v2252_v8 = vmul.f32 1.442695, %v2117_v30  ;;  %v10721_v39 = vmul.f32 0.17677669, %v13567_v59  ;;  %v13570_v60 = vld [vmem:[#allocation119_spill] sm:$0xff] }
 0x574   : > { %7534 = vmatprep.mubr.msk.f32.mxu1 %vm328_vm0, %v10621_v7  ;;  %13549 = vst [vmem:[#allocation54_spill] sm:$0xff] %v10668_v26  ;;  %v10674_v25 = vpop.eup %7877  ;;  %7895 = vpow2.f32 %v2246_v33  ;;  %v13566_v33 = vld [vmem:[#allocation13_spill] sm:$0xff] }
 0x575   : > { %2728 = vmatmul.mubr.f32.gmra.mxu0 %v10628_v24  ;;  %13551 = vst [vmem:[#allocation57_spill] sm:$0xff] %v10674_v25  ;;  %v10688_v36 = vpop.eup %7879  ;;  %7897 = vpow2.f32 %v2254_v2  ;;  %v10717_v30 = vmul.f32 0.17677669, %v13566_v33  ;;  %v2258_v2 = vmul.f32 1.442695, %v2120_v40 }
 0x576   : > { %2732 = vmatprep.mubr.f32.mxu0 %v10634_v11  ;;  %13555 = vst [vmem:[#allocation56_spill] sm:$0xff] %v10688_v36  ;;  %v10694_v28 = vpop.eup %7881  ;;  %7899 = vpow2.f32 %v2252_v8  ;;  %v13572_v8 = vld [vmem:[#allocation15_spill] sm:$0xff] }
 0x577   : > { %7535 = vmatmul.mubr.msk.f32.gmra.mxu1 %vm328_vm0, %v10637_v9  ;;  %13558 = vst [vmem:[#allocation59_spill] sm:$0xff] %v10694_v28  ;;  %v10708_v53 = vpop.eup %7883  ;;  %7901 = vpow2.f32 %v2260_v17  ;;  %v10737_v40 = vmul.f32 0.17677669, %v13572_v8  ;;  %v13574_v17 = vld [vmem:[#allocation118_spill] sm:$0xff] }
 0x578   : > { %7537 = vmatprep.mubr.msk.f32.mxu1 %vm328_vm0, %v10641_v48  ;;  %13562 = vst [vmem:[#allocation58_spill] sm:$0xff] %v10708_v53  ;;  %v10714_v12 = vpop.eup %7885  ;;  %7903 = vpow2.f32 %v2258_v2  ;;  %v13578_v2 = vld [vmem:[#allocation17_spill] sm:$0xff] }
 0x579   : > { %2733 = vmatmul.mubr.f32.gmra.mxu0 %v10648_v43  ;;  %13565 = vst [vmem:[#allocation61_spill] sm:$0xff] %v10714_v12 }
 0x57a   : > { %2737 = vmatprep.mubr.f32.mxu0 %v10654_v19  ;;  %v13564_v19 = vld [vmem:[#allocation116_spill] sm:$0xff] }
 0x57b   : > { %7538 = vmatmul.mubr.msk.f32.gmra.mxu1 %vm328_vm0, %v10657_v38 }
 0x57c   : > { %7540 = vmatprep.mubr.msk.f32.mxu1 %vm328_vm0, %v10661_v51 }
 0x57d   : > { %2738 = vmatmul.mubr.f32.gmra.mxu0 %v10668_v26  ;;  %v13563_v26 = vld [vmem:[#allocation83_spill] sm:$0xff] }
 0x57e   : > { %2742 = vmatprep.mubr.f32.mxu0 %v10674_v25  ;;  %v2124_v24 = vsub.f32 %v13564_v19, %v13563_v26  ;;  %v2123_v19 = vsub.f32 %v13568_v18, %v13563_v26  ;;  %v13573_v26 = vld [vmem:[#allocation18_spill] sm:$0xff] }
 0x57f   : > { %7541 = vmatmul.mubr.msk.f32.gmra.mxu1 %vm328_vm0, %v10677_v1  ;;  %v10741_v18 = vmul.f32 0.17677669, %v13573_v26 }
 0x580   : > { %7543 = vmatprep.mubr.msk.f32.mxu1 %vm328_vm0, %v10681_v54  ;;  %v2266_v33 = vmul.f32 1.442695, %v2124_v24  ;;  %v2264_v24 = vmul.f32 1.442695, %v2123_v19  ;;  %v10757_v19 = vmul.f32 0.17677669, %v13578_v2 }
 0x581   : > { %2743 = vmatmul.mubr.f32.gmra.mxu0 %v10688_v36  ;;  %v13596_v36 = vld [vmem:[#allocation131_spill] sm:$0xff] }
 0x582   : > { %2747 = vmatprep.mubr.f32.mxu0 %v10694_v28  ;;  %v10728_v28 = vpop.eup %7887  ;;  %7905 = vpow2.f32 %v2266_v33  ;;  %v13580_v33 = vld [vmem:[#allocation121_spill] sm:$0xff] }
 0x583   : > { %7544 = vmatmul.mubr.msk.f32.gmra.mxu1 %vm328_vm0, %v10697_v27  ;;  %13569 = vst [vmem:[#allocation60_spill] sm:$0xff] %v10728_v28  ;;  %v10734_v59 = vpop.eup %7889  ;;  %7907 = vpow2.f32 %v2264_v24  ;;  %v13584_v24 = vld [vmem:[#allocation19_spill] sm:$0xff] }
 0x584   : > { %7546 = vmatprep.mubr.msk.f32.mxu1 %vm328_vm0, %v10701_v3  ;;  %13571 = vst [vmem:[#allocation63_spill] sm:$0xff] %v10734_v59  ;;  %v10748_v37 = vpop.eup %7891 }
 0x585   : > { %2748 = vmatmul.mubr.f32.gmra.mxu0 %v10708_v53  ;;  %v2127_v53 = vsub.f32 %v13570_v60, %v10091_v29  ;;  %v2126_v60 = vsub.f32 %v13574_v17, %v10091_v29  ;;  %13575 = vst [vmem:[#allocation62_spill] sm:$0xff] %v10748_v37  ;;  %v10754_v26 = vpop.eup %7893  ;;  %v13579_v29 = vld [vmem:[#allocation20_spill] sm:$0xff] }
 0x586   : > { %2752 = vmatprep.mubr.f32.mxu0 %v10714_v12  ;;  %13577 = vst [vmem:[#allocation65_spill] sm:$0xff] %v10754_v26  ;;  %v10761_v17 = vmul.f32 0.17677669, %v13579_v29  ;;  %v13582_v12 = vld [vmem:[#allocation125_spill] sm:$0xff] }
 0x587   : > { %7547 = vmatmul.mubr.msk.f32.gmra.mxu1 %vm328_vm0, %v10717_v30  ;;  %v2272_v8 = vmul.f32 1.442695, %v2127_v53  ;;  %v2270_v53 = vmul.f32 1.442695, %v2126_v60  ;;  %v10777_v60 = vmul.f32 0.17677669, %v13584_v24 }
 0x588   : > { %7549 = vmatprep.mubr.msk.f32.mxu1 %vm328_vm0, %v10721_v39 }
 0x589   : > { %2753 = vmatmul.mubr.f32.gmra.mxu0 %v10728_v28  ;;  %v2130_v28 = vsub.f32 %v13576_v42, %v10103_v62  ;;  %v2129_v42 = vsub.f32 %v13580_v33, %v10103_v62  ;;  %7909 = vpow2.f32 %v2272_v8  ;;  %v13585_v62 = vld [vmem:[#allocation22_spill] sm:$0xff]  ;;  %v13586_v8 = vld [vmem:[#allocation124_spill] sm:$0xff] }
 0x58a   : > { %2757 = vmatprep.mubr.f32.mxu0 %v10734_v59  ;;  %v10768_v59 = vpop.eup %7895  ;;  %v10781_v33 = vmul.f32 0.17677669, %v13585_v62  ;;  %7911 = vpow2.f32 %v2270_v53  ;;  %v13590_v53 = vld [vmem:[#allocation21_spill] sm:$0xff] }
 0x58b   : > { %7550 = vmatmul.mubr.msk.f32.gmra.mxu1 %vm328_vm0, %v10737_v40  ;;  %13581 = vst [vmem:[#allocation64_spill] sm:$0xff] %v10768_v59  ;;  %v2278_v2 = vmul.f32 1.442695, %v2130_v28  ;;  %v10774_v29 = vpop.eup %7897  ;;  %v2276_v28 = vmul.f32 1.442695, %v2129_v42 }
 0x58c   : > { %7552 = vmatprep.mubr.msk.f32.mxu1 %vm328_vm0, %v10741_v18  ;;  %13583 = vst [vmem:[#allocation67_spill] sm:$0xff] %v10774_v29  ;;  %v10797_v42 = vmul.f32 0.17677669, %v13590_v53 }
 0x58d   : > { %2758 = vmatmul.mubr.f32.gmra.mxu0 %v10748_v37  ;;  %v2133_v37 = vsub.f32 %v13582_v12, %v10117_v16  ;;  %v2132_v12 = vsub.f32 %v13586_v8, %v10117_v16  ;;  %7913 = vpow2.f32 %v2278_v2  ;;  %v13592_v16 = vld [vmem:[#allocation24_spill] sm:$0xff] }
 0x58e   : > { %2762 = vmatprep.mubr.f32.mxu0 %v10754_v26  ;;  %v10788_v26 = vpop.eup %7899  ;;  %v10803_v8 = vmul.f32 0.17677669, %v13592_v16  ;;  %7915 = vpow2.f32 %v2276_v28  ;;  %v13598_v28 = vld [vmem:[#allocation23_spill] sm:$0xff] }
 0x58f   : > { %7553 = vmatmul.mubr.msk.f32.gmra.mxu1 %vm328_vm0, %v10757_v19  ;;  %13587 = vst [vmem:[#allocation66_spill] sm:$0xff] %v10788_v26  ;;  %v2284_v24 = vmul.f32 1.442695, %v2133_v37  ;;  %v10794_v62 = vpop.eup %7901  ;;  %v2282_v37 = vmul.f32 1.442695, %v2132_v12 }
 0x590   : > { %7555 = vmatprep.mubr.msk.f32.mxu1 %vm328_vm0, %v10761_v17  ;;  %13589 = vst [vmem:[#allocation69_spill] sm:$0xff] %v10794_v62  ;;  %v10810_v52 = vpop.eup %7903  ;;  %v10819_v12 = vmul.f32 0.17677669, %v13598_v28 }
 0x591   : > { %2763 = vmatmul.mubr.f32.gmra.mxu0 %v10768_v59  ;;  %v2136_v59 = vsub.f32 %v13588_v4, %v10130_v31  ;;  %v13593_v4 = vld [vmem:[#allocation127_spill] sm:$0xff]  ;;  %13594 = vst [vmem:[#allocation102_spill] sm:$0xff] %v10810_v52  ;;  %7917 = vpow2.f32 %v2284_v24  ;;  %v10816_v16 = vpop.eup %7905 }
 0x592   : > { %2767 = vmatprep.mubr.f32.mxu0 %v10774_v29  ;;  %v10799_v29 = vpop.f32.mrf.mxu1  ;;  %v2135_v2 = vsub.f32 %v13593_v4, %v10130_v31  ;;  %13597 = vst [vmem:[#allocation70_spill] sm:$0xff] %v10816_v16  ;;  %v13600_v31 = vld [vmem:[#allocation26_spill] sm:$0xff]  ;;  %7919 = vpow2.f32 %v2282_v37  ;;  %v10834_v28 = vpop.eup %7907 }
 0x593   : > { %7556 = vmatmul.mubr.msk.f32.gmra.mxu1 %vm328_vm0, %v10777_v60  ;;  %13591 = vst [vmem:[#allocation68_spill] sm:$0xff] %v10799_v29  ;;  %v2290_v53 = vmul.f32 1.442695, %v2136_v59  ;;  %v13595_v29 = vld [vmem:[#allocation117_spill] sm:$0xff]  ;;  %v10825_v4 = vmul.f32 0.17677669, %v13600_v31 }
 0x594   : > { %7558 = vmatprep.mubr.msk.f32.mxu1 %vm328_vm0, %v10781_v33  ;;  %v2288_v59 = vmul.f32 1.442695, %v2135_v2  ;;  %13603 = vst [vmem:[#allocation103_spill] sm:$0xff] %v10834_v28  ;;  %v13606_v2 = vld [vmem:[#allocation25_spill] sm:$0xff] }
 0x595   : > { %2768 = vmatmul.mubr.f32.gmra.mxu0 %v10788_v26  ;;  %v2139_v26 = vsub.f32 %v13596_v36, %v13595_v29  ;;  %v13601_v36 = vld [vmem:[#allocation130_spill] sm:$0xff]  ;;  %7921 = vpow2.f32 %v2290_v53  ;;  %v13608_v53 = vld [vmem:[#allocation133_spill] sm:$0xff] }
 0x596   : > { %2772 = vmatprep.mubr.f32.mxu0 %v10794_v62  ;;  %v10821_v62 = vpop.f32.mrf.mxu1  ;;  %v2138_v24 = vsub.f32 %v13601_v36, %v13595_v29  ;;  %v10840_v37 = vpop.eup %7909  ;;  %v13607_v29 = vld [vmem:[#allocation28_spill] sm:$0xff]  ;;  %7923 = vpow2.f32 %v2288_v59 }
 0x597   : > { %7559 = vmatmul.mubr.msk.f32.gmra.mxu1 %vm328_vm0, %v10797_v42  ;;  %13599 = vst [vmem:[#allocation104_spill] sm:$0xff] %v10821_v62  ;;  %v2296_v62 = vmul.f32 1.442695, %v2139_v26  ;;  %13605 = vst [vmem:[#allocation106_spill] sm:$0xff] %v10840_v37  ;;  %v10847_v36 = vmul.f32 0.17677669, %v13607_v29  ;;  %v10856_v43 = vpop.eup %7911 }
 0x598   : > { %7561 = vmatprep.mubr.msk.f32.mxu1 %vm328_vm0, %v10803_v8  ;;  %v10830_v25 = vpop.f32.mrf.mxu1  ;;  %v2294_v26 = vmul.f32 1.442695, %v2138_v24  ;;  %13610 = vst [vmem:[#allocation8_spill] sm:$0xff] %v10856_v43  ;;  %v13613_v24 = vld [vmem:[#allocation27_spill] sm:$0xff] }
 0x599   : > { %2773 = vmatmul.mubr.f32.gmra.mxu0 %v10810_v52  ;;  %13602 = vst [vmem:[#allocation6_spill] sm:$0xff] %v10830_v25  ;;  %v13604_v52 = vld [vmem:[#allocation134_spill] sm:$0xff]  ;;  %7925 = vpow2.f32 %v2296_v62 }
 0x59a   : > { %2777 = vmatprep.mubr.f32.mxu0 %v10816_v16  ;;  %v2142_v31 = vsub.f32 %v13604_v52, %v10149_v22  ;;  %v10843_v16 = vmul.f32 0.17677669, %v13606_v2  ;;  %v2141_v52 = vsub.f32 %v13608_v53, %v10149_v22  ;;  %v10852_v25 = vpop.f32.mrf.mxu1  ;;  %v10862_v59 = vpop.eup %7913  ;;  %v13615_v53 = vld [vmem:[#allocation30_spill] sm:$0xff]  ;;  %7927 = vpow2.f32 %v2294_v26  ;;  %v13620_v26 = vld [vmem:[#allocation29_spill] sm:$0xff] }
 0x59b   : > { %7562 = vmatmul.mubr.msk.f32.gmra.mxu1 %vm328_vm0, %v10819_v12  ;;  %13609 = vst [vmem:[#allocation5_spill] sm:$0xff] %v10852_v25  ;;  %13612 = vst [vmem:[#allocation105_spill] sm:$0xff] %v10862_v59  ;;  %v10871_v25 = vmul.f32 0.17677669, %v13615_v53  ;;  %v10878_v11 = vpop.eup %7915 }
 0x59c   : > { %7564 = vmatprep.mubr.msk.f32.mxu1 %vm328_vm0, %v10825_v4  ;;  %v2302_v2 = vmul.f32 1.442695, %v2142_v31  ;;  %v10867_v22 = vpop.f32.mrf.mxu1  ;;  %v2300_v62 = vmul.f32 1.442695, %v2141_v52  ;;  %13617 = vst [vmem:[#allocation7_spill] sm:$0xff] %v10878_v11 }
 0x59d   : > { %2778 = vmatmul.mubr.f32.gmra.mxu0 %v10834_v28  ;;  %v13611_v28 = vld [vmem:[#allocation137_spill] sm:$0xff]  ;;  %13614 = vst [vmem:[#allocation108_spill] sm:$0xff] %v10867_v22  ;;  %v13618_v22 = vld [vmem:[#allocation139_spill] sm:$0xff]  ;;  %v10887_v52 = vmul.f32 0.17677669, %v13620_v26 }
 0x59e   : > { %2782 = vmatprep.mubr.f32.mxu0 %v10840_v37  ;;  %v2145_v29 = vsub.f32 %v13611_v28, %v10158_v10  ;;  %v10865_v37 = vmul.f32 0.17677669, %v13613_v24  ;;  %v13616_v28 = vld [vmem:[#allocation136_spill] sm:$0xff]  ;;  %7929 = vpow2.f32 %v2302_v2  ;;  %v10884_v53 = vpop.eup %7917 }
 0x59f   : > { %7565 = vmatmul.mubr.msk.f32.gmra.mxu1 %vm328_vm0, %v10843_v16  ;;  %v2144_v31 = vsub.f32 %v13616_v28, %v10158_v10  ;;  %13619 = vst [vmem:[#allocation10_spill] sm:$0xff] %v10884_v53  ;;  %13621 = vst [vmem:[#allocation107_spill] sm:$0xff] %v10887_v52  ;;  %v13623_v10 = vld [vmem:[#allocation32_spill] sm:$0xff]  ;;  %7931 = vpow2.f32 %v2300_v62  ;;  %v10902_v26 = vpop.eup %7919 }
 0x5a0   : > { %7567 = vmatprep.mubr.msk.f32.mxu1 %vm328_vm0, %v10847_v36  ;;  %v2308_v24 = vmul.f32 1.442695, %v2145_v29  ;;  %v10893_v28 = vmul.f32 0.17677669, %v13623_v10  ;;  %v13625_v29 = vld [vmem:[#allocation140_spill] sm:$0xff]  ;;  %13627 = vst [vmem:[#allocation109_spill] sm:$0xff] %v10902_v26 }
 0x5a1   : > { %2783 = vmatmul.mubr.f32.gmra.mxu0 %v10856_v43  ;;  %v2148_v43 = vsub.f32 %v13618_v22, %v10230_v55  ;;  %v2306_v2 = vmul.f32 1.442695, %v2144_v31  ;;  %v2147_v22 = vsub.f32 %v13625_v29, %v10230_v55  ;;  %v13630_v31 = vld [vmem:[#allocation31_spill] sm:$0xff]  ;;  %v13632_v55 = vld [vmem:[#allocation36_spill] sm:$0xff] }
 0x5a2   : > { %2787 = vmatprep.mubr.f32.mxu0 %v10862_v59  ;;  %v10889_v59 = vpop.f32.mrf.mxu1  ;;  %13624 = vst [vmem:[#allocation9_spill] sm:$0xff] %v10893_v28  ;;  %7933 = vpow2.f32 %v2308_v24  ;;  %v10908_v62 = vpop.eup %7921  ;;  %v10915_v29 = vmul.f32 0.17677669, %v13632_v55  ;;  %v13634_v24 = vld [vmem:[#allocation145_spill] sm:$0xff] }
 0x5a3   : > { %7568 = vmatmul.mubr.msk.f32.gmra.mxu1 %vm328_vm0, %v10865_v37  ;;  %13622 = vst [vmem:[#allocation110_spill] sm:$0xff] %v10889_v59  ;;  %v2314_v59 = vmul.f32 1.442695, %v2148_v43  ;;  %13629 = vst [vmem:[#allocation82_spill] sm:$0xff] %v10908_v62  ;;  %7935 = vpow2.f32 %v2306_v2  ;;  %v2312_v43 = vmul.f32 1.442695, %v2147_v22  ;;  %v10924_v56 = vpop.eup %7923 }
 0x5a4   : > { %7570 = vmatprep.mubr.msk.f32.mxu1 %vm328_vm0, %v10871_v25  ;;  %v10898_v44 = vpop.f32.mrf.mxu1  ;;  %13633 = vst [vmem:[#allocation11_spill] sm:$0xff] %v10915_v29  ;;  %13636 = vst [vmem:[#allocation112_spill] sm:$0xff] %v10924_v56  ;;  %v13640_v22 = vld [vmem:[#allocation33_spill] sm:$0xff] }
 0x5a5   : > { %2788 = vmatmul.mubr.f32.gmra.mxu0 %v10878_v11  ;;  %13626 = vst [vmem:[#allocation12_spill] sm:$0xff] %v10898_v44  ;;  %v13628_v11 = vld [vmem:[#allocation142_spill] sm:$0xff]  ;;  %7937 = vpow2.f32 %v2314_v59 }
 0x5a6   : > { %2792 = vmatprep.mubr.f32.mxu0 %v10884_v53  ;;  %v2151_v10 = vsub.f32 %v13628_v11, %v10238_v61  ;;  %v10911_v53 = vmul.f32 0.17677669, %v13630_v31  ;;  %v2150_v11 = vsub.f32 %v13634_v24, %v10238_v61  ;;  %v10920_v44 = vpop.f32.mrf.mxu1  ;;  %v10930_v2 = vpop.eup %7925  ;;  %7939 = vpow2.f32 %v2312_v43  ;;  %v13649_v43 = vld [vmem:[#allocation150_spill] sm:$0xff] }
 0x5a7   : > { %7571 = vmatmul.mubr.msk.f32.gmra.mxu1 %vm328_vm0, %v10887_v52  ;;  %13635 = vst [vmem:[#allocation14_spill] sm:$0xff] %v10920_v44  ;;  %13639 = vst [vmem:[#allocation83_spill] sm:$0xff] %v10930_v2 }
 0x5a8   : > { %7573 = vmatprep.mubr.msk.f32.mxu1 %vm328_vm0, %v10893_v28  ;;  %13631 = vst [vmem:[#allocation113_spill] sm:$0xff] %v10911_v53  ;;  %v2320_v31 = vmul.f32 1.442695, %v2151_v10  ;;  %v10935_v61 = vpop.f32.mrf.mxu1  ;;  %v2318_v59 = vmul.f32 1.442695, %v2150_v11  ;;  %v13643_v10 = vld [vmem:[#allocation148_spill] sm:$0xff] }
 0x5a9   : > { %2793 = vmatmul.mubr.f32.gmra.mxu0 %v10902_v26  ;;  %v13637_v26 = vld [vmem:[#allocation34_spill] sm:$0xff]  ;;  %13642 = vst [vmem:[#allocation13_spill] sm:$0xff] %v10935_v61 }
 0x5aa   : > { %2797 = vmatprep.mubr.f32.mxu0 %v10908_v62  ;;  %v2154_v55 = vsub.f32 %v13638_v5, %v13637_v26  ;;  %v10933_v62 = vmul.f32 0.17677669, %v13640_v22  ;;  %v2153_v24 = vsub.f32 %v13643_v10, %v13637_v26  ;;  %v10943_v5 = vpop.eup %7927  ;;  %7941 = vpow2.f32 %v2320_v31  ;;  %v13645_v22 = vld [vmem:[#allocation43_spill] sm:$0xff] }
 0x5ab   : > { %7574 = vmatmul.mubr.msk.f32.gmra.mxu1 %vm328_vm0, %v10911_v53  ;;  %13644 = vst [vmem:[#allocation16_spill] sm:$0xff] %v10943_v5  ;;  %v2157_v23 = vsub.f32 %v13646_v13, %v13645_v22  ;;  %v10947_v61 = vpop.eup %7929  ;;  %7943 = vpow2.f32 %v2318_v59  ;;  %v2156_v11 = vsub.f32 %v13649_v43, %v13645_v22  ;;  %v13652_v13 = vld [vmem:[#allocation45_spill] sm:$0xff] }
 0x5ac   : > { %7576 = vmatprep.mubr.msk.f32.mxu1 %vm328_vm0, %v10915_v29  ;;  %13641 = vst [vmem:[#allocation116_spill] sm:$0xff] %v10933_v62  ;;  %v2326_v44 = vmul.f32 1.442695, %v2154_v55  ;;  %13647 = vst [vmem:[#allocation115_spill] sm:$0xff] %v10947_v61  ;;  %v2324_v26 = vmul.f32 1.442695, %v2153_v24  ;;  %v10957_v31 = vpop.eup %7931 }
 0x5ad   : > { %2798 = vmatmul.mubr.f32.gmra.mxu0 %v10924_v56  ;;  %v10949_v56 = vpop.f32.mrf.mxu1  ;;  %13651 = vst [vmem:[#allocation18_spill] sm:$0xff] %v10957_v31  ;;  %v2332_v55 = vmul.f32 1.442695, %v2157_v23  ;;  %v2330_v59 = vmul.f32 1.442695, %v2156_v11  ;;  %v13655_v24 = vld [vmem:[#allocation152_spill] sm:$0xff] }
 0x5ae   : > { %2802 = vmatprep.mubr.f32.mxu0 %v10930_v2  ;;  %13648 = vst [vmem:[#allocation119_spill] sm:$0xff] %v10949_v56  ;;  %7945 = vpow2.f32 %v2326_v44  ;;  %v13653_v2 = vld [vmem:[#allocation151_spill] sm:$0xff]  ;;  %v2159_v22 = vsub.f32 %v13655_v24, %v13652_v13  ;;  %v13658_v44 = vld [vmem:[#allocation153_spill] sm:$0xff]  ;;  %v13661_v11 = vld [vmem:[#allocation154_spill] sm:$0xff] }
 0x5af   : > { %7577 = vmatmul.mubr.msk.f32.gmra.mxu1 %vm328_vm0, %v10933_v62  ;;  %v10955_v10 = vpop.f32.mrf.mxu1  ;;  %v2160_v46 = vsub.f32 %v13653_v2, %v13652_v13  ;;  %v10961_v49 = vpop.eup %7933  ;;  %7947 = vpow2.f32 %v2324_v26  ;;  %v2163_v2 = vsub.f32 %v13658_v44, %v10280_v57  ;;  %v2162_v13 = vsub.f32 %v13661_v11, %v10280_v57 }
 0x5b0   : > { %13650 = vst [vmem:[#allocation15_spill] sm:$0xff] %v10955_v10  ;;  %13654 = vst [vmem:[#allocation118_spill] sm:$0xff] %v10961_v49  ;;  %v10969_v10 = vpop.eup %7935  ;;  %7949 = vpow2.f32 %v2332_v55  ;;  %v2336_v26 = vmul.f32 1.442695, %v2159_v22  ;;  %v13663_v55 = vld [vmem:[#allocation155_spill] sm:$0xff]  ;;  %v13666_v22 = vld [vmem:[#allocation156_spill] sm:$0xff] }
 0x5b1   : > { %2803 = vmatmul.mubr.f32.gmra.mxu0 %v10943_v5  ;;  %v10967_v43 = vpop.f32.mrf.mxu1  ;;  %13657 = vst [vmem:[#allocation17_spill] sm:$0xff] %v10969_v10  ;;  %v2338_v23 = vmul.f32 1.442695, %v2160_v46  ;;  %7951 = vpow2.f32 %v2330_v59  ;;  %v2344_v46 = vmul.f32 1.442695, %v2163_v2  ;;  %v2166_v44 = vsub.f32 %v13663_v55, %v10291_v45  ;;  %v13669_v2 = vld [vmem:[#allocation143_spill] sm:$0xff] }
 0x5b2   : > { %2807 = vmatprep.mubr.f32.mxu0 %v10947_v61  ;;  %13656 = vst [vmem:[#allocation122_spill] sm:$0xff] %v10967_v43  ;;  %v10973_v56 = vpop.eup %7937  ;;  %v2342_v59 = vmul.f32 1.442695, %v2162_v13  ;;  %v2165_v57 = vsub.f32 %v13666_v22, %v10291_v45  ;;  %v2169_v55 = vsub.f32 %v13669_v2, %v10240_v34 }
 0x5b3   : > { %13659 = vst [vmem:[#allocation20_spill] sm:$0xff] %v10973_v56  ;;  %v10975_v61 = vpop.f32.mrf.mxu1  ;;  %v10981_v24 = vpop.eup %7939  ;;  %7953 = vpow2.f32 %v2338_v23 }
 0x5b4   : > { %13660 = vst [vmem:[#allocation121_spill] sm:$0xff] %v10975_v61  ;;  %13662 = vst [vmem:[#allocation125_spill] sm:$0xff] %v10981_v24  ;;  %7955 = vpow2.f32 %v2336_v26  ;;  %v2350_v61 = vmul.f32 1.442695, %v2166_v44  ;;  %v13671_v26 = vld [vmem:[#allocation146_spill] sm:$0xff] }
 0x5b5   : > { %2808 = vmatmul.mubr.f32.gmra.mxu0 %v10957_v31  ;;  %v10987_v31 = vpop.f32.mrf.mxu1  ;;  %7957 = vpow2.f32 %v2344_v46  ;;  %v2168_v13 = vsub.f32 %v13671_v26, %v10240_v34  ;;  %v2348_v45 = vmul.f32 1.442695, %v2165_v57  ;;  %v13674_v46 = vld [vmem:[#allocation87_spill] sm:$0xff] }
 0x5b6   : > { %2812 = vmatprep.mubr.f32.mxu0 %v10961_v49  ;;  %13665 = vst [vmem:[#allocation22_spill] sm:$0xff] %v10987_v31  ;;  %7959 = vpow2.f32 %v2342_v59  ;;  %v2356_v31 = vmul.f32 1.442695, %v2169_v55  ;;  %v2172_v44 = vsub.f32 %v13674_v46, %v10336_v47  ;;  %v13677_v59 = vld [vmem:[#allocation111_spill] sm:$0xff] }
 0x5b7   : > { %v10985_v43 = vpop.eup %7941  ;;  %v10993_v11 = vpop.f32.mrf.mxu1  ;;  %7961 = vpow2.f32 %v2350_v61  ;;  %v2354_v34 = vmul.f32 1.442695, %v2168_v13  ;;  %v2171_v57 = vsub.f32 %v13677_v59, %v10336_v47 }
 0x5b8   : > { %13664 = vst [vmem:[#allocation19_spill] sm:$0xff] %v10985_v43  ;;  %13667 = vst [vmem:[#allocation124_spill] sm:$0xff] %v10993_v11  ;;  %v10995_v23 = vpop.eup %7943  ;;  %7963 = vpow2.f32 %v2348_v45  ;;  %v2362_v61 = vmul.f32 1.442695, %v2172_v44 }
 0x5b9   : > { %2813 = vmatmul.mubr.f32.gmra.mxu0 %v10969_v10  ;;  %13668 = vst [vmem:[#allocation128_spill] sm:$0xff] %v10995_v23  ;;  %v11005_v22 = vpop.f32.mrf.mxu1  ;;  %7965 = vpow2.f32 %v2356_v31 }
 0x5ba   : > { %2817 = vmatprep.mubr.f32.mxu0 %v10973_v56  ;;  %13672 = vst [vmem:[#allocation24_spill] sm:$0xff] %v11005_v22  ;;  %7967 = vpow2.f32 %v2354_v34 }
 0x5bb   : > { %v10999_v56 = vpop.eup %7945  ;;  %7969 = vpow2.f32 %v2362_v61 }
 0x5bc   : > { %13670 = vst [vmem:[#allocation21_spill] sm:$0xff] %v10999_v56  ;;  %v11007_v11 = vpop.eup %7947 }
 0x5bd   : > { %2818 = vmatmul.mubr.f32.gmra.mxu0 %v10981_v24  ;;  %13673 = vst [vmem:[#allocation127_spill] sm:$0xff] %v11007_v11  ;;  %v11011_v2 = vpop.eup %7949  ;;  %v11013_v24 = vpop.f32.mrf.mxu1 }
 0x5be   : > { %2822 = vmatprep.mubr.f32.mxu0 %v10985_v43  ;;  %13675 = vst [vmem:[#allocation117_spill] sm:$0xff] %v11011_v2  ;;  %13676 = vst [vmem:[#allocation131_spill] sm:$0xff] %v11013_v24  ;;  %v11019_v26 = vpop.eup %7951  ;;  %v2360_v24 = vmul.f32 1.442695, %v2171_v57 }
 0x5bf   : > { %13678 = vst [vmem:[#allocation23_spill] sm:$0xff] %v11019_v26  ;;  %v11023_v46 = vpop.f32.mrf.mxu1 }
 0x5c0   : > { %v11021_v55 = vpop.eup %7953  ;;  %13680 = vst [vmem:[#allocation130_spill] sm:$0xff] %v11023_v46  ;;  %7971 = vpow2.f32 %v2360_v24 }
 0x5c1   : > { %2823 = vmatmul.mubr.f32.gmra.mxu0 %v10995_v23  ;;  %13679 = vst [vmem:[#allocation26_spill] sm:$0xff] %v11021_v55  ;;  %v11027_v22 = vpop.f32.mrf.mxu1  ;;  %v11029_v13 = vpop.eup %7955 }
 0x5c2   : > { %2827 = vmatprep.mubr.f32.mxu0 %v10999_v56  ;;  %13681 = vst [vmem:[#allocation134_spill] sm:$0xff] %v11027_v22  ;;  %13682 = vst [vmem:[#allocation25_spill] sm:$0xff] %v11029_v13  ;;  %v11031_v47 = vpop.eup %7957 }
 0x5c3   : > { %13683 = vst [vmem:[#allocation28_spill] sm:$0xff] %v11031_v47  ;;  %v11035_v31 = vpop.f32.mrf.mxu1  ;;  %v11037_v45 = vpop.eup %7959 }
 0x5c4   : > { %13684 = vst [vmem:[#allocation133_spill] sm:$0xff] %v11035_v31  ;;  %13685 = vst [vmem:[#allocation137_spill] sm:$0xff] %v11037_v45  ;;  %v11039_v44 = vpop.eup %7961 }
 0x5c5   : > { %2828 = vmatmul.mubr.f32.gmra.mxu0 %v11007_v11  ;;  %13686 = vst [vmem:[#allocation27_spill] sm:$0xff] %v11039_v44  ;;  %v11041_v34 = vpop.f32.mrf.mxu1  ;;  %v11045_v59 = vpop.eup %7963 }
 0x5c6   : > { %2832 = vmatprep.mubr.f32.mxu0 %v11011_v2  ;;  %13687 = vst [vmem:[#allocation30_spill] sm:$0xff] %v11041_v34  ;;  %13688 = vst [vmem:[#allocation136_spill] sm:$0xff] %v11045_v59  ;;  %v11047_v57 = vpop.eup %7965 }
 0x5c7   : > { %13689 = vst [vmem:[#allocation139_spill] sm:$0xff] %v11047_v57  ;;  %v11049_v61 = vpop.f32.mrf.mxu1  ;;  %v11055_v22 = vpop.eup %7967 }
 0x5c8   : > { %13690 = vst [vmem:[#allocation29_spill] sm:$0xff] %v11049_v61  ;;  %13692 = vst [vmem:[#allocation140_spill] sm:$0xff] %v11055_v22  ;;  %v11057_v31 = vpop.eup %7969 }
 0x5c9   : > { %2833 = vmatmul.mubr.f32.gmra.mxu0 %v11019_v26  ;;  %v11053_v24 = vpop.f32.mrf.mxu1  ;;  %13693 = vst [vmem:[#allocation142_spill] sm:$0xff] %v11057_v31 }
 0x5ca   : > { %2837 = vmatprep.mubr.f32.mxu0 %v11021_v55  ;;  %13691 = vst [vmem:[#allocation32_spill] sm:$0xff] %v11053_v24 }
 0x5cb   : > { %v11061_v34 = vpop.f32.mrf.mxu1 }
 0x5cc   : > { %13694 = vst [vmem:[#allocation31_spill] sm:$0xff] %v11061_v34 }
 0x5cd   : > { %2838 = vmatmul.mubr.f32.gmra.mxu0 %v11029_v13  ;;  %v11063_v46 = vpop.eup %7971 }
 0x5ce   : > { %2842 = vmatprep.mubr.f32.mxu0 %v11031_v47  ;;  %13695 = vst [vmem:[#allocation36_spill] sm:$0xff] %v11063_v46 }
 0x5d1   : > { %2843 = vmatmul.mubr.f32.gmra.mxu0 %v11037_v45 }
 0x5d2   : > { %2847 = vmatprep.mubr.f32.mxu0 %v11039_v44  ;;  %v11065_v44 = vpop.f32.mrf.mxu1 }
 0x5d3   : > { %13696 = vst [vmem:[#allocation145_spill] sm:$0xff] %v11065_v44 }
 0x5d4   : > { %v11070_v24 = vpop.f32.mrf.mxu1 }
 0x5d5   : > { %2848 = vmatmul.mubr.f32.gmra.mxu0 %v11045_v59  ;;  %13697 = vst [vmem:[#allocation34_spill] sm:$0xff] %v11070_v24 }
 0x5d6   : > { %2852 = vmatprep.mubr.f32.mxu0 %v11047_v57  ;;  %v11072_v61 = vpop.f32.mrf.mxu1 }
 0x5d7   : > { %13698 = vst [vmem:[#allocation147_spill] sm:$0xff] %v11072_v61 }
 0x5d8   : > { %v11074_v59 = vpop.f32.mrf.mxu1 }
 0x5d9   : > { %2853 = vmatmul.mubr.f32.gmra.mxu0 %v11055_v22  ;;  %13699 = vst [vmem:[#allocation33_spill] sm:$0xff] %v11074_v59 }
 0x5da   : > { %2857 = vmatprep.mubr.f32.mxu0 %v11057_v31  ;;  %v11076_v13 = vpop.f32.mrf.mxu1 }
 0x5db   : > { %13700 = vst [vmem:[#allocation148_spill] sm:$0xff] %v11076_v13 }
 0x5dc   : > { %v11078_v31 = vpop.f32.mrf.mxu1 }
 0x5dd   : > { %2858 = vmatmul.mubr.f32.gmra.mxu0 %v11063_v46  ;;  %13701 = vst [vmem:[#allocation43_spill] sm:$0xff] %v11078_v31 }
 0x5de   : > { %7007 = vmatprep.mubr.msk.f32.mxu0 %vm328_vm0, %v10597_v20 }
 0x5ee   : > { %v11080_v34 = vpop.f32.mrf.mxu1 }
 0x5ef   : > { %13702 = vst [vmem:[#allocation149_spill] sm:$0xff] %v11080_v34 }
 0x5f0   : > { %v11082_v55 = vpop.f32.mrf.mxu1 }
 0x5f1   : > { %13703 = vst [vmem:[#allocation150_spill] sm:$0xff] %v11082_v55 }
 0x5f2   : > { %v6927_v44 = vpop.f32.mrf.mxu1 }
 0x5f4   : > { %v6928_v11 = vpop.f32.mrf.mxu1 }
 0x5f5   : > { %v11084_v46 = vadd.f32 %v6928_v11, %v6927_v44 }
 0x5f6   : > { %v6930_v56 = vpop.f32.mrf.mxu1 }
 0x5f7   : > { %4723 = vrot.lane.b32.xlu1 %v11084_v46, %s8333_s12 }
 0x5f8   : > { %v6931_v24 = vpop.f32.mrf.mxu1 }
 0x5f9   : > { %v11088_v61 = vadd.f32 %v6931_v24, %v6930_v56 }
 0x5fa   : > { %v6933_v59 = vpop.f32.mrf.mxu1 }
 0x5fb   : > { %4725 = vrot.lane.b32.xlu0 %v11088_v61, %s8333_s12 }
 0x5fc   : > { %v6934_v13 = vpop.f32.mrf.mxu1 }
 0x5fd   : > { %v11092_v31 = vadd.f32 %v6934_v13, %v6933_v59 }
 0x5fe   : > { %v6936_v34 = vpop.f32.mrf.mxu1 }
 0x5ff   : > { %4727 = vrot.lane.b32.xlu1 %v11092_v31, %s8333_s12 }
 0x600   : > { %v6937_v11 = vpop.f32.mrf.mxu1 }
 0x601   : > { %v11096_v44 = vadd.f32 %v6937_v11, %v6936_v34 }
 0x602   : > { %v6939_v55 = vpop.f32.mrf.mxu1 }
 0x603   : > { %4729 = vrot.lane.b32.xlu0 %v11096_v44, %s8333_s12 }
 0x604   : > { %v6940_v56 = vpop.f32.mrf.mxu1 }
 0x605   : > { %v11100_v24 = vadd.f32 %v6940_v56, %v6939_v55 }
 0x606   : > { %v6942_v22 = vpop.f32.mrf.mxu1 }
 0x607   : > { %4731 = vrot.lane.b32.xlu1 %v11100_v24, %s8333_s12 }
 0x608   : > { %v6943_v13 = vpop.f32.mrf.mxu1 }
 0x609   : > { %v11104_v59 = vadd.f32 %v6943_v13, %v6942_v22 }
 0x60a   : > { %v6945_v57 = vpop.f32.mrf.mxu1 }
 0x60b   : > { %4733 = vrot.lane.b32.xlu0 %v11104_v59, %s8333_s12 }
 0x60c   : > { %v6946_v34 = vpop.f32.mrf.mxu1 }
 0x60d   : > { %v11108_v11 = vadd.f32 %v6946_v34, %v6945_v57 }
 0x60e   : > { %v6948_v45 = vpop.f32.mrf.mxu1 }
 0x60f   : > { %4735 = vrot.lane.b32.xlu1 %v11108_v11, %s8333_s12 }
 0x610   : > { %v6949_v55 = vpop.f32.mrf.mxu1 }
 0x611   : > { %v11112_v56 = vadd.f32 %v6949_v55, %v6948_v45 }
 0x612   : > { %v6951_v47 = vpop.f32.mrf.mxu1 }
 0x613   : > { %4737 = vrot.lane.b32.xlu0 %v11112_v56, %s8333_s12 }
 0x614   : > { %v6952_v22 = vpop.f32.mrf.mxu1 }
 0x615   : > { %v11116_v13 = vadd.f32 %v6952_v22, %v6951_v47 }
 0x616   : > { %v6954_v26 = vpop.f32.mrf.mxu1 }
 0x617   : > { %4739 = vrot.lane.b32.xlu1 %v11116_v13, %s8333_s12 }
 0x618   : > { %v6955_v57 = vpop.f32.mrf.mxu1 }
 0x619   : > { %v11120_v34 = vadd.f32 %v6955_v57, %v6954_v26 }
 0x61a   : > { %v6957_v2 = vpop.f32.mrf.mxu1 }
 0x61b   : > { %4741 = vrot.lane.b32.xlu0 %v11120_v34, %s8333_s12 }
 0x61c   : > { %v6958_v45 = vpop.f32.mrf.mxu1 }
 0x61d   : > { %v6959_v55 = vadd.f32 %v6958_v45, %v6957_v2 }
 0x61e   : > { %v6960_v23 = vpop.f32.mrf.mxu1 }
 0x61f   : > { %4743 = vrot.lane.b32.xlu1 %v6959_v55, %s8333_s12 }
 0x620   : > { %v6961_v43 = vpop.f32.mrf.mxu1 }
 0x621   : > { %v11125_v10 = vpop.f32.mrf.mxu0  ;;  %v6962_v47 = vadd.f32 %v6961_v43, %v6960_v23 }
 0x622   : > { %13704 = vst [vmem:[#allocation45_spill] sm:$0xff] %v11125_v10 }
 0x623   : > { %v6963_v22 = vpop.f32.mrf.mxu1  ;;  %v2706_v49 = vpop.f32.mrf.mxu0  ;;  %4745 = vrot.lane.b32.xlu0 %v6962_v47, %s8333_s12 }
 0x625   : > { %v6964_v5 = vpop.f32.mrf.mxu1  ;;  %v11128_v26 = vpop.f32.mrf.mxu0 }
 0x626   : > { %13705 = vst [vmem:[#allocation151_spill] sm:$0xff] %v11128_v26  ;;  %v6965_v57 = vadd.f32 %v6964_v5, %v6963_v22  ;;  %v11139_v22 = vpop.permute.xlu0 %4781 }
 0x627   : > { %v6966_v15 = vpop.f32.mrf.mxu1  ;;  %v2711_v62 = vpop.f32.mrf.mxu0 }
 0x628   : > { %4747 = vrot.lane.b32.xlu1 %v6965_v57, %s8333_s12 }
 0x629   : > { %v6967_v2 = vpop.f32.mrf.mxu1  ;;  %v11131_v45 = vpop.f32.mrf.mxu0 }
 0x62a   : > { %13706 = vst [vmem:[#allocation152_spill] sm:$0xff] %v11131_v45  ;;  %v6968_v29 = vadd.f32 %v6967_v2, %v6966_v15 }
 0x62b   : > { %v6969_v53 = vpop.f32.mrf.mxu1  ;;  %v2716_v28 = vpop.f32.mrf.mxu0 }
 0x62c   : > { %4749 = vrot.lane.b32.xlu0 %v6968_v29, %s8333_s12  ;;  %v13710_v28 = vld [vmem:[#allocation76_spill] sm:$0xff] }
 0x62d   : > { %v6970_v43 = vpop.f32.mrf.mxu1  ;;  %v11134_v49 = vpop.f32.mrf.mxu0 }
 0x62e   : > { %13707 = vst [vmem:[#allocation153_spill] sm:$0xff] %v11134_v49  ;;  %v6971_v23 = vadd.f32 %v6970_v43, %v6969_v53 }
 0x62f   : > { %v6972_v10 = vpop.f32.mrf.mxu1  ;;  %v2721_v52 = vpop.f32.mrf.mxu0 }
 0x630   : > { %4751 = vrot.lane.b32.xlu1 %v6971_v23, %s8333_s12  ;;  %v11147_v52 = vpop.permute.xlu0 %4773 }
 0x631   : > { %v6973_v5 = vpop.f32.mrf.mxu1  ;;  %v11137_v62 = vpop.f32.mrf.mxu0 }
 0x632   : > { %13708 = vst [vmem:[#allocation154_spill] sm:$0xff] %v11137_v62  ;;  %v6974_v26 = vadd.f32 %v6973_v5, %v6972_v10  ;;  %v11154_v10 = vpop.permute.xlu1 %4785 }
 0x633   : > { %v2726_v45 = vpop.f32.mrf.mxu0 }
 0x634   : > { %4753 = vrot.lane.b32.xlu0 %v6974_v26, %s8333_s12  ;;  %6976 = vmatpush3.xpose.msk.msra.mxu0 %vm328_vm0, %v6974_v26  ;;  %v11161_v26 = vpop.permute.xlu0 %4771 }
 0x635   : > { %6977 = vmatprep.subr.msk.mxu0 %vm328_vm0, %v13407_v35  ;;  %v11145_v15 = vpop.f32.mrf.mxu0 }
 0x636   : > { %13709 = vst [vmem:[#allocation155_spill] sm:$0xff] %v11145_v15  ;;  %v11163_v5 = vpop.permute.xlu1 %4783 }
 0x637   : > { %v2731_v53 = vpop.f32.mrf.mxu0 }
 0x638   : > { %6978 = vmatpush3.xpose.msk.msra.mxu0 %vm328_vm0, %v6971_v23 }
 0x639   : > { %6979 = vmatprep.subr.msk.mxu0 %vm328_vm0, %v13710_v28  ;;  %v11152_v2 = vpop.f32.mrf.mxu0  ;;  %v11170_v28 = vpop.permute.xlu0 %4769 }
 0x63a   : > { %13711 = vst [vmem:[#allocation156_spill] sm:$0xff] %v11152_v2 }
 0x63b   : > { %v2736_v45 = vpop.f32.mrf.mxu0 }
 0x63c   : > { %6980 = vmatpush3.xpose.msk.msra.mxu0 %vm328_vm0, %v6968_v29  ;;  %v11177_v29 = vpop.permute.xlu1 %4779 }
 0x63d   : > { %6981 = vmatprep.subr.msk.mxu0 %vm328_vm0, %v13413_v14  ;;  %v11159_v35 = vpop.f32.mrf.mxu0 }
 0x63e   : > { %13712 = vst [vmem:[#allocation143_spill] sm:$0xff] %v11159_v35 }
 0x63f   : > { %v2741_v43 = vpop.f32.mrf.mxu0 }
 0x640   : > { %6982 = vmatpush3.xpose.msk.msra.mxu0 %vm328_vm0, %v6965_v57  ;;  %v13715_v57 = vld [vmem:[#allocation84_spill] sm:$0xff]  ;;  %v11184_v43 = vpop.permute.xlu0 %4761  ;;  %v11186_v35 = vpop.permute.xlu1 %4777 }
 0x641   : > { %6983 = vmatprep.subr.msk.mxu0 %vm328_vm0, %v13415_v63  ;;  %v11168_v23 = vpop.f32.mrf.mxu0 }
 0x642   : > { %13713 = vst [vmem:[#allocation146_spill] sm:$0xff] %v11168_v23 }
 0x643   : > { %v2746_v53 = vpop.f32.mrf.mxu0 }
 0x644   : > { %6984 = vmatpush3.xpose.msk.msra.mxu0 %vm328_vm0, %v6962_v47 }
 0x645   : > { %6985 = vmatprep.subr.msk.mxu0 %vm328_vm0, %v13418_v6  ;;  %v11175_v14 = vpop.f32.mrf.mxu0  ;;  %v13717_v6 = vld [vmem:[#allocation86_spill] sm:$0xff] }
 0x646   : > { %13714 = vst [vmem:[#allocation87_spill] sm:$0xff] %v11175_v14  ;;  %v11202_v14 = vpop.permute.xlu1 %4775 }
 0x647   : > { %v2751_v45 = vpop.f32.mrf.mxu0 }
 0x648   : > { %6986 = vmatpush3.xpose.msk.msra.mxu0 %vm328_vm0, %v6959_v55  ;;  %v11194_v55 = vpop.permute.xlu0 %4759 }
 0x649   : > { %6987 = vmatprep.subr.msk.mxu0 %vm328_vm0, %v13715_v57  ;;  %v11182_v63 = vpop.f32.mrf.mxu0  ;;  %v13719_v57 = vld [vmem:[#allocation88_spill] sm:$0xff] }
 0x64a   : > { %13716 = vst [vmem:[#allocation111_spill] sm:$0xff] %v11182_v63 }
 0x64b   : > { %v2756_v53 = vpop.f32.mrf.mxu0 }
 0x64c   : > { %6988 = vmatpush3.xpose.msk.msra.mxu0 %vm328_vm0, %v11120_v34 }
 0x64d   : > { %6989 = vmatprep.subr.msk.mxu0 %vm328_vm0, %v13717_v6  ;;  %v11192_v47 = vpop.f32.mrf.mxu0  ;;  %v4818_v6 = vpop.permute.xlu0 %4817 }
 0x64e   : > { %13718 = vst [vmem:[#allocation76_spill] sm:$0xff] %v11192_v47  ;;  %v11210_v47 = vpop.permute.xlu1 %4767 }
 0x64f   : > { %v2761_v45 = vpop.f32.mrf.mxu0 }
 0x650   : > { %6990 = vmatpush3.xpose.msk.msra.mxu0 %vm328_vm0, %v11116_v13 }
 0x651   : > { %6991 = vmatprep.subr.msk.mxu0 %vm328_vm0, %v13719_v57  ;;  %v11200_v53 = vpop.f32.mrf.mxu0  ;;  %v4814_v57 = vpop.permute.xlu0 %4813 }
 0x652   : > { %13720 = vst [vmem:[#allocation84_spill] sm:$0xff] %v11200_v53 }
 0x653   : > { %v2766_v15 = vpop.f32.mrf.mxu0 }
 0x654   : > { %6992 = vmatpush3.xpose.msk.msra.mxu0 %vm328_vm0, %v11112_v56  ;;  %v11224_v56 = vpop.permute.xlu1 %4765 }
 0x655   : > { %6993 = vmatprep.subr.msk.mxu0 %vm328_vm0, %v9272_v32  ;;  %v11208_v34 = vpop.f32.mrf.mxu0 }
 0x656   : > { %13721 = vst [vmem:[#allocation86_spill] sm:$0xff] %v11208_v34 }
 0x657   : > { %v2771_v45 = vpop.f32.mrf.mxu0 }
 0x658   : > { %6994 = vmatpush3.xpose.msk.msra.mxu0 %vm328_vm0, %v11108_v11  ;;  %v13724_v11 = vld [vmem:[#allocation92_spill] sm:$0xff] }
 0x659   : > { %6995 = vmatprep.subr.msk.mxu0 %vm328_vm0, %v9286_v21  ;;  %v11216_v13 = vpop.f32.mrf.mxu0 }
 0x65a   : > { %13722 = vst [vmem:[#allocation88_spill] sm:$0xff] %v11216_v13  ;;  %v11232_v13 = vpop.permute.xlu1 %4763 }
 0x65b   : > { %v2776_v15 = vpop.f32.mrf.mxu0 }
 0x65c   : > { %6996 = vmatpush3.xpose.msk.msra.mxu0 %vm328_vm0, %v11104_v59  ;;  %v4812_v15 = vpop.permute.xlu0 %4811 }
 0x65d   : > { %6997 = vmatprep.subr.msk.mxu0 %vm328_vm0, %v9298_v58  ;;  %v11222_v32 = vpop.f32.mrf.mxu0  ;;  %v13726_v58 = vld [vmem:[#allocation40_spill] sm:$0xff] }
 0x65e   : > { %13723 = vst [vmem:[#allocation159_spill] sm:$0xff] %v11222_v32 }
 0x65f   : > { %v2781_v45 = vpop.f32.mrf.mxu0 }
 0x660   : > { %6998 = vmatpush3.xpose.msk.msra.mxu0 %vm328_vm0, %v11100_v24  ;;  %v4808_v32 = vpop.permute.xlu0 %4807 }
 0x661   : > { %6999 = vmatprep.subr.msk.mxu0 %vm328_vm0, %v13724_v11  ;;  %v11230_v21 = vpop.f32.mrf.mxu0 }
 0x662   : > { %13725 = vst [vmem:[#allocation92_spill] sm:$0xff] %v11230_v21 }
 0x663   : > { %v2786_v34 = vpop.f32.mrf.mxu0 }
 0x664   : > { %7000 = vmatpush3.xpose.msk.msra.mxu0 %vm328_vm0, %v11096_v44  ;;  %v11246_v34 = vpop.permute.xlu1 %4757  ;;  %v13729_v44 = vld [vmem:[#allocation95_spill] sm:$0xff] }
 0x665   : > { %7001 = vmatprep.subr.msk.mxu0 %vm328_vm0, %v13726_v58  ;;  %v11238_v59 = vpop.f32.mrf.mxu0 }
 0x666   : > { %13727 = vst [vmem:[#allocation40_spill] sm:$0xff] %v11238_v59 }
 0x667   : > { %v2791_v45 = vpop.f32.mrf.mxu0 }
 0x668   : > { %7002 = vmatpush3.xpose.msk.msra.mxu0 %vm328_vm0, %v11092_v31  ;;  %v4806_v45 = vpop.permute.xlu0 %4805  ;;  %v11254_v59 = vpop.permute.xlu1 %4755 }
 0x669   : > { %7003 = vmatprep.subr.msk.mxu0 %vm328_vm0, %v10298_v50  ;;  %v11244_v24 = vpop.f32.mrf.mxu0 }
 0x66a   : > { %13728 = vst [vmem:[#allocation160_spill] sm:$0xff] %v11244_v24 }
 0x66b   : > { %v2796_v11 = vpop.f32.mrf.mxu0 }
 0x66c   : > { %7004 = vmatpush3.xpose.msk.msra.mxu0 %vm328_vm0, %v11088_v61  ;;  %v4804_v61 = vpop.permute.xlu0 %4803  ;;  %v4816_v24 = vpop.permute.xlu1 %4815 }
 0x66d   : > { %7005 = vmatprep.subr.msk.mxu0 %vm328_vm0, %v13729_v44  ;;  %v11252_v58 = vpop.f32.mrf.mxu0 }
 0x66e   : > { %13730 = vst [vmem:[#allocation95_spill] sm:$0xff] %v11252_v58 }
 0x66f   : > { %v2801_v31 = vpop.f32.mrf.mxu0 }
 0x670   : > { %7006 = vmatpush3.xpose.msk.msra.mxu0 %vm328_vm0, %v11084_v46  ;;  %v4800_v31 = vpop.permute.xlu0 %4799 }
 0x671   : > { %7579 = vmatprep.subr.mxu0 %v4818_v6  ;;  %v11258_v50 = vpop.f32.mrf.mxu0 }
 0x672   : > { %13731 = vst [vmem:[#allocation161_spill] sm:$0xff] %v11258_v50 }
 0x673   : > { %7008 = vmatmul.mubr.msk.f32.vlgmr.msra.gmra.mxu0 %vm328_vm0, %v10597_v20  ;;  %v2806_v11 = vpop.f32.mrf.mxu0 }
 0x674   : > { %7009 = vmatprep.mubr.msk.f32.mxu0 %vm328_vm0, %v10616_v0  ;;  %7580 = vmatpush3.msra.mxu0 %v4818_v6  ;;  %v4810_v11 = vpop.permute.xlu1 %4809 }
 0x675   : > { %7581 = vmatprep.subr.mxu0 %v4816_v24  ;;  %v11264_v44 = vpop.f32.mrf.mxu0 }
 0x676   : > { %13732 = vst [vmem:[#allocation162_spill] sm:$0xff] %v11264_v44  ;;  %7582 = vmatpush3.msra.mxu0 %v4816_v24  ;;  %v4798_v24 = vpop.permute.xlu0 %4797 }
 0x677   : > { %7010 = vmatmul.mubr.msk.f32.gmra.mxu0 %vm328_vm0, %v10616_v0  ;;  %7583 = vmatprep.subr.mxu0 %v4814_v57  ;;  %v2811_v46 = vpop.f32.mrf.mxu0 }
 0x678   : > { %7011 = vmatprep.mubr.msk.f32.mxu0 %vm328_vm0, %v10621_v7  ;;  %7584 = vmatpush3.msra.mxu0 %v4814_v57 }
 0x679   : > { %7585 = vmatprep.subr.mxu0 %v4812_v15  ;;  %v11270_v20 = vpop.f32.mrf.mxu0 }
 0x67a   : > { %13733 = vst [vmem:[#allocation163_spill] sm:$0xff] %v11270_v20  ;;  %7586 = vmatpush3.msra.mxu0 %v4812_v15  ;;  %v4802_v15 = vpop.permute.xlu1 %4801  ;;  %v4796_v46 = vpop.permute.xlu0 %4795 }
 0x67b   : > { %7012 = vmatmul.mubr.msk.f32.gmra.mxu0 %vm328_vm0, %v10621_v7  ;;  %7587 = vmatprep.subr.mxu0 %v4810_v11  ;;  %v2816_v6 = vpop.f32.mrf.mxu0 }
 0x67c   : > { %7013 = vmatprep.mubr.msk.f32.mxu0 %vm328_vm0, %v10637_v9  ;;  %7588 = vmatpush3.msra.mxu0 %v4810_v11 }
 0x67d   : > { %7589 = vmatprep.subr.mxu0 %v4808_v32  ;;  %v11276_v0 = vpop.f32.mrf.mxu0 }
 0x67e   : > { %13734 = vst [vmem:[#allocation164_spill] sm:$0xff] %v11276_v0  ;;  %7590 = vmatpush3.msra.mxu0 %v4808_v32 }
 0x67f   : > { %7014 = vmatmul.mubr.msk.f32.gmra.mxu0 %vm328_vm0, %v10637_v9  ;;  %7591 = vmatprep.subr.mxu0 %v4806_v45  ;;  %v2821_v57 = vpop.f32.mrf.mxu0 }
 0x680   : > { %7015 = vmatprep.mubr.msk.f32.mxu0 %vm328_vm0, %v10641_v48  ;;  %7592 = vmatpush3.msra.mxu0 %v4806_v45 }
 0x681   : > { %7593 = vmatprep.subr.mxu0 %v4804_v61  ;;  %v11282_v7 = vpop.f32.mrf.mxu0 }
 0x682   : > { %13735 = vst [vmem:[#allocation165_spill] sm:$0xff] %v11282_v7  ;;  %7594 = vmatpush3.msra.mxu0 %v4804_v61  ;;  %v11296_v61 = vpop.permute.xlu0 %4725 }
 0x683   : > { %7016 = vmatmul.mubr.msk.f32.gmra.mxu0 %vm328_vm0, %v10641_v48  ;;  %7595 = vmatprep.subr.mxu0 %v4802_v15  ;;  %v2826_v32 = vpop.f32.mrf.mxu0 }
 0x684   : > { %7017 = vmatprep.mubr.msk.f32.mxu0 %vm328_vm0, %v10657_v38  ;;  %7596 = vmatpush3.msra.mxu0 %v4802_v15 }
 0x685   : > { %7597 = vmatprep.subr.mxu0 %v4800_v31  ;;  %v11288_v9 = vpop.f32.mrf.mxu0 }
 0x686   : > { %13736 = vst [vmem:[#allocation166_spill] sm:$0xff] %v11288_v9  ;;  %7598 = vmatpush3.msra.mxu0 %v4800_v31  ;;  %v11300_v31 = vpop.permute.xlu1 %4723  ;;  %v11306_v6 = vpop.permute.xlu0 %4729 }
 0x687   : > { %7018 = vmatmul.mubr.msk.f32.gmra.mxu0 %vm328_vm0, %v10657_v38  ;;  %7599 = vmatprep.subr.mxu0 %v4798_v24  ;;  %v2831_v45 = vpop.f32.mrf.mxu0 }
 0x688   : > { %7019 = vmatprep.mubr.msk.f32.mxu0 %vm328_vm0, %v10661_v51  ;;  %7600 = vmatpush3.msra.mxu0 %v4798_v24 }
 0x689   : > { %7601 = vmatprep.subr.mxu0 %v4796_v46  ;;  %v11294_v48 = vpop.f32.mrf.mxu0 }
 0x68a   : > { %13737 = vst [vmem:[#allocation167_spill] sm:$0xff] %v11294_v48  ;;  %7602 = vmatpush3.msra.mxu0 %v4796_v46  ;;  %v11310_v24 = vpop.permute.xlu1 %4727  ;;  %v4734_v15 = vpop.permute.xlu0 %4733 }
 0x68b   : > { %7020 = vmatmul.mubr.msk.f32.gmra.mxu0 %vm328_vm0, %v10661_v51  ;;  %v2836_v11 = vpop.f32.mrf.mxu0 }
 0x68c   : > { %7021 = vmatprep.mubr.msk.f32.mxu0 %vm328_vm0, %v10677_v1 }
 0x68d   : > { %v11304_v38 = vpop.f32.mrf.mxu0 }
 0x68e   : > { %13738 = vst [vmem:[#allocation168_spill] sm:$0xff] %v11304_v38  ;;  %v4732_v46 = vpop.permute.xlu1 %4731 }
 0x68f   : > { %7022 = vmatmul.mubr.msk.f32.gmra.mxu0 %vm328_vm0, %v10677_v1  ;;  %v2841_v57 = vpop.f32.mrf.mxu0  ;;  %v4738_v1 = vpop.permute.xlu0 %4737 }
 0x690   : > { %7023 = vmatprep.mubr.msk.f32.mxu0 %vm328_vm0, %v10681_v54 }
 0x691   : > { %v11314_v51 = vpop.f32.mrf.mxu0 }
 0x692   : > { %13739 = vst [vmem:[#allocation169_spill] sm:$0xff] %v11314_v51  ;;  %v4736_v57 = vpop.permute.xlu1 %4735 }
 0x693   : > { %7024 = vmatmul.mubr.msk.f32.gmra.mxu0 %vm328_vm0, %v10681_v54  ;;  %v2846_v32 = vpop.f32.mrf.mxu0  ;;  %v4742_v9 = vpop.permute.xlu0 %4741 }
 0x694   : > { %7025 = vmatprep.mubr.msk.f32.mxu0 %vm328_vm0, %v10697_v27 }
 0x695   : > { %v11320_v45 = vpop.f32.mrf.mxu0 }
 0x696   : > { %13740 = vst [vmem:[#allocation170_spill] sm:$0xff] %v11320_v45  ;;  %v4740_v32 = vpop.permute.xlu1 %4739 }
 0x697   : > { %7026 = vmatmul.mubr.msk.f32.gmra.mxu0 %vm328_vm0, %v10697_v27  ;;  %v2851_v11 = vpop.f32.mrf.mxu0  ;;  %v4746_v0 = vpop.permute.xlu0 %4745 }
 0x698   : > { %7027 = vmatprep.mubr.msk.f32.mxu0 %vm328_vm0, %v10701_v3 }
 0x699   : > { %v11326_v38 = vpop.f32.mrf.mxu0 }
 0x69a   : > { %13741 = vst [vmem:[#allocation171_spill] sm:$0xff] %v11326_v38  ;;  %v4744_v11 = vpop.permute.xlu1 %4743 }
 0x69b   : > { %7028 = vmatmul.mubr.msk.f32.gmra.mxu0 %vm328_vm0, %v10701_v3  ;;  %v2856_v54 = vpop.f32.mrf.mxu0 }
 0x69c   : > { %7029 = vmatprep.mubr.msk.f32.mxu0 %vm328_vm0, %v10717_v30 }
 0x69d   : > { %v11332_v45 = vpop.f32.mrf.mxu0 }
 0x69e   : > { %13742 = vst [vmem:[#allocation172_spill] sm:$0xff] %v11332_v45  ;;  %v4750_v38 = vpop.permute.xlu0 %4749  ;;  %v4748_v3 = vpop.permute.xlu1 %4747 }
 0x69f   : > { %7030 = vmatmul.mubr.msk.f32.gmra.mxu0 %vm328_vm0, %v10717_v30  ;;  %v2861_v27 = vpop.f32.mrf.mxu0  ;;  %v13743_v30 = vld [vmem:[#allocation107_spill] sm:$0xff] }
 0x6a0   : > { %7031 = vmatprep.mubr.msk.f32.mxu0 %vm328_vm0, %v10721_v39 }
 0x6a2   : > { %v4752_v45 = vpop.permute.xlu1 %4751 }
 0x6a3   : > { %7032 = vmatmul.mubr.msk.f32.gmra.mxu0 %vm328_vm0, %v10721_v39  ;;  %v13744_v39 = vld [vmem:[#allocation9_spill] sm:$0xff] }
 0x6a4   : > { %7033 = vmatprep.mubr.msk.f32.mxu0 %vm328_vm0, %v10737_v40 }
 0x6a6   : > { %v4754_v54 = vpop.permute.xlu0 %4753 }
 0x6a7   : > { %7034 = vmatmul.mubr.msk.f32.gmra.mxu0 %vm328_vm0, %v10737_v40  ;;  %4868 = vmatpush1.msra.mxu1 %v4754_v54  ;;  %v13746_v40 = vld [vmem:[#allocation11_spill] sm:$0xff] }
 0x6a8   : > { %7035 = vmatprep.mubr.msk.f32.mxu0 %vm328_vm0, %v10741_v18  ;;  %4869 = vmatprep.subr.mxu1 %v13495_v41 }
 0x6a9   : > { %4870 = vmatpush1.msra.mxu1 %v4752_v45 }
 0x6aa   : > { %4871 = vmatprep.subr.mxu1 %v13495_v41 }
 0x6ab   : > { %7036 = vmatmul.mubr.msk.f32.gmra.mxu0 %vm328_vm0, %v10741_v18  ;;  %4872 = vmatpush1.msra.mxu1 %v4750_v38  ;;  %v13747_v18 = vld [vmem:[#allocation116_spill] sm:$0xff] }
 0x6ac   : > { %7037 = vmatprep.mubr.msk.f32.mxu0 %vm328_vm0, %v10757_v19  ;;  %4873 = vmatprep.subr.mxu1 %v13495_v41 }
 0x6ad   : > { %4874 = vmatpush1.msra.mxu1 %v4748_v3 }
 0x6ae   : > { %4875 = vmatprep.subr.mxu1 %v13495_v41 }
 0x6af   : > { %7038 = vmatmul.mubr.msk.f32.gmra.mxu0 %vm328_vm0, %v10757_v19  ;;  %4876 = vmatpush1.msra.mxu1 %v4746_v0  ;;  %v7533_v19 = vpop.f32.mrf.mxu1 }
 0x6b0   : > { %7039 = vmatprep.mubr.msk.f32.mxu0 %vm328_vm0, %v10761_v17  ;;  %4877 = vmatprep.subr.mxu1 %v13495_v41 }
 0x6b1   : > { %4878 = vmatpush1.msra.mxu1 %v4744_v11 }
 0x6b2   : > { %4879 = vmatprep.subr.mxu1 %v13495_v41 }
 0x6b3   : > { %7040 = vmatmul.mubr.msk.f32.gmra.mxu0 %vm328_vm0, %v10761_v17  ;;  %4880 = vmatpush1.msra.mxu1 %v4742_v9 }
 0x6b4   : > { %7041 = vmatprep.mubr.msk.f32.mxu0 %vm328_vm0, %v10777_v60  ;;  %4881 = vmatprep.subr.mxu1 %v13495_v41 }
 0x6b5   : > { %4882 = vmatpush1.msra.mxu1 %v4740_v32 }
 0x6b6   : > { %4883 = vmatprep.subr.mxu1 %v13495_v41 }
 0x6b7   : > { %7042 = vmatmul.mubr.msk.f32.gmra.mxu0 %vm328_vm0, %v10777_v60  ;;  %4884 = vmatpush1.msra.mxu1 %v4738_v1 }
 0x6b8   : > { %7043 = vmatprep.mubr.msk.f32.mxu0 %vm328_vm0, %v10781_v33  ;;  %4885 = vmatprep.subr.mxu1 %v13495_v41 }
 0x6b9   : > { %4886 = vmatpush1.msra.mxu1 %v4736_v57 }
 0x6ba   : > { %4887 = vmatprep.subr.mxu1 %v13495_v41 }
 0x6bb   : > { %7044 = vmatmul.mubr.msk.f32.gmra.mxu0 %vm328_vm0, %v10781_v33  ;;  %4888 = vmatpush1.msra.mxu1 %v4734_v15  ;;  %v13748_v33 = vld [vmem:[#allocation51_spill] sm:$0xff] }
 0x6bc   : > { %7045 = vmatprep.mubr.msk.f32.mxu0 %vm328_vm0, %v10797_v42  ;;  %4889 = vmatprep.subr.mxu1 %v13495_v41 }
 0x6bd   : > { %4890 = vmatpush1.msra.mxu1 %v4732_v46 }
 0x6be   : > { %4891 = vmatprep.subr.mxu1 %v13495_v41 }
 0x6bf   : > { %7046 = vmatmul.mubr.msk.f32.gmra.mxu0 %vm328_vm0, %v10797_v42  ;;  %4892 = vmatpush1.msra.mxu1 %v11306_v6 }
 0x6c0   : > { %7047 = vmatprep.mubr.msk.f32.mxu0 %vm328_vm0, %v10803_v8  ;;  %4893 = vmatprep.subr.mxu1 %v13495_v41 }
 0x6c1   : > { %4894 = vmatpush1.msra.mxu1 %v11310_v24 }
 0x6c2   : > { %4895 = vmatprep.subr.mxu1 %v13495_v41 }
 0x6c3   : > { %7048 = vmatmul.mubr.msk.f32.gmra.mxu0 %vm328_vm0, %v10803_v8  ;;  %4896 = vmatpush1.msra.mxu1 %v11296_v61  ;;  %v13749_v8 = vld [vmem:[#allocation52_spill] sm:$0xff] }
 0x6c4   : > { %7049 = vmatprep.mubr.msk.f32.mxu0 %vm328_vm0, %v10819_v12  ;;  %4897 = vmatprep.subr.mxu1 %v13495_v41 }
 0x6c5   : > { %4898 = vmatpush1.msra.mxu1 %v11300_v31 }
 0x6c6   : > { %4899 = vmatprep.subr.mxu1 %v13495_v41 }
 0x6c7   : > { %7050 = vmatmul.mubr.msk.f32.gmra.mxu0 %vm328_vm0, %v10819_v12  ;;  %4900 = vmatpush2.msra.mxu1 %v11154_v10 }
 0x6c8   : > { %7051 = vmatprep.mubr.msk.f32.mxu0 %vm328_vm0, %v10825_v4  ;;  %4901 = vmatprep.subr.mxu1 %v13495_v41 }
 0x6c9   : > { %4902 = vmatpush2.msra.mxu1 %v11163_v5 }
 0x6ca   : > { %4903 = vmatprep.subr.mxu1 %v13495_v41 }
 0x6cb   : > { %7052 = vmatmul.mubr.msk.f32.gmra.mxu0 %vm328_vm0, %v10825_v4  ;;  %4904 = vmatpush2.msra.mxu1 %v11139_v22  ;;  %v13750_v4 = vld [vmem:[#allocation53_spill] sm:$0xff] }
 0x6cc   : > { %7053 = vmatprep.mubr.msk.f32.mxu0 %vm328_vm0, %v10843_v16  ;;  %4905 = vmatprep.subr.mxu1 %v13495_v41 }
 0x6cd   : > { %4906 = vmatpush2.msra.mxu1 %v11177_v29 }
 0x6ce   : > { %4907 = vmatprep.subr.mxu1 %v13495_v41 }
 0x6cf   : > { %7054 = vmatmul.mubr.msk.f32.gmra.mxu0 %vm328_vm0, %v10843_v16  ;;  %4908 = vmatpush2.msra.mxu1 %v11186_v35 }
 0x6d0   : > { %7055 = vmatprep.mubr.msk.f32.mxu0 %vm328_vm0, %v10847_v36  ;;  %4909 = vmatprep.subr.mxu1 %v13495_v41 }
 0x6d1   : > { %4910 = vmatpush2.msra.mxu1 %v11202_v14 }
 0x6d2   : > { %4911 = vmatprep.subr.mxu1 %v13495_v41 }
 0x6d3   : > { %7056 = vmatmul.mubr.msk.f32.gmra.mxu0 %vm328_vm0, %v10847_v36  ;;  %4912 = vmatpush2.msra.mxu1 %v11147_v52 }
 0x6d4   : > { %7057 = vmatprep.mubr.msk.f32.mxu0 %vm328_vm0, %v10865_v37  ;;  %4913 = vmatprep.subr.mxu1 %v13495_v41 }
 0x6d5   : > { %4914 = vmatpush2.msra.mxu1 %v11161_v26 }
 0x6d6   : > { %4915 = vmatprep.subr.mxu1 %v13495_v41 }
 0x6d7   : > { %7058 = vmatmul.mubr.msk.f32.gmra.mxu0 %vm328_vm0, %v10865_v37  ;;  %4916 = vmatpush2.msra.mxu1 %v11170_v28  ;;  %v11488_v28 = vadd.f32 %v7533_v19, %v13750_v4 }
 0x6d8   : > { %7059 = vmatprep.mubr.msk.f32.mxu0 %vm328_vm0, %v10871_v25  ;;  %4917 = vmatprep.subr.mxu1 %v13495_v41 }
 0x6d9   : > { %4918 = vmatpush2.msra.mxu1 %v11210_v47 }
 0x6da   : > { %4919 = vmatprep.subr.mxu1 %v13495_v41 }
 0x6db   : > { %7060 = vmatmul.mubr.msk.f32.gmra.mxu0 %vm328_vm0, %v10871_v25  ;;  %4920 = vmatpush2.msra.mxu1 %v11224_v56  ;;  %v13745_v25 = vld [vmem:[#allocation113_spill] sm:$0xff] }
 0x6dc   : > { %7061 = vmatprep.mubr.msk.f32.mxu0 %vm328_vm0, %v13743_v30  ;;  %4921 = vmatprep.subr.mxu1 %v13495_v41 }
 0x6dd   : > { %4922 = vmatpush2.msra.mxu1 %v11232_v13 }
 0x6de   : > { %4923 = vmatprep.subr.mxu1 %v13495_v41 }
 0x6df   : > { %7062 = vmatmul.mubr.msk.f32.gmra.mxu0 %vm328_vm0, %v13743_v30  ;;  %4924 = vmatpush2.msra.mxu1 %v11184_v43 }
 0x6e0   : > { %7063 = vmatprep.mubr.msk.f32.mxu0 %vm328_vm0, %v13744_v39  ;;  %4925 = vmatprep.subr.mxu1 %v13495_v41 }
 0x6e1   : > { %4926 = vmatpush2.msra.mxu1 %v11194_v55 }
 0x6e2   : > { %4927 = vmatprep.subr.mxu1 %v13495_v41 }
 0x6e3   : > { %7064 = vmatmul.mubr.msk.f32.gmra.mxu0 %vm328_vm0, %v13744_v39  ;;  %4928 = vmatpush2.msra.mxu1 %v11246_v34 }
 0x6e4   : > { %7065 = vmatprep.mubr.msk.f32.mxu0 %vm328_vm0, %v13745_v25  ;;  %4929 = vmatprep.subr.mxu1 %v13495_v41  ;;  %v4020_v41 = vpop.f32.mrf.mxu1 }
 0x6e5   : > { %4930 = vmatpush2.msra.mxu1 %v11254_v59  ;;  %v11474_v37 = vadd.f32 %v4020_v41, %v13750_v4 }
 0x6e6   : > { %v11478_v22 = vpop.f32.mrf.mxu1 }
 0x6e7   : > { %7066 = vmatmul.mubr.msk.f32.gmra.mxu0 %vm328_vm0, %v13745_v25 }
 0x6e8   : > { %7067 = vmatprep.mubr.msk.f32.mxu0 %vm328_vm0, %v13746_v40  ;;  %v4030_v29 = vpop.f32.mrf.mxu1 }
 0x6e9   : > { %v11502_v59 = vadd.f32 %v4030_v29, %v13750_v4 }
 0x6ea   : > { %v7539_v0 = vpop.f32.mrf.mxu1 }
 0x6eb   : > { %7068 = vmatmul.mubr.msk.f32.gmra.mxu0 %vm328_vm0, %v13746_v40  ;;  %v11524_v32 = vadd.f32 %v7539_v0, %v13750_v4  ;;  %v13751_v40 = vld [vmem:[#allocation90_spill] sm:$0xff] }
 0x6ec   : > { %7069 = vmatprep.mubr.msk.f32.mxu0 %vm328_vm0, %v13747_v18  ;;  %v11511_v38 = vpop.f32.mrf.mxu1 }
 0x6ee   : > { %v7542_v15 = vpop.f32.mrf.mxu1 }
 0x6ef   : > { %7070 = vmatmul.mubr.msk.f32.gmra.mxu0 %vm328_vm0, %v13747_v18  ;;  %v11544_v41 = vadd.f32 %v7542_v15, %v13750_v4 }
 0x6f0   : > { %v11528_v11 = vpop.f32.mrf.mxu1 }
 0x6f2   : > { %v7545_v39 = vpop.f32.mrf.mxu1 }
 0x733   : > { %v3763_v17 = vpop.f32.mrf.mxu0 }
 0x734   : > { %v11468_v42 = vadd.f32 %v3763_v17, %v13748_v33 }
 0x735   : > { %v3765_v60 = vpop.f32.mrf.mxu0 }
 0x736   : > { %v11471_v16 = vadd.f32 %v3765_v60, %v13749_v8 }
 0x737   : > { %v3769_v12 = vpop.f32.mrf.mxu0 }
 0x738   : > { %v4179_v36 = vmax.f32 %v11468_v42, %v11471_v16  ;;  %v11481_v10 = vadd.f32 %v3769_v12, %v13748_v33  ;;  %v11548_v12 = vpop.f32.mrf.mxu1 }
 0x739   : > { %v3771_v52 = vpop.f32.mrf.mxu0 }
 0x73a   : > { %v11484_v35 = vadd.f32 %v3771_v52, %v13749_v8  ;;  %v4180_v26 = vmax.f32 %v4179_v36, %v11474_v37 }
 0x73b   : > { %v3775_v5 = vpop.f32.mrf.mxu0 }
 0x73c   : > { %v4183_v14 = vmax.f32 %v11481_v10, %v11484_v35  ;;  %4181 = vmax.xlane.f32.xlu0 %v4180_v26  ;;  %v11493_v47 = vadd.f32 %v3775_v5, %v13748_v33  ;;  %v7548_v5 = vpop.f32.mrf.mxu1 }
 0x73d   : > { %v3777_v43 = vpop.f32.mrf.mxu0 }
 0x73e   : > { %v11496_v55 = vadd.f32 %v3777_v43, %v13749_v8  ;;  %v4184_v13 = vmax.f32 %v4183_v14, %v11488_v28 }
 0x73f   : > { %v11499_v56 = vpop.f32.mrf.mxu0 }
 0x740   : > { %v4187_v34 = vmax.f32 %v11493_v47, %v11496_v55  ;;  %4185 = vmax.xlane.f32.xlu1 %v4184_v13 }
 0x741   : > { %v11506_v9 = vpop.f32.mrf.mxu0 }
 0x742   : > { %v4188_v61 = vmax.f32 %v4187_v34, %v11502_v59  ;;  %v11560_v34 = vadd.f32 %v7545_v39, %v13750_v4 }
 0x743   : > { %v11509_v31 = vpop.f32.mrf.mxu0 }
 0x744   : > { %4189 = vmax.xlane.f32.xlu0 %v4188_v61  ;;  %v4070_v61 = vpop.f32.mrf.mxu1  ;;  %v11644_v21 = vadd.f32 %v11509_v31, %v13748_v33 }
 0x745   : > { %v11513_v6 = vpop.f32.mrf.mxu0 }
 0x747   : > { %v3793_v24 = vpop.f32.mrf.mxu0 }
 0x748   : > { %v11516_v45 = vadd.f32 %v3793_v24, %v13748_v33 }
 0x749   : > { %v3795_v46 = vpop.f32.mrf.mxu0 }
 0x74a   : > { %v11519_v1 = vadd.f32 %v3795_v46, %v13749_v8 }
 0x74b   : > { %v11521_v57 = vpop.f32.mrf.mxu0 }
 0x74c   : > { %v4199_v27 = vmax.f32 %v11516_v45, %v11519_v1  ;;  %v11671_v2 = vadd.f32 %v11521_v57, %v13748_v33 }
 0x74d   : > { %v11530_v3 = vpop.f32.mrf.mxu0 }
 0x74e   : > { %v4200_v54 = vmax.f32 %v4199_v27, %v11524_v32 }
 0x74f   : > { %v3805_v30 = vpop.f32.mrf.mxu0 }
 0x750   : > { %4201 = vmax.xlane.f32.xlu0 %v4200_v54  ;;  %v11536_v18 = vadd.f32 %v3805_v30, %v13748_v33  ;;  %v11572_v30 = vadd.f32 %v4070_v61, %v13750_v4 }
 0x751   : > { %v3807_v25 = vpop.f32.mrf.mxu0  ;;  %4793 = vrot.lane.b32.xlu1 %v13751_v40, %s8333_s12 }
 0x752   : > { %v11539_v19 = vadd.f32 %v3807_v25, %v13749_v8  ;;  %v7551_v25 = vpop.f32.mrf.mxu1 }
 0x753   : > { %v11541_v17 = vpop.f32.mrf.mxu0  ;;  %v11612_v48 = vadd.f32 %v7551_v25, %v13750_v4 }
 0x754   : > { %v4207_v60 = vmax.f32 %v11536_v18, %v11539_v19  ;;  %v4080_v61 = vpop.f32.mrf.mxu1 }
 0x755   : > { %v11550_v36 = vpop.f32.mrf.mxu0  ;;  %13760 = vst [vmem:[#allocation90_spill] sm:$0xff] %v11612_v48 }
 0x756   : > { %v4208_v52 = vmax.f32 %v4207_v60, %v11544_v41  ;;  %v7554_v51 = vpop.f32.mrf.mxu1  ;;  %v11678_v62 = vadd.f32 %v11550_v36, %v13749_v8 }
 0x757   : > { %v3817_v26 = vpop.f32.mrf.mxu0  ;;  %v11661_v23 = vadd.f32 %v7554_v51, %v13750_v4 }
 0x758   : > { %4209 = vmax.xlane.f32.xlu0 %v4208_v52  ;;  %v11554_v29 = vadd.f32 %v3817_v26, %v13748_v33  ;;  %v4090_v7 = vpop.f32.mrf.mxu1  ;;  %13768 = vst [vmem:[#allocation180_spill] sm:$0xff] %v11678_v62 }
 0x759   : > { %v3819_v14 = vpop.f32.mrf.mxu0  ;;  %13767 = vst [vmem:[#allocation179_spill] sm:$0xff] %v11661_v23 }
 0x75a   : > { %v11557_v43 = vadd.f32 %v3819_v14, %v13749_v8 }
 0x75b   : > { %v3823_v13 = vpop.f32.mrf.mxu0 }
 0x75c   : > { %v4215_v0 = vmax.f32 %v11554_v29, %v11557_v43  ;;  %v11565_v15 = vadd.f32 %v3823_v13, %v13748_v33  ;;  %v11584_v13 = vadd.f32 %v7548_v5, %v13750_v4 }
 0x75d   : > { %v3825_v24 = vpop.f32.mrf.mxu0 }
 0x75e   : > { %v11568_v46 = vadd.f32 %v3825_v24, %v13749_v8  ;;  %v4216_v27 = vmax.f32 %v4215_v0, %v11560_v34  ;;  %13754 = vst [vmem:[#allocation113_spill] sm:$0xff] %v11584_v13 }
 0x75f   : > { %v3829_v54 = vpop.f32.mrf.mxu0 }
 0x760   : > { %v4219_v39 = vmax.f32 %v11565_v15, %v11568_v46  ;;  %4217 = vmax.xlane.f32.xlu0 %v4216_v27  ;;  %v11577_v60 = vadd.f32 %v3829_v54, %v13748_v33 }
 0x761   : > { %v3831_v40 = vpop.f32.mrf.mxu0 }
 0x762   : > { %13752 = vst [vmem:[#allocation107_spill] sm:$0xff] %v11577_v60  ;;  %v11580_v52 = vadd.f32 %v3831_v40, %v13749_v8  ;;  %v4220_v26 = vmax.f32 %v4219_v39, %v11572_v30  ;;  %v11596_v39 = vadd.f32 %v4080_v61, %v13750_v4 }
 0x763   : > { %v3835_v14 = vpop.f32.mrf.mxu0 }
 0x764   : > { %13753 = vst [vmem:[#allocation9_spill] sm:$0xff] %v11580_v52  ;;  %v4223_v0 = vmax.f32 %v11577_v60, %v11580_v52  ;;  %4221 = vmax.xlane.f32.xlu0 %v4220_v26  ;;  %v11589_v27 = vadd.f32 %v3835_v14, %v13748_v33  ;;  %13757 = vst [vmem:[#allocation51_spill] sm:$0xff] %v11596_v39 }
 0x765   : > { %v3837_v24 = vpop.f32.mrf.mxu0 }
 0x766   : > { %13755 = vst [vmem:[#allocation11_spill] sm:$0xff] %v11589_v27  ;;  %v11592_v54 = vadd.f32 %v3837_v24, %v13749_v8  ;;  %v4224_v40 = vmax.f32 %v4223_v0, %v11584_v13  ;;  %v11609_v0 = vadd.f32 %v11506_v9, %v13749_v8 }
 0x767   : > { %v3841_v44 = vpop.f32.mrf.mxu0 }
 0x768   : > { %13756 = vst [vmem:[#allocation116_spill] sm:$0xff] %v11592_v54  ;;  %v4227_v5 = vmax.f32 %v11589_v27, %v11592_v54  ;;  %4225 = vmax.xlane.f32.xlu0 %v4224_v40  ;;  %v11601_v58 = vadd.f32 %v3841_v44, %v13748_v33  ;;  %v11618_v44 = vadd.f32 %v11499_v56, %v13748_v33 }
 0x769   : > { %v3843_v26 = vpop.f32.mrf.mxu0  ;;  %v11634_v56 = vadd.f32 %v4090_v7, %v13750_v4 }
 0x76a   : > { %13758 = vst [vmem:[#allocation52_spill] sm:$0xff] %v11601_v58  ;;  %v11604_v14 = vadd.f32 %v3843_v26, %v13749_v8  ;;  %v4228_v24 = vmax.f32 %v4227_v5, %v11596_v39  ;;  %v4191_v25 = vmax.f32 %v11618_v44, %v11609_v0 }
 0x76b   : > { %v3847_v61 = vpop.f32.mrf.mxu0  ;;  %13763 = vst [vmem:[#allocation175_spill] sm:$0xff] %v11634_v56 }
 0x76c   : > { %13759 = vst [vmem:[#allocation53_spill] sm:$0xff] %v11604_v14  ;;  %v4231_v40 = vmax.f32 %v11601_v58, %v11604_v14  ;;  %4229 = vmax.xlane.f32.xlu0 %v4228_v24  ;;  %v11621_v5 = vadd.f32 %v3847_v61, %v13748_v33  ;;  %v11631_v24 = vadd.f32 %v11513_v6, %v13749_v8 }
 0x76d   : > { %v3849_v26 = vpop.f32.mrf.mxu0 }
 0x76e   : > { %13761 = vst [vmem:[#allocation173_spill] sm:$0xff] %v11621_v5  ;;  %v11624_v9 = vadd.f32 %v3849_v26, %v13749_v8  ;;  %v4232_v20 = vmax.f32 %v4231_v40, %v11612_v48  ;;  %v11640_v26 = vadd.f32 %v11478_v22, %v13750_v4  ;;  %v7557_v40 = vpop.f32.mrf.mxu1  ;;  %v11657_v22 = vadd.f32 %v11530_v3, %v13749_v8 }
 0x76f   : > { %v3853_v50 = vpop.f32.mrf.mxu0  ;;  %v11683_v48 = vadd.f32 %v11528_v11, %v13750_v4 }
 0x770   : > { %13762 = vst [vmem:[#allocation174_spill] sm:$0xff] %v11624_v9  ;;  %v4235_v61 = vmax.f32 %v11621_v5, %v11624_v9  ;;  %4233 = vmax.xlane.f32.xlu0 %v4232_v20  ;;  %13764 = vst [vmem:[#allocation176_spill] sm:$0xff] %v11640_v26  ;;  %v11647_v6 = vadd.f32 %v3853_v50, %v13748_v33  ;;  %v4195_v20 = vmax.f32 %v11644_v21, %v11631_v24 }
 0x771   : > { %v3855_v53 = vpop.f32.mrf.mxu0  ;;  %v4192_v31 = vmax.f32 %v4191_v25, %v11640_v26  ;;  %v4203_v51 = vmax.f32 %v11671_v2, %v11657_v22 }
 0x772   : > { %13765 = vst [vmem:[#allocation177_spill] sm:$0xff] %v11647_v6  ;;  %v11650_v7 = vadd.f32 %v3855_v53, %v13749_v8  ;;  %v4236_v49 = vmax.f32 %v4235_v61, %v11634_v56  ;;  %v11667_v53 = vadd.f32 %v11511_v38, %v13750_v4  ;;  %v4100_v61 = vpop.f32.mrf.mxu1 }
 0x773   : > { %v3859_v63 = vpop.f32.mrf.mxu0 }
 0x774   : > { %13766 = vst [vmem:[#allocation178_spill] sm:$0xff] %v11650_v7  ;;  %v4239_v50 = vmax.f32 %v11647_v6, %v11650_v7  ;;  %4237 = vmax.xlane.f32.xlu0 %v4236_v49  ;;  %v4196_v38 = vmax.f32 %v4195_v20, %v11667_v53  ;;  %v7560_v57 = vpop.f32.mrf.mxu1  ;;  %v4204_v7 = vmax.f32 %v4203_v51, %v11683_v48 }
 0x775   : > { %v3861_v3 = vpop.f32.mrf.mxu0  ;;  %4193 = vmax.xlane.f32.xlu1 %v4192_v31  ;;  %v11687_v31 = vadd.f32 %v11541_v17, %v13748_v33  ;;  %v11702_v17 = vadd.f32 %v7557_v40, %v13750_v4  ;;  %v11711_v6 = vadd.f32 %v3859_v63, %v13748_v33 }
 0x776   : > { %v4240_v25 = vmax.f32 %v4239_v50, %v11661_v23 }
 0x777   : > { %v3865_v49 = vpop.f32.mrf.mxu0  ;;  %13769 = vst [vmem:[#allocation181_spill] sm:$0xff] %v11687_v31  ;;  %v4211_v20 = vmax.f32 %v11687_v31, %v11678_v62  ;;  %13773 = vst [vmem:[#allocation185_spill] sm:$0xff] %v11702_v17 }
 0x778   : > { %4241 = vmax.xlane.f32.xlu0 %v4240_v25  ;;  %v11690_v23 = vadd.f32 %v3865_v49, %v13748_v33  ;;  %v11698_v25 = vadd.f32 %v3861_v3, %v13749_v8  ;;  %v11708_v49 = vadd.f32 %v11548_v12, %v13750_v4  ;;  %13775 = vst [vmem:[#allocation187_spill] sm:$0xff] %v11711_v6 }
 0x779   : > { %v3867_v50 = vpop.f32.mrf.mxu0  ;;  %4197 = vmax.xlane.f32.xlu1 %v4196_v38  ;;  %v11721_v12 = vadd.f32 %v4100_v61, %v13750_v4  ;;  %v11736_v61 = vadd.f32 %v7560_v57, %v13750_v4 }
 0x77a   : > { %13770 = vst [vmem:[#allocation182_spill] sm:$0xff] %v11690_v23  ;;  %v11693_v36 = vadd.f32 %v3867_v50, %v13749_v8  ;;  %13772 = vst [vmem:[#allocation184_spill] sm:$0xff] %v11698_v25  ;;  %v4110_v50 = vpop.f32.mrf.mxu1  ;;  %v4243_v51 = vmax.f32 %v11711_v6, %v11698_v25 }
 0x77b   : > { %v3871_v11 = vpop.f32.mrf.mxu0  ;;  %13774 = vst [vmem:[#allocation186_spill] sm:$0xff] %v11708_v49  ;;  %13777 = vst [vmem:[#allocation189_spill] sm:$0xff] %v11721_v12 }
 0x77c   : > { %13771 = vst [vmem:[#allocation183_spill] sm:$0xff] %v11693_v36  ;;  %v4247_v38 = vmax.f32 %v11690_v23, %v11693_v36  ;;  %v4212_v36 = vmax.f32 %v4211_v20, %v11708_v49  ;;  %v7563_v23 = vpop.f32.mrf.mxu1  ;;  %v11724_v63 = vadd.f32 %v3871_v11, %v13748_v33  ;;  %13781 = vst [vmem:[#allocation193_spill] sm:$0xff] %v11736_v61 }
 0x77d   : > { %v3873_v56 = vpop.f32.mrf.mxu0  ;;  %4205 = vmax.xlane.f32.xlu1 %v4204_v7 }
 0x77e   : > { %v4248_v3 = vmax.f32 %v4247_v38, %v11702_v17  ;;  %v11717_v40 = vadd.f32 %v3873_v56, %v13749_v8  ;;  %13778 = vst [vmem:[#allocation190_spill] sm:$0xff] %v11724_v63 }
 0x77f   : > { %v3877_v14 = vpop.f32.mrf.mxu0 }
 0x780   : > { %13776 = vst [vmem:[#allocation188_spill] sm:$0xff] %v11717_v40  ;;  %4249 = vmax.xlane.f32.xlu0 %v4248_v3  ;;  %v11727_v38 = vadd.f32 %v3877_v14, %v13748_v33  ;;  %v4251_v56 = vmax.f32 %v11724_v63, %v11717_v40  ;;  %v4244_v3 = vmax.f32 %v4243_v51, %v11721_v12  ;;  %v4120_v14 = vpop.f32.mrf.mxu1 }
 0x781   : > { %v3879_v7 = vpop.f32.mrf.mxu0  ;;  %4213 = vmax.xlane.f32.xlu1 %v4212_v36  ;;  %v11741_v36 = vadd.f32 %v4110_v50, %v13750_v4  ;;  %v11752_v63 = vadd.f32 %v4120_v14, %v13750_v4 }
 0x782   : > { %13779 = vst [vmem:[#allocation191_spill] sm:$0xff] %v11727_v38  ;;  %v11730_v17 = vadd.f32 %v3879_v7, %v13749_v8 }
 0x783   : > { %v3883_v20 = vpop.f32.mrf.mxu0  ;;  %13782 = vst [vmem:[#allocation194_spill] sm:$0xff] %v11741_v36  ;;  %v4252_v57 = vmax.f32 %v4251_v56, %v11741_v36  ;;  %13785 = vst [vmem:[#allocation197_spill] sm:$0xff] %v11752_v63  ;;  %v11764_v56 = vadd.f32 %v7563_v23, %v13750_v4 }
 0x784   : > { %13780 = vst [vmem:[#allocation192_spill] sm:$0xff] %v11730_v17  ;;  %v4255_v11 = vmax.f32 %v11727_v38, %v11730_v17  ;;  %v11744_v7 = vadd.f32 %v3883_v20, %v13748_v33 }
 0x785   : > { %v3885_v25 = vpop.f32.mrf.mxu0  ;;  %4245 = vmax.xlane.f32.xlu1 %v4244_v3  ;;  %13788 = vst [vmem:[#allocation200_spill] sm:$0xff] %v11764_v56 }
 0x786   : > { %13783 = vst [vmem:[#allocation195_spill] sm:$0xff] %v11744_v7  ;;  %v11747_v40 = vadd.f32 %v3885_v25, %v13749_v8  ;;  %v4256_v51 = vmax.f32 %v4255_v11, %v11736_v61 }
 0x787   : > { %v3889_v12 = vpop.f32.mrf.mxu0 }
 0x788   : > { %13784 = vst [vmem:[#allocation196_spill] sm:$0xff] %v11747_v40  ;;  %v4259_v50 = vmax.f32 %v11744_v7, %v11747_v40  ;;  %4257 = vmax.xlane.f32.xlu0 %v4256_v51  ;;  %v11757_v20 = vadd.f32 %v3889_v12, %v13748_v33 }
 0x789   : > { %v3891_v17 = vpop.f32.mrf.mxu0  ;;  %4253 = vmax.xlane.f32.xlu1 %v4252_v57 }
 0x78a   : > { %13786 = vst [vmem:[#allocation198_spill] sm:$0xff] %v11757_v20  ;;  %v11760_v25 = vadd.f32 %v3891_v17, %v13749_v8  ;;  %v4260_v3 = vmax.f32 %v4259_v50, %v11752_v63  ;;  %v13789_v50 = vld [vmem:[#allocation123_spill] sm:$0xff]  ;;  %v7566_v63 = vpop.f32.mrf.mxu1 }
 0x78b   : > { %v3895_v11 = vpop.f32.mrf.mxu0 }
 0x78c   : > { %13787 = vst [vmem:[#allocation199_spill] sm:$0xff] %v11760_v25  ;;  %v4263_v14 = vmax.f32 %v11757_v20, %v11760_v25  ;;  %v4130_v58 = vpop.f32.mrf.mxu1  ;;  %v13790_v25 = vld [vmem:[#allocation132_spill] sm:$0xff]  ;;  %v11789_v60 = vadd.f32 %v3895_v11, %v13748_v33 }
 0x78d   : > { %v3897_v61 = vpop.f32.mrf.mxu0  ;;  %4261 = vmax.xlane.f32.xlu1 %v4260_v3  ;;  %v11797_v54 = vadd.f32 %v4130_v58, %v13750_v4 }
 0x78e   : > { %v4264_v51 = vmax.f32 %v4263_v14, %v11764_v56  ;;  %v7569_v14 = vpop.f32.mrf.mxu1  ;;  %v11782_v13 = vadd.f32 %v3897_v61, %v13749_v8  ;;  %13793 = vst [vmem:[#allocation132_spill] sm:$0xff] %v11789_v60 }
 0x78f   : > { %v3901_v57 = vpop.f32.mrf.mxu0  ;;  %13795 = vst [vmem:[#allocation201_spill] sm:$0xff] %v11797_v54 }
 0x790   : > { %4265 = vmax.xlane.f32.xlu0 %v4264_v51  ;;  %v13791_v51 = vld [vmem:[#allocation135_spill] sm:$0xff]  ;;  %v4140_v20 = vpop.f32.mrf.mxu1  ;;  %13792 = vst [vmem:[#allocation123_spill] sm:$0xff] %v11782_v13  ;;  %v11814_v58 = vadd.f32 %v3901_v57, %v13748_v33 }
 0x791   : > { %v3903_v12 = vpop.f32.mrf.mxu0  ;;  %v11817_v27 = vadd.f32 %v4140_v20, %v13750_v4 }
 0x792   : > { %v11777_v9 = vpop.f32.mrf.mxu1  ;;  %v11805_v31 = vadd.f32 %v3903_v12, %v13749_v8  ;;  %13799 = vst [vmem:[#allocation205_spill] sm:$0xff] %v11814_v58 }
 0x793   : > { %v3907_v38 = vpop.f32.mrf.mxu0  ;;  %13800 = vst [vmem:[#allocation206_spill] sm:$0xff] %v11817_v27 }
 0x794   : > { %v11802_v61 = vadd.f32 %v3907_v38, %v13748_v33  ;;  %13797 = vst [vmem:[#allocation203_spill] sm:$0xff] %v11805_v31 }
 0x795   : > { %v3909_v36 = vpop.f32.mrf.mxu0 }
 0x796   : > { %v11794_v26 = vadd.f32 %v3909_v36, %v13749_v8  ;;  %13796 = vst [vmem:[#allocation202_spill] sm:$0xff] %v11802_v61 }
 0x797   : > { %v3913_v17 = vpop.f32.mrf.mxu0 }
 0x798   : > { %13794 = vst [vmem:[#allocation135_spill] sm:$0xff] %v11794_v26  ;;  %v4275_v11 = vmax.f32 %v11802_v61, %v11794_v26  ;;  %v11822_v12 = vadd.f32 %v3913_v17, %v13748_v33  ;;  %v4271_v26 = vmax.f32 %v11814_v58, %v11805_v31  ;;  %v11836_v61 = vadd.f32 %v7566_v63, %v13750_v4 }
 0x799   : > { %v3915_v40 = vpop.f32.mrf.mxu0 }
 0x79a   : > { %13801 = vst [vmem:[#allocation207_spill] sm:$0xff] %v11822_v12  ;;  %v4276_v20 = vmax.f32 %v4275_v11, %v11817_v27 }
 0x79b   : > { %v3919_v7 = vpop.f32.mrf.mxu0 }
 0x79c   : > { %v11839_v17 = vadd.f32 %v3919_v7, %v13748_v33 }
 0x79d   : > { %v3921_v23 = vpop.f32.mrf.mxu0 }
 0x79e   : > { %4791 = vrot.lane.b32.xlu1 %v13789_v50, %s8333_s12  ;;  %v4150_v50 = vpop.f32.mrf.mxu1 }
 0x79f   : > { %v3925_v6 = vpop.f32.mrf.mxu0 }
 0x7a1   : > { %v3927_v3 = vpop.f32.mrf.mxu0 }
 0x7a2   : > { %v11853_v7 = vadd.f32 %v3927_v3, %v13749_v8 }
 0x7a3   : > { %v11775_v56 = vpop.f32.mrf.mxu0 }
 0x7a5   : > { %v3933_v39 = vpop.f32.mrf.mxu0 }
 0x7a6   : > { %4789 = vrot.lane.b32.xlu0 %v13790_v25, %s8333_s12  ;;  %v11786_v25 = vpop.f32.mrf.mxu1 }
 0x7a7   : > { %v11779_v5 = vpop.f32.mrf.mxu0 }
 0x7a8   : > { %v11799_v62 = vpop.f32.mrf.mxu1 }
 0x7a9   : > { %v11784_v52 = vpop.f32.mrf.mxu0 }
 0x7aa   : > { %4787 = vrot.lane.b32.xlu0 %v13791_v51, %s8333_s12  ;;  %v4267_v51 = vmax.f32 %v11789_v60, %v11782_v13  ;;  %v11810_v13 = vadd.f32 %v3915_v40, %v13749_v8  ;;  %v11819_v38 = vpop.f32.mrf.mxu1  ;;  %v11827_v40 = vadd.f32 %v3921_v23, %v13749_v8  ;;  %v11845_v23 = vadd.f32 %v7569_v14, %v13750_v4 }
 0x7ab   : > { %v3943_v49 = vpop.f32.mrf.mxu0  ;;  %v4272_v14 = vmax.f32 %v4271_v26, %v11836_v61 }
 0x7ac   : > { %13798 = vst [vmem:[#allocation204_spill] sm:$0xff] %v11810_v13  ;;  %v4268_v60 = vmax.f32 %v4267_v51, %v11797_v54  ;;  %v4279_v57 = vmax.f32 %v11822_v12, %v11810_v13  ;;  %v4283_v63 = vmax.f32 %v11839_v17, %v11827_v40 }
 0x7ad   : > { %v3945_v36 = vpop.f32.mrf.mxu0 }
 0x7ae   : > { %v11830_v51 = vadd.f32 %v3945_v36, %v13749_v8  ;;  %v4170_v36 = vpop.f32.mrf.mxu1 }
 0x7c2   : > { %4269 = vmax.xlane.f32.xlu1 %v4268_v60  ;;  %v11842_v60 = vadd.f32 %v3943_v49, %v13748_v33 }
 0x7c4   : > { %v4299_v49 = vmax.f32 %v11842_v60, %v11830_v51 }
 0x7c5   : > { %v4182_v31 = vpop.xlane.xlu0 %4181 }
 0x7c6   : > { %v4307_v58 = vsub.f32 %v11468_v42, %v4182_v31  ;;  %v4308_v13 = vsub.f32 %v11471_v16, %v4182_v31  ;;  %v4309_v11 = vsub.f32 %v11474_v37, %v4182_v31  ;;  %4277 = vmax.xlane.f32.xlu1 %v4276_v20  ;;  %v4280_v42 = vmax.f32 %v4279_v57, %v11845_v23 }
 0x7c7   : > { %v11860_v16 = vadd.f32 %v4150_v50, %v13750_v4  ;;  %v11863_v37 = vadd.f32 %v4170_v36, %v13750_v4  ;;  %v11866_v31 = vadd.f32 %v3925_v6, %v13748_v33  ;;  %v11879_v57 = vadd.f32 %v3933_v39, %v13749_v8 }
 0x7c8   : > { %v4403_v12 = vmul.f32 1.442695, %v4307_v58  ;;  %v4405_v27 = vmul.f32 1.442695, %v4308_v13  ;;  %v4407_v54 = vmul.f32 1.442695, %v4309_v11  ;;  %v3949_v11 = vpop.f32.mrf.mxu0 }
 0x7c9   : > { %v11868_v3 = vpop.xlane.xlu1 %4185  ;;  %4273 = vmax.xlane.f32.xlu0 %v4272_v14  ;;  %v4287_v50 = vmax.f32 %v11866_v31, %v11853_v7  ;;  %v4300_v58 = vmax.f32 %v4299_v49, %v11863_v37  ;;  %v4284_v6 = vmax.f32 %v4283_v63, %v11860_v16  ;;  %v13803_v63 = vld [vmem:[#allocation42_spill] sm:$0xff] }
 0x7ca   : > { %7973 = vpow2.f32 %v4403_v12  ;;  %v4310_v26 = vsub.f32 %v11481_v10, %v11868_v3  ;;  %v4311_v13 = vsub.f32 %v11484_v35, %v11868_v3  ;;  %4281 = vmax.xlane.f32.xlu1 %v4280_v42  ;;  %v11883_v10 = vadd.f32 %v11777_v9, %v13750_v4  ;;  %v13802_v9 = vld [vmem:[#allocation101_spill] sm:$0xff] }
 0x7cb   : > { %7975 = vpow2.f32 %v4405_v27  ;;  %v11889_v27 = vadd.f32 %v11775_v56, %v13748_v33  ;;  %v2374_v49 = vadd.f32 %v13803_v63, %v13802_v9  ;;  %v11927_v63 = vadd.f32 %v3949_v11, %v13748_v33  ;;  %v13818_v11 = vld [vmem:[#allocation78_spill] sm:$0xff] }
 0x7cc   : > { %7977 = vpow2.f32 %v4407_v54  ;;  %v4409_v12 = vmul.f32 1.442695, %v4310_v26  ;;  %v4411_v20 = vmul.f32 1.442695, %v4311_v13  ;;  %v4288_v26 = vmax.f32 %v4287_v50, %v11883_v10  ;;  %v13805_v13 = vld [vmem:[#allocation157_spill] sm:$0xff] }
 0x7cd   : > { %v4794_v35 = vpop.permute.xlu1 %4793  ;;  %4301 = vmax.xlane.f32.xlu0 %v4300_v58  ;;  %v11885_v36 = vpop.xlane.xlu0 %4189  ;;  %v4291_v14 = vmax.f32 %v11889_v27, %v11879_v57 }
 0x7ce   : > { %7979 = vpow2.f32 %v4409_v12  ;;  %v4313_v39 = vsub.f32 %v11493_v47, %v11885_v36  ;;  %v4314_v54 = vsub.f32 %v11496_v55, %v11885_v36  ;;  %4285 = vmax.xlane.f32.xlu1 %v4284_v6  ;;  %7603 = vmatprep.subr.mxu0 %v4794_v35  ;;  %v11902_v47 = vadd.f32 %v11784_v52, %v13749_v8  ;;  %v3951_v58 = vpop.f32.mrf.mxu0  ;;  %v13808_v12 = vld [vmem:[#allocation72_spill] sm:$0xff] }
 0x7cf   : > { %7981 = vpow2.f32 %v4411_v20  ;;  %7604 = vmatpush3.msra.mxu0 %v4794_v35  ;;  %v11907_v55 = vadd.f32 %v11799_v62, %v13750_v4  ;;  %v11911_v6 = vadd.f32 %v11779_v5, %v13748_v33  ;;  %v2375_v50 = vadd.f32 %v13808_v12, %v2374_v49  ;;  %v13809_v20 = vld [vmem:[#allocation38_spill] sm:$0xff]  ;;  %v13810_v35 = vld [vmem:[#allocation35_spill] sm:$0xff]  ;;  %v13814_v49 = vld [vmem:[#allocation73_spill] sm:$0xff] }
 0x7d0   : > { %v4415_v56 = vmul.f32 1.442695, %v4313_v39  ;;  %v4417_v42 = vmul.f32 1.442695, %v4314_v54  ;;  %13804 = vst [vmem:[#allocation101_spill] sm:$0xff] %v11902_v47  ;;  %v2382_v52 = vadd.f32 %v13810_v35, %v13809_v20  ;;  %v11920_v62 = vadd.f32 %v3951_v58, %v13749_v8  ;;  %13813 = vst [vmem:[#allocation35_spill] sm:$0xff] %v11927_v63 }
 0x7d1   : > { %2368 = vadd.xlane.f32.xlu0 %v13805_v13  ;;  %13806 = vst [vmem:[#allocation42_spill] sm:$0xff] %v11907_v55  ;;  %13807 = vst [vmem:[#allocation157_spill] sm:$0xff] %v11911_v6  ;;  %v4292_v39 = vmax.f32 %v4291_v14, %v11907_v55  ;;  %v4295_v54 = vmax.f32 %v11911_v6, %v11902_v47  ;;  %v11924_v5 = vadd.f32 %v11786_v25, %v13750_v4  ;;  %v13816_v14 = vld [vmem:[#allocation50_spill] sm:$0xff]  ;;  %v13819_v35 = vld [vmem:[#allocation57_spill] sm:$0xff] }
 0x7d2   : > { %7983 = vpow2.f32 %v4415_v56  ;;  %4289 = vmax.xlane.f32.xlu1 %v4288_v26  ;;  %13811 = vst [vmem:[#allocation72_spill] sm:$0xff] %v11920_v62  ;;  %v2383_v56 = vadd.f32 %v13814_v49, %v2382_v52  ;;  %v4303_v8 = vmax.f32 %v11927_v63, %v11920_v62  ;;  %v11937_v33 = vadd.f32 %v11819_v38, %v13750_v4  ;;  %v13820_v52 = vld [vmem:[#allocation56_spill] sm:$0xff]  ;;  %v13849_v55 = vld [vmem:[#allocation109_spill] sm:$0xff] }
 0x7d3   : > { %7985 = vpow2.f32 %v4417_v42  ;;  %13812 = vst [vmem:[#allocation38_spill] sm:$0xff] %v11924_v5  ;;  %v13815_v42 = vld [vmem:[#allocation48_spill] sm:$0xff]  ;;  %v4296_v58 = vmax.f32 %v4295_v54, %v11924_v5 }
 0x7d4   : > { %v2390_v26 = vadd.f32 %v13816_v14, %v13815_v42  ;;  %13817 = vst [vmem:[#allocation73_spill] sm:$0xff] %v11937_v33  ;;  %v4304_v54 = vmax.f32 %v4303_v8, %v11937_v33  ;;  %v13823_v38 = vld [vmem:[#allocation80_spill] sm:$0xff]  ;;  %v13826_v8 = vld [vmem:[#allocation158_spill] sm:$0xff] }
 0x7d5   : > { %2376 = vadd.xlane.f32.xlu0 %v2375_v50  ;;  %v13833_v62 = vld [vmem:[#allocation44_spill] sm:$0xff] }
 0x7d6   : > { %4293 = vmax.xlane.f32.xlu1 %v4292_v39  ;;  %v2391_v20 = vadd.f32 %v13818_v11, %v2390_v26  ;;  %v2398_v39 = vadd.f32 %v13820_v52, %v13819_v35  ;;  %v13825_v11 = vld [vmem:[#allocation60_spill] sm:$0xff]  ;;  %v13827_v52 = vld [vmem:[#allocation41_spill] sm:$0xff] }
 0x7d7   : > { %v7974_v9 = vpop.eup %7973  ;;  %v13843_v6 = vld [vmem:[#allocation8_spill] sm:$0xff] }
 0x7d8   : > { %v7976_v13 = vpop.eup %7975  ;;  %v2399_v26 = vadd.f32 %v13823_v38, %v2398_v39 }
 0x7d9   : > { %v7978_v12 = vpop.eup %7977  ;;  %4931 = vmatprep.mubr.f32.mxu1 %v7976_v13  ;;  %2384 = vadd.xlane.f32.xlu0 %v2383_v56  ;;  %v4595_v50 = vadd.f32 %v7976_v13, %v7974_v9  ;;  %v13821_v56 = vld [vmem:[#allocation99_spill] sm:$0xff]  ;;  %v11956_v35 = vpop.xlane.xlu0 %4201 }
 0x7da   : > { %7611 = vmatprep.mubr.f32.mxu0 %v7978_v12  ;;  %4932 = vmatmul.mubr.f32.vlgmr.msra.gmra.mxu1 %v7974_v9  ;;  %v13822_v9 = vld [vmem:[#allocation71_spill] sm:$0xff] }
 0x7db   : > { %v7980_v25 = vpop.eup %7979  ;;  %4297 = vmax.xlane.f32.xlu1 %v4296_v58  ;;  %v11942_v49 = vadd.f32 %v7978_v12, %v4595_v50  ;;  %v2370_v14 = vadd.f32 %v13822_v9, %v13821_v56  ;;  %v13824_v58 = vld [vmem:[#allocation61_spill] sm:$0xff]  ;;  %v13831_v9 = vld [vmem:[#allocation64_spill] sm:$0xff] }
 0x7dc   : > { %v7982_v42 = vpop.eup %7981  ;;  %v2406_v12 = vadd.f32 %v13825_v11, %v13824_v58  ;;  %v13830_v56 = vld [vmem:[#allocation65_spill] sm:$0xff]  ;;  %v13832_v11 = vld [vmem:[#allocation74_spill] sm:$0xff] }
 0x7dd   : > { %4936 = vmatprep.mubr.f32.mxu1 %v7982_v42  ;;  %2392 = vadd.xlane.f32.xlu0 %v2391_v20  ;;  %v11947_v13 = vadd.f32 %v7982_v42, %v7980_v25  ;;  %v2371_v20 = vadd.f32 %v13826_v8, %v2370_v14  ;;  %v13828_v42 = vld [vmem:[#allocation144_spill] sm:$0xff]  ;;  %v2414_v38 = vadd.f32 %v13831_v9, %v13830_v56  ;;  %v13835_v14 = vld [vmem:[#allocation3_spill] sm:$0xff]  ;;  %v13840_v9 = vld [vmem:[#allocation54_spill] sm:$0xff] }
 0x7de   : > { %4937 = vmatmul.mubr.f32.gmra.mxu1 %v7980_v25  ;;  %v2378_v25 = vadd.f32 %v13828_v42, %v13827_v52  ;;  %v13836_v52 = vld [vmem:[#allocation69_spill] sm:$0xff]  ;;  %v13837_v42 = vld [vmem:[#allocation102_spill] sm:$0xff]  ;;  %v13839_v56 = vld [vmem:[#allocation55_spill] sm:$0xff] }
 0x7df   : > { %v11949_v4 = vpop.eup %7983  ;;  %4305 = vmax.xlane.f32.xlu1 %v4304_v54  ;;  %v13829_v54 = vld [vmem:[#allocation81_spill] sm:$0xff]  ;;  %v2415_v8 = vadd.f32 %v13835_v14, %v2414_v38  ;;  %v2422_v5 = vadd.f32 %v13837_v42, %v13836_v52  ;;  %v2394_v47 = vadd.f32 %v13840_v9, %v13839_v56  ;;  %v13846_v14 = vld [vmem:[#allocation58_spill] sm:$0xff]  ;;  %v13847_v42 = vld [vmem:[#allocation100_spill] sm:$0xff] }
 0x7e0   : > { %v11954_v50 = vpop.eup %7985  ;;  %v2407_v39 = vadd.f32 %v13829_v54, %v2406_v12  ;;  %v2379_v33 = vadd.f32 %v13832_v11, %v2378_v25  ;;  %v13838_v12 = vld [vmem:[#allocation75_spill] sm:$0xff]  ;;  %v13842_v11 = vld [vmem:[#allocation106_spill] sm:$0xff] }
 0x7e1   : > { %4941 = vmatprep.mubr.f32.mxu1 %v11954_v50  ;;  %2400 = vadd.xlane.f32.xlu0 %v2399_v26  ;;  %v11966_v58 = vpop.xlane.xlu0 %4209  ;;  %v13834_v26 = vld [vmem:[#allocation46_spill] sm:$0xff]  ;;  %v13851_v9 = vld [vmem:[#allocation63_spill] sm:$0xff] }
 0x7e2   : > { %4942 = vmatmul.mubr.f32.gmra.mxu1 %v11949_v4  ;;  %v2386_v63 = vadd.f32 %v13834_v26, %v13833_v62  ;;  %v2430_v62 = vadd.f32 %v13843_v6, %v13842_v11  ;;  %v13845_v26 = vld [vmem:[#allocation59_spill] sm:$0xff] }
 0x7e3   : > { %2372 = vadd.xlane.f32.xlu1 %v2371_v20  ;;  %v2402_v52 = vadd.f32 %v13846_v14, %v13845_v26  ;;  %v13854_v11 = vld [vmem:[#allocation83_spill] sm:$0xff] }
 0x7e4   : > { %v2387_v54 = vadd.f32 %v13838_v12, %v2386_v63  ;;  %v2431_v63 = vadd.f32 %v13847_v42, %v2430_v62  ;;  %v13848_v12 = vld [vmem:[#allocation10_spill] sm:$0xff]  ;;  %v4315_v62 = vsub.f32 %v11502_v59, %v11885_v36  ;;  %v13857_v42 = vld [vmem:[#allocation67_spill] sm:$0xff]  ;;  %v4323_v59 = vsub.f32 %v11519_v1, %v11956_v35 }
 0x7e5   : > { %2408 = vadd.xlane.f32.xlu0 %v2407_v39  ;;  %v13841_v39 = vld [vmem:[#allocation114_spill] sm:$0xff]  ;;  %v2438_v56 = vadd.f32 %v13849_v55, %v13848_v12  ;;  %v13856_v55 = vld [vmem:[#allocation85_spill] sm:$0xff]  ;;  %v4329_v1 = vsub.f32 %v11539_v19, %v11966_v58 }
 0x7e6   : > { %v2423_v25 = vadd.f32 %v13841_v39, %v2422_v5  ;;  %v13852_v39 = vld [vmem:[#allocation62_spill] sm:$0xff]  ;;  %v4419_v36 = vmul.f32 1.442695, %v4315_v62 }
 0x7e7   : > { %2380 = vadd.xlane.f32.xlu1 %v2379_v33  ;;  %v13844_v33 = vld [vmem:[#allocation77_spill] sm:$0xff]  ;;  %v2410_v6 = vadd.f32 %v13852_v39, %v13851_v9  ;;  %v13860_v9 = vld [vmem:[#allocation118_spill] sm:$0xff] }
 0x7e8   : > { %v2395_v38 = vadd.f32 %v13844_v33, %v2394_v47  ;;  %v13855_v33 = vld [vmem:[#allocation16_spill] sm:$0xff]  ;;  %v13861_v39 = vld [vmem:[#allocation17_spill] sm:$0xff] }
 0x7e9   : > { %2416 = vadd.xlane.f32.xlu0 %v2415_v8  ;;  %v11974_v20 = vpop.xlane.xlu0 %4217  ;;  %v2446_v26 = vadd.f32 %v13855_v33, %v13854_v11  ;;  %v13863_v11 = vld [vmem:[#allocation70_spill] sm:$0xff]  ;;  %v13864_v33 = vld [vmem:[#allocation103_spill] sm:$0xff] }
 0x7eb   : > { %2388 = vadd.xlane.f32.xlu1 %v2387_v54  ;;  %v13850_v54 = vld [vmem:[#allocation79_spill] sm:$0xff] }
 0x7ec   : > { %v2403_v5 = vadd.f32 %v13850_v54, %v2402_v52  ;;  %v2411_v52 = vadd.f32 %v13856_v55, %v2410_v6  ;;  %v13859_v54 = vld [vmem:[#allocation141_spill] sm:$0xff]  ;;  %v4324_v6 = vsub.f32 %v11524_v32, %v11956_v35 }
 0x7ed   : > { %2424 = vadd.xlane.f32.xlu0 %v2423_v25  ;;  %v11985_v8 = vpop.xlane.xlu0 %4221  ;;  %v13853_v25 = vld [vmem:[#allocation39_spill] sm:$0xff]  ;;  %v13867_v32 = vld [vmem:[#allocation129_spill] sm:$0xff] }
 0x7ee   : > { %v2439_v47 = vadd.f32 %v13853_v25, %v2438_v56  ;;  %v4322_v56 = vsub.f32 %v11516_v45, %v11956_v35  ;;  %v13862_v25 = vld [vmem:[#allocation96_spill] sm:$0xff]  ;;  %v2426_v45 = vadd.f32 %v13864_v33, %v13863_v11  ;;  %v4447_v33 = vmul.f32 1.442695, %v4329_v1 }
 0x7ef   : > { %2396 = vadd.xlane.f32.xlu1 %v2395_v38  ;;  %v4312_v38 = vsub.f32 %v11488_v28, %v11868_v3  ;;  %v2454_v28 = vadd.f32 %v13861_v39, %v13860_v9  ;;  %v13870_v9 = vld [vmem:[#allocation7_spill] sm:$0xff] }
 0x7f0   : > { %v4433_v55 = vmul.f32 1.442695, %v4322_v56  ;;  %v4437_v56 = vmul.f32 1.442695, %v4324_v6 }
 0x7f1   : > { %2432 = vadd.xlane.f32.xlu0 %v2431_v63  ;;  %v12000_v14 = vpop.xlane.xlu0 %4225  ;;  %v13858_v63 = vld [vmem:[#allocation66_spill] sm:$0xff]  ;;  %v4413_v3 = vmul.f32 1.442695, %v4312_v38  ;;  %v2455_v35 = vadd.f32 %v13867_v32, %v2454_v28  ;;  %v13872_v28 = vld [vmem:[#allocation117_spill] sm:$0xff] }
 0x7f2   : > { %v2418_v12 = vadd.f32 %v13858_v63, %v13857_v42  ;;  %v13866_v42 = vld [vmem:[#allocation128_spill] sm:$0xff]  ;;  %v4435_v63 = vmul.f32 1.442695, %v4323_v59 }
 0x7f3   : > { %2404 = vadd.xlane.f32.xlu1 %v2403_v5  ;;  %v2447_v5 = vadd.f32 %v13859_v54, %v2446_v26  ;;  %v4328_v26 = vsub.f32 %v11536_v18, %v11966_v58  ;;  %7987 = vpow2.f32 %v4413_v3  ;;  %v13868_v18 = vld [vmem:[#allocation98_spill] sm:$0xff]  ;;  %v13873_v3 = vld [vmem:[#allocation23_spill] sm:$0xff] }
 0x7f4   : > { %7989 = vpow2.f32 %v4419_v36  ;;  %v2427_v54 = vadd.f32 %v13868_v18, %v2426_v45  ;;  %v2470_v59 = vadd.f32 %v13873_v3, %v13872_v28  ;;  %v4335_v45 = vsub.f32 %v11557_v43, %v11974_v20  ;;  %v13877_v43 = vld [vmem:[#allocation28_spill] sm:$0xff] }
 0x7f5   : > { %2440 = vadd.xlane.f32.xlu0 %v2439_v47  ;;  %v2419_v47 = vadd.f32 %v13862_v25, %v2418_v12  ;;  %v12023_v62 = vpop.xlane.xlu0 %4229  ;;  %v4330_v12 = vsub.f32 %v11544_v41, %v11966_v58  ;;  %7991 = vpow2.f32 %v4433_v55  ;;  %v4445_v19 = vmul.f32 1.442695, %v4328_v26  ;;  %v13874_v55 = vld [vmem:[#allocation82_spill] sm:$0xff]  ;;  %v13875_v26 = vld [vmem:[#allocation112_spill] sm:$0xff] }
 0x7f6   : > { %v4334_v41 = vsub.f32 %v11554_v29, %v11974_v20  ;;  %7993 = vpow2.f32 %v4435_v63  ;;  %v13878_v63 = vld [vmem:[#allocation137_spill] sm:$0xff] }
 0x7f7   : > { %2412 = vadd.xlane.f32.xlu1 %v2411_v52  ;;  %v13865_v52 = vld [vmem:[#allocation19_spill] sm:$0xff]  ;;  %v4449_v6 = vmul.f32 1.442695, %v4330_v12  ;;  %7995 = vpow2.f32 %v4437_v56  ;;  %v2478_v12 = vadd.f32 %v13878_v63, %v13877_v43 }
 0x7f8   : > { %v2462_v38 = vadd.f32 %v13866_v42, %v13865_v52  ;;  %v2442_v52 = vadd.f32 %v13875_v26, %v13874_v55  ;;  %v4336_v42 = vsub.f32 %v11560_v34, %v11974_v20  ;;  %7997 = vpow2.f32 %v4445_v19  ;;  %v13879_v20 = vld [vmem:[#allocation49_spill] sm:$0xff] }
 0x7f9   : > { %2448 = vadd.xlane.f32.xlu0 %v2447_v5  ;;  %v13869_v5 = vld [vmem:[#allocation105_spill] sm:$0xff]  ;;  %v12048_v29 = vpop.xlane.xlu0 %4233  ;;  %7999 = vpow2.f32 %v4447_v33  ;;  %v4457_v56 = vmul.f32 1.442695, %v4334_v41  ;;  %v2471_v18 = vadd.f32 %v13879_v20, %v2470_v59  ;;  %v13884_v59 = vld [vmem:[#allocation139_spill] sm:$0xff]  ;;  %v4338_v55 = vsub.f32 %v11568_v46, %v11985_v8 }
 0x7fa   : > { %v2434_v39 = vadd.f32 %v13870_v9, %v13869_v5  ;;  %8001 = vpow2.f32 %v4449_v6  ;;  %v13880_v9 = vld [vmem:[#allocation126_spill] sm:$0xff]  ;;  %v4461_v19 = vmul.f32 1.442695, %v4336_v42  ;;  %v13887_v42 = vld [vmem:[#allocation125_spill] sm:$0xff] }
 0x7fb   : > { %2420 = vadd.xlane.f32.xlu1 %v2419_v47  ;;  %v13871_v47 = vld [vmem:[#allocation47_spill] sm:$0xff] }
 0x7fc   : > { %v2463_v11 = vadd.f32 %v13871_v47, %v2462_v38  ;;  %v13881_v47 = vld [vmem:[#allocation115_spill] sm:$0xff] }
 0x7fd   : > { %2456 = vadd.xlane.f32.xlu0 %v2455_v35 }
 0x7fe   : > { %v12031_v25 = vpop.xlane.xlu1 %4193 }
 0x7ff   : > { %2428 = vadd.xlane.f32.xlu1 %v2427_v54  ;;  %v4316_v58 = vsub.f32 %v11618_v44, %v12031_v25  ;;  %v4317_v36 = vsub.f32 %v11609_v0, %v12031_v25  ;;  %v13876_v44 = vld [vmem:[#allocation120_spill] sm:$0xff]  ;;  %v4337_v0 = vsub.f32 %v11565_v15, %v11985_v8  ;;  %v4459_v54 = vmul.f32 1.442695, %v4335_v45 }
 0x800   : > { %v2435_v1 = vadd.f32 %v13876_v44, %v2434_v39  ;;  %v2443_v39 = vadd.f32 %v13880_v9, %v2442_v52  ;;  %v13886_v52 = vld [vmem:[#allocation20_spill] sm:$0xff]  ;;  %v12073_v44 = vpop.eup %7987  ;;  %v13892_v9 = vld [vmem:[#allocation138_spill] sm:$0xff] }
 0x801   : > { %v4421_v38 = vmul.f32 1.442695, %v4316_v58  ;;  %2464 = vadd.xlane.f32.xlu0 %v2463_v11  ;;  %v4423_v32 = vmul.f32 1.442695, %v4317_v36  ;;  %v13882_v11 = vld [vmem:[#allocation18_spill] sm:$0xff]  ;;  %v13885_v58 = vld [vmem:[#allocation140_spill] sm:$0xff] }
 0x802   : > { %v4198_v35 = vpop.xlane.xlu1 %4197  ;;  %v2450_v28 = vadd.f32 %v13882_v11, %v13881_v47  ;;  %v4463_v3 = vmul.f32 1.442695, %v4337_v0  ;;  %v2486_v36 = vadd.f32 %v13885_v58, %v13884_v59  ;;  %v13894_v11 = vld [vmem:[#allocation21_spill] sm:$0xff] }
 0x803   : > { %2436 = vadd.xlane.f32.xlu1 %v2435_v1  ;;  %v4319_v34 = vsub.f32 %v11644_v21, %v4198_v35  ;;  %v4320_v5 = vsub.f32 %v11631_v24, %v4198_v35  ;;  %8003 = vpow2.f32 %v4421_v38  ;;  %v4321_v15 = vsub.f32 %v11667_v53, %v4198_v35  ;;  %v13883_v21 = vld [vmem:[#allocation91_spill] sm:$0xff]  ;;  %v12065_v24 = vpop.xlane.xlu0 %4237 }
 0x804   : > { %8005 = vpow2.f32 %v4423_v32  ;;  %v2479_v41 = vadd.f32 %v13883_v21, %v2478_v12  ;;  %v2458_v38 = vadd.f32 %v13887_v42, %v13886_v52  ;;  %v13888_v32 = vld [vmem:[#allocation37_spill] sm:$0xff]  ;;  %v13889_v12 = vld [vmem:[#allocation11_spill] sm:$0xff]  ;;  %v13898_v52 = vld [vmem:[#allocation176_spill] sm:$0xff] }
 0x805   : > { %2472 = vadd.xlane.f32.xlu0 %v2471_v18  ;;  %8007 = vpow2.f32 %v4457_v56  ;;  %v4427_v6 = vmul.f32 1.442695, %v4319_v34  ;;  %v4429_v26 = vmul.f32 1.442695, %v4320_v5  ;;  %v4431_v1 = vmul.f32 1.442695, %v4321_v15 }
 0x806   : > { %v4206_v33 = vpop.xlane.xlu1 %4205  ;;  %8009 = vpow2.f32 %v4459_v54  ;;  %v2451_v35 = vadd.f32 %v13888_v32, %v2450_v28  ;;  %v4343_v56 = vsub.f32 %v13889_v12, %v12023_v62  ;;  %v4465_v18 = vmul.f32 1.442695, %v4338_v55  ;;  %v13891_v54 = vld [vmem:[#allocation181_spill] sm:$0xff]  ;;  %v13893_v15 = vld [vmem:[#allocation180_spill] sm:$0xff]  ;;  %v13895_v28 = vld [vmem:[#allocation127_spill] sm:$0xff] }
 0x807   : > { %2444 = vadd.xlane.f32.xlu1 %v2443_v39  ;;  %v4325_v45 = vsub.f32 %v11671_v2, %v4206_v33  ;;  %v4326_v53 = vsub.f32 %v11657_v22, %v4206_v33  ;;  %8011 = vpow2.f32 %v4461_v19  ;;  %v4327_v0 = vsub.f32 %v11683_v48, %v4206_v33  ;;  %v12077_v2 = vpop.eup %7989  ;;  %v13890_v48 = vld [vmem:[#allocation94_spill] sm:$0xff] }
 0x808   : > { %v4339_v22 = vsub.f32 %v11572_v30, %v11985_v8  ;;  %8013 = vpow2.f32 %v4463_v3  ;;  %v12081_v63 = vpop.eup %7991  ;;  %v2487_v20 = vadd.f32 %v13890_v48, %v2486_v36  ;;  %v2459_v39 = vadd.f32 %v13892_v9, %v2458_v38  ;;  %v12090_v8 = vpop.xlane.xlu0 %4241 }
 0x809   : > { %2480 = vadd.xlane.f32.xlu0 %v2479_v41  ;;  %v4439_v46 = vmul.f32 1.442695, %v4325_v45  ;;  %8015 = vpow2.f32 %v4427_v6  ;;  %v4441_v34 = vmul.f32 1.442695, %v4326_v53  ;;  %v12088_v30 = vpop.eup %7993  ;;  %v4443_v19 = vmul.f32 1.442695, %v4327_v0 }
 0x80a   : > { %v4214_v43 = vpop.xlane.xlu1 %4213  ;;  %8017 = vpow2.f32 %v4429_v26  ;;  %v2466_v3 = vadd.f32 %v13895_v28, %v13894_v11  ;;  %v12095_v33 = vpop.eup %7995  ;;  %v4467_v21 = vmul.f32 1.442695, %v4339_v22  ;;  %v13896_v41 = vld [vmem:[#allocation116_spill] sm:$0xff]  ;;  %v4475_v6 = vmul.f32 1.442695, %v4343_v56  ;;  %v13897_v45 = vld [vmem:[#allocation186_spill] sm:$0xff] }
 0x80b   : > { %2452 = vadd.xlane.f32.xlu1 %v2451_v35  ;;  %v4331_v5 = vsub.f32 %v13891_v54, %v4214_v43  ;;  %8019 = vpow2.f32 %v4431_v1  ;;  %v4332_v47 = vsub.f32 %v13893_v15, %v4214_v43  ;;  %v4344_v59 = vsub.f32 %v13896_v41, %v12023_v62  ;;  %v12101_v36 = vpop.eup %7997  ;;  %v13899_v1 = vld [vmem:[#allocation26_spill] sm:$0xff]  ;;  %v13900_v0 = vld [vmem:[#allocation25_spill] sm:$0xff]  ;;  %v13901_v22 = vld [vmem:[#allocation107_spill] sm:$0xff] }
 0x80c   : > { %8021 = vpow2.f32 %v4439_v46  ;;  %v4333_v53 = vsub.f32 %v13897_v45, %v4214_v43  ;;  %v4603_v55 = vadd.f32 %v11954_v50, %v11949_v4  ;;  %v12106_v26 = vpop.eup %7999  ;;  %v4318_v42 = vsub.f32 %v13898_v52, %v12031_v25  ;;  %v12116_v43 = vpop.xlane.xlu0 %4249  ;;  %v13902_v4 = vld [vmem:[#allocation4_spill] sm:$0xff]  ;;  %v13903_v25 = vld [vmem:[#allocation9_spill] sm:$0xff] }
 0x80d   : > { %2488 = vadd.xlane.f32.xlu0 %v2487_v20  ;;  %8023 = vpow2.f32 %v4441_v34  ;;  %v4451_v38 = vmul.f32 1.442695, %v4331_v5  ;;  %v2474_v32 = vadd.f32 %v13900_v0, %v13899_v1  ;;  %v12112_v35 = vpop.eup %8001  ;;  %v4340_v46 = vsub.f32 %v13901_v22, %v12000_v14  ;;  %v13904_v54 = vld [vmem:[#allocation113_spill] sm:$0xff]  ;;  %v13909_v45 = vld [vmem:[#allocation136_spill] sm:$0xff] }
 0x80e   : > { %v12099_v58 = vpop.xlane.xlu1 %4245  ;;  %8025 = vpow2.f32 %v4465_v18  ;;  %v4453_v12 = vmul.f32 1.442695, %v4332_v47  ;;  %v2467_v50 = vadd.f32 %v13902_v4, %v2466_v3  ;;  %v4341_v34 = vsub.f32 %v13903_v25, %v12000_v14  ;;  %v13906_v11 = vld [vmem:[#allocation89_spill] sm:$0xff]  ;;  %v13911_v22 = vld [vmem:[#allocation52_spill] sm:$0xff] }
 0x80f   : > { %2460 = vadd.xlane.f32.xlu1 %v2459_v39  ;;  %8027 = vpow2.f32 %v4443_v19  ;;  %v4477_v48 = vmul.f32 1.442695, %v4344_v59  ;;  %v4342_v5 = vsub.f32 %v13904_v54, %v12000_v14  ;;  %v4455_v9 = vmul.f32 1.442695, %v4333_v53  ;;  %v13905_v19 = vld [vmem:[#allocation173_spill] sm:$0xff]  ;;  %v13907_v14 = vld [vmem:[#allocation174_spill] sm:$0xff] }
 0x810   : > { %v12120_v56 = vpop.eup %8003  ;;  %8029 = vpow2.f32 %v4467_v21  ;;  %v4349_v15 = vsub.f32 %v13905_v19, %v12065_v24  ;;  %v4425_v47 = vmul.f32 1.442695, %v4318_v42  ;;  %v2475_v28 = vadd.f32 %v13906_v11, %v2474_v32  ;;  %v13910_v42 = vld [vmem:[#allocation51_spill] sm:$0xff]  ;;  %v13913_v4 = vld [vmem:[#allocation36_spill] sm:$0xff] }
 0x811   : > { %4597 = vadd.xlane.f32.xlu0 %v11942_v49  ;;  %v12126_v18 = vpop.eup %8005  ;;  %8031 = vpow2.f32 %v4475_v6  ;;  %v4604_v49 = vadd.f32 %v12077_v2, %v4603_v55  ;;  %v4469_v21 = vmul.f32 1.442695, %v4340_v46  ;;  %v4350_v41 = vsub.f32 %v13907_v14, %v12065_v24  ;;  %v12141_v59 = vpop.xlane.xlu0 %4257  ;;  %v13908_v6 = vld [vmem:[#allocation27_spill] sm:$0xff]  ;;  %v13915_v19 = vld [vmem:[#allocation184_spill] sm:$0xff]  ;;  %v13916_v14 = vld [vmem:[#allocation93_spill] sm:$0xff] }
 0x812   : > { %v12124_v20 = vpop.xlane.xlu1 %4253  ;;  %v12131_v39 = vpop.eup %8007  ;;  %8033 = vpow2.f32 %v4451_v38  ;;  %4946 = vmatprep.mubr.f32.mxu1 %v12126_v18  ;;  %v2482_v53 = vadd.f32 %v13909_v45, %v13908_v6  ;;  %v4471_v52 = vmul.f32 1.442695, %v4341_v34  ;;  %v4345_v38 = vsub.f32 %v13910_v42, %v12023_v62  ;;  %v13914_v34 = vld [vmem:[#allocation187_spill] sm:$0xff] }
 0x813   : > { %2468 = vadd.xlane.f32.xlu1 %v2467_v50  ;;  %v12137_v3 = vpop.eup %8009  ;;  %8035 = vpow2.f32 %v4453_v12  ;;  %4947 = vmatmul.mubr.f32.gmra.mxu1 %v12120_v56  ;;  %v4473_v32 = vmul.f32 1.442695, %v4342_v5  ;;  %v4346_v46 = vsub.f32 %v13911_v22, %v12048_v29  ;;  %v13912_v12 = vld [vmem:[#allocation142_spill] sm:$0xff]  ;;  %v4487_v54 = vmul.f32 1.442695, %v4349_v15  ;;  %v13917_v15 = vld [vmem:[#allocation53_spill] sm:$0xff] }
 0x814   : > { %v12146_v55 = vpop.eup %8011  ;;  %8037 = vpow2.f32 %v4477_v48  ;;  %v2490_v50 = vadd.f32 %v13913_v4, %v13912_v12  ;;  %v4355_v62 = vsub.f32 %v13914_v34, %v12099_v58  ;;  %v4356_v5 = vsub.f32 %v13915_v19, %v12099_v58  ;;  %v13919_v4 = vld [vmem:[#allocation97_spill] sm:$0xff] }
 0x815   : > { %4605 = vadd.xlane.f32.xlu0 %v4604_v49  ;;  %v12152_v0 = vpop.eup %8013  ;;  %8039 = vpow2.f32 %v4455_v9  ;;  %v4489_v49 = vmul.f32 1.442695, %v4350_v41  ;;  %v2483_v9 = vadd.f32 %v13916_v14, %v2482_v53  ;;  %v4479_v6 = vmul.f32 1.442695, %v4345_v38  ;;  %v13918_v41 = vld [vmem:[#allocation175_spill] sm:$0xff]  ;;  %v13920_v38 = vld [vmem:[#allocation190_spill] sm:$0xff] }
 0x816   : > { %v12150_v1 = vpop.xlane.xlu1 %4261  ;;  %v8016_v25 = vpop.eup %8015  ;;  %8041 = vpow2.f32 %v4425_v47  ;;  %v4347_v47 = vsub.f32 %v13917_v15, %v12048_v29  ;;  %v4351_v12 = vsub.f32 %v13918_v41, %v12065_v24  ;;  %v2491_v53 = vadd.f32 %v13919_v4, %v2490_v50  ;;  %v13921_v24 = vld [vmem:[#allocation188_spill] sm:$0xff] }
 0x817   : > { %2476 = vadd.xlane.f32.xlu1 %v2475_v28  ;;  %v8018_v48 = vpop.eup %8017  ;;  %8043 = vpow2.f32 %v4469_v21  ;;  %v4481_v21 = vmul.f32 1.442695, %v4346_v46  ;;  %v4361_v19 = vsub.f32 %v13920_v38, %v12124_v20  ;;  %v4501_v46 = vmul.f32 1.442695, %v4356_v5  ;;  %v13923_v5 = vld [vmem:[#allocation189_spill] sm:$0xff] }
 0x818   : > { %v12165_v28 = vpop.eup %8019  ;;  %8045 = vpow2.f32 %v4471_v52  ;;  %4951 = vmatprep.mubr.f32.mxu1 %v8018_v48  ;;  %v4611_v45 = vadd.f32 %v8018_v48, %v8016_v25  ;;  %v4499_v52 = vmul.f32 1.442695, %v4355_v62  ;;  %v4483_v62 = vmul.f32 1.442695, %v4347_v47  ;;  %v13924_v47 = vld [vmem:[#allocation195_spill] sm:$0xff] }
 0x819   : > { %v12162_v11 = vpop.xlane.xlu0 %4265  ;;  %v8022_v22 = vpop.eup %8021  ;;  %8047 = vpow2.f32 %v4473_v32  ;;  %4952 = vmatmul.mubr.f32.gmra.mxu1 %v8016_v25  ;;  %v4362_v25 = vsub.f32 %v13921_v24, %v12124_v20  ;;  %v4357_v41 = vsub.f32 %v13923_v5, %v12099_v58  ;;  %v4367_v38 = vsub.f32 %v13924_v47, %v12150_v1  ;;  %v13928_v5 = vld [vmem:[#allocation90_spill] sm:$0xff] }
 0x81a   : > { %v4792_v42 = vpop.permute.xlu1 %4791  ;;  %v8024_v34 = vpop.eup %8023  ;;  %8049 = vpow2.f32 %v4487_v54  ;;  %4956 = vmatprep.mubr.f32.mxu1 %v12088_v30  ;;  %v4612_v48 = vadd.f32 %v12165_v28, %v4611_v45 }
 0x81b   : > { %2484 = vadd.xlane.f32.xlu1 %v2483_v9  ;;  %7605 = vmatprep.subr.mxu0 %v4792_v42  ;;  %v12176_v32 = vpop.eup %8025  ;;  %8051 = vpow2.f32 %v4489_v49  ;;  %v4619_v50 = vadd.f32 %v8024_v34, %v8022_v22  ;;  %v13922_v9 = vld [vmem:[#allocation177_spill] sm:$0xff]  ;;  %v4491_v49 = vmul.f32 1.442695, %v4351_v12  ;;  %v4513_v58 = vmul.f32 1.442695, %v4362_v25 }
 0x81c   : > { %7606 = vmatpush3.msra.mxu0 %v4792_v42  ;;  %v12180_v54 = vpop.eup %8027  ;;  %8053 = vpow2.f32 %v4479_v6  ;;  %v4352_v15 = vsub.f32 %v13922_v9, %v12090_v8  ;;  %4613 = vadd.xlane.f32.xlu0 %v4612_v48  ;;  %v4511_v6 = vmul.f32 1.442695, %v4361_v19  ;;  %v13925_v48 = vld [vmem:[#allocation196_spill] sm:$0xff] }
 0x81d   : > { %v4790_v14 = vpop.permute.xlu0 %4789  ;;  %v12184_v45 = vpop.eup %8029  ;;  %8055 = vpow2.f32 %v4481_v21  ;;  %4957 = vmatmul.mubr.f32.gmra.mxu1 %v12081_v63  ;;  %v4620_v42 = vadd.f32 %v12180_v54, %v4619_v50  ;;  %v4600_v21 = vadd.f32 %v12073_v44, %v11947_v13  ;;  %v4368_v24 = vsub.f32 %v13925_v48, %v12150_v1 }
 0x81e   : > { %7607 = vmatprep.subr.mxu0 %v4790_v14  ;;  %v12190_v4 = vpop.eup %8031  ;;  %8057 = vpow2.f32 %v4499_v52  ;;  %4961 = vmatprep.mubr.f32.mxu1 %v8024_v34  ;;  %v12202_v52 = vadd.f32 %v12088_v30, %v12081_v63  ;;  %v13926_v34 = vld [vmem:[#allocation178_spill] sm:$0xff]  ;;  %v4607_v13 = vadd.f32 %v12126_v18, %v12120_v56  ;;  %v4503_v63 = vmul.f32 1.442695, %v4357_v41 }
 0x81f   : > { %2492 = vadd.xlane.f32.xlu1 %v2491_v53  ;;  %7608 = vmatpush3.msra.mxu0 %v4790_v14  ;;  %v12196_v12 = vpop.eup %8033  ;;  %8059 = vpow2.f32 %v4501_v46  ;;  %v4353_v50 = vsub.f32 %v13926_v34, %v12090_v8  ;;  %v4493_v14 = vmul.f32 1.442695, %v4352_v15  ;;  %v5480_v46 = vld [vmem:[%s12820_s4 + $0x18] sm:$0xff]  ;;  %v4348_v56 = vsub.f32 %v13928_v5, %v12048_v29 }
 0x820   : > { %v8036_v19 = vpop.eup %8035  ;;  %8061 = vpow2.f32 %v4483_v62  ;;  %4621 = vadd.xlane.f32.xlu0 %v4620_v42  ;;  %v13927_v30 = vld [vmem:[#allocation194_spill] sm:$0xff]  ;;  %v4523_v18 = vmul.f32 1.442695, %v4367_v38  ;;  %v4525_v42 = vmul.f32 1.442695, %v4368_v24  ;;  %v13930_v38 = vld [vmem:[#allocation183_spill] sm:$0xff] }
 0x821   : > { %v4788_v53 = vpop.permute.xlu0 %4787  ;;  %v12211_v25 = vpop.eup %8037  ;;  %8063 = vpow2.f32 %v4491_v49  ;;  %v4363_v62 = vsub.f32 %v13927_v30, %v12124_v20  ;;  %4962 = vmatmul.mubr.f32.gmra.mxu1 %v8022_v22  ;;  %v4627_v9 = vadd.f32 %v8036_v19, %v12196_v12  ;;  %v4635_v49 = vadd.f32 %v12176_v32, %v12152_v0  ;;  %v13929_v20 = vld [vmem:[#allocation182_spill] sm:$0xff] }
 0x822   : > { %7609 = vmatprep.subr.mxu0 %v4788_v53  ;;  %v12216_v15 = vpop.eup %8039  ;;  %8065 = vpow2.f32 %v4511_v6  ;;  %4966 = vmatprep.mubr.f32.mxu1 %v12106_v26  ;;  %v4358_v22 = vsub.f32 %v13929_v20, %v12116_v43  ;;  %v4495_v6 = vmul.f32 1.442695, %v4353_v50  ;;  %v4623_v50 = vadd.f32 %v12106_v26, %v12101_v36 }
 0x823   : > { %4601 = vadd.xlane.f32.xlu1 %v4600_v21  ;;  %7610 = vmatpush3.msra.mxu0 %v4788_v53  ;;  %v8042_v41 = vpop.eup %8041  ;;  %8067 = vpow2.f32 %v4513_v58  ;;  %v4628_v47 = vadd.f32 %v12216_v15, %v4627_v9  ;;  %v4359_v21 = vsub.f32 %v13930_v38, %v12116_v43  ;;  %v5479_v58 = vld [vmem:[%s12820_s4 + $0x10] sm:$0xff] }
 0x824   : > { %7612 = vmatmul.mubr.f32.vlgmr.msra.gmra.mxu0 %v12073_v44  ;;  %7659 = vmatprep.subr.mxu0 %v5480_v46  ;;  %v12227_v29 = vpop.eup %8043  ;;  %8069 = vpow2.f32 %v4493_v14  ;;  %v4608_v48 = vadd.f32 %v8042_v41, %v4607_v13  ;;  %v4515_v44 = vmul.f32 1.442695, %v4363_v62  ;;  %v13931_v53 = vld [vmem:[#allocation197_spill] sm:$0xff]  ;;  %v4485_v14 = vmul.f32 1.442695, %v4348_v56  ;;  %v13932_v13 = vld [vmem:[#allocation179_spill] sm:$0xff] }
 0x825   : > { %7614 = vmatprep.mubr.f32.mxu0 %v12077_v2  ;;  %7660 = vmatpush3.msra.mxu0 %v5480_v46  ;;  %v12235_v24 = vpop.eup %8045  ;;  %8071 = vpow2.f32 %v4503_v63  ;;  %v4369_v34 = vsub.f32 %v13931_v53, %v12150_v1  ;;  %v4354_v46 = vsub.f32 %v13932_v13, %v12090_v8  ;;  %v4643_v63 = vadd.f32 %v12211_v25, %v12190_v4  ;;  %v13933_v62 = vld [vmem:[#allocation191_spill] sm:$0xff] }
 0x826   : > { %4629 = vadd.xlane.f32.xlu0 %v4628_v47  ;;  %4967 = vmatmul.mubr.f32.gmra.mxu1 %v12101_v36  ;;  %v12242_v2 = vpop.eup %8047  ;;  %8073 = vpow2.f32 %v4523_v18  ;;  %v4505_v1 = vmul.f32 1.442695, %v4358_v22  ;;  %v4364_v9 = vsub.f32 %v13933_v62, %v12141_v59  ;;  %v4636_v36 = vadd.f32 %v12184_v45, %v4635_v49  ;;  %v5478_v18 = vld [vmem:[%s12820_s4 + $0x8] sm:$0xff] }
 0x827   : > { %4971 = vmatprep.mubr.f32.mxu1 %v8036_v19  ;;  %4609 = vadd.xlane.f32.xlu1 %v4608_v48  ;;  %v12248_v30 = vpop.eup %8049  ;;  %8075 = vpow2.f32 %v4525_v42  ;;  %v4507_v8 = vmul.f32 1.442695, %v4359_v21  ;;  %v13934_v19 = vld [vmem:[#allocation192_spill] sm:$0xff]  ;;  %v4616_v56 = vadd.f32 %v12095_v33, %v12202_v52  ;;  %v4624_v20 = vadd.f32 %v12112_v35, %v4623_v50  ;;  %v13935_v52 = vld [vmem:[#allocation185_spill] sm:$0xff] }
 0x828   : > { %7615 = vmatmul.mubr.f32.gmra.mxu0 %v8042_v41  ;;  %7661 = vmatprep.subr.mxu0 %v5479_v58  ;;  %v12253_v26 = vpop.eup %8051  ;;  %8077 = vpow2.f32 %v4495_v6  ;;  %v4365_v5 = vsub.f32 %v13934_v19, %v12141_v59  ;;  %v4527_v41 = vmul.f32 1.442695, %v4369_v34  ;;  %v4360_v42 = vsub.f32 %v13935_v52, %v12116_v43  ;;  %v13939_v19 = vld [vmem:[#allocation200_spill] sm:$0xff] }
 0x829   : > { %7617 = vmatprep.mubr.f32.mxu0 %v12165_v28  ;;  %7662 = vmatpush3.msra.mxu0 %v5479_v58  ;;  %v12263_v49 = vpop.eup %8053  ;;  %8079 = vpow2.f32 %v4515_v44  ;;  %v4497_v28 = vmul.f32 1.442695, %v4354_v46  ;;  %v4517_v38 = vmul.f32 1.442695, %v4364_v9  ;;  %v4651_v48 = vadd.f32 %v12253_v26, %v12248_v30  ;;  %v13937_v44 = vld [vmem:[#allocation199_spill] sm:$0xff] }
 0x82a   : > { %4637 = vadd.xlane.f32.xlu0 %v4636_v36  ;;  %4972 = vmatmul.mubr.f32.gmra.mxu1 %v12196_v12  ;;  %v12267_v22 = vpop.eup %8055  ;;  %8081 = vpow2.f32 %v4485_v14  ;;  %v4644_v47 = vadd.f32 %v12263_v49, %v4643_v63  ;;  %v13936_v12 = vld [vmem:[#allocation198_spill] sm:$0xff]  ;;  %v4519_v43 = vmul.f32 1.442695, %v4365_v5  ;;  %v4371_v53 = vsub.f32 %v13937_v44, %v12162_v11 }
 0x82b   : > { %4976 = vmatprep.mubr.f32.mxu1 %v12137_v3  ;;  %4617 = vadd.xlane.f32.xlu1 %v4616_v56  ;;  %v12273_v6 = vpop.eup %8057  ;;  %8083 = vpow2.f32 %v4505_v1  ;;  %v4370_v21 = vsub.f32 %v13936_v12, %v12162_v11  ;;  %v4631_v34 = vadd.f32 %v12137_v3, %v12131_v39  ;;  %v4509_v13 = vmul.f32 1.442695, %v4360_v42 }
 0x82c   : > { %7618 = vmatmul.mubr.f32.gmra.mxu0 %v12095_v33  ;;  %7663 = vmatprep.subr.mxu0 %v5478_v18  ;;  %v12280_v58 = vpop.eup %8059  ;;  %8085 = vpow2.f32 %v4507_v8  ;;  %v5477_v33 = vld [vmem:[%s12820_s4] sm:$0xff]  ;;  %v4531_v9 = vmul.f32 1.442695, %v4371_v53  ;;  %v4372_v5 = vsub.f32 %v13939_v19, %v12162_v11 }
 0x82d   : > { %7620 = vmatprep.mubr.f32.mxu0 %v12180_v54  ;;  %7664 = vmatpush3.msra.mxu0 %v5478_v18  ;;  %v12290_v50 = vpop.eup %8061  ;;  %8087 = vpow2.f32 %v4527_v41  ;;  %v13938_v54 = vld [vmem:[#allocation193_spill] sm:$0xff]  ;;  %v4529_v63 = vmul.f32 1.442695, %v4370_v21 }
 0x82e   : > { %4645 = vadd.xlane.f32.xlu0 %v4644_v47  ;;  %4977 = vmatmul.mubr.f32.gmra.mxu1 %v12131_v39  ;;  %v12293_v14 = vpop.eup %8063  ;;  %8089 = vpow2.f32 %v4497_v28  ;;  %v4366_v46 = vsub.f32 %v13938_v54, %v12141_v59  ;;  %v4659_v39 = vadd.f32 %v12280_v58, %v12273_v6  ;;  %v4632_v59 = vadd.f32 %v12146_v55, %v4631_v34  ;;  %v13940_v54 = vld [vmem:[#allocation132_spill] sm:$0xff] }
 0x82f   : > { %4981 = vmatprep.mubr.f32.mxu1 %v12176_v32  ;;  %4625 = vadd.xlane.f32.xlu1 %v4624_v20  ;;  %v12298_v3 = vpop.eup %8065  ;;  %8091 = vpow2.f32 %v4517_v38  ;;  %v4652_v1 = vadd.f32 %v12293_v14, %v4651_v48  ;;  %v4639_v32 = vadd.f32 %v12235_v24, %v12227_v29  ;;  %v4647_v11 = vadd.f32 %v12290_v50, %v12267_v22 }
 0x830   : > { %7621 = vmatmul.mubr.f32.gmra.mxu0 %v12112_v35  ;;  %7665 = vmatprep.subr.mxu0 %v5477_v33  ;;  %v12304_v62 = vpop.eup %8067  ;;  %8093 = vpow2.f32 %v4519_v43  ;;  %v4521_v8 = vmul.f32 1.442695, %v4366_v46 }
 0x831   : > { %7623 = vmatprep.mubr.f32.mxu0 %v12216_v15  ;;  %7666 = vmatpush3.msra.mxu0 %v5477_v33  ;;  %v12310_v36 = vpop.eup %8069  ;;  %8095 = vpow2.f32 %v4509_v13  ;;  %v4667_v18 = vadd.f32 %v12304_v62, %v12298_v3 }
 0x832   : > { %4653 = vadd.xlane.f32.xlu0 %v4652_v1  ;;  %4982 = vmatmul.mubr.f32.gmra.mxu1 %v12152_v0  ;;  %v8072_v35 = vpop.eup %8071  ;;  %8097 = vpow2.f32 %v4529_v63  ;;  %v4640_v0 = vadd.f32 %v12242_v2, %v4639_v32  ;;  %v13941_v63 = vld [vmem:[#allocation123_spill] sm:$0xff] }
 0x833   : > { %4986 = vmatprep.mubr.f32.mxu1 %v12235_v24  ;;  %4633 = vadd.xlane.f32.xlu1 %v4632_v59  ;;  %v12316_v15 = vpop.eup %8073  ;;  %v4660_v56 = vadd.f32 %v8072_v35, %v4659_v39  ;;  %8099 = vpow2.f32 %v4531_v9  ;;  %v13942_v39 = vld [vmem:[#allocation201_spill] sm:$0xff] }
 0x834   : > { %7624 = vmatmul.mubr.f32.gmra.mxu0 %v12146_v55  ;;  %v12321_v41 = vpop.eup %8075  ;;  %8101 = vpow2.f32 %v4521_v8  ;;  %v4533_v55 = vmul.f32 1.442695, %v4372_v5  ;;  %v13944_v8 = vld [vmem:[#allocation135_spill] sm:$0xff]  ;;  %v13945_v5 = vld [vmem:[#allocation206_spill] sm:$0xff] }
 0x835   : > { %7626 = vmatprep.mubr.f32.mxu0 %v12184_v45  ;;  %v8078_v24 = vpop.eup %8077  ;;  %v4675_v45 = vadd.f32 %v12321_v41, %v12316_v15 }
 0x836   : > { %4661 = vadd.xlane.f32.xlu0 %v4660_v56  ;;  %4987 = vmatmul.mubr.f32.gmra.mxu1 %v12227_v29  ;;  %v8080_v20 = vpop.eup %8079  ;;  %v4655_v38 = vadd.f32 %v8078_v24, %v12310_v36  ;;  %8103 = vpow2.f32 %v4533_v55 }
 0x837   : > { %4991 = vmatprep.mubr.f32.mxu1 %v12211_v25  ;;  %4641 = vadd.xlane.f32.xlu1 %v4640_v0  ;;  %v8082_v28 = vpop.eup %8081  ;;  %v4668_v52 = vadd.f32 %v8080_v20, %v4667_v18 }
 0x838   : > { %7627 = vmatmul.mubr.f32.gmra.mxu0 %v12242_v2  ;;  %v8084_v42 = vpop.eup %8083  ;;  %v4648_v47 = vadd.f32 %v8082_v28, %v4647_v11 }
 0x839   : > { %7629 = vmatprep.mubr.f32.mxu0 %v12263_v49  ;;  %v8086_v29 = vpop.eup %8085 }
 0x83a   : > { %4669 = vadd.xlane.f32.xlu0 %v4668_v52  ;;  %4992 = vmatmul.mubr.f32.gmra.mxu1 %v12190_v4  ;;  %v8088_v12 = vpop.eup %8087  ;;  %v4663_v48 = vadd.f32 %v8086_v29, %v8084_v42 }
 0x83b   : > { %4996 = vmatprep.mubr.f32.mxu1 %v12290_v50  ;;  %4649 = vadd.xlane.f32.xlu1 %v4648_v47  ;;  %v8090_v25 = vpop.eup %8089  ;;  %v4676_v2 = vadd.f32 %v8088_v12, %v4675_v45 }
 0x83c   : > { %7630 = vmatmul.mubr.f32.gmra.mxu0 %v8082_v28  ;;  %v12336_v21 = vpop.eup %8091  ;;  %v4656_v49 = vadd.f32 %v8090_v25, %v4655_v38  ;;  %v13947_v28 = vld [vmem:[#allocation203_spill] sm:$0xff]  ;;  %v13949_v38 = vld [vmem:[#allocation204_spill] sm:$0xff] }
 0x83d   : > { %7632 = vmatprep.mubr.f32.mxu0 %v12293_v14  ;;  %v8094_v43 = vpop.eup %8093 }
 0x83e   : > { %4677 = vadd.xlane.f32.xlu0 %v4676_v2  ;;  %4997 = vmatmul.mubr.f32.gmra.mxu1 %v12267_v22  ;;  %v8096_v4 = vpop.eup %8095  ;;  %v4671_v34 = vadd.f32 %v8094_v43, %v12336_v21 }
 0x83f   : > { %5001 = vmatprep.mubr.f32.mxu1 %v12253_v26  ;;  %4657 = vadd.xlane.f32.xlu1 %v4656_v49  ;;  %v12341_v44 = vpop.eup %8097  ;;  %v4664_v53 = vadd.f32 %v8096_v4, %v4663_v48 }
 0x840   : > { %7633 = vmatmul.mubr.f32.gmra.mxu0 %v8090_v25  ;;  %v12344_v33 = vpop.eup %8099 }
 0x841   : > { %7635 = vmatprep.mubr.f32.mxu0 %v8072_v35  ;;  %v8102_v50 = vpop.eup %8101  ;;  %v4679_v26 = vadd.f32 %v12344_v33, %v12341_v44  ;;  %v13943_v35 = vld [vmem:[#allocation202_spill] sm:$0xff] }
 0x842   : > { %5002 = vmatmul.mubr.f32.gmra.mxu1 %v12248_v30  ;;  %v4672_v22 = vadd.f32 %v8102_v50, %v4671_v34 }
 0x843   : > { %5006 = vmatprep.mubr.f32.mxu1 %v8078_v24  ;;  %4665 = vadd.xlane.f32.xlu1 %v4664_v53  ;;  %v8104_v14 = vpop.eup %8103 }
 0x844   : > { %7636 = vmatmul.mubr.f32.gmra.mxu0 %v8096_v4  ;;  %v4680_v13 = vadd.f32 %v8104_v14, %v4679_v26 }
 0x845   : > { %7638 = vmatprep.mubr.f32.mxu0 %v8080_v20  ;;  %v13946_v20 = vld [vmem:[#allocation205_spill] sm:$0xff] }
 0x846   : > { %5007 = vmatmul.mubr.f32.gmra.mxu1 %v12310_v36 }
 0x847   : > { %5011 = vmatprep.mubr.f32.mxu1 %v12280_v58  ;;  %4673 = vadd.xlane.f32.xlu1 %v4672_v22 }
 0x848   : > { %7639 = vmatmul.mubr.f32.gmra.mxu0 %v8102_v50 }
 0x849   : > { %7641 = vmatprep.mubr.f32.mxu0 %v8088_v12 }
 0x84a   : > { %5012 = vmatmul.mubr.f32.gmra.mxu1 %v12273_v6 }
 0x84b   : > { %v4270_v30 = vpop.xlane.xlu1 %4269  ;;  %5016 = vmatprep.mubr.f32.mxu1 %v8086_v29  ;;  %4681 = vadd.xlane.f32.xlu1 %v4680_v13 }
 0x84c   : > { %v4373_v46 = vsub.f32 %v13940_v54, %v4270_v30  ;;  %v4374_v1 = vsub.f32 %v13941_v63, %v4270_v30  ;;  %v4375_v9 = vsub.f32 %v13942_v39, %v4270_v30  ;;  %7642 = vmatmul.mubr.f32.gmra.mxu0 %v8104_v14 }
 0x84e   : > { %v4535_v59 = vmul.f32 1.442695, %v4373_v46  ;;  %v4537_v32 = vmul.f32 1.442695, %v4374_v1  ;;  %v4539_v58 = vmul.f32 1.442695, %v4375_v9  ;;  %5017 = vmatmul.mubr.f32.gmra.mxu1 %v8084_v42 }
 0x84f   : > { %v4278_v36 = vpop.xlane.xlu1 %4277  ;;  %5021 = vmatprep.mubr.f32.mxu1 %v12304_v62  ;;  %v13948_v42 = vld [vmem:[#allocation207_spill] sm:$0xff] }
 0x850   : > { %8105 = vpow2.f32 %v4535_v59  ;;  %v4379_v6 = vsub.f32 %v13943_v35, %v4278_v36  ;;  %v4380_v19 = vsub.f32 %v13944_v8, %v4278_v36  ;;  %v4381_v56 = vsub.f32 %v13945_v5, %v4278_v36 }
 0x851   : > { %8107 = vpow2.f32 %v4537_v32  ;;  %v13950_v32 = vld [vmem:[#allocation42_spill] sm:$0xff] }
 0x852   : > { %8109 = vpow2.f32 %v4539_v58  ;;  %v4547_v18 = vmul.f32 1.442695, %v4379_v6  ;;  %v4549_v0 = vmul.f32 1.442695, %v4380_v19  ;;  %v4551_v11 = vmul.f32 1.442695, %v4381_v56  ;;  %v4274_v24 = vpop.xlane.xlu0 %4273  ;;  %5022 = vmatmul.mubr.f32.gmra.mxu1 %v12298_v3 }
 0x853   : > { %v4376_v55 = vsub.f32 %v13946_v20, %v4274_v24  ;;  %v4377_v52 = vsub.f32 %v13947_v28, %v4274_v24  ;;  %v4378_v62 = vsub.f32 %v11836_v61, %v4274_v24  ;;  %v4282_v45 = vpop.xlane.xlu1 %4281  ;;  %5026 = vmatprep.mubr.f32.mxu1 %v8094_v43  ;;  %v13952_v24 = vld [vmem:[#allocation101_spill] sm:$0xff]  ;;  %v13953_v28 = vld [vmem:[#allocation38_spill] sm:$0xff] }
 0x854   : > { %8111 = vpow2.f32 %v4547_v18  ;;  %v4382_v47 = vsub.f32 %v13948_v42, %v4282_v45  ;;  %v4383_v29 = vsub.f32 %v13949_v38, %v4282_v45  ;;  %v4384_v12 = vsub.f32 %v11845_v23, %v4282_v45 }
 0x855   : > { %8113 = vpow2.f32 %v4549_v0  ;;  %v4541_v25 = vmul.f32 1.442695, %v4376_v55  ;;  %v4543_v2 = vmul.f32 1.442695, %v4377_v52  ;;  %v4545_v49 = vmul.f32 1.442695, %v4378_v62 }
 0x856   : > { %8115 = vpow2.f32 %v4551_v11  ;;  %v4553_v3 = vmul.f32 1.442695, %v4382_v47  ;;  %v4555_v48 = vmul.f32 1.442695, %v4383_v29  ;;  %v4302_v4 = vpop.xlane.xlu0 %4301  ;;  %5027 = vmatmul.mubr.f32.gmra.mxu1 %v12336_v21  ;;  %v4557_v23 = vmul.f32 1.442695, %v4384_v12 }
 0x857   : > { %8117 = vpow2.f32 %v4541_v25  ;;  %v4397_v61 = vsub.f32 %v11842_v60, %v4302_v4  ;;  %v4398_v43 = vsub.f32 %v11830_v51, %v4302_v4  ;;  %v4399_v53 = vsub.f32 %v11863_v37, %v4302_v4  ;;  %v4286_v34 = vpop.xlane.xlu1 %4285  ;;  %5031 = vmatprep.mubr.f32.mxu1 %v12321_v41  ;;  %v13951_v0 = vld [vmem:[#allocation157_spill] sm:$0xff]  ;;  %v13955_v4 = vld [vmem:[#allocation72_spill] sm:$0xff] }
 0x858   : > { %8119 = vpow2.f32 %v4543_v2  ;;  %v4385_v50 = vsub.f32 %v11839_v17, %v4286_v34  ;;  %v4386_v26 = vsub.f32 %v11827_v40, %v4286_v34  ;;  %v4387_v14 = vsub.f32 %v11860_v16, %v4286_v34  ;;  %v13956_v34 = vld [vmem:[#allocation73_spill] sm:$0xff] }
 0x859   : > { %8121 = vpow2.f32 %v4545_v49  ;;  %v4583_v22 = vmul.f32 1.442695, %v4397_v61  ;;  %v4585_v21 = vmul.f32 1.442695, %v4398_v43  ;;  %v4587_v51 = vmul.f32 1.442695, %v4399_v53 }
 0x85a   : > { %8123 = vpow2.f32 %v4553_v3  ;;  %v2369_v60 = vpop.xlane.xlu0 %2368  ;;  %5032 = vmatmul.mubr.f32.gmra.mxu1 %v12316_v15  ;;  %v4559_v13 = vmul.f32 1.442695, %v4385_v50  ;;  %v4561_v30 = vmul.f32 1.442695, %v4386_v26  ;;  %v4563_v16 = vmul.f32 1.442695, %v4387_v14 }
 0x85b   : > { %8125 = vpow2.f32 %v4555_v48  ;;  %v4290_v37 = vpop.xlane.xlu1 %4289  ;;  %5036 = vmatprep.mubr.f32.mxu1 %v12344_v33  ;;  %v13954_v3 = vld [vmem:[#allocation35_spill] sm:$0xff] }
 0x85c   : > { %8127 = vpow2.f32 %v4557_v23  ;;  %v4388_v17 = vsub.f32 %v11866_v31, %v4290_v37  ;;  %v4389_v40 = vsub.f32 %v11853_v7, %v4290_v37  ;;  %v4390_v46 = vsub.f32 %v11883_v10, %v4290_v37 }
 0x85d   : > { %v8106_v41 = vpop.eup %8105  ;;  %8129 = vpow2.f32 %v4583_v22 }
 0x85e   : > { %v8108_v54 = vpop.eup %8107  ;;  %8131 = vpow2.f32 %v4585_v21  ;;  %v2377_v63 = vpop.xlane.xlu0 %2376  ;;  %5037 = vmatmul.mubr.f32.gmra.mxu1 %v12341_v44  ;;  %v4565_v33 = vmul.f32 1.442695, %v4388_v17  ;;  %v4567_v59 = vmul.f32 1.442695, %v4389_v40  ;;  %v4569_v35 = vmul.f32 1.442695, %v4390_v46 }
 0x85f   : > { %v8110_v15 = vpop.eup %8109  ;;  %8133 = vpow2.f32 %v4587_v51  ;;  %v4294_v1 = vpop.xlane.xlu1 %4293  ;;  %v4683_v39 = vadd.f32 %v8108_v54, %v8106_v41  ;;  %5041 = vmatprep.mubr.f32.mxu1 %v8108_v54  ;;  %v13957_v54 = vld [vmem:[#allocation45_spill] sm:$0xff] }
 0x860   : > { %8135 = vpow2.f32 %v4559_v13  ;;  %7644 = vmatprep.mubr.f32.mxu0 %v8110_v15  ;;  %v4391_v31 = vsub.f32 %v11889_v27, %v4294_v1  ;;  %v4392_v7 = vsub.f32 %v11879_v57, %v4294_v1  ;;  %v4393_v10 = vsub.f32 %v13950_v32, %v4294_v1  ;;  %v13959_v32 = vld [vmem:[#allocation152_spill] sm:$0xff] }
 0x861   : > { %v8112_v9 = vpop.eup %8111  ;;  %8137 = vpow2.f32 %v4561_v30  ;;  %v4684_v58 = vadd.f32 %v8110_v15, %v4683_v39 }
 0x862   : > { %v8114_v36 = vpop.eup %8113  ;;  %8139 = vpow2.f32 %v4563_v16  ;;  %v2385_v44 = vpop.xlane.xlu0 %2384  ;;  %5042 = vmatmul.mubr.f32.gmra.mxu1 %v8106_v41  ;;  %v4571_v27 = vmul.f32 1.442695, %v4391_v31  ;;  %v4573_v5 = vmul.f32 1.442695, %v4392_v7  ;;  %v4575_v18 = vmul.f32 1.442695, %v4393_v10 }
 0x863   : > { %v8116_v6 = vpop.eup %8115  ;;  %8141 = vrcp.f32 %v2369_v60  ;;  %4685 = vadd.xlane.f32.xlu0 %v4684_v58  ;;  %v4691_v8 = vadd.f32 %v8114_v36, %v8112_v9  ;;  %v13958_v16 = vld [vmem:[#allocation104_spill] sm:$0xff]  ;;  %v13960_v10 = vld [vmem:[#allocation5_spill] sm:$0xff] }
 0x864   : > { %v8118_v19 = vpop.eup %8117  ;;  %8143 = vpow2.f32 %v4565_v33  ;;  %v4298_v57 = vpop.xlane.xlu1 %4297  ;;  %v2930_v46 = vadd.f32 %v13958_v16, %v13957_v54  ;;  %v2940_v58 = vadd.f32 %v13960_v10, %v13959_v32  ;;  %v13970_v54 = vld [vmem:[#allocation122_spill] sm:$0xff] }
 0x865   : > { %v8120_v56 = vpop.eup %8119  ;;  %8145 = vpow2.f32 %v4567_v59  ;;  %v4394_v11 = vsub.f32 %v13951_v0, %v4298_v57  ;;  %v4395_v20 = vsub.f32 %v13952_v24, %v4298_v57  ;;  %v4396_v52 = vsub.f32 %v13953_v28, %v4298_v57  ;;  %v13974_v32 = vld [vmem:[#allocation22_spill] sm:$0xff] }
 0x866   : > { %v8122_v55 = vpop.eup %8121  ;;  %8147 = vpow2.f32 %v4569_v35  ;;  %5046 = vmatprep.mubr.f32.mxu1 %v8120_v56  ;;  %v4692_v62 = vadd.f32 %v8116_v6, %v4691_v8  ;;  %v2393_v45 = vpop.xlane.xlu0 %2392  ;;  %v4687_v42 = vadd.f32 %v8120_v56, %v8118_v19  ;;  %v13961_v56 = vld [vmem:[#allocation154_spill] sm:$0xff] }
 0x867   : > { %v8124_v47 = vpop.eup %8123  ;;  %8149 = vrcp.f32 %v2377_v63  ;;  %7645 = vmatmul.mubr.f32.gmra.mxu0 %v8122_v55  ;;  %5047 = vmatmul.mubr.f32.gmra.mxu1 %v8118_v19  ;;  %v4577_v29 = vmul.f32 1.442695, %v4394_v11  ;;  %v4579_v49 = vmul.f32 1.442695, %v4395_v20  ;;  %v4581_v53 = vmul.f32 1.442695, %v4396_v52 }
 0x868   : > { %v8126_v38 = vpop.eup %8125  ;;  %8151 = vpow2.f32 %v4571_v27  ;;  %4693 = vadd.xlane.f32.xlu0 %v4692_v62  ;;  %7647 = vmatprep.mubr.f32.mxu0 %v8116_v6  ;;  %v4306_v12 = vpop.xlane.xlu1 %4305  ;;  %v4688_v25 = vadd.f32 %v8122_v55, %v4687_v42 }
 0x869   : > { %v8128_v2 = vpop.eup %8127  ;;  %8153 = vpow2.f32 %v4573_v5  ;;  %v4400_v48 = vsub.f32 %v13954_v3, %v4306_v12  ;;  %v4401_v61 = vsub.f32 %v13955_v4, %v4306_v12  ;;  %5051 = vmatprep.mubr.f32.mxu1 %v8114_v36  ;;  %v4402_v23 = vsub.f32 %v13956_v34, %v4306_v12 }
 0x86a   : > { %v12388_v43 = vpop.eup %8129  ;;  %8155 = vpow2.f32 %v4575_v18  ;;  %4689 = vadd.xlane.f32.xlu1 %v4688_v25  ;;  %v2401_v50 = vpop.xlane.xlu0 %2400  ;;  %v4695_v22 = vadd.f32 %v8126_v38, %v8124_v47  ;;  %v13962_v18 = vld [vmem:[#allocation110_spill] sm:$0xff] }
 0x86b   : > { %v12391_v26 = vpop.eup %8131  ;;  %8157 = vrcp.f32 %v2385_v44  ;;  %7648 = vmatmul.mubr.f32.gmra.mxu0 %v8128_v2  ;;  %5052 = vmatmul.mubr.f32.gmra.mxu1 %v8112_v9  ;;  %v4589_v14 = vmul.f32 1.442695, %v4400_v48  ;;  %v4591_v13 = vmul.f32 1.442695, %v4401_v61  ;;  %v4593_v41 = vmul.f32 1.442695, %v4402_v23 }
 0x86c   : > { %v12393_v21 = vpop.eup %8133  ;;  %8159 = vpow2.f32 %v4577_v29  ;;  %v2373_v60 = vpop.xlane.xlu1 %2372  ;;  %5056 = vmatprep.mubr.f32.mxu1 %v8126_v38  ;;  %v4696_v51 = vadd.f32 %v8128_v2, %v4695_v22  ;;  %v2950_v0 = vadd.f32 %v13962_v18, %v13961_v56  ;;  %v4715_v62 = vadd.f32 %v12391_v26, %v12388_v43  ;;  %v13963_v38 = vld [vmem:[#allocation156_spill] sm:$0xff]  ;;  %v13964_v29 = vld [vmem:[#allocation14_spill] sm:$0xff]  ;;  %v13966_v22 = vld [vmem:[#allocation119_spill] sm:$0xff] }
 0x86d   : > { %v8136_v37 = vpop.eup %8135  ;;  %8161 = vpow2.f32 %v4579_v49  ;;  %v2960_v12 = vadd.f32 %v13964_v29, %v13963_v38  ;;  %v13983_v29 = vld [vmem:[#allocation87_spill] sm:$0xff] }
 0x86e   : > { %v8138_v17 = vpop.eup %8137  ;;  %8163 = vpow2.f32 %v4581_v53  ;;  %4697 = vadd.xlane.f32.xlu1 %v4696_v51  ;;  %v2409_v30 = vpop.xlane.xlu0 %2408  ;;  %v4716_v61 = vadd.f32 %v12393_v21, %v4715_v62 }
 0x86f   : > { %v8140_v40 = vpop.eup %8139  ;;  %8165 = vrcp.f32 %v2393_v45  ;;  %v4699_v63 = vadd.f32 %v8138_v17, %v8136_v37  ;;  %5057 = vmatmul.mubr.f32.gmra.mxu1 %v8124_v47 }
 0x870   : > { %v8142_v15 = vpop.eup %8141  ;;  %8167 = vpow2.f32 %v4589_v14  ;;  %7650 = vmatprep.mubr.f32.mxu0 %v8140_v40  ;;  %v2381_v1 = vpop.xlane.xlu1 %2380  ;;  %5061 = vmatprep.mubr.f32.mxu1 %v8138_v17 }
 0x871   : > { %v8144_v39 = vpop.eup %8143  ;;  %v3120_v33 = vmul.f32 %v8142_v15, %v2930_v46  ;;  %8169 = vpow2.f32 %v4591_v13  ;;  %v4700_v31 = vadd.f32 %v8140_v40, %v4699_v63  ;;  %v13968_v13 = vld [vmem:[#allocation68_spill] sm:$0xff]  ;;  %v13969_v40 = vld [vmem:[#allocation111_spill] sm:$0xff] }
 0x872   : > { %v8146_v7 = vpop.eup %8145  ;;  %8171 = vpow2.f32 %v4593_v41  ;;  %v2417_v9 = vpop.xlane.xlu0 %2416  ;;  %v2980_v16 = vadd.f32 %v13970_v54, %v13969_v40 }
 0x873   : > { %v8148_v59 = vpop.eup %8147  ;;  %3152 = vst.msk [vmem:[#allocation2] sm:$0xff] %vm328_vm0, %v3120_v33  ;;  %8173 = vrcp.f32 %v2401_v50  ;;  %4701 = vadd.xlane.f32.xlu0 %v4700_v31  ;;  %5062 = vmatmul.mubr.f32.gmra.mxu1 %v8136_v37  ;;  %v4703_v36 = vadd.f32 %v8146_v7, %v8144_v39  ;;  %v13965_v50 = vld [vmem:[#allocation146_spill] sm:$0xff]  ;;  %v13967_v37 = vld [vmem:[#allocation151_spill] sm:$0xff] }
 0x874   : > { %v8150_v35 = vpop.eup %8149  ;;  %8175 = vrcp.f32 %v2373_v60  ;;  %7651 = vmatmul.mubr.f32.gmra.mxu0 %v8148_v59  ;;  %v2389_v44 = vpop.xlane.xlu1 %2388  ;;  %5066 = vmatprep.mubr.f32.mxu1 %v8146_v7  ;;  %v2970_v14 = vadd.f32 %v13966_v22, %v13965_v50  ;;  %v2935_v17 = vadd.f32 %v13968_v13, %v13967_v37 }
 0x875   : > { %v8152_v6 = vpop.eup %8151  ;;  %v3122_v8 = vmul.f32 %v8150_v35, %v2940_v58  ;;  %8177 = vrcp.f32 %v2409_v30  ;;  %v4704_v19 = vadd.f32 %v8148_v59, %v4703_v36  ;;  %v13973_v59 = vld [vmem:[#allocation84_spill] sm:$0xff]  ;;  %v13975_v35 = vld [vmem:[#allocation155_spill] sm:$0xff] }
 0x876   : > { %v8154_v27 = vpop.eup %8153  ;;  %8179 = vrcp.f32 %v2381_v1  ;;  %v2425_v5 = vpop.xlane.xlu0 %2424  ;;  %v13971_v1 = vld [vmem:[#allocation153_spill] sm:$0xff]  ;;  %v2990_v10 = vadd.f32 %v13974_v32, %v13973_v59  ;;  %v13993_v59 = vld [vmem:[#allocation163_spill] sm:$0xff] }
 0x877   : > { %v8156_v57 = vpop.eup %8155  ;;  %3154 = vst.msk [vmem:[#allocation2 + $0x10] sm:$0xff] %vm328_vm0, %v3122_v8  ;;  %4705 = vadd.xlane.f32.xlu1 %v4704_v19  ;;  %8181 = vrcp.f32 %v2417_v9  ;;  %v4707_v11 = vadd.f32 %v8154_v27, %v8152_v6  ;;  %5067 = vmatmul.mubr.f32.gmra.mxu1 %v8144_v39  ;;  %v13972_v39 = vld [vmem:[#allocation6_spill] sm:$0xff]  ;;  %v13994_v32 = vld [vmem:[#allocation31_spill] sm:$0xff] }
 0x878   : > { %v8158_v24 = vpop.eup %8157  ;;  %7653 = vmatprep.mubr.f32.mxu0 %v8156_v57  ;;  %8183 = vrcp.f32 %v2389_v44  ;;  %v2397_v20 = vpop.xlane.xlu1 %2396  ;;  %5071 = vmatprep.mubr.f32.mxu1 %v8154_v27  ;;  %v2945_v33 = vadd.f32 %v13972_v39, %v13971_v1  ;;  %v13976_v44 = vld [vmem:[#allocation108_spill] sm:$0xff]  ;;  %v13992_v1 = vld [vmem:[#allocation121_spill] sm:$0xff] }
 0x879   : > { %v8160_v55 = vpop.eup %8159  ;;  %v3124_v28 = vmul.f32 %v8158_v24, %v2950_v0  ;;  %v4708_v52 = vadd.f32 %v8156_v57, %v4707_v11  ;;  %8185 = vrcp.f32 %v2425_v5  ;;  %v13977_v27 = vld [vmem:[#allocation88_spill] sm:$0xff]  ;;  %v13979_v0 = vld [vmem:[#allocation143_spill] sm:$0xff] }
 0x87a   : > { %v8162_v45 = vpop.eup %8161  ;;  %8187 = vrcp.f32 %v2397_v20  ;;  %v2433_v42 = vpop.xlane.xlu0 %2432  ;;  %v13978_v5 = vld [vmem:[#allocation24_spill] sm:$0xff] }
 0x87b   : > { %v8164_v47 = vpop.eup %8163  ;;  %3156 = vst.msk [vmem:[#allocation2 + $0x20] sm:$0xff] %vm328_vm0, %v3124_v28  ;;  %4709 = vadd.xlane.f32.xlu0 %v4708_v52  ;;  %5072 = vmatmul.mubr.f32.gmra.mxu1 %v8152_v6  ;;  %v4711_v25 = vadd.f32 %v8162_v45, %v8160_v55  ;;  %8189 = vrcp.f32 %v2433_v42  ;;  %v2955_v6 = vadd.f32 %v13976_v44, %v13975_v35  ;;  %v13980_v11 = vld [vmem:[#allocation12_spill] sm:$0xff]  ;;  %v13982_v52 = vld [vmem:[#allocation130_spill] sm:$0xff] }
 0x87c   : > { %v8166_v2 = vpop.eup %8165  ;;  %7654 = vmatmul.mubr.f32.gmra.mxu0 %v8164_v47  ;;  %v2405_v49 = vpop.xlane.xlu1 %2404  ;;  %5076 = vmatprep.mubr.f32.mxu1 %v8162_v45  ;;  %v3000_v57 = vadd.f32 %v13978_v5, %v13977_v27  ;;  %v2965_v24 = vadd.f32 %v13980_v11, %v13979_v0 }
 0x87d   : > { %v12408_v3 = vpop.eup %8167  ;;  %v3126_v48 = vmul.f32 %v8166_v2, %v2960_v12  ;;  %7656 = vmatprep.mubr.f32.mxu0 %v12393_v21  ;;  %v4712_v4 = vadd.f32 %v8164_v47, %v4711_v25  ;;  %8191 = vrcp.f32 %v2405_v49  ;;  %v5413_v21 = vld [vmem:[#allocation2] sm:$0xff]  ;;  %v13984_v12 = vld [vmem:[#allocation13_spill] sm:$0xff] }
 0x87e   : > { %v8170_v53 = vpop.eup %8169  ;;  %v2441_v34 = vpop.xlane.xlu0 %2440  ;;  %v2975_v25 = vadd.f32 %v13984_v12, %v13983_v29  ;;  %v5415_v50 = vld [vmem:[#allocation2 + $0x10] sm:$0xff] }
 0x87f   : > { %v8172_v23 = vpop.eup %8171  ;;  %3158 = vst.msk [vmem:[#allocation2 + $0x30] sm:$0xff] %vm328_vm0, %v3126_v48  ;;  %4713 = vadd.xlane.f32.xlu1 %v4712_v4  ;;  %4717 = vadd.xlane.f32.xlu0 %v4716_v61  ;;  %v4719_v60 = vadd.f32 %v8170_v53, %v12408_v3  ;;  %8193 = vrcp.f32 %v2441_v34  ;;  %v13985_v4 = vld [vmem:[#allocation160_spill] sm:$0xff]  ;;  %v13986_v61 = vld [vmem:[#allocation133_spill] sm:$0xff] }
 0x880   : > { %v8174_v51 = vpop.eup %8173  ;;  %7657 = vmatmul.mubr.f32.gmra.mxu0 %v8172_v23  ;;  %5077 = vmatmul.mubr.f32.gmra.mxu1 %v8160_v55  ;;  %v2413_v41 = vpop.xlane.xlu1 %2412  ;;  %v14002_v29 = vld [vmem:[#allocation33_spill] sm:$0xff] }
 0x881   : > { %v8176_v30 = vpop.eup %8175  ;;  %v3128_v46 = vmul.f32 %v8174_v51, %v2970_v14  ;;  %7667 = vmatprep.mubr.msk.f32.mxu0 %vm328_vm0, %v5413_v21  ;;  %v4720_v63 = vadd.f32 %v8172_v23, %v4719_v60  ;;  %8195 = vrcp.f32 %v2413_v41  ;;  %5081 = vmatprep.mubr.f32.mxu1 %v12391_v26  ;;  %v13987_v14 = vld [vmem:[#allocation76_spill] sm:$0xff]  ;;  %v13988_v60 = vld [vmem:[#allocation15_spill] sm:$0xff]  ;;  %v13989_v41 = vld [vmem:[#allocation161_spill] sm:$0xff] }
 0x882   : > { %v8178_v15 = vpop.eup %8177  ;;  %v3121_v31 = vmul.f32 %v8176_v30, %v2935_v17  ;;  %v2449_v7 = vpop.xlane.xlu0 %2448  ;;  %v2985_v51 = vadd.f32 %v13988_v60, %v13987_v14  ;;  %v13990_v30 = vld [vmem:[#allocation29_spill] sm:$0xff]  ;;  %v14006_v60 = vld [vmem:[#allocation43_spill] sm:$0xff] }
 0x883   : > { %v8180_v9 = vpop.eup %8179  ;;  %3160 = vst.msk [vmem:[#allocation2 + $0x40] sm:$0xff] %vm328_vm0, %v3128_v46  ;;  %v3130_v58 = vmul.f32 %v8178_v15, %v2980_v16  ;;  %4721 = vadd.xlane.f32.xlu1 %v4720_v63  ;;  %8197 = vrcp.f32 %v2449_v7  ;;  %v3030_v40 = vadd.f32 %v13990_v30, %v13989_v41  ;;  %v5417_v46 = vld [vmem:[#allocation2 + $0x20] sm:$0xff]  ;;  %v13991_v15 = vld [vmem:[#allocation86_spill] sm:$0xff]  ;;  %v14005_v14 = vld [vmem:[#allocation169_spill] sm:$0xff] }
 0x884   : > { %v8182_v36 = vpop.eup %8181  ;;  %3153 = vst.msk [vmem:[#allocation2 + $0x8] sm:$0xff] %vm328_vm0, %v3121_v31  ;;  %v3123_v26 = vmul.f32 %v8180_v9, %v2945_v33  ;;  %5082 = vmatmul.mubr.f32.gmra.mxu1 %v12388_v43  ;;  %v2421_v8 = vpop.xlane.xlu1 %2420  ;;  %v13981_v43 = vld [vmem:[#allocation92_spill] sm:$0xff]  ;;  %v2995_v39 = vadd.f32 %v13992_v1, %v13991_v15  ;;  %v14007_v30 = vld [vmem:[#allocation162_spill] sm:$0xff]  ;;  %v14009_v1 = vld [vmem:[#allocation171_spill] sm:$0xff] }
 0x885   : > { %v8184_v19 = vpop.eup %8183  ;;  %3162 = vst.msk [vmem:[#allocation2 + $0x50] sm:$0xff] %vm328_vm0, %v3130_v58  ;;  %v3132_v56 = vmul.f32 %v8182_v36, %v2990_v10  ;;  %8199 = vrcp.f32 %v2421_v8  ;;  %5086 = vmatprep.mubr.f32.mxu1 %v8170_v53  ;;  %v3010_v62 = vadd.f32 %v13982_v52, %v13981_v43  ;;  %v3020_v53 = vadd.f32 %v13986_v61, %v13985_v4  ;;  %v14000_v43 = vld [vmem:[#allocation131_spill] sm:$0xff] }
 0x886   : > { %v8186_v18 = vpop.eup %8185  ;;  %3155 = vst.msk [vmem:[#allocation2 + $0x18] sm:$0xff] %vm328_vm0, %v3123_v26  ;;  %v3125_v20 = vmul.f32 %v8184_v19, %v2955_v6  ;;  %v2457_v55 = vpop.xlane.xlu0 %2456  ;;  %v3040_v10 = vadd.f32 %v13994_v32, %v13993_v59  ;;  %v5419_v35 = vld [vmem:[#allocation2 + $0x30] sm:$0xff]  ;;  %v13995_v6 = vld [vmem:[#allocation159_spill] sm:$0xff]  ;;  %v13996_v26 = vld [vmem:[#allocation124_spill] sm:$0xff] }
 0x887   : > { %v8188_v28 = vpop.eup %8187  ;;  %3164 = vst.msk [vmem:[#allocation2 + $0x60] sm:$0xff] %vm328_vm0, %v3132_v56  ;;  %v3134_v45 = vmul.f32 %v8186_v18, %v3000_v57  ;;  %8201 = vrcp.f32 %v2457_v55  ;;  %v3005_v8 = vadd.f32 %v13996_v26, %v13995_v6  ;;  %v13997_v56 = vld [vmem:[#allocation165_spill] sm:$0xff]  ;;  %v13998_v18 = vld [vmem:[#allocation34_spill] sm:$0xff]  ;;  %v14003_v61 = vld [vmem:[#allocation95_spill] sm:$0xff] }
 0x888   : > { %v8190_v42 = vpop.eup %8189  ;;  %3157 = vst.msk [vmem:[#allocation2 + $0x28] sm:$0xff] %vm328_vm0, %v3125_v20  ;;  %v3127_v47 = vmul.f32 %v8188_v28, %v2965_v24  ;;  %5087 = vmatmul.mubr.f32.gmra.mxu1 %v12408_v3  ;;  %v2429_v38 = vpop.xlane.xlu1 %2428  ;;  %v3050_v0 = vadd.f32 %v13998_v18, %v13997_v56  ;;  %v13999_v28 = vld [vmem:[#allocation40_spill] sm:$0xff] }
 0x889   : > { %3166 = vst.msk [vmem:[#allocation2 + $0x70] sm:$0xff] %vm328_vm0, %v3134_v45  ;;  %v3136_v2 = vmul.f32 %v8190_v42, %v3010_v62  ;;  %8203 = vrcp.f32 %v2429_v38  ;;  %v3015_v52 = vadd.f32 %v14000_v43, %v13999_v28  ;;  %v14001_v38 = vld [vmem:[#allocation167_spill] sm:$0xff] }
 0x88a   : > { %v8192_v49 = vpop.eup %8191  ;;  %3159 = vst.msk [vmem:[#allocation2 + $0x38] sm:$0xff] %vm328_vm0, %v3127_v47  ;;  %v2465_v48 = vpop.xlane.xlu0 %2464  ;;  %v5421_v20 = vld [vmem:[#allocation2 + $0x40] sm:$0xff]  ;;  %v3060_v12 = vadd.f32 %v14002_v29, %v14001_v38 }
 0x88b   : > { %3168 = vst.msk [vmem:[#allocation2 + $0x80] sm:$0xff] %vm328_vm0, %v3136_v2  ;;  %v3129_v34 = vmul.f32 %v8192_v49, %v2975_v25  ;;  %v5414_v23 = vld [vmem:[#allocation2 + $0x8] sm:$0xff]  ;;  %8205 = vrcp.f32 %v2465_v48 }
 0x88c   : > { %v8194_v3 = vpop.eup %8193  ;;  %7668 = vmatmul.mubr.msk.f32.vlgmr.msra.gmra.mxu0 %vm328_vm0, %v5414_v23  ;;  %v2437_v22 = vpop.xlane.xlu1 %2436  ;;  %v5423_v49 = vld [vmem:[#allocation2 + $0x50] sm:$0xff] }
 0x88d   : > { %3161 = vst.msk [vmem:[#allocation2 + $0x48] sm:$0xff] %vm328_vm0, %v3129_v34  ;;  %v3138_v37 = vmul.f32 %v8194_v3, %v3020_v53  ;;  %7670 = vmatprep.mubr.msk.f32.mxu0 %vm328_vm0, %v5415_v50  ;;  %v5416_v13 = vld [vmem:[#allocation2 + $0x18] sm:$0xff]  ;;  %8207 = vrcp.f32 %v2437_v22 }
 0x88e   : > { %v8196_v17 = vpop.eup %8195  ;;  %v2473_v21 = vpop.xlane.xlu0 %2472  ;;  %v14004_v53 = vld [vmem:[#allocation134_spill] sm:$0xff] }
 0x88f   : > { %3170 = vst.msk [vmem:[#allocation2 + $0x90] sm:$0xff] %vm328_vm0, %v3138_v37  ;;  %v3131_v54 = vmul.f32 %v8196_v17, %v2985_v51  ;;  %8209 = vrcp.f32 %v2473_v21  ;;  %v5418_v31 = vld [vmem:[#allocation2 + $0x28] sm:$0xff]  ;;  %v3025_v34 = vadd.f32 %v14004_v53, %v14003_v61  ;;  %v3070_v51 = vadd.f32 %v14006_v60, %v14005_v14  ;;  %v5425_v17 = vld [vmem:[#allocation2 + $0x60] sm:$0xff] }
 0x890   : > { %v8198_v16 = vpop.eup %8197  ;;  %7671 = vmatmul.mubr.msk.f32.gmra.mxu0 %vm328_vm0, %v5416_v13  ;;  %v2445_v63 = vpop.xlane.xlu1 %2444 }
 0x891   : > { %3163 = vst.msk [vmem:[#allocation2 + $0x58] sm:$0xff] %vm328_vm0, %v3131_v54  ;;  %v3140_v33 = vmul.f32 %v8198_v16, %v3030_v40  ;;  %7673 = vmatprep.mubr.msk.f32.mxu0 %vm328_vm0, %v5417_v46  ;;  %8211 = vrcp.f32 %v2445_v63  ;;  %v5420_v27 = vld [vmem:[#allocation2 + $0x38] sm:$0xff] }
 0x892   : > { %v8200_v7 = vpop.eup %8199  ;;  %v2481_v9 = vpop.xlane.xlu0 %2480  ;;  %v14008_v40 = vld [vmem:[#allocation30_spill] sm:$0xff] }
 0x893   : > { %3172 = vst.msk [vmem:[#allocation2 + $0xa0] sm:$0xff] %vm328_vm0, %v3140_v33  ;;  %v3133_v58 = vmul.f32 %v8200_v7, %v2995_v39  ;;  %8213 = vrcp.f32 %v2481_v9  ;;  %v3035_v54 = vadd.f32 %v14008_v40, %v14007_v30  ;;  %v14010_v39 = vld [vmem:[#allocation150_spill] sm:$0xff]  ;;  %v5427_v9 = vld [vmem:[#allocation2 + $0x70] sm:$0xff] }
 0x894   : > { %v8202_v36 = vpop.eup %8201  ;;  %7674 = vmatmul.mubr.msk.f32.gmra.mxu0 %vm328_vm0, %v5418_v31  ;;  %v2453_v44 = vpop.xlane.xlu1 %2452  ;;  %v5422_v45 = vld [vmem:[#allocation2 + $0x48] sm:$0xff]  ;;  %v3080_v33 = vadd.f32 %v14010_v39, %v14009_v1 }
 0x895   : > { %3165 = vst.msk [vmem:[#allocation2 + $0x68] sm:$0xff] %vm328_vm0, %v3133_v58  ;;  %v3142_v19 = vmul.f32 %v8202_v36, %v3040_v10  ;;  %7676 = vmatprep.mubr.msk.f32.mxu0 %vm328_vm0, %v5419_v35  ;;  %8215 = vrcp.f32 %v2453_v44  ;;  %v14011_v10 = vld [vmem:[#allocation164_spill] sm:$0xff] }
 0x896   : > { %v8204_v5 = vpop.eup %8203  ;;  %v2489_v57 = vpop.xlane.xlu0 %2488  ;;  %v14012_v58 = vld [vmem:[#allocation32_spill] sm:$0xff] }
 0x897   : > { %3174 = vst.msk [vmem:[#allocation2 + $0xb0] sm:$0xff] %vm328_vm0, %v3142_v19  ;;  %v3135_v11 = vmul.f32 %v8204_v5, %v3005_v8  ;;  %8217 = vrcp.f32 %v2489_v57  ;;  %v3045_v36 = vadd.f32 %v14012_v58, %v14011_v10  ;;  %v5429_v8 = vld [vmem:[#allocation2 + $0x80] sm:$0xff]  ;;  %v14014_v5 = vld [vmem:[#allocation145_spill] sm:$0xff] }
 0x898   : > { %v8206_v24 = vpop.eup %8205  ;;  %7677 = vmatmul.mubr.msk.f32.gmra.mxu0 %vm328_vm0, %v5420_v27  ;;  %v2461_v55 = vpop.xlane.xlu1 %2460  ;;  %v5424_v3 = vld [vmem:[#allocation2 + $0x58] sm:$0xff] }
 0x899   : > { %3167 = vst.msk [vmem:[#allocation2 + $0x78] sm:$0xff] %vm328_vm0, %v3135_v11  ;;  %v3144_v62 = vmul.f32 %v8206_v24, %v3050_v0  ;;  %7679 = vmatprep.mubr.msk.f32.mxu0 %vm328_vm0, %v5421_v20  ;;  %8219 = vrcp.f32 %v2461_v55  ;;  %v14013_v27 = vld [vmem:[#allocation166_spill] sm:$0xff]  ;;  %v5431_v11 = vld [vmem:[#allocation2 + $0x90] sm:$0xff]  ;;  %v14015_v24 = vld [vmem:[#allocation168_spill] sm:$0xff] }
 0x89a   : > { %v8208_v42 = vpop.eup %8207  ;;  %v12478_v47 = vpop.f32.mrf.mxu1  ;;  %v3055_v57 = vadd.f32 %v14014_v5, %v14013_v27  ;;  %v14016_v20 = vld [vmem:[#allocation147_spill] sm:$0xff] }
 0x89b   : > { %3176 = vst.msk [vmem:[#allocation2 + $0xc0] sm:$0xff] %vm328_vm0, %v3144_v62  ;;  %v3137_v25 = vmul.f32 %v8208_v42, %v3015_v52  ;;  %v3065_v55 = vadd.f32 %v14016_v20, %v14015_v24  ;;  %v5433_v62 = vld [vmem:[#allocation2 + $0xa0] sm:$0xff]  ;;  %v14018_v42 = vld [vmem:[#allocation148_spill] sm:$0xff] }
 0x89c   : > { %v8210_v2 = vpop.eup %8209  ;;  %7680 = vmatmul.mubr.msk.f32.gmra.mxu0 %vm328_vm0, %v5422_v45  ;;  %v2469_v48 = vpop.xlane.xlu1 %2468  ;;  %v5426_v46 = vld [vmem:[#allocation2 + $0x68] sm:$0xff]  ;;  %v14017_v45 = vld [vmem:[#allocation170_spill] sm:$0xff] }
 0x89d   : > { %v4935_v4 = vpop.f32.mrf.mxu1  ;;  %3169 = vst.msk [vmem:[#allocation2 + $0x88] sm:$0xff] %vm328_vm0, %v3137_v25  ;;  %v3146_v23 = vmul.f32 %v8210_v2, %v3060_v12  ;;  %7682 = vmatprep.mubr.msk.f32.mxu0 %vm328_vm0, %v5423_v49  ;;  %8221 = vrcp.f32 %v2469_v48  ;;  %v3075_v38 = vadd.f32 %v14018_v42, %v14017_v45  ;;  %v14019_v49 = vld [vmem:[#allocation172_spill] sm:$0xff]  ;;  %v14020_v48 = vld [vmem:[#allocation149_spill] sm:$0xff] }
 0x89e   : > { %v8212_v50 = vpop.eup %8211  ;;  %v5435_v2 = vld [vmem:[#allocation2 + $0xb0] sm:$0xff]  ;;  %v3085_v4 = vadd.f32 %v14020_v48, %v14019_v49 }
 0x89f   : > { %v12488_v22 = vpop.f32.mrf.mxu1  ;;  %3178 = vst.msk [vmem:[#allocation2 + $0xd0] sm:$0xff] %vm328_vm0, %v3146_v23  ;;  %v3139_v37 = vmul.f32 %v8212_v50, %v3025_v34 }
 0x8a0   : > { %v8214_v13 = vpop.eup %8213  ;;  %7683 = vmatmul.mubr.msk.f32.gmra.mxu0 %vm328_vm0, %v5424_v3  ;;  %v2477_v21 = vpop.xlane.xlu1 %2476  ;;  %v5428_v44 = vld [vmem:[#allocation2 + $0x78] sm:$0xff] }
 0x8a1   : > { %v4940_v41 = vpop.f32.mrf.mxu1  ;;  %3171 = vst.msk [vmem:[#allocation2 + $0x98] sm:$0xff] %vm328_vm0, %v3139_v37  ;;  %v3148_v16 = vmul.f32 %v8214_v13, %v3070_v51  ;;  %7685 = vmatprep.mubr.msk.f32.mxu0 %vm328_vm0, %v5425_v17  ;;  %8223 = vrcp.f32 %v2477_v21  ;;  %v4598_v17 = vpop.xlane.xlu0 %4597 }
 0x8a2   : > { %v8216_v63 = vpop.eup %8215  ;;  %v5437_v23 = vld [vmem:[#allocation2 + $0xc0] sm:$0xff] }
 0x8a3   : > { %v12498_v15 = vpop.f32.mrf.mxu1  ;;  %3180 = vst.msk [vmem:[#allocation2 + $0xe0] sm:$0xff] %vm328_vm0, %v3148_v16  ;;  %v3141_v31 = vmul.f32 %v8216_v63, %v3035_v54 }
 0x8a4   : > { %v8218_v7 = vpop.eup %8217  ;;  %7686 = vmatmul.mubr.msk.f32.gmra.mxu0 %vm328_vm0, %v5426_v46  ;;  %v2485_v59 = vpop.xlane.xlu1 %2484  ;;  %v5430_v56 = vld [vmem:[#allocation2 + $0x88] sm:$0xff] }
 0x8a5   : > { %v4945_v32 = vpop.f32.mrf.mxu1  ;;  %3173 = vst.msk [vmem:[#allocation2 + $0xa8] sm:$0xff] %vm328_vm0, %v3141_v31  ;;  %v3150_v35 = vmul.f32 %v8218_v7, %v3080_v33  ;;  %7688 = vmatprep.mubr.msk.f32.mxu0 %vm328_vm0, %v5427_v9  ;;  %8225 = vrcp.f32 %v2485_v59  ;;  %v4606_v41 = vpop.xlane.xlu0 %4605 }
 0x8a6   : > { %v8220_v6 = vpop.eup %8219  ;;  %v5439_v50 = vld [vmem:[#allocation2 + $0xd0] sm:$0xff] }
 0x8a7   : > { %3182 = vst.msk [vmem:[#allocation2 + $0xf0] sm:$0xff] %vm328_vm0, %v3150_v35  ;;  %v3143_v26 = vmul.f32 %v8220_v6, %v3045_v36 }
 0x8a8   : > { %7689 = vmatmul.mubr.msk.f32.gmra.mxu0 %vm328_vm0, %v5428_v44  ;;  %v2493_v19 = vpop.xlane.xlu1 %2492  ;;  %v5432_v28 = vld [vmem:[#allocation2 + $0x98] sm:$0xff] }
 0x8a9   : > { %3175 = vst.msk [vmem:[#allocation2 + $0xb8] sm:$0xff] %vm328_vm0, %v3143_v26  ;;  %7691 = vmatprep.mubr.msk.f32.mxu0 %vm328_vm0, %v5429_v8  ;;  %8227 = vrcp.f32 %v2493_v19  ;;  %v4614_v16 = vpop.xlane.xlu0 %4613 }
 0x8aa   : > { %v8222_v18 = vpop.eup %8221  ;;  %v5441_v60 = vld [vmem:[#allocation2 + $0xe0] sm:$0xff] }
 0x8ab   : > { %v3145_v0 = vmul.f32 %v8222_v18, %v3055_v57 }
 0x8ac   : > { %7692 = vmatmul.mubr.msk.f32.gmra.mxu0 %vm328_vm0, %v5430_v56  ;;  %v5434_v29 = vld [vmem:[#allocation2 + $0xa8] sm:$0xff]  ;;  %v4602_v21 = vpop.xlane.xlu1 %4601 }
 0x8ad   : > { %3177 = vst.msk [vmem:[#allocation2 + $0xc8] sm:$0xff] %vm328_vm0, %v3145_v0  ;;  %7694 = vmatprep.mubr.msk.f32.mxu0 %vm328_vm0, %v5431_v11  ;;  %8229 = vrcp.f32 %v4602_v21  ;;  %v4622_v39 = vpop.xlane.xlu0 %4621 }
 0x8ae   : > { %v8224_v43 = vpop.eup %8223  ;;  %v5443_v37 = vld [vmem:[#allocation2 + $0xf0] sm:$0xff]  ;;  %8231 = vrcp.f32 %v4598_v17 }
 0x8af   : > { %v3147_v52 = vmul.f32 %v8224_v43, %v3065_v55 }
 0x8b0   : > { %7695 = vmatmul.mubr.msk.f32.gmra.mxu0 %vm328_vm0, %v5432_v28  ;;  %v5436_v61 = vld [vmem:[#allocation2 + $0xb8] sm:$0xff]  ;;  %v4610_v30 = vpop.xlane.xlu1 %4609 }
 0x8b1   : > { %3179 = vst.msk [vmem:[#allocation2 + $0xd8] sm:$0xff] %vm328_vm0, %v3147_v52  ;;  %7697 = vmatprep.mubr.msk.f32.mxu0 %vm328_vm0, %v5433_v62  ;;  %8233 = vrcp.f32 %v4610_v30  ;;  %v4630_v59 = vpop.xlane.xlu0 %4629 }
 0x8b2   : > { %v8226_v12 = vpop.eup %8225  ;;  %8235 = vrcp.f32 %v4606_v41 }
 0x8b3   : > { %v3149_v25 = vmul.f32 %v8226_v12, %v3075_v38 }
 0x8b4   : > { %7698 = vmatmul.mubr.msk.f32.gmra.mxu0 %vm328_vm0, %v5434_v29  ;;  %v5438_v3 = vld [vmem:[#allocation2 + $0xc8] sm:$0xff]  ;;  %v4618_v46 = vpop.xlane.xlu1 %4617 }
 0x8b5   : > { %3181 = vst.msk [vmem:[#allocation2 + $0xe8] sm:$0xff] %vm328_vm0, %v3149_v25  ;;  %7700 = vmatprep.mubr.msk.f32.mxu0 %vm328_vm0, %v5435_v2  ;;  %8237 = vrcp.f32 %v4618_v46  ;;  %v4638_v57 = vpop.xlane.xlu0 %4637 }
 0x8b6   : > { %v8228_v53 = vpop.eup %8227  ;;  %8239 = vrcp.f32 %v4614_v16 }
 0x8b7   : > { %v3151_v34 = vmul.f32 %v8228_v53, %v3085_v4 }
 0x8b8   : > { %7701 = vmatmul.mubr.msk.f32.gmra.mxu0 %vm328_vm0, %v5436_v61  ;;  %v5440_v14 = vld [vmem:[#allocation2 + $0xd8] sm:$0xff]  ;;  %v4626_v33 = vpop.xlane.xlu1 %4625 }
 0x8b9   : > { %3183 = vst.msk [vmem:[#allocation2 + $0xf8] sm:$0xff] %vm328_vm0, %v3151_v34  ;;  %7703 = vmatprep.mubr.msk.f32.mxu0 %vm328_vm0, %v5437_v23  ;;  %8241 = vrcp.f32 %v4626_v33  ;;  %v4646_v29 = vpop.xlane.xlu0 %4645 }
 0x8ba   : > { %v8230_v35 = vpop.eup %8229  ;;  %8243 = vrcp.f32 %v4622_v39 }
 0x8bb   : > { %v8232_v19 = vpop.eup %8231 }
 0x8bc   : > { %7704 = vmatmul.mubr.msk.f32.gmra.mxu0 %vm328_vm0, %v5438_v3  ;;  %v5442_v51 = vld [vmem:[#allocation2 + $0xe8] sm:$0xff]  ;;  %v4634_v32 = vpop.xlane.xlu1 %4633 }
 0x8bd   : > { %7706 = vmatprep.mubr.msk.f32.mxu0 %vm328_vm0, %v5439_v50  ;;  %8245 = vrcp.f32 %v4634_v32 }
 0x8be   : > { %v8234_v11 = vpop.eup %8233  ;;  %8247 = vrcp.f32 %v4630_v59 }
 0x8c0   : > { %7707 = vmatmul.mubr.msk.f32.gmra.mxu0 %vm328_vm0, %v5440_v14  ;;  %v5444_v13 = vld [vmem:[#allocation2 + $0xf8] sm:$0xff]  ;;  %v4642_v56 = vpop.xlane.xlu1 %4641 }
 0x8c1   : > { %7709 = vmatprep.mubr.msk.f32.mxu0 %vm328_vm0, %v5441_v60  ;;  %8249 = vrcp.f32 %v4642_v56 }
 0x8c2   : > { %8251 = vrcp.f32 %v4638_v57 }
 0x8c4   : > { %7710 = vmatmul.mubr.msk.f32.gmra.mxu0 %vm328_vm0, %v5442_v51 }
 0x8c5   : > { %7712 = vmatprep.mubr.msk.f32.mxu0 %vm328_vm0, %v5443_v37 }
 0x8c8   : > { %7713 = vmatmul.mubr.msk.f32.gmra.mxu0 %vm328_vm0, %v5444_v13  ;;  %v4654_v13 = vpop.xlane.xlu0 %4653 }
 0x8d3   : > { %v4948_v40 = vpop.f32.mrf.mxu1 }
 0x8d5   : > { %v4950_v54 = vpop.f32.mrf.mxu1 }
 0x8d9   : > { %v4953_v63 = vpop.f32.mrf.mxu1 }
 0x8db   : > { %v4955_v1 = vpop.f32.mrf.mxu1 }
 0x8dd   : > { %v4958_v31 = vpop.f32.mrf.mxu1 }
 0x8df   : > { %v4960_v7 = vpop.f32.mrf.mxu1 }
 0x8e1   : > { %v12539_v9 = vpop.f32.mrf.mxu1 }
 0x8e3   : > { %v4965_v10 = vpop.f32.mrf.mxu1 }
 0x8e4   : > { %v7613_v58 = vpop.f32.mrf.mxu0 }
 0x8e5   : > { %v5164_v36 = vadd.f32 %v7613_v58, %v12488_v22 }
 0x8e6   : > { %v4968_v44 = vpop.f32.mrf.mxu1  ;;  %v5158_v6 = vpop.f32.mrf.mxu0 }
 0x8e7   : > { %v5350_v26 = vmul.f32 %v8230_v35, %v5164_v36  ;;  %v5159_v8 = vadd.f32 %v5158_v6, %v12478_v47  ;;  %v8236_v47 = vpop.eup %8235 }
 0x8e8   : > { %v4970_v27 = vpop.f32.mrf.mxu1  ;;  %v7616_v5 = vpop.f32.mrf.mxu0 }
 0x8e9   : > { %5382 = vst.msk [vmem:[#allocation2 + $0x108] sm:$0xff] %vm328_vm0, %v5350_v26  ;;  %v5349_v18 = vmul.f32 %v8232_v19, %v5159_v8  ;;  %v5174_v0 = vadd.f32 %v7616_v5, %v4948_v40  ;;  %v8238_v45 = vpop.eup %8237 }
 0x8ea   : > { %v4973_v22 = vpop.f32.mrf.mxu1  ;;  %v5168_v24 = vpop.f32.mrf.mxu0 }
 0x8eb   : > { %5381 = vst.msk [vmem:[#allocation2 + $0x100] sm:$0xff] %vm328_vm0, %v5349_v18  ;;  %v5352_v20 = vmul.f32 %v8234_v11, %v5174_v0  ;;  %v5169_v55 = vadd.f32 %v5168_v24, %v12498_v15  ;;  %v8240_v2 = vpop.eup %8239  ;;  %v4650_v15 = vpop.xlane.xlu1 %4649 }
 0x8ec   : > { %v4975_v28 = vpop.f32.mrf.mxu1  ;;  %v7619_v43 = vpop.f32.mrf.mxu0  ;;  %8253 = vrcp.f32 %v4650_v15 }
 0x8ed   : > { %5384 = vst.msk [vmem:[#allocation2 + $0x118] sm:$0xff] %vm328_vm0, %v5352_v20  ;;  %v5351_v52 = vmul.f32 %v8236_v47, %v5169_v55  ;;  %v5184_v62 = vadd.f32 %v7619_v43, %v4958_v31  ;;  %v8242_v23 = vpop.eup %8241  ;;  %8255 = vrcp.f32 %v4646_v29 }
 0x8ee   : > { %v4978_v42 = vpop.f32.mrf.mxu1  ;;  %v5178_v38 = vpop.f32.mrf.mxu0  ;;  %8257 = vrcp.f32 %v4654_v13 }
 0x8ef   : > { %5383 = vst.msk [vmem:[#allocation2 + $0x110] sm:$0xff] %vm328_vm0, %v5351_v52  ;;  %v5354_v12 = vmul.f32 %v8238_v45, %v5184_v62  ;;  %v5179_v25 = vadd.f32 %v5178_v38, %v4953_v63  ;;  %v8244_v37 = vpop.eup %8243  ;;  %v4658_v63 = vpop.xlane.xlu1 %4657 }
 0x8f0   : > { %v4980_v49 = vpop.f32.mrf.mxu1  ;;  %v7622_v4 = vpop.f32.mrf.mxu0  ;;  %v5446_v50 = vld [vmem:[#allocation2 + $0x108] sm:$0xff]  ;;  %8259 = vrcp.f32 %v4658_v63 }
 0x8f1   : > { %5386 = vst.msk [vmem:[#allocation2 + $0x128] sm:$0xff] %vm328_vm0, %v5354_v12  ;;  %v5353_v48 = vmul.f32 %v8240_v2, %v5179_v25  ;;  %v5194_v53 = vadd.f32 %v7622_v4, %v4968_v44  ;;  %v8246_v54 = vpop.eup %8245  ;;  %v4662_v44 = vpop.xlane.xlu0 %4661 }
 0x8f2   : > { %v4983_v61 = vpop.f32.mrf.mxu1  ;;  %v5445_v34 = vld [vmem:[#allocation2 + $0x100] sm:$0xff]  ;;  %v5188_v3 = vpop.f32.mrf.mxu0  ;;  %8261 = vrcp.f32 %v4662_v44 }
 0x8f3   : > { %5385 = vst.msk [vmem:[#allocation2 + $0x120] sm:$0xff] %vm328_vm0, %v5353_v48  ;;  %7715 = vmatprep.mubr.msk.f32.mxu0 %vm328_vm0, %v5445_v34  ;;  %v5356_v60 = vmul.f32 %v8242_v23, %v5194_v53  ;;  %v5189_v51 = vadd.f32 %v5188_v3, %v12539_v9  ;;  %v8248_v31 = vpop.eup %8247 }
 0x8f4   : > { %v4985_v14 = vpop.f32.mrf.mxu1  ;;  %7716 = vmatmul.mubr.msk.f32.gmra.mxu0 %vm328_vm0, %v5446_v50  ;;  %v7625_v17 = vpop.f32.mrf.mxu0  ;;  %v5448_v46 = vld [vmem:[#allocation2 + $0x118] sm:$0xff] }
 0x8f5   : > { %5388 = vst.msk [vmem:[#allocation2 + $0x138] sm:$0xff] %vm328_vm0, %v5356_v60  ;;  %v5355_v41 = vmul.f32 %v8244_v37, %v5189_v51  ;;  %v5204_v30 = vadd.f32 %v7625_v17, %v4978_v42  ;;  %v8250_v58 = vpop.eup %8249  ;;  %v4670_v38 = vpop.xlane.xlu0 %4669 }
 0x8f6   : > { %v4988_v21 = vpop.f32.mrf.mxu1  ;;  %v5447_v40 = vld [vmem:[#allocation2 + $0x110] sm:$0xff]  ;;  %v5198_v16 = vpop.f32.mrf.mxu0 }
 0x8f7   : > { %7718 = vmatprep.mubr.msk.f32.mxu0 %vm328_vm0, %v5447_v40  ;;  %5387 = vst.msk [vmem:[#allocation2 + $0x130] sm:$0xff] %vm328_vm0, %v5355_v41  ;;  %v5358_v39 = vmul.f32 %v8246_v54, %v5204_v30  ;;  %v5199_v33 = vadd.f32 %v5198_v16, %v4973_v22  ;;  %v8252_v19 = vpop.eup %8251  ;;  %v4666_v22 = vpop.xlane.xlu1 %4665 }
 0x8f8   : > { %v4990_v1 = vpop.f32.mrf.mxu1  ;;  %7719 = vmatmul.mubr.msk.f32.gmra.mxu0 %vm328_vm0, %v5448_v46  ;;  %v7628_v7 = vpop.f32.mrf.mxu0  ;;  %v5450_v35 = vld [vmem:[#allocation2 + $0x128] sm:$0xff]  ;;  %8263 = vrcp.f32 %v4666_v22 }
 0x8f9   : > { %5390 = vst.msk [vmem:[#allocation2 + $0x148] sm:$0xff] %vm328_vm0, %v5358_v39  ;;  %v5357_v59 = vmul.f32 %v8248_v31, %v5199_v33  ;;  %v5214_v32 = vadd.f32 %v7628_v7, %v4988_v21  ;;  %v8254_v11 = vpop.eup %8253  ;;  %8265 = vrcp.f32 %v4670_v38  ;;  %v4678_v17 = vpop.xlane.xlu0 %4677 }
 0x8fa   : > { %v4993_v9 = vpop.f32.mrf.mxu1  ;;  %v5449_v10 = vld [vmem:[#allocation2 + $0x120] sm:$0xff]  ;;  %v5208_v36 = vpop.f32.mrf.mxu0 }
 0x8fb   : > { %7721 = vmatprep.mubr.msk.f32.mxu0 %vm328_vm0, %v5449_v10  ;;  %5389 = vst.msk [vmem:[#allocation2 + $0x140] sm:$0xff] %vm328_vm0, %v5357_v59  ;;  %v5360_v26 = vmul.f32 %v8250_v58, %v5214_v32  ;;  %v5209_v8 = vadd.f32 %v5208_v36, %v4983_v61  ;;  %v8256_v47 = vpop.eup %8255  ;;  %v4674_v4 = vpop.xlane.xlu1 %4673 }
 0x8fc   : > { %v4995_v6 = vpop.f32.mrf.mxu1  ;;  %7722 = vmatmul.mubr.msk.f32.gmra.mxu0 %vm328_vm0, %v5450_v35  ;;  %v7631_v27 = vpop.f32.mrf.mxu0  ;;  %v5452_v55 = vld [vmem:[#allocation2 + $0x138] sm:$0xff]  ;;  %8267 = vrcp.f32 %v4674_v4 }
 0x8fd   : > { %5392 = vst.msk [vmem:[#allocation2 + $0x158] sm:$0xff] %vm328_vm0, %v5360_v26  ;;  %v5359_v57 = vmul.f32 %v8252_v19, %v5209_v8  ;;  %v8258_v2 = vpop.eup %8257  ;;  %8269 = vrcp.f32 %v4678_v17  ;;  %v4686_v6 = vpop.xlane.xlu0 %4685 }
 0x8fe   : > { %v4998_v5 = vpop.f32.mrf.mxu1  ;;  %v5218_v18 = vpop.f32.mrf.mxu0  ;;  %v5451_v0 = vld [vmem:[#allocation2 + $0x130] sm:$0xff] }
 0x8ff   : > { %v5224_v56 = vadd.f32 %v7631_v27, %v4998_v5  ;;  %5391 = vst.msk [vmem:[#allocation2 + $0x150] sm:$0xff] %vm328_vm0, %v5359_v57  ;;  %v5219_v20 = vadd.f32 %v5218_v18, %v4993_v9  ;;  %7724 = vmatprep.mubr.msk.f32.mxu0 %vm328_vm0, %v5451_v0  ;;  %v8260_v34 = vpop.eup %8259  ;;  %v4682_v1 = vpop.xlane.xlu1 %4681 }
 0x900   : > { %v5000_v24 = vpop.f32.mrf.mxu1  ;;  %v7634_v43 = vpop.f32.mrf.mxu0  ;;  %7725 = vmatmul.mubr.msk.f32.gmra.mxu0 %vm328_vm0, %v5452_v55  ;;  %v5454_v25 = vld [vmem:[#allocation2 + $0x148] sm:$0xff]  ;;  %8271 = vrcp.f32 %v4682_v1 }
 0x901   : > { %v5362_v28 = vmul.f32 %v8254_v11, %v5224_v56  ;;  %v5361_v62 = vmul.f32 %v8256_v47, %v5219_v20  ;;  %v8262_v13 = vpop.eup %8261  ;;  %v4694_v20 = vpop.xlane.xlu0 %4693 }
 0x902   : > { %v5003_v52 = vpop.f32.mrf.mxu1  ;;  %v5228_v45 = vpop.f32.mrf.mxu0  ;;  %v5453_v42 = vld [vmem:[#allocation2 + $0x140] sm:$0xff] }
 0x903   : > { %5394 = vst.msk [vmem:[#allocation2 + $0x168] sm:$0xff] %vm328_vm0, %v5362_v28  ;;  %5393 = vst.msk [vmem:[#allocation2 + $0x160] sm:$0xff] %vm328_vm0, %v5361_v62  ;;  %v5229_v12 = vadd.f32 %v5228_v45, %v5003_v52  ;;  %7727 = vmatprep.mubr.msk.f32.mxu0 %vm328_vm0, %v5453_v42  ;;  %v4690_v19 = vpop.xlane.xlu1 %4689 }
 0x904   : > { %v5005_v29 = vpop.f32.mrf.mxu1  ;;  %v7637_v15 = vpop.f32.mrf.mxu0  ;;  %7728 = vmatmul.mubr.msk.f32.gmra.mxu0 %vm328_vm0, %v5454_v25  ;;  %v5456_v50 = vld [vmem:[#allocation2 + $0x158] sm:$0xff]  ;;  %8273 = vrcp.f32 %v4690_v19 }
 0x905   : > { %v5363_v48 = vmul.f32 %v8258_v2, %v5229_v12  ;;  %v8264_v63 = vpop.eup %8263  ;;  %8275 = vrcp.f32 %v4686_v6 }
 0x906   : > { %v5008_v49 = vpop.f32.mrf.mxu1  ;;  %v5455_v53 = vld [vmem:[#allocation2 + $0x150] sm:$0xff]  ;;  %v5238_v3 = vpop.f32.mrf.mxu0  ;;  %8277 = vrcp.f32 %v4694_v20 }
 0x907   : > { %v5234_v61 = vadd.f32 %v7634_v43, %v5008_v49  ;;  %5395 = vst.msk [vmem:[#allocation2 + $0x170] sm:$0xff] %vm328_vm0, %v5363_v48  ;;  %7730 = vmatprep.mubr.msk.f32.mxu0 %vm328_vm0, %v5455_v53  ;;  %v8266_v32 = vpop.eup %8265  ;;  %v4698_v52 = vpop.xlane.xlu1 %4697 }
 0x908   : > { %v5010_v23 = vpop.f32.mrf.mxu1  ;;  %7731 = vmatmul.mubr.msk.f32.gmra.mxu0 %vm328_vm0, %v5456_v50  ;;  %v7640_v40 = vpop.f32.mrf.mxu0  ;;  %8279 = vrcp.f32 %v4698_v52 }
 0x909   : > { %v5364_v14 = vmul.f32 %v8260_v34, %v5234_v61  ;;  %v8268_v8 = vpop.eup %8267 }
 0x90a   : > { %v5013_v60 = vpop.f32.mrf.mxu1  ;;  %v5457_v37 = vld [vmem:[#allocation2 + $0x160] sm:$0xff]  ;;  %v5458_v41 = vld [vmem:[#allocation2 + $0x168] sm:$0xff]  ;;  %v5248_v31 = vpop.f32.mrf.mxu0 }
 0x90b   : > { %5396 = vst.msk [vmem:[#allocation2 + $0x178] sm:$0xff] %vm328_vm0, %v5364_v14  ;;  %v5239_v51 = vadd.f32 %v5238_v3, %v5013_v60  ;;  %7733 = vmatprep.mubr.msk.f32.mxu0 %vm328_vm0, %v5457_v37  ;;  %v8270_v11 = vpop.eup %8269  ;;  %v4706_v49 = vpop.xlane.xlu1 %4705 }
 0x90c   : > { %v5015_v21 = vpop.f32.mrf.mxu1  ;;  %7734 = vmatmul.mubr.msk.f32.gmra.mxu0 %vm328_vm0, %v5458_v41  ;;  %v7643_v36 = vpop.f32.mrf.mxu0 }
 0x90d   : > { %v5365_v30 = vmul.f32 %v8262_v13, %v5239_v51  ;;  %v8272_v43 = vpop.eup %8271 }
 0x90e   : > { %v5018_v54 = vpop.f32.mrf.mxu1  ;;  %v5459_v46 = vld [vmem:[#allocation2 + $0x170] sm:$0xff]  ;;  %v5258_v57 = vpop.f32.mrf.mxu0 }
 0x90f   : > { %5397 = vst.msk [vmem:[#allocation2 + $0x180] sm:$0xff] %vm328_vm0, %v5365_v30  ;;  %v5244_v16 = vadd.f32 %v7637_v15, %v5018_v54  ;;  %7736 = vmatprep.mubr.msk.f32.mxu0 %vm328_vm0, %v5459_v46  ;;  %v4702_v15 = vpop.xlane.xlu0 %4701 }
 0x910   : > { %v5020_v39 = vpop.f32.mrf.mxu1  ;;  %8281 = vrcp.f32 %v4702_v15 }
 0x911   : > { %v5366_v33 = vmul.f32 %v8264_v63, %v5244_v16  ;;  %v8274_v4 = vpop.eup %8273  ;;  %8283 = vrcp.f32 %v4706_v49  ;;  %v4714_v63 = vpop.xlane.xlu1 %4713 }
 0x912   : > { %v5023_v7 = vpop.f32.mrf.mxu1  ;;  %v5460_v9 = vld [vmem:[#allocation2 + $0x178] sm:$0xff]  ;;  %v8276_v3 = vpop.eup %8275 }
 0x913   : > { %5398 = vst.msk [vmem:[#allocation2 + $0x188] sm:$0xff] %vm328_vm0, %v5366_v33  ;;  %v5249_v59 = vadd.f32 %v5248_v31, %v5023_v7  ;;  %7737 = vmatmul.mubr.msk.f32.gmra.mxu0 %vm328_vm0, %v5460_v9  ;;  %v8278_v21 = vpop.eup %8277  ;;  %v4710_v30 = vpop.xlane.xlu0 %4709 }
 0x914   : > { %v5025_v10 = vpop.f32.mrf.mxu1  ;;  %8285 = vrcp.f32 %v4710_v30 }
 0x915   : > { %v5367_v58 = vmul.f32 %v8266_v32, %v5249_v59  ;;  %v8280_v16 = vpop.eup %8279  ;;  %8287 = vrcp.f32 %v4714_v63  ;;  %v4722_v19 = vpop.xlane.xlu1 %4721 }
 0x916   : > { %v5028_v35 = vpop.f32.mrf.mxu1  ;;  %v5461_v44 = vld [vmem:[#allocation2 + $0x180] sm:$0xff] }
 0x917   : > { %5399 = vst.msk [vmem:[#allocation2 + $0x190] sm:$0xff] %vm328_vm0, %v5367_v58  ;;  %v5254_v26 = vadd.f32 %v7640_v40, %v5028_v35  ;;  %7739 = vmatprep.mubr.msk.f32.mxu0 %vm328_vm0, %v5461_v44  ;;  %v4718_v9 = vpop.xlane.xlu0 %4717 }
 0x918   : > { %v5030_v27 = vpop.f32.mrf.mxu1  ;;  %8289 = vrcp.f32 %v4718_v9 }
 0x919   : > { %v5368_v5 = vmul.f32 %v8268_v8, %v5254_v26  ;;  %8291 = vrcp.f32 %v4722_v19 }
 0x91a   : > { %v5033_v56 = vpop.f32.mrf.mxu1  ;;  %v5462_v18 = vld [vmem:[#allocation2 + $0x188] sm:$0xff] }
 0x91b   : > { %5400 = vst.msk [vmem:[#allocation2 + $0x198] sm:$0xff] %vm328_vm0, %v5368_v5  ;;  %v5259_v0 = vadd.f32 %v5258_v57, %v5033_v56  ;;  %7740 = vmatmul.mubr.msk.f32.gmra.mxu0 %vm328_vm0, %v5462_v18 }
 0x91c   : > { %v5035_v22 = vpop.f32.mrf.mxu1 }
 0x91d   : > { %v5369_v24 = vmul.f32 %v8270_v11, %v5259_v0 }
 0x91e   : > { %v5038_v55 = vpop.f32.mrf.mxu1  ;;  %v5463_v47 = vld [vmem:[#allocation2 + $0x190] sm:$0xff] }
 0x91f   : > { %5401 = vst.msk [vmem:[#allocation2 + $0x1a0] sm:$0xff] %vm328_vm0, %v5369_v24  ;;  %v5264_v28 = vadd.f32 %v7643_v36, %v5038_v55  ;;  %7742 = vmatprep.mubr.msk.f32.mxu0 %vm328_vm0, %v5463_v47  ;;  %v8282_v36 = vpop.eup %8281 }
 0x920   : > { %v5040_v62 = vpop.f32.mrf.mxu1  ;;  %v8284_v44 = vpop.eup %8283 }
 0x921   : > { %v5370_v45 = vmul.f32 %v8272_v43, %v5264_v28  ;;  %v8286_v22 = vpop.eup %8285 }
 0x922   : > { %v5043_v42 = vpop.f32.mrf.mxu1  ;;  %v5464_v38 = vld [vmem:[#allocation2 + $0x198] sm:$0xff]  ;;  %v8288_v28 = vpop.eup %8287 }
 0x923   : > { %5402 = vst.msk [vmem:[#allocation2 + $0x1a8] sm:$0xff] %vm328_vm0, %v5370_v45  ;;  %7743 = vmatmul.mubr.msk.f32.gmra.mxu0 %vm328_vm0, %v5464_v38 }
 0x924   : > { %v5045_v29 = vpop.f32.mrf.mxu1 }
 0x926   : > { %v5465_v12 = vld [vmem:[#allocation2 + $0x1a0] sm:$0xff] }
 0x927   : > { %v7646_v25 = vpop.f32.mrf.mxu0  ;;  %v5048_v2 = vpop.f32.mrf.mxu1  ;;  %7745 = vmatprep.mubr.msk.f32.mxu0 %vm328_vm0, %v5465_v12 }
 0x928   : > { %v5274_v48 = vadd.f32 %v7646_v25, %v5048_v2  ;;  %v8290_v12 = vpop.eup %8289 }
 0x929   : > { %v5268_v61 = vpop.f32.mrf.mxu0  ;;  %v5050_v53 = vpop.f32.mrf.mxu1 }
 0x92a   : > { %v5372_v34 = vmul.f32 %v8274_v4, %v5274_v48  ;;  %v5269_v23 = vadd.f32 %v5268_v61, %v5043_v42  ;;  %v5466_v50 = vld [vmem:[#allocation2 + $0x1a8] sm:$0xff]  ;;  %v8292_v48 = vpop.eup %8291  ;;  %v12607_v4 = vld [vmem:[%s12821_s5] ss:$0 sm:$0xff] }
 0x92b   : > { %v7649_v14 = vpop.f32.mrf.mxu0  ;;  %v5053_v60 = vpop.f32.mrf.mxu1  ;;  %7746 = vmatmul.mubr.msk.f32.gmra.mxu0 %vm328_vm0, %v5466_v50 }
 0x92c   : > { %5404 = vst.msk [vmem:[#allocation2 + $0x1b8] sm:$0xff] %vm328_vm0, %v5372_v34  ;;  %v5371_v51 = vmul.f32 %v8276_v3, %v5269_v23 }
 0x92d   : > { %v5278_v37 = vpop.f32.mrf.mxu0  ;;  %v5055_v13 = vpop.f32.mrf.mxu1 }
 0x92e   : > { %5403 = vst.msk [vmem:[#allocation2 + $0x1b0] sm:$0xff] %vm328_vm0, %v5371_v51  ;;  %v5279_v17 = vadd.f32 %v5278_v37, %v5053_v60 }
 0x92f   : > { %v5058_v41 = vpop.f32.mrf.mxu1 }
 0x930   : > { %v5373_v40 = vmul.f32 %v8278_v21, %v5279_v17  ;;  %v5284_v54 = vadd.f32 %v7649_v14, %v5058_v41 }
 0x931   : > { %v5060_v46 = vpop.f32.mrf.mxu1 }
 0x932   : > { %5405 = vst.msk [vmem:[#allocation2 + $0x1c0] sm:$0xff] %vm328_vm0, %v5373_v40  ;;  %v5374_v1 = vmul.f32 %v8280_v16, %v5284_v54 }
 0x933   : > { %v5063_v39 = vpop.f32.mrf.mxu1  ;;  %v5468_v32 = vld [vmem:[#allocation2 + $0x1b8] sm:$0xff] }
 0x934   : > { %5406 = vst.msk [vmem:[#allocation2 + $0x1c8] sm:$0xff] %vm328_vm0, %v5374_v1  ;;  %v7652_v33 = vpop.f32.mrf.mxu0 }
 0x935   : > { %v5065_v31 = vpop.f32.mrf.mxu1  ;;  %v5467_v7 = vld [vmem:[#allocation2 + $0x1b0] sm:$0xff] }
 0x936   : > { %v5288_v59 = vpop.f32.mrf.mxu0  ;;  %7748 = vmatprep.mubr.msk.f32.mxu0 %vm328_vm0, %v5467_v7 }
 0x937   : > { %v5289_v10 = vadd.f32 %v5288_v59, %v5063_v39  ;;  %7749 = vmatmul.mubr.msk.f32.gmra.mxu0 %vm328_vm0, %v5468_v32  ;;  %v5068_v58 = vpop.f32.mrf.mxu1 }
 0x938   : > { %v5294_v35 = vadd.f32 %v7652_v33, %v5068_v58 }
 0x939   : > { %v5375_v6 = vmul.f32 %v8282_v36, %v5289_v10  ;;  %v5070_v26 = vpop.f32.mrf.mxu1  ;;  %v5469_v8 = vld [vmem:[#allocation2 + $0x1c0] sm:$0xff] }
 0x93a   : > { %v5376_v27 = vmul.f32 %v8284_v44, %v5294_v35  ;;  %7751 = vmatprep.mubr.msk.f32.mxu0 %vm328_vm0, %v5469_v8 }
 0x93b   : > { %5407 = vst.msk [vmem:[#allocation2 + $0x1d0] sm:$0xff] %vm328_vm0, %v5375_v6  ;;  %v5073_v5 = vpop.f32.mrf.mxu1  ;;  %v5470_v57 = vld [vmem:[#allocation2 + $0x1c8] sm:$0xff] }
 0x93c   : > { %5408 = vst.msk [vmem:[#allocation2 + $0x1d8] sm:$0xff] %vm328_vm0, %v5376_v27  ;;  %v7655_v56 = vpop.f32.mrf.mxu0  ;;  %7752 = vmatmul.mubr.msk.f32.gmra.mxu0 %vm328_vm0, %v5470_v57 }
 0x93d   : > { %v5075_v18 = vpop.f32.mrf.mxu1 }
 0x93e   : > { %v5298_v0 = vpop.f32.mrf.mxu0 }
 0x93f   : > { %v5299_v11 = vadd.f32 %v5298_v0, %v5073_v5 }
 0x940   : > { %v7658_v24 = vpop.f32.mrf.mxu0  ;;  %v5078_v20 = vpop.f32.mrf.mxu1 }
 0x941   : > { %v5377_v55 = vmul.f32 %v8286_v22, %v5299_v11  ;;  %v5304_v47 = vadd.f32 %v7655_v56, %v5078_v20 }
 0x942   : > { %v5471_v43 = vld [vmem:[#allocation2 + $0x1d0] sm:$0xff]  ;;  %v5080_v52 = vpop.f32.mrf.mxu1  ;;  %v5308_v42 = vpop.f32.mrf.mxu0 }
 0x943   : > { %5409 = vst.msk [vmem:[#allocation2 + $0x1e0] sm:$0xff] %vm328_vm0, %v5377_v55  ;;  %v5378_v62 = vmul.f32 %v8288_v28, %v5304_v47  ;;  %7754 = vmatprep.mubr.msk.f32.mxu0 %vm328_vm0, %v5471_v43  ;;  %v5472_v45 = vld [vmem:[#allocation2 + $0x1d8] sm:$0xff] }
 0x944   : > { %v5083_v38 = vpop.f32.mrf.mxu1  ;;  %7755 = vmatmul.mubr.msk.f32.gmra.mxu0 %vm328_vm0, %v5472_v45 }
 0x945   : > { %5410 = vst.msk [vmem:[#allocation2 + $0x1e8] sm:$0xff] %vm328_vm0, %v5378_v62  ;;  %v5309_v29 = vadd.f32 %v5308_v42, %v5083_v38 }
 0x946   : > { %v5085_v25 = vpop.f32.mrf.mxu1 }
 0x947   : > { %v5379_v2 = vmul.f32 %v8290_v12, %v5309_v29 }
 0x948   : > { %v5088_v15 = vpop.f32.mrf.mxu1 }
 0x949   : > { %5411 = vst.msk [vmem:[#allocation2 + $0x1f0] sm:$0xff] %vm328_vm0, %v5379_v2  ;;  %v5314_v49 = vadd.f32 %v7658_v24, %v5088_v15 }
 0x94a   : > { %v5473_v61 = vld [vmem:[#allocation2 + $0x1e0] sm:$0xff]  ;;  %v5090_v53 = vpop.f32.mrf.mxu1 }
 0x94b   : > { %v5380_v34 = vmul.f32 %v8292_v48, %v5314_v49  ;;  %7757 = vmatprep.mubr.msk.f32.mxu0 %vm328_vm0, %v5473_v61 }
 0x94c   : > { %v7669_v23 = vpop.f32.mrf.mxu0  ;;  %v5474_v3 = vld [vmem:[#allocation2 + $0x1e8] sm:$0xff] }
 0x94d   : > { %v5752_v50 = vadd.f32 %v7669_v23, %v12607_v4  ;;  %5412 = vst.msk [vmem:[#allocation2 + $0x1f8] sm:$0xff] %vm328_vm0, %v5380_v34  ;;  %7758 = vmatmul.mubr.msk.f32.gmra.mxu0 %vm328_vm0, %v5474_v3 }
 0x94e   : > { %v5746_v14 = vpop.f32.mrf.mxu0 }
 0x94f   : > { %6066 = vst.msk [vmem:[%s12615_s14 + $0x8] sm:$0xff] %vm328_vm0, %v5752_v50  ;;  %v5747_v60 = vadd.f32 %v12607_v4, %v5746_v14 }
 0x950   : > { %v7672_v51 = vpop.f32.mrf.mxu0  ;;  %v5475_v37 = vld [vmem:[#allocation2 + $0x1f0] sm:$0xff] }
 0x951   : > { %6065 = vst.msk [vmem:[%s12615_s14] sm:$0xff] %vm328_vm0, %v5747_v60  ;;  %v5762_v13 = vadd.f32 %v7672_v51, %v12607_v4  ;;  %7760 = vmatprep.mubr.msk.f32.mxu0 %vm328_vm0, %v5475_v37 }
 0x952   : > { %v5756_v17 = vpop.f32.mrf.mxu0 }
 0x953   : > { %6068 = vst.msk [vmem:[%s12615_s14 + $0x18] sm:$0xff] %vm328_vm0, %v5762_v13  ;;  %v5757_v21 = vadd.f32 %v12607_v4, %v5756_v17 }
 0x954   : > { %v7675_v41 = vpop.f32.mrf.mxu0  ;;  %v5476_v30 = vld [vmem:[#allocation2 + $0x1f8] sm:$0xff] }
 0x955   : > { %6067 = vst.msk [vmem:[%s12615_s14 + $0x10] sm:$0xff] %vm328_vm0, %v5757_v21  ;;  %v5772_v40 = vadd.f32 %v7675_v41, %v12607_v4  ;;  %7761 = vmatmul.mubr.msk.f32.gmra.mxu0 %vm328_vm0, %v5476_v30 }
 0x956   : > { %v5766_v54 = vpop.f32.mrf.mxu0 }
 0x957   : > { %6070 = vst.msk [vmem:[%s12615_s14 + $0x28] sm:$0xff] %vm328_vm0, %v5772_v40  ;;  %v5767_v16 = vadd.f32 %v12607_v4, %v5766_v54 }
 0x958   : > { %v7678_v46 = vpop.f32.mrf.mxu0 }
 0x959   : > { %6069 = vst.msk [vmem:[%s12615_s14 + $0x20] sm:$0xff] %vm328_vm0, %v5767_v16  ;;  %v5782_v63 = vadd.f32 %v7678_v46, %v12607_v4 }
 0x95a   : > { %v5776_v1 = vpop.f32.mrf.mxu0 }
 0x95b   : > { %6072 = vst.msk [vmem:[%s12615_s14 + $0x38] sm:$0xff] %vm328_vm0, %v5782_v63  ;;  %v5777_v39 = vadd.f32 %v12607_v4, %v5776_v1 }
 0x95c   : > { %v7681_v33 = vpop.f32.mrf.mxu0 }
 0x95d   : > { %6071 = vst.msk [vmem:[%s12615_s14 + $0x30] sm:$0xff] %vm328_vm0, %v5777_v39  ;;  %v5792_v31 = vadd.f32 %v7681_v33, %v12607_v4 }
 0x95e   : > { %v5786_v7 = vpop.f32.mrf.mxu0 }
 0x95f   : > { %6074 = vst.msk [vmem:[%s12615_s14 + $0x48] sm:$0xff] %vm328_vm0, %v5792_v31  ;;  %v5787_v9 = vadd.f32 %v12607_v4, %v5786_v7 }
 0x960   : > { %v7684_v59 = vpop.f32.mrf.mxu0 }
 0x961   : > { %6073 = vst.msk [vmem:[%s12615_s14 + $0x40] sm:$0xff] %vm328_vm0, %v5787_v9  ;;  %v5802_v32 = vadd.f32 %v7684_v59, %v12607_v4 }
 0x962   : > { %v5796_v10 = vpop.f32.mrf.mxu0 }
 0x963   : > { %6076 = vst.msk [vmem:[%s12615_s14 + $0x58] sm:$0xff] %vm328_vm0, %v5802_v32  ;;  %v5797_v58 = vadd.f32 %v12607_v4, %v5796_v10 }
 0x964   : > { %v7687_v36 = vpop.f32.mrf.mxu0 }
 0x965   : > { %6075 = vst.msk [vmem:[%s12615_s14 + $0x50] sm:$0xff] %vm328_vm0, %v5797_v58  ;;  %v5812_v35 = vadd.f32 %v7687_v36, %v12607_v4 }
 0x966   : > { %v5806_v44 = vpop.f32.mrf.mxu0 }
 0x967   : > { %6078 = vst.msk [vmem:[%s12615_s14 + $0x68] sm:$0xff] %vm328_vm0, %v5812_v35  ;;  %v5807_v6 = vadd.f32 %v12607_v4, %v5806_v44 }
 0x968   : > { %v7690_v26 = vpop.f32.mrf.mxu0 }
 0x969   : > { %6077 = vst.msk [vmem:[%s12615_s14 + $0x60] sm:$0xff] %vm328_vm0, %v5807_v6  ;;  %v5822_v8 = vadd.f32 %v7690_v26, %v12607_v4 }
 0x96a   : > { %v5816_v19 = vpop.f32.mrf.mxu0 }
 0x96b   : > { %6080 = vst.msk [vmem:[%s12615_s14 + $0x78] sm:$0xff] %vm328_vm0, %v5822_v8  ;;  %v5817_v27 = vadd.f32 %v12607_v4, %v5816_v19 }
 0x96c   : > { %v7693_v5 = vpop.f32.mrf.mxu0 }
 0x96d   : > { %6079 = vst.msk [vmem:[%s12615_s14 + $0x70] sm:$0xff] %vm328_vm0, %v5817_v27  ;;  %v5832_v57 = vadd.f32 %v7693_v5, %v12607_v4 }
 0x96e   : > { %v5826_v56 = vpop.f32.mrf.mxu0 }
 0x96f   : > { %6082 = vst.msk [vmem:[%s12615_s14 + $0x88] sm:$0xff] %vm328_vm0, %v5832_v57  ;;  %v5827_v18 = vadd.f32 %v12607_v4, %v5826_v56 }
 0x970   : > { %v7696_v0 = vpop.f32.mrf.mxu0 }
 0x971   : > { %6081 = vst.msk [vmem:[%s12615_s14 + $0x80] sm:$0xff] %vm328_vm0, %v5827_v18  ;;  %v5842_v11 = vadd.f32 %v7696_v0, %v12607_v4 }
 0x972   : > { %v5836_v22 = vpop.f32.mrf.mxu0 }
 0x973   : > { %6084 = vst.msk [vmem:[%s12615_s14 + $0x98] sm:$0xff] %vm328_vm0, %v5842_v11  ;;  %v5837_v24 = vadd.f32 %v12607_v4, %v5836_v22 }
 0x974   : > { %v7699_v20 = vpop.f32.mrf.mxu0 }
 0x975   : > { %6083 = vst.msk [vmem:[%s12615_s14 + $0x90] sm:$0xff] %vm328_vm0, %v5837_v24  ;;  %v5852_v55 = vadd.f32 %v7699_v20, %v12607_v4 }
 0x976   : > { %v5846_v47 = vpop.f32.mrf.mxu0 }
 0x977   : > { %6086 = vst.msk [vmem:[%s12615_s14 + $0xa8] sm:$0xff] %vm328_vm0, %v5852_v55  ;;  %v5847_v28 = vadd.f32 %v12607_v4, %v5846_v47 }
 0x978   : > { %v7702_v43 = vpop.f32.mrf.mxu0 }
 0x979   : > { %6085 = vst.msk [vmem:[%s12615_s14 + $0xa0] sm:$0xff] %vm328_vm0, %v5847_v28  ;;  %v5862_v52 = vadd.f32 %v7702_v43, %v12607_v4 }
 0x97a   : > { %v5856_v62 = vpop.f32.mrf.mxu0 }
 0x97b   : > { %6088 = vst.msk [vmem:[%s12615_s14 + $0xb8] sm:$0xff] %vm328_vm0, %v5862_v52  ;;  %v5857_v45 = vadd.f32 %v12607_v4, %v5856_v62 }
 0x97c   : > { %v7705_v42 = vpop.f32.mrf.mxu0 }
 0x97d   : > { %6087 = vst.msk [vmem:[%s12615_s14 + $0xb0] sm:$0xff] %vm328_vm0, %v5857_v45  ;;  %v5872_v38 = vadd.f32 %v7705_v42, %v12607_v4 }
 0x97e   : > { %v5866_v29 = vpop.f32.mrf.mxu0 }
 0x97f   : > { %6090 = vst.msk [vmem:[%s12615_s14 + $0xc8] sm:$0xff] %vm328_vm0, %v5872_v38  ;;  %v5867_v12 = vadd.f32 %v12607_v4, %v5866_v29 }
 0x980   : > { %v7708_v25 = vpop.f32.mrf.mxu0 }
 0x981   : > { %6089 = vst.msk [vmem:[%s12615_s14 + $0xc0] sm:$0xff] %vm328_vm0, %v5867_v12  ;;  %v5882_v2 = vadd.f32 %v7708_v25, %v12607_v4 }
 0x982   : > { %v5876_v15 = vpop.f32.mrf.mxu0 }
 0x983   : > { %6092 = vst.msk [vmem:[%s12615_s14 + $0xd8] sm:$0xff] %vm328_vm0, %v5882_v2  ;;  %v5877_v49 = vadd.f32 %v12607_v4, %v5876_v15 }
 0x984   : > { %v7711_v48 = vpop.f32.mrf.mxu0 }
 0x985   : > { %6091 = vst.msk [vmem:[%s12615_s14 + $0xd0] sm:$0xff] %vm328_vm0, %v5877_v49  ;;  %v5892_v61 = vadd.f32 %v7711_v48, %v12607_v4 }
 0x986   : > { %v5886_v53 = vpop.f32.mrf.mxu0 }
 0x987   : > { %6094 = vst.msk [vmem:[%s12615_s14 + $0xe8] sm:$0xff] %vm328_vm0, %v5892_v61  ;;  %v5887_v34 = vadd.f32 %v12607_v4, %v5886_v53 }
 0x988   : > { %v7714_v23 = vpop.f32.mrf.mxu0 }
 0x989   : > { %6093 = vst.msk [vmem:[%s12615_s14 + $0xe0] sm:$0xff] %vm328_vm0, %v5887_v34  ;;  %v5902_v3 = vadd.f32 %v7714_v23, %v12607_v4 }
 0x98a   : > { %v5896_v50 = vpop.f32.mrf.mxu0 }
 0x98b   : > { %6096 = vst.msk [vmem:[%s12615_s14 + $0xf8] sm:$0xff] %vm328_vm0, %v5902_v3  ;;  %v5897_v14 = vadd.f32 %v12607_v4, %v5896_v50 }
 0x98d   : > { %6095 = vst.msk [vmem:[%s12615_s14 + $0xf0] sm:$0xff] %vm328_vm0, %v5897_v14 }
 0x9b4   : > { %v7717_v60 = vpop.f32.mrf.mxu0 }
 0x9b5   : > { %v5912_v51 = vadd.f32 %v7717_v60, %v12607_v4 }
 0x9b6   : > { %v5906_v37 = vpop.f32.mrf.mxu0 }
 0x9b7   : > { %6098 = vst.msk [vmem:[%s12615_s14 + $0x108] sm:$0xff] %vm328_vm0, %v5912_v51  ;;  %v5907_v13 = vadd.f32 %v12607_v4, %v5906_v37 }
 0x9b8   : > { %v7720_v17 = vpop.f32.mrf.mxu0 }
 0x9b9   : > { %6097 = vst.msk [vmem:[%s12615_s14 + $0x100] sm:$0xff] %vm328_vm0, %v5907_v13  ;;  %v5922_v21 = vadd.f32 %v7720_v17, %v12607_v4 }
 0x9ba   : > { %v5916_v41 = vpop.f32.mrf.mxu0 }
 0x9bb   : > { %6100 = vst.msk [vmem:[%s12615_s14 + $0x118] sm:$0xff] %vm328_vm0, %v5922_v21  ;;  %v5917_v30 = vadd.f32 %v12607_v4, %v5916_v41 }
 0x9bc   : > { %v7723_v40 = vpop.f32.mrf.mxu0 }
 0x9bd   : > { %6099 = vst.msk [vmem:[%s12615_s14 + $0x110] sm:$0xff] %vm328_vm0, %v5917_v30  ;;  %v5932_v54 = vadd.f32 %v7723_v40, %v12607_v4 }
 0x9be   : > { %v5926_v16 = vpop.f32.mrf.mxu0 }
 0x9bf   : > { %6102 = vst.msk [vmem:[%s12615_s14 + $0x128] sm:$0xff] %vm328_vm0, %v5932_v54  ;;  %v5927_v46 = vadd.f32 %v12607_v4, %v5926_v16 }
 0x9c0   : > { %v7726_v63 = vpop.f32.mrf.mxu0 }
 0x9c1   : > { %6101 = vst.msk [vmem:[%s12615_s14 + $0x120] sm:$0xff] %vm328_vm0, %v5927_v46  ;;  %v5942_v1 = vadd.f32 %v7726_v63, %v12607_v4 }
 0x9c2   : > { %v5936_v39 = vpop.f32.mrf.mxu0 }
 0x9c3   : > { %6104 = vst.msk [vmem:[%s12615_s14 + $0x138] sm:$0xff] %vm328_vm0, %v5942_v1  ;;  %v5937_v33 = vadd.f32 %v12607_v4, %v5936_v39 }
 0x9c4   : > { %v7729_v31 = vpop.f32.mrf.mxu0 }
 0x9c5   : > { %6103 = vst.msk [vmem:[%s12615_s14 + $0x130] sm:$0xff] %vm328_vm0, %v5937_v33  ;;  %v5952_v7 = vadd.f32 %v7729_v31, %v12607_v4 }
 0x9c6   : > { %v5946_v9 = vpop.f32.mrf.mxu0 }
 0x9c7   : > { %6106 = vst.msk [vmem:[%s12615_s14 + $0x148] sm:$0xff] %vm328_vm0, %v5952_v7  ;;  %v5947_v59 = vadd.f32 %v12607_v4, %v5946_v9 }
 0x9c8   : > { %v7732_v32 = vpop.f32.mrf.mxu0 }
 0x9c9   : > { %6105 = vst.msk [vmem:[%s12615_s14 + $0x140] sm:$0xff] %vm328_vm0, %v5947_v59  ;;  %v5962_v10 = vadd.f32 %v7732_v32, %v12607_v4 }
 0x9ca   : > { %v5956_v58 = vpop.f32.mrf.mxu0 }
 0x9cb   : > { %6108 = vst.msk [vmem:[%s12615_s14 + $0x158] sm:$0xff] %vm328_vm0, %v5962_v10  ;;  %v5957_v36 = vadd.f32 %v12607_v4, %v5956_v58 }
 0x9cc   : > { %v7735_v35 = vpop.f32.mrf.mxu0 }
 0x9cd   : > { %6107 = vst.msk [vmem:[%s12615_s14 + $0x150] sm:$0xff] %vm328_vm0, %v5957_v36  ;;  %v5972_v44 = vadd.f32 %v7735_v35, %v12607_v4 }
 0x9ce   : > { %v5966_v6 = vpop.f32.mrf.mxu0 }
 0x9cf   : > { %6110 = vst.msk [vmem:[%s12615_s14 + $0x168] sm:$0xff] %vm328_vm0, %v5972_v44  ;;  %v5967_v26 = vadd.f32 %v12607_v4, %v5966_v6 }
 0x9d1   : > { %6109 = vst.msk [vmem:[%s12615_s14 + $0x160] sm:$0xff] %vm328_vm0, %v5967_v26 }
 0x9d3   : > { %v7738_v8 = vpop.f32.mrf.mxu0 }
 0x9d4   : > { %v5982_v19 = vadd.f32 %v7738_v8, %v12607_v4 }
 0x9d5   : > { %v5976_v27 = vpop.f32.mrf.mxu0 }
 0x9d6   : > { %6112 = vst.msk [vmem:[%s12615_s14 + $0x178] sm:$0xff] %vm328_vm0, %v5982_v19  ;;  %v5977_v5 = vadd.f32 %v12607_v4, %v5976_v27 }
 0x9d8   : > { %6111 = vst.msk [vmem:[%s12615_s14 + $0x170] sm:$0xff] %vm328_vm0, %v5977_v5 }
 0x9db   : > { %v7741_v57 = vpop.f32.mrf.mxu0 }
 0x9dc   : > { %v5992_v56 = vadd.f32 %v7741_v57, %v12607_v4 }
 0x9dd   : > { %v5986_v18 = vpop.f32.mrf.mxu0 }
 0x9de   : > { %6114 = vst.msk [vmem:[%s12615_s14 + $0x188] sm:$0xff] %vm328_vm0, %v5992_v56  ;;  %v5987_v0 = vadd.f32 %v12607_v4, %v5986_v18 }
 0x9e0   : > { %6113 = vst.msk [vmem:[%s12615_s14 + $0x180] sm:$0xff] %vm328_vm0, %v5987_v0 }
 0x9e3   : > { %v7744_v11 = vpop.f32.mrf.mxu0 }
 0x9e4   : > { %v6002_v22 = vadd.f32 %v7744_v11, %v12607_v4 }
 0x9e5   : > { %v5996_v24 = vpop.f32.mrf.mxu0 }
 0x9e6   : > { %6116 = vst.msk [vmem:[%s12615_s14 + $0x198] sm:$0xff] %vm328_vm0, %v6002_v22  ;;  %v5997_v20 = vadd.f32 %v12607_v4, %v5996_v24 }
 0x9e8   : > { %6115 = vst.msk [vmem:[%s12615_s14 + $0x190] sm:$0xff] %vm328_vm0, %v5997_v20 }
 0x9eb   : > { %v7747_v55 = vpop.f32.mrf.mxu0 }
 0x9ec   : > { %v6012_v47 = vadd.f32 %v7747_v55, %v12607_v4 }
 0x9ed   : > { %v6006_v28 = vpop.f32.mrf.mxu0 }
 0x9ee   : > { %6118 = vst.msk [vmem:[%s12615_s14 + $0x1a8] sm:$0xff] %vm328_vm0, %v6012_v47  ;;  %v6007_v43 = vadd.f32 %v12607_v4, %v6006_v28 }
 0x9f0   : > { %6117 = vst.msk [vmem:[%s12615_s14 + $0x1a0] sm:$0xff] %vm328_vm0, %v6007_v43 }
 0x9f7   : > { %v7750_v52 = vpop.f32.mrf.mxu0 }
 0x9f8   : > { %v6022_v62 = vadd.f32 %v7750_v52, %v12607_v4 }
 0x9f9   : > { %v6016_v45 = vpop.f32.mrf.mxu0 }
 0x9fa   : > { %6120 = vst.msk [vmem:[%s12615_s14 + $0x1b8] sm:$0xff] %vm328_vm0, %v6022_v62  ;;  %v6017_v42 = vadd.f32 %v12607_v4, %v6016_v45 }
 0x9fc   : > { %6119 = vst.msk [vmem:[%s12615_s14 + $0x1b0] sm:$0xff] %vm328_vm0, %v6017_v42  ;;  %v7753_v38 = vpop.f32.mrf.mxu0 }
 0x9fd   : > { %v6032_v29 = vadd.f32 %v7753_v38, %v12607_v4 }
 0x9fe   : > { %v6026_v12 = vpop.f32.mrf.mxu0 }
 0x9ff   : > { %6122 = vst.msk [vmem:[%s12615_s14 + $0x1c8] sm:$0xff] %vm328_vm0, %v6032_v29  ;;  %v6027_v25 = vadd.f32 %v12607_v4, %v6026_v12 }
 0xa01   : > { %6121 = vst.msk [vmem:[%s12615_s14 + $0x1c0] sm:$0xff] %vm328_vm0, %v6027_v25 }
 0xa04   : > { %v7756_v2 = vpop.f32.mrf.mxu0 }
 0xa05   : > { %v6042_v15 = vadd.f32 %v7756_v2, %v12607_v4 }
 0xa06   : > { %v6036_v49 = vpop.f32.mrf.mxu0 }
 0xa07   : > { %6124 = vst.msk [vmem:[%s12615_s14 + $0x1d8] sm:$0xff] %vm328_vm0, %v6042_v15  ;;  %v6037_v48 = vadd.f32 %v12607_v4, %v6036_v49 }
 0xa09   : > { %6123 = vst.msk [vmem:[%s12615_s14 + $0x1d0] sm:$0xff] %vm328_vm0, %v6037_v48 }
 0xa0d   : > { %v7759_v61 = vpop.f32.mrf.mxu0 }
 0xa0e   : > { %v6052_v53 = vadd.f32 %v7759_v61, %v12607_v4 }
 0xa0f   : > { %v6046_v34 = vpop.f32.mrf.mxu0 }
 0xa10   : > { %6126 = vst.msk [vmem:[%s12615_s14 + $0x1e8] sm:$0xff] %vm328_vm0, %v6052_v53  ;;  %v6047_v23 = vadd.f32 %v12607_v4, %v6046_v34 }
 0xa12   : > { %6125 = vst.msk [vmem:[%s12615_s14 + $0x1e0] sm:$0xff] %vm328_vm0, %v6047_v23 }
 0xa15   : > { %v7762_v3 = vpop.f32.mrf.mxu0 }
 0xa16   : > { %v6062_v50 = vadd.f32 %v7762_v3, %v12607_v4 }
 0xa17   : > { %v6056_v14 = vpop.f32.mrf.mxu0 }
 0xa18   : > { %6128 = vst.msk [vmem:[%s12615_s14 + $0x1f8] sm:$0xff] %vm328_vm0, %v6062_v50  ;;  %v6057_v60 = vadd.f32 %v12607_v4, %v6056_v14 }
 0xa1a   : > { %6127 = vst.msk [vmem:[%s12615_s14 + $0x1f0] sm:$0xff] %vm328_vm0, %v6057_v60 }
 0xa1b PF: > { %s16_s21 = sadd.s32 1, %s8331_s21  }
 0xa1c   : > { %p13_p4 = scmp.ge.s32.totalorder %s16_s21, 4  }
 0xa1e   :  { %15 = sbr.rel (!%p13_p4) target bundleno = 1 (0x1), region = 74 }

</bundles_post_ra>
